<compile_context>
chip_gen: v7x
topology: tpu7x:2x2x1
jax: 0.10.0
libtpu: 0.0.40
codegen_flags: <defaults>
</compile_context>

<pallas_src>
import functools

import jax
import jax.numpy as jnp
from jax.experimental import pallas as pl
from jax.experimental.pallas import tpu as pltpu


LANE = 128
VMEM_LIMIT = 32 * 1024 * 1024   # demo needs ~2 MiB; safe headroom on v7x


# ---------------------------------------------------------------------------
# Small helpers
# ---------------------------------------------------------------------------
def _silu(v):
    return v * jax.nn.sigmoid(v)


def _leaky(v):
    return jnp.where(v > 0, v, 0.1 * v)


def _round_up(v, m):
    return ((v + m - 1) // m) * m


def _pad_to(a, target, axis, value=0.0):
    """Constant-pad `axis` of `a` up to length `target`."""
    pad = target - a.shape[axis]
    if pad <= 0:
        return a
    widths = [(0, 0)] * a.ndim
    widths[axis] = (0, pad)
    return jnp.pad(a, widths, constant_values=value)


# ---------------------------------------------------------------------------
# The fused BottleneckCSP kernel: one image per grid step.
#   t  = SiLU(BN(x @ cv1_w))                       (entry 1x1 conv)
#   repeat n times:
#     h       = SiLU(BN(t @ w1))                   (Bottleneck 1x1 conv)
#     patches = im2col(zero-pad(h))                (H*W, 9c) bf16 in VMEM
#     y       = SiLU(BN(patches @ w2_flat))        (single K=9c matmul)
#     t       = t + y  (if shortcut)
#   a1 = LeakyReLU(BN_top(t @ cv3_w)); a2 = LeakyReLU(BN_bot(x @ cv2_w))
#   out = SiLU(BN4(concat(a1, a2) @ cv4_stacked))  (single K=2c matmul)
# ---------------------------------------------------------------------------
def _csp_kernel(x_ref, cv1w_ref, cv1s_ref, cv1b_ref,
                mw1_ref, ms1_ref, mb1_ref, mw2_ref, ms2_ref, mb2_ref,
                cv3w_ref, bns1_ref, bnb1_ref, cv2w_ref, bns2_ref, bnb2_ref,
                cv4w_ref, cv4s_ref, cv4b_ref,
                o_ref, hp_ref, *, H, W, c, n, add):
    bf16 = jnp.bfloat16
    HW = H * W
    Hp, Wp = H + 2, W + 2

    x2d = x_ref[...]                                   # (HW, C1) bf16

    # --- entry cv1: 1x1 conv + BN + SiLU (stays f32 in VMEM) ---------------
    t = jnp.dot(x2d, cv1w_ref[...], preferred_element_type=jnp.float32)
    t = _silu(t * cv1s_ref[...] + cv1b_ref[...])       # (HW, c) f32

    # --- zero ONLY the 1-wide halo border, once per image ------------------
    hp_ref[0:1, :, :] = jnp.zeros((1, Wp, c), bf16)
    hp_ref[Hp - 1:Hp, :, :] = jnp.zeros((1, Wp, c), bf16)
    hp_ref[:, 0:1, :] = jnp.zeros((Hp, 1, c), bf16)
    hp_ref[:, Wp - 1:Wp, :] = jnp.zeros((Hp, 1, c), bf16)

    # --- Bottleneck chain (n is small & static: unrolled Python loop) ------
    for i in range(n):
        # 1x1 conv + BN + SiLU
        h = jnp.dot(t.astype(bf16), mw1_ref[i],
                    preferred_element_type=jnp.float32)
        h = _silu(h * ms1_ref[i] + mb1_ref[i])                     # (HW, c)

        # write the interior of the padded image (border already zero)
        hp_ref[1:H + 1, 1:W + 1, :] = h.reshape(H, W, c).astype(bf16)

        # im2col: nine shifted reads, concatenated on the lane axis
        cols = []
        for dy in range(3):
            for dx in range(3):
                cols.append(hp_ref[dy:dy + H, dx:dx + W, :].reshape(HW, c))
        patches = jnp.concatenate(cols, axis=-1)                   # (HW, 9c)

        # single K=9c matmul (one accumulator pop, no VMEM RMW)
        y = jnp.dot(patches, mw2_ref[i], preferred_element_type=jnp.float32)
        y = _silu(y * ms2_ref[i] + mb2_ref[i])
        t = t + y if add else y                                    # f32 residual

    # --- fused CSP tail -----------------------------------------------------
    a1 = jnp.dot(t.astype(bf16), cv3w_ref[...],
                 preferred_element_type=jnp.float32)
    a1 = _leaky(a1 * bns1_ref[...] + bnb1_ref[...])
    a2 = jnp.dot(x2d, cv2w_ref[...], preferred_element_type=jnp.float32)
    a2 = _leaky(a2 * bns2_ref[...] + bnb2_ref[...])

    a = jnp.concatenate([a1.astype(bf16), a2.astype(bf16)], axis=-1)  # (HW, 2c)
    out = jnp.dot(a, cv4w_ref[...], preferred_element_type=jnp.float32)
    o_ref[...] = _silu(out * cv4s_ref[...] + cv4b_ref[...])


def _forward_impl(x_nchw, A, *, n, add, cp, c2p, c2):
    N, C1, H, W = x_nchw.shape
    HW = H * W

    # NCHW -> (N, H*W, C) bf16 in one fused XLA pass (channels on the lanes)
    x3 = jnp.transpose(x_nchw, (0, 2, 3, 1)).astype(jnp.bfloat16).reshape(N, HW, C1)

    kernel = functools.partial(_csp_kernel, H=H, W=W, c=cp, n=n, add=add)
    wspec2 = lambda b: (0, 0)
    wspec3 = lambda b: (0, 0, 0)
    out = pl.pallas_call(
        kernel,
        out_shape=jax.ShapeDtypeStruct((N, HW, c2p), jnp.float32),
        grid_spec=pltpu.PrefetchScalarGridSpec(
            num_scalar_prefetch=0,
            grid=(N,),
            in_specs=[
                pl.BlockSpec((None, HW, C1), lambda b: (b, 0, 0)),   # x (squeezed batch)
                pl.BlockSpec((C1, cp), wspec2),                      # cv1 w
                pl.BlockSpec((1, cp), wspec2),                       # cv1 scale
                pl.BlockSpec((1, cp), wspec2),                       # cv1 bias
                pl.BlockSpec((n, cp, cp), wspec3),                   # m.cv1 w  (stacked)
                pl.BlockSpec((n, 1, cp), wspec3),                    # m.cv1 scale
                pl.BlockSpec((n, 1, cp), wspec3),                    # m.cv1 bias
                pl.BlockSpec((n, 9 * cp, cp), wspec3),               # m.cv2 w  (im2col)
                pl.BlockSpec((n, 1, cp), wspec3),                    # m.cv2 scale
                pl.BlockSpec((n, 1, cp), wspec3),                    # m.cv2 bias
                pl.BlockSpec((cp, cp), wspec2),                      # cv3 w
                pl.BlockSpec((1, cp), wspec2),                       # bn scale (y1)
                pl.BlockSpec((1, cp), wspec2),                       # bn bias  (y1)
                pl.BlockSpec((C1, cp), wspec2),                      # cv2 w (CSP branch)
                pl.BlockSpec((1, cp), wspec2),                       # bn scale (y2)
                pl.BlockSpec((1, cp), wspec2),                       # bn bias  (y2)
                pl.BlockSpec((2 * cp, c2p), wspec2),                 # cv4 w (stacked K)
                pl.BlockSpec((1, c2p), wspec2),                      # cv4 scale
                pl.BlockSpec((1, c2p), wspec2),                      # cv4 bias
            ],
            out_specs=pl.BlockSpec((None, HW, c2p), lambda b: (b, 0, 0)),
            scratch_shapes=[pltpu.VMEM((H + 2, W + 2, cp), jnp.bfloat16)],
        ),
        compiler_params=pltpu.CompilerParams(
            dimension_semantics=("parallel",),
            vmem_limit_bytes=VMEM_LIMIT),
    )(x3, A["cv1_w"], A["cv1_s"], A["cv1_b"],
      A["m_w1"], A["m_s1"], A["m_b1"], A["m_w2"], A["m_s2"], A["m_b2"],
      A["cv3_w"], A["bn_s1"], A["bn_b1"], A["cv2_w"], A["bn_s2"], A["bn_b2"],
      A["cv4_w"], A["cv4_s"], A["cv4_b"])

    out = out.reshape(N, H, W, c2p)[..., :c2]
    return jnp.transpose(out, (0, 3, 1, 2))           # back to NCHW


def make_csp_forward(meta):
    """jit-compiled forward with the static config baked in."""
    return jax.jit(functools.partial(
        _forward_impl, n=meta["n"], add=meta["add"],
        cp=meta["cp"], c2p=meta["c2p"], c2=meta["c2"]))


# ---------------------------------------------------------------------------
# One-time parameter prep: lane padding + bf16 cast + per-block stacking.
# Padded channels provably stay zero (scale padded with 1, bias with 0,
# SiLU(0)=LeakyReLU(0)=0, padded weight rows/cols are 0).
# ---------------------------------------------------------------------------
def prepare_params(P):
    c1 = P["cv1_w"].shape[0]
    c_ = P["cv1_w"].shape[1]
    c2 = P["cv4_w"].shape[1]
    n = P["n"]
    cp = _round_up(c_, LANE)
    c2p = _round_up(c2, LANE)
    bf16 = jnp.bfloat16

    A = {}
    A["cv1_w"] = _pad_to(P["cv1_w"], cp, 1).astype(bf16)                  # (C1, cp)
    A["cv1_s"] = _pad_to(P["cv1_s"], cp, 0, 1.0).reshape(1, cp)
    A["cv1_b"] = _pad_to(P["cv1_b"], cp, 0, 0.0).reshape(1, cp)
    A["cv2_w"] = _pad_to(P["cv2_w"], cp, 1).astype(bf16)                  # (C1, cp)
    A["cv3_w"] = _pad_to(_pad_to(P["cv3_w"], cp, 0), cp, 1).astype(bf16)  # (cp, cp)
    A["bn_s1"] = _pad_to(P["bn_s"][:c_], cp, 0, 1.0).reshape(1, cp)
    A["bn_b1"] = _pad_to(P["bn_b"][:c_], cp, 0, 0.0).reshape(1, cp)
    A["bn_s2"] = _pad_to(P["bn_s"][c_:], cp, 0, 1.0).reshape(1, cp)
    A["bn_b2"] = _pad_to(P["bn_b"][c_:], cp, 0, 0.0).reshape(1, cp)
    # cv4: stack the two halves along K so the tail is one K=2*cp matmul
    w4a = _pad_to(_pad_to(P["cv4_w"][:c_], cp, 0), c2p, 1)
    w4b = _pad_to(_pad_to(P["cv4_w"][c_:], cp, 0), c2p, 1)
    A["cv4_w"] = jnp.concatenate([w4a, w4b], axis=0).astype(bf16)         # (2cp, c2p)
    A["cv4_s"] = _pad_to(P["cv4_s"], c2p, 0, 1.0).reshape(1, c2p)
    A["cv4_b"] = _pad_to(P["cv4_b"], c2p, 0, 0.0).reshape(1, c2p)

    w1s, s1s, b1s, w2s, s2s, b2s = [], [], [], [], [], []
    add = True
    for p in P["m"]:
        w1s.append(_pad_to(_pad_to(p["cv1_w"], cp, 0), cp, 1))
        s1s.append(_pad_to(p["cv1_s"], cp, 0, 1.0).reshape(1, cp))
        b1s.append(_pad_to(p["cv1_b"], cp, 0, 0.0).reshape(1, cp))
        w2 = _pad_to(_pad_to(p["cv2_w"], cp, 2), cp, 3)                   # (3,3,cp,cp)
        w2s.append(w2.reshape(9 * cp, cp))      # rows ordered (dy, dx, cin) = im2col
        s2s.append(_pad_to(p["cv2_s"], cp, 0, 1.0).reshape(1, cp))
        b2s.append(_pad_to(p["cv2_b"], cp, 0, 0.0).reshape(1, cp))
        add = bool(p["add"])
    A["m_w1"] = jnp.stack(w1s).astype(bf16)     # (n, cp, cp)
    A["m_s1"] = jnp.stack(s1s)                  # (n, 1, cp)
    A["m_b1"] = jnp.stack(b1s)
    A["m_w2"] = jnp.stack(w2s).astype(bf16)     # (n, 9cp, cp)
    A["m_s2"] = jnp.stack(s2s)
    A["m_b2"] = jnp.stack(b2s)

    meta = dict(n=n, add=add, c1=c1, c_=c_, c2=c2, cp=cp, c2p=c2p)
    return A, meta


# ---------------------------------------------------------------------------
# Parameter init (deterministic, BN folded to scale/bias — eval mode)
# ---------------------------------------------------------------------------
def _bn_fold(key, c, eps=1e-5):
    k1, k2, k3, k4 = jax.random.split(key, 4)
    gamma = 1.0 + 0.1 * jax.random.normal(k1, (c,), jnp.float32)
    beta = 0.1 * jax.random.normal(k2, (c,), jnp.float32)
    mean = 0.1 * jax.random.normal(k3, (c,), jnp.float32)
    var = jnp.abs(1.0 + 0.1 * jax.random.normal(k4, (c,), jnp.float32))
    scale = gamma / jnp.sqrt(var + eps)
    bias = beta - mean * scale
    return scale, bias


def init_params(key, c1, c2, n, shortcut=True, e=0.5):
    c_ = int(c2 * e)
    keys = jax.random.split(key, 8 + 4 * n)

    def w_(k, shape, fan_in):
        return jax.random.normal(k, shape, jnp.float32) / jnp.sqrt(fan_in)

    P = {"n": n}
    P["cv1_w"] = w_(keys[0], (c1, c_), c1)
    P["cv1_s"], P["cv1_b"] = _bn_fold(keys[1], c_)
    P["cv2_w"] = w_(keys[2], (c1, c_), c1)            # plain conv, no BN/act
    P["cv3_w"] = w_(keys[3], (c_, c_), c_)            # plain conv, no BN/act
    P["bn_s"], P["bn_b"] = _bn_fold(keys[4], 2 * c_)  # BN on the concat
    P["cv4_w"] = w_(keys[5], (2 * c_, c2), 2 * c_)
    P["cv4_s"], P["cv4_b"] = _bn_fold(keys[6], c2)

    m = []
    for i in range(n):
        k0, k1_, k2_, k3_ = keys[7 + 4 * i: 11 + 4 * i]
        p = {}
        p["cv1_w"] = w_(k0, (c_, c_), c_)             # Bottleneck e=1.0
        p["cv1_s"], p["cv1_b"] = _bn_fold(k1_, c_)
        p["cv2_w"] = w_(k2_, (3, 3, c_, c_), 9 * c_)  # HWIO
        p["cv2_s"], p["cv2_b"] = _bn_fold(k3_, c_)
        p["add"] = bool(shortcut)                     # c1 == c2 inside CSP
        m.append(p)
    P["m"] = m
    return P


# ---------------------------------------------------------------------------
# Pure-JAX reference (same folded-BN params).  Emulates the kernel's bf16
# rounding of matmul operands (f32 accumulation).
# ---------------------------------------------------------------------------
def ref_forward(x_nchw, P):
    hi = jax.lax.Precision.HIGHEST
    q = lambda v: v.astype(jnp.bfloat16).astype(jnp.float32)
    silu = lambda v: v * jax.nn.sigmoid(v)
    leaky = lambda v: jnp.where(v > 0, v, 0.1 * v)
    x = jnp.transpose(x_nchw, (0, 2, 3, 1)).astype(jnp.float32)

    t = silu(jnp.einsum("nhwc,cd->nhwd", q(x), q(P["cv1_w"]), precision=hi)
             * P["cv1_s"] + P["cv1_b"])
    for p in P["m"]:
        h = silu(jnp.einsum("nhwc,cd->nhwd", q(t), q(p["cv1_w"]), precision=hi)
                 * p["cv1_s"] + p["cv1_b"])
        conv = jax.lax.conv_general_dilated(
            q(h), q(p["cv2_w"]), (1, 1), "SAME",
            dimension_numbers=("NHWC", "HWIO", "NHWC"), precision=hi)
        h2 = silu(conv * p["cv2_s"] + p["cv2_b"])
        t = t + h2 if p["add"] else h2
    y1 = jnp.einsum("nhwc,cd->nhwd", q(t), q(P["cv3_w"]), precision=hi)
    y2 = jnp.einsum("nhwc,cd->nhwd", q(x), q(P["cv2_w"]), precision=hi)
    ycat = jnp.concatenate([y1, y2], axis=-1)
    ya = leaky(ycat * P["bn_s"] + P["bn_b"])
    out = silu(jnp.einsum("nhwc,cd->nhwd", q(ya), q(P["cv4_w"]), precision=hi)
               * P["cv4_s"] + P["cv4_b"])
    return jnp.transpose(out, (0, 3, 1, 2))


# ---------------------------------------------------------------------------
if __name__ == "__main__":
    N, C1, H, W = 2, 4, 16, 16
    C2, n_blocks = 4, 1

    root = jax.random.PRNGKey(0)
    k_params, k_data = jax.random.split(root)
    params = init_params(k_params, C1, C2, n_blocks, shortcut=True, e=0.5)
    x = jax.random.normal(k_data, (N, C1, H, W), jnp.float32)

    arrays, meta = prepare_params(params)      # one-time pad/cast/stack
    forward = make_csp_forward(meta)           # jitted fused-kernel forward

    out = jax.block_until_ready(forward(x, arrays))

    ref = ref_forward(x, params)
    assert out.shape == (N, C2, H, W), out.shape
    err = float(jnp.max(jnp.abs(out - ref)))
    assert err < 5e-2, f"max abs error {err}"

    print("KERNEL_OK")
</pallas_src>

<mosaic_0001>
module attributes {stable_mosaic.version = 11 : i64} {
  func.func @_csp_kernel(%arg0: i32, %arg1: memref<1x256x4xbf16, #tpu.memory_space<vmem>>, %arg2: memref<4x128xbf16, #tpu.memory_space<vmem>>, %arg3: memref<1x128xf32, #tpu.memory_space<vmem>>, %arg4: memref<1x128xf32, #tpu.memory_space<vmem>>, %arg5: memref<1x128x128xbf16, #tpu.memory_space<vmem>>, %arg6: memref<1x1x128xf32, #tpu.memory_space<vmem>>, %arg7: memref<1x1x128xf32, #tpu.memory_space<vmem>>, %arg8: memref<1x1152x128xbf16, #tpu.memory_space<vmem>>, %arg9: memref<1x1x128xf32, #tpu.memory_space<vmem>>, %arg10: memref<1x1x128xf32, #tpu.memory_space<vmem>>, %arg11: memref<128x128xbf16, #tpu.memory_space<vmem>>, %arg12: memref<1x128xf32, #tpu.memory_space<vmem>>, %arg13: memref<1x128xf32, #tpu.memory_space<vmem>>, %arg14: memref<4x128xbf16, #tpu.memory_space<vmem>>, %arg15: memref<1x128xf32, #tpu.memory_space<vmem>>, %arg16: memref<1x128xf32, #tpu.memory_space<vmem>>, %arg17: memref<256x128xbf16, #tpu.memory_space<vmem>>, %arg18: memref<1x128xf32, #tpu.memory_space<vmem>>, %arg19: memref<1x128xf32, #tpu.memory_space<vmem>>, %arg20: memref<1x256x128xf32, #tpu.memory_space<vmem>>, %arg21: memref<18x18x128xbf16, #tpu.memory_space<vmem>>) attributes {dimension_semantics = [#tpu.dimension_semantics<parallel>], iteration_bounds = array<i64: 2>, scalar_prefetch = 0 : i64, scratch_operands = 1 : i64, tpu.core_type = #tpu.core_type<tc>, window_params = [{transform_indices = @transform_0, window_bounds = array<i64: 1, 256, 4>}, {pipeline_mode = #tpu.pipeline_mode<synchronous>, transform_indices = @transform_1, window_bounds = array<i64: 4, 128>}, {pipeline_mode = #tpu.pipeline_mode<synchronous>, transform_indices = @transform_2, window_bounds = array<i64: 1, 128>}, {pipeline_mode = #tpu.pipeline_mode<synchronous>, transform_indices = @transform_3, window_bounds = array<i64: 1, 128>}, {pipeline_mode = #tpu.pipeline_mode<synchronous>, transform_indices = @transform_4, window_bounds = array<i64: 1, 128, 128>}, {pipeline_mode = #tpu.pipeline_mode<synchronous>, transform_indices = @transform_5, window_bounds = array<i64: 1, 1, 128>}, {pipeline_mode = #tpu.pipeline_mode<synchronous>, transform_indices = @transform_6, window_bounds = array<i64: 1, 1, 128>}, {pipeline_mode = #tpu.pipeline_mode<synchronous>, transform_indices = @transform_7, window_bounds = array<i64: 1, 1152, 128>}, {pipeline_mode = #tpu.pipeline_mode<synchronous>, transform_indices = @transform_8, window_bounds = array<i64: 1, 1, 128>}, {pipeline_mode = #tpu.pipeline_mode<synchronous>, transform_indices = @transform_9, window_bounds = array<i64: 1, 1, 128>}, {pipeline_mode = #tpu.pipeline_mode<synchronous>, transform_indices = @transform_10, window_bounds = array<i64: 128, 128>}, {pipeline_mode = #tpu.pipeline_mode<synchronous>, transform_indices = @transform_11, window_bounds = array<i64: 1, 128>}, {pipeline_mode = #tpu.pipeline_mode<synchronous>, transform_indices = @transform_12, window_bounds = array<i64: 1, 128>}, {pipeline_mode = #tpu.pipeline_mode<synchronous>, transform_indices = @transform_13, window_bounds = array<i64: 4, 128>}, {pipeline_mode = #tpu.pipeline_mode<synchronous>, transform_indices = @transform_14, window_bounds = array<i64: 1, 128>}, {pipeline_mode = #tpu.pipeline_mode<synchronous>, transform_indices = @transform_15, window_bounds = array<i64: 1, 128>}, {pipeline_mode = #tpu.pipeline_mode<synchronous>, transform_indices = @transform_16, window_bounds = array<i64: 256, 128>}, {pipeline_mode = #tpu.pipeline_mode<synchronous>, transform_indices = @transform_17, window_bounds = array<i64: 1, 128>}, {pipeline_mode = #tpu.pipeline_mode<synchronous>, transform_indices = @transform_18, window_bounds = array<i64: 1, 128>}, {transform_indices = @transform_19, window_bounds = array<i64: 1, 256, 128>}]} {
    %c0 = arith.constant 0 : index
    %c0_0 = arith.constant 0 : index
    %c0_1 = arith.constant 0 : index
    %0 = vector.load %arg1[%c0, %c0_0, %c0_1] : memref<1x256x4xbf16, #tpu.memory_space<vmem>>, vector<1x256x4xbf16>
    %1 = vector.shape_cast %0 : vector<1x256x4xbf16> to vector<256x4xbf16>
    %c0_2 = arith.constant 0 : index
    %c0_3 = arith.constant 0 : index
    %2 = vector.load %arg2[%c0_2, %c0_3] : memref<4x128xbf16, #tpu.memory_space<vmem>>, vector<4x128xbf16>
    %cst = arith.constant dense<0.000000e+00> : vector<256x128xf32>
    %3 = tpu.matmul %1, %2, %cst {dimension_numbers = #tpu.dot_dimension_numbers<[1], [0], [0], [1], [0, 0, 1, 1], [], []>} : vector<256x4xbf16>, vector<4x128xbf16>, vector<256x128xf32> -> vector<256x128xf32>
    %c0_4 = arith.constant 0 : index
    %c0_5 = arith.constant 0 : index
    %4 = vector.load %arg3[%c0_4, %c0_5] : memref<1x128xf32, #tpu.memory_space<vmem>>, vector<1x128xf32>
    %5 = vector.broadcast %4 : vector<1x128xf32> to vector<256x128xf32>
    %6 = arith.mulf %3, %5 : vector<256x128xf32>
    %c0_6 = arith.constant 0 : index
    %c0_7 = arith.constant 0 : index
    %7 = vector.load %arg4[%c0_6, %c0_7] : memref<1x128xf32, #tpu.memory_space<vmem>>, vector<1x128xf32>
    %8 = vector.broadcast %7 : vector<1x128xf32> to vector<256x128xf32>
    %9 = arith.addf %6, %8 : vector<256x128xf32>
    %10 = arith.negf %9 : vector<256x128xf32>
    %11 = math.exp %10 : vector<256x128xf32>
    %cst_8 = arith.constant 1.000000e+00 : f32
    %12 = vector.broadcast %cst_8 : f32 to vector<256x128xf32>
    %13 = arith.addf %12, %11 : vector<256x128xf32>
    %14 = arith.divf %12, %13 : vector<256x128xf32>
    %15 = arith.mulf %9, %14 : vector<256x128xf32>
    %cst_9 = arith.constant 0.000000e+00 : bf16
    %16 = vector.broadcast %cst_9 : bf16 to vector<1x18x128xbf16>
    %c0_10 = arith.constant 0 : index
    %c0_11 = arith.constant 0 : index
    %c0_12 = arith.constant 0 : index
    %17 = vector.load %arg21[%c0_10, %c0_11, %c0_12] : memref<18x18x128xbf16, #tpu.memory_space<vmem>>, vector<1x18x128xbf16>
    tpu.vector_store %arg21[%c0_10, %c0_11, %c0_12], %16 {strides = array<i32>} : memref<18x18x128xbf16, #tpu.memory_space<vmem>>, vector<1x18x128xbf16>,
    %cst_13 = arith.constant 0.000000e+00 : bf16
    %18 = vector.broadcast %cst_13 : bf16 to vector<1x18x128xbf16>
    %c17 = arith.constant 17 : index
    %c0_14 = arith.constant 0 : index
    %c0_15 = arith.constant 0 : index
    %19 = vector.load %arg21[%c17, %c0_14, %c0_15] : memref<18x18x128xbf16, #tpu.memory_space<vmem>>, vector<1x18x128xbf16>
    tpu.vector_store %arg21[%c17, %c0_14, %c0_15], %18 {strides = array<i32>} : memref<18x18x128xbf16, #tpu.memory_space<vmem>>, vector<1x18x128xbf16>,
    %cst_16 = arith.constant 0.000000e+00 : bf16
    %20 = vector.broadcast %cst_16 : bf16 to vector<18x1x128xbf16>
    %c0_17 = arith.constant 0 : index
    %c0_18 = arith.constant 0 : index
    %c0_19 = arith.constant 0 : index
    %21 = vector.load %arg21[%c0_17, %c0_18, %c0_19] : memref<18x18x128xbf16, #tpu.memory_space<vmem>>, vector<18x1x128xbf16>
    tpu.vector_store %arg21[%c0_17, %c0_18, %c0_19], %20 {strides = array<i32>} : memref<18x18x128xbf16, #tpu.memory_space<vmem>>, vector<18x1x128xbf16>,
    %cst_20 = arith.constant 0.000000e+00 : bf16
    %22 = vector.broadcast %cst_20 : bf16 to vector<18x1x128xbf16>
    %c0_21 = arith.constant 0 : index
    %c17_22 = arith.constant 17 : index
    %c0_23 = arith.constant 0 : index
    %23 = vector.load %arg21[%c0_21, %c17_22, %c0_23] : memref<18x18x128xbf16, #tpu.memory_space<vmem>>, vector<18x1x128xbf16>
    tpu.vector_store %arg21[%c0_21, %c17_22, %c0_23], %22 {strides = array<i32>} : memref<18x18x128xbf16, #tpu.memory_space<vmem>>, vector<18x1x128xbf16>,
    %24 = arith.truncf %15 : vector<256x128xf32> to vector<256x128xbf16>
    %c0_24 = arith.constant 0 : index
    %c0_25 = arith.constant 0 : index
    %c0_26 = arith.constant 0 : index
    %25 = vector.load %arg5[%c0_24, %c0_25, %c0_26] : memref<1x128x128xbf16, #tpu.memory_space<vmem>>, vector<1x128x128xbf16>
    %26 = vector.shape_cast %25 : vector<1x128x128xbf16> to vector<128x128xbf16>
    %cst_27 = arith.constant dense<0.000000e+00> : vector<256x128xf32>
    %27 = tpu.matmul %24, %26, %cst_27 {dimension_numbers = #tpu.dot_dimension_numbers<[1], [0], [0], [1], [0, 0, 1, 1], [], []>} : vector<256x128xbf16>, vector<128x128xbf16>, vector<256x128xf32> -> vector<256x128xf32>
    %c0_28 = arith.constant 0 : index
    %c0_29 = arith.constant 0 : index
    %c0_30 = arith.constant 0 : index
    %28 = vector.load %arg6[%c0_28, %c0_29, %c0_30] : memref<1x1x128xf32, #tpu.memory_space<vmem>>, vector<1x1x128xf32>
    %29 = vector.shape_cast %28 : vector<1x1x128xf32> to vector<1x128xf32>
    %30 = vector.broadcast %29 : vector<1x128xf32> to vector<256x128xf32>
    %31 = arith.mulf %27, %30 : vector<256x128xf32>
    %c0_31 = arith.constant 0 : index
    %c0_32 = arith.constant 0 : index
    %c0_33 = arith.constant 0 : index
    %32 = vector.load %arg7[%c0_31, %c0_32, %c0_33] : memref<1x1x128xf32, #tpu.memory_space<vmem>>, vector<1x1x128xf32>
    %33 = vector.shape_cast %32 : vector<1x1x128xf32> to vector<1x128xf32>
    %34 = vector.broadcast %33 : vector<1x128xf32> to vector<256x128xf32>
    %35 = arith.addf %31, %34 : vector<256x128xf32>
    %36 = arith.negf %35 : vector<256x128xf32>
    %37 = math.exp %36 : vector<256x128xf32>
    %cst_34 = arith.constant 1.000000e+00 : f32
    %38 = vector.broadcast %cst_34 : f32 to vector<256x128xf32>
    %39 = arith.addf %38, %37 : vector<256x128xf32>
    %40 = arith.divf %38, %39 : vector<256x128xf32>
    %41 = arith.mulf %35, %40 : vector<256x128xf32>
    %42 = vector.shape_cast %41 : vector<256x128xf32> to vector<16x16x128xf32>
    %43 = arith.truncf %42 : vector<16x16x128xf32> to vector<16x16x128xbf16>
    %c1 = arith.constant 1 : index
    %c1_35 = arith.constant 1 : index
    %c0_36 = arith.constant 0 : index
    %44 = vector.load %arg21[%c1, %c1_35, %c0_36] : memref<18x18x128xbf16, #tpu.memory_space<vmem>>, vector<16x16x128xbf16>
    tpu.vector_store %arg21[%c1, %c1_35, %c0_36], %43 {strides = array<i32>} : memref<18x18x128xbf16, #tpu.memory_space<vmem>>, vector<16x16x128xbf16>,
    %c0_37 = arith.constant 0 : index
    %c0_38 = arith.constant 0 : index
    %c0_39 = arith.constant 0 : index
    %45 = vector.load %arg21[%c0_37, %c0_38, %c0_39] : memref<18x18x128xbf16, #tpu.memory_space<vmem>>, vector<16x16x128xbf16>
    %46 = vector.shape_cast %45 : vector<16x16x128xbf16> to vector<256x128xbf16>
    %c0_40 = arith.constant 0 : index
    %c1_41 = arith.constant 1 : index
    %c0_42 = arith.constant 0 : index
    %47 = vector.load %arg21[%c0_40, %c1_41, %c0_42] : memref<18x18x128xbf16, #tpu.memory_space<vmem>>, vector<16x16x128xbf16>
    %48 = vector.shape_cast %47 : vector<16x16x128xbf16> to vector<256x128xbf16>
    %c0_43 = arith.constant 0 : index
    %c2 = arith.constant 2 : index
    %c0_44 = arith.constant 0 : index
    %49 = vector.load %arg21[%c0_43, %c2, %c0_44] : memref<18x18x128xbf16, #tpu.memory_space<vmem>>, vector<16x16x128xbf16>
    %50 = vector.shape_cast %49 : vector<16x16x128xbf16> to vector<256x128xbf16>
    %c1_45 = arith.constant 1 : index
    %c0_46 = arith.constant 0 : index
    %c0_47 = arith.constant 0 : index
    %51 = vector.load %arg21[%c1_45, %c0_46, %c0_47] : memref<18x18x128xbf16, #tpu.memory_space<vmem>>, vector<16x16x128xbf16>
    %52 = vector.shape_cast %51 : vector<16x16x128xbf16> to vector<256x128xbf16>
    %c1_48 = arith.constant 1 : index
    %c1_49 = arith.constant 1 : index
    %c0_50 = arith.constant 0 : index
    %53 = vector.load %arg21[%c1_48, %c1_49, %c0_50] : memref<18x18x128xbf16, #tpu.memory_space<vmem>>, vector<16x16x128xbf16>
    %54 = vector.shape_cast %53 : vector<16x16x128xbf16> to vector<256x128xbf16>
    %c1_51 = arith.constant 1 : index
    %c2_52 = arith.constant 2 : index
    %c0_53 = arith.constant 0 : index
    %55 = vector.load %arg21[%c1_51, %c2_52, %c0_53] : memref<18x18x128xbf16, #tpu.memory_space<vmem>>, vector<16x16x128xbf16>
    %56 = vector.shape_cast %55 : vector<16x16x128xbf16> to vector<256x128xbf16>
    %c2_54 = arith.constant 2 : index
    %c0_55 = arith.constant 0 : index
    %c0_56 = arith.constant 0 : index
    %57 = vector.load %arg21[%c2_54, %c0_55, %c0_56] : memref<18x18x128xbf16, #tpu.memory_space<vmem>>, vector<16x16x128xbf16>
    %58 = vector.shape_cast %57 : vector<16x16x128xbf16> to vector<256x128xbf16>
    %c2_57 = arith.constant 2 : index
    %c1_58 = arith.constant 1 : index
    %c0_59 = arith.constant 0 : index
    %59 = vector.load %arg21[%c2_57, %c1_58, %c0_59] : memref<18x18x128xbf16, #tpu.memory_space<vmem>>, vector<16x16x128xbf16>
    %60 = vector.shape_cast %59 : vector<16x16x128xbf16> to vector<256x128xbf16>
    %c2_60 = arith.constant 2 : index
    %c2_61 = arith.constant 2 : index
    %c0_62 = arith.constant 0 : index
    %61 = vector.load %arg21[%c2_60, %c2_61, %c0_62] : memref<18x18x128xbf16, #tpu.memory_space<vmem>>, vector<16x16x128xbf16>
    %62 = vector.shape_cast %61 : vector<16x16x128xbf16> to vector<256x128xbf16>
    %63 = tpu.concatenate %46, %48, %50, %52, %54, %56, %58, %60, %62 in 1 : vector<256x128xbf16>, vector<256x128xbf16>, vector<256x128xbf16>, vector<256x128xbf16>, vector<256x128xbf16>, vector<256x128xbf16>, vector<256x128xbf16>, vector<256x128xbf16>, vector<256x128xbf16> -> vector<256x1152xbf16>
    %c0_63 = arith.constant 0 : index
    %c0_64 = arith.constant 0 : index
    %c0_65 = arith.constant 0 : index
    %64 = vector.load %arg8[%c0_63, %c0_64, %c0_65] : memref<1x1152x128xbf16, #tpu.memory_space<vmem>>, vector<1x1152x128xbf16>
    %65 = vector.shape_cast %64 : vector<1x1152x128xbf16> to vector<1152x128xbf16>
    %cst_66 = arith.constant dense<0.000000e+00> : vector<256x128xf32>
    %66 = tpu.matmul %63, %65, %cst_66 {dimension_numbers = #tpu.dot_dimension_numbers<[1], [0], [0], [1], [0, 0, 1, 1], [], []>} : vector<256x1152xbf16>, vector<1152x128xbf16>, vector<256x128xf32> -> vector<256x128xf32>
    %c0_67 = arith.constant 0 : index
    %c0_68 = arith.constant 0 : index
    %c0_69 = arith.constant 0 : index
    %67 = vector.load %arg9[%c0_67, %c0_68, %c0_69] : memref<1x1x128xf32, #tpu.memory_space<vmem>>, vector<1x1x128xf32>
    %68 = vector.shape_cast %67 : vector<1x1x128xf32> to vector<1x128xf32>
    %69 = vector.broadcast %68 : vector<1x128xf32> to vector<256x128xf32>
    %70 = arith.mulf %66, %69 : vector<256x128xf32>
    %c0_70 = arith.constant 0 : index
    %c0_71 = arith.constant 0 : index
    %c0_72 = arith.constant 0 : index
    %71 = vector.load %arg10[%c0_70, %c0_71, %c0_72] : memref<1x1x128xf32, #tpu.memory_space<vmem>>, vector<1x1x128xf32>
    %72 = vector.shape_cast %71 : vector<1x1x128xf32> to vector<1x128xf32>
    %73 = vector.broadcast %72 : vector<1x128xf32> to vector<256x128xf32>
    %74 = arith.addf %70, %73 : vector<256x128xf32>
    %75 = arith.negf %74 : vector<256x128xf32>
    %76 = math.exp %75 : vector<256x128xf32>
    %cst_73 = arith.constant 1.000000e+00 : f32
    %77 = vector.broadcast %cst_73 : f32 to vector<256x128xf32>
    %78 = arith.addf %77, %76 : vector<256x128xf32>
    %79 = arith.divf %77, %78 : vector<256x128xf32>
    %80 = arith.mulf %74, %79 : vector<256x128xf32>
    %81 = arith.addf %15, %80 : vector<256x128xf32>
    %82 = arith.truncf %81 : vector<256x128xf32> to vector<256x128xbf16>
    %c0_74 = arith.constant 0 : index
    %c0_75 = arith.constant 0 : index
    %83 = vector.load %arg11[%c0_74, %c0_75] : memref<128x128xbf16, #tpu.memory_space<vmem>>, vector<128x128xbf16>
    %cst_76 = arith.constant dense<0.000000e+00> : vector<256x128xf32>
    %84 = tpu.matmul %82, %83, %cst_76 {dimension_numbers = #tpu.dot_dimension_numbers<[1], [0], [0], [1], [0, 0, 1, 1], [], []>} : vector<256x128xbf16>, vector<128x128xbf16>, vector<256x128xf32> -> vector<256x128xf32>
    %c0_77 = arith.constant 0 : index
    %c0_78 = arith.constant 0 : index
    %85 = vector.load %arg12[%c0_77, %c0_78] : memref<1x128xf32, #tpu.memory_space<vmem>>, vector<1x128xf32>
    %86 = vector.broadcast %85 : vector<1x128xf32> to vector<256x128xf32>
    %87 = arith.mulf %84, %86 : vector<256x128xf32>
    %c0_79 = arith.constant 0 : index
    %c0_80 = arith.constant 0 : index
    %88 = vector.load %arg13[%c0_79, %c0_80] : memref<1x128xf32, #tpu.memory_space<vmem>>, vector<1x128xf32>
    %89 = vector.broadcast %88 : vector<1x128xf32> to vector<256x128xf32>
    %90 = arith.addf %87, %89 : vector<256x128xf32>
    %cst_81 = arith.constant 0.000000e+00 : f32
    %91 = vector.broadcast %cst_81 : f32 to vector<256x128xf32>
    %92 = arith.cmpf ogt, %90, %91 : vector<256x128xf32>
    %cst_82 = arith.constant 1.000000e-01 : f32
    %93 = vector.broadcast %cst_82 : f32 to vector<256x128xf32>
    %94 = arith.mulf %93, %90 : vector<256x128xf32>
    %95 = arith.select %92, %90, %94 : vector<256x128xi1>, vector<256x128xf32>
    %c0_83 = arith.constant 0 : index
    %c0_84 = arith.constant 0 : index
    %96 = vector.load %arg14[%c0_83, %c0_84] : memref<4x128xbf16, #tpu.memory_space<vmem>>, vector<4x128xbf16>
    %cst_85 = arith.constant dense<0.000000e+00> : vector<256x128xf32>
    %97 = tpu.matmul %1, %96, %cst_85 {dimension_numbers = #tpu.dot_dimension_numbers<[1], [0], [0], [1], [0, 0, 1, 1], [], []>} : vector<256x4xbf16>, vector<4x128xbf16>, vector<256x128xf32> -> vector<256x128xf32>
    %c0_86 = arith.constant 0 : index
    %c0_87 = arith.constant 0 : index
    %98 = vector.load %arg15[%c0_86, %c0_87] : memref<1x128xf32, #tpu.memory_space<vmem>>, vector<1x128xf32>
    %99 = vector.broadcast %98 : vector<1x128xf32> to vector<256x128xf32>
    %100 = arith.mulf %97, %99 : vector<256x128xf32>
    %c0_88 = arith.constant 0 : index
    %c0_89 = arith.constant 0 : index
    %101 = vector.load %arg16[%c0_88, %c0_89] : memref<1x128xf32, #tpu.memory_space<vmem>>, vector<1x128xf32>
    %102 = vector.broadcast %101 : vector<1x128xf32> to vector<256x128xf32>
    %103 = arith.addf %100, %102 : vector<256x128xf32>
    %cst_90 = arith.constant 0.000000e+00 : f32
    %104 = vector.broadcast %cst_90 : f32 to vector<256x128xf32>
    %105 = arith.cmpf ogt, %103, %104 : vector<256x128xf32>
    %cst_91 = arith.constant 1.000000e-01 : f32
    %106 = vector.broadcast %cst_91 : f32 to vector<256x128xf32>
    %107 = arith.mulf %106, %103 : vector<256x128xf32>
    %108 = arith.select %105, %103, %107 : vector<256x128xi1>, vector<256x128xf32>
    %109 = arith.truncf %95 : vector<256x128xf32> to vector<256x128xbf16>
    %110 = arith.truncf %108 : vector<256x128xf32> to vector<256x128xbf16>
    %111 = tpu.concatenate %109, %110 in 1 : vector<256x128xbf16>, vector<256x128xbf16> -> vector<256x256xbf16>
    %c0_92 = arith.constant 0 : index
    %c0_93 = arith.constant 0 : index
    %112 = vector.load %arg17[%c0_92, %c0_93] : memref<256x128xbf16, #tpu.memory_space<vmem>>, vector<256x128xbf16>
    %cst_94 = arith.constant dense<0.000000e+00> : vector<256x128xf32>
    %113 = tpu.matmul %111, %112, %cst_94 {dimension_numbers = #tpu.dot_dimension_numbers<[1], [0], [0], [1], [0, 0, 1, 1], [], []>} : vector<256x256xbf16>, vector<256x128xbf16>, vector<256x128xf32> -> vector<256x128xf32>
    %c0_95 = arith.constant 0 : index
    %c0_96 = arith.constant 0 : index
    %114 = vector.load %arg18[%c0_95, %c0_96] : memref<1x128xf32, #tpu.memory_space<vmem>>, vector<1x128xf32>
    %115 = vector.broadcast %114 : vector<1x128xf32> to vector<256x128xf32>
    %116 = arith.mulf %113, %115 : vector<256x128xf32>
    %c0_97 = arith.constant 0 : index
    %c0_98 = arith.constant 0 : index
    %117 = vector.load %arg19[%c0_97, %c0_98] : memref<1x128xf32, #tpu.memory_space<vmem>>, vector<1x128xf32>
    %118 = vector.broadcast %117 : vector<1x128xf32> to vector<256x128xf32>
    %119 = arith.addf %116, %118 : vector<256x128xf32>
    %120 = arith.negf %119 : vector<256x128xf32>
    %121 = math.exp %120 : vector<256x128xf32>
    %cst_99 = arith.constant 1.000000e+00 : f32
    %122 = vector.broadcast %cst_99 : f32 to vector<256x128xf32>
    %123 = arith.addf %122, %121 : vector<256x128xf32>
    %124 = arith.divf %122, %123 : vector<256x128xf32>
    %125 = arith.mulf %119, %124 : vector<256x128xf32>
    %c0_100 = arith.constant 0 : index
    %c0_101 = arith.constant 0 : index
    %c0_102 = arith.constant 0 : index
    %126 = vector.load %arg20[%c0_100, %c0_101, %c0_102] : memref<1x256x128xf32, #tpu.memory_space<vmem>>, vector<1x256x128xf32>
    %127 = vector.shape_cast %126 : vector<1x256x128xf32> to vector<256x128xf32>
    %128 = vector.shape_cast %125 : vector<256x128xf32> to vector<1x256x128xf32>
    tpu.vector_store %arg20[%c0_100, %c0_101, %c0_102], %128 {strides = array<i32>} : memref<1x256x128xf32, #tpu.memory_space<vmem>>, vector<1x256x128xf32>,
    return
  }
  func.func @transform_0(%arg0: i32) -> (i32, i32, i32) {
    %c0_i32 = arith.constant 0 : i32
    %c0_i32_0 = arith.constant 0 : i32
    %c0_i32_1 = arith.constant 0 : i32
    return %arg0, %c0_i32, %c0_i32_0 : i32, i32, i32
  }
  func.func @transform_1(%arg0: i32) -> (i32, i32) {
    %c0_i32 = arith.constant 0 : i32
    %c0_i32_0 = arith.constant 0 : i32
    %c0_i32_1 = arith.constant 0 : i32
    return %c0_i32, %c0_i32_0 : i32, i32
  }
  func.func @transform_2(%arg0: i32) -> (i32, i32) {
    %c0_i32 = arith.constant 0 : i32
    %c0_i32_0 = arith.constant 0 : i32
    %c0_i32_1 = arith.constant 0 : i32
    return %c0_i32, %c0_i32_0 : i32, i32
  }
  func.func @transform_3(%arg0: i32) -> (i32, i32) {
    %c0_i32 = arith.constant 0 : i32
    %c0_i32_0 = arith.constant 0 : i32
    %c0_i32_1 = arith.constant 0 : i32
    return %c0_i32, %c0_i32_0 : i32, i32
  }
  func.func @transform_4(%arg0: i32) -> (i32, i32, i32) {
    %c0_i32 = arith.constant 0 : i32
    %c0_i32_0 = arith.constant 0 : i32
    %c0_i32_1 = arith.constant 0 : i32
    %c0_i32_2 = arith.constant 0 : i32
    return %c0_i32, %c0_i32_0, %c0_i32_1 : i32, i32, i32
  }
  func.func @transform_5(%arg0: i32) -> (i32, i32, i32) {
    %c0_i32 = arith.constant 0 : i32
    %c0_i32_0 = arith.constant 0 : i32
    %c0_i32_1 = arith.constant 0 : i32
    %c0_i32_2 = arith.constant 0 : i32
    return %c0_i32, %c0_i32_0, %c0_i32_1 : i32, i32, i32
  }
  func.func @transform_6(%arg0: i32) -> (i32, i32, i32) {
    %c0_i32 = arith.constant 0 : i32
    %c0_i32_0 = arith.constant 0 : i32
    %c0_i32_1 = arith.constant 0 : i32
    %c0_i32_2 = arith.constant 0 : i32
    return %c0_i32, %c0_i32_0, %c0_i32_1 : i32, i32, i32
  }
  func.func @transform_7(%arg0: i32) -> (i32, i32, i32) {
    %c0_i32 = arith.constant 0 : i32
    %c0_i32_0 = arith.constant 0 : i32
    %c0_i32_1 = arith.constant 0 : i32
    %c0_i32_2 = arith.constant 0 : i32
    return %c0_i32, %c0_i32_0, %c0_i32_1 : i32, i32, i32
  }
  func.func @transform_8(%arg0: i32) -> (i32, i32, i32) {
    %c0_i32 = arith.constant 0 : i32
    %c0_i32_0 = arith.constant 0 : i32
    %c0_i32_1 = arith.constant 0 : i32
    %c0_i32_2 = arith.constant 0 : i32
    return %c0_i32, %c0_i32_0, %c0_i32_1 : i32, i32, i32
  }
  func.func @transform_9(%arg0: i32) -> (i32, i32, i32) {
    %c0_i32 = arith.constant 0 : i32
    %c0_i32_0 = arith.constant 0 : i32
    %c0_i32_1 = arith.constant 0 : i32
    %c0_i32_2 = arith.constant 0 : i32
    return %c0_i32, %c0_i32_0, %c0_i32_1 : i32, i32, i32
  }
  func.func @transform_10(%arg0: i32) -> (i32, i32) {
    %c0_i32 = arith.constant 0 : i32
    %c0_i32_0 = arith.constant 0 : i32
    %c0_i32_1 = arith.constant 0 : i32
    return %c0_i32, %c0_i32_0 : i32, i32
  }
  func.func @transform_11(%arg0: i32) -> (i32, i32) {
    %c0_i32 = arith.constant 0 : i32
    %c0_i32_0 = arith.constant 0 : i32
    %c0_i32_1 = arith.constant 0 : i32
    return %c0_i32, %c0_i32_0 : i32, i32
  }
  func.func @transform_12(%arg0: i32) -> (i32, i32) {
    %c0_i32 = arith.constant 0 : i32
    %c0_i32_0 = arith.constant 0 : i32
    %c0_i32_1 = arith.constant 0 : i32
    return %c0_i32, %c0_i32_0 : i32, i32
  }
  func.func @transform_13(%arg0: i32) -> (i32, i32) {
    %c0_i32 = arith.constant 0 : i32
    %c0_i32_0 = arith.constant 0 : i32
    %c0_i32_1 = arith.constant 0 : i32
    return %c0_i32, %c0_i32_0 : i32, i32
  }
  func.func @transform_14(%arg0: i32) -> (i32, i32) {
    %c0_i32 = arith.constant 0 : i32
    %c0_i32_0 = arith.constant 0 : i32
    %c0_i32_1 = arith.constant 0 : i32
    return %c0_i32, %c0_i32_0 : i32, i32
  }
  func.func @transform_15(%arg0: i32) -> (i32, i32) {
    %c0_i32 = arith.constant 0 : i32
    %c0_i32_0 = arith.constant 0 : i32
    %c0_i32_1 = arith.constant 0 : i32
    return %c0_i32, %c0_i32_0 : i32, i32
  }
  func.func @transform_16(%arg0: i32) -> (i32, i32) {
    %c0_i32 = arith.constant 0 : i32
    %c0_i32_0 = arith.constant 0 : i32
    %c0_i32_1 = arith.constant 0 : i32
    return %c0_i32, %c0_i32_0 : i32, i32
  }
  func.func @transform_17(%arg0: i32) -> (i32, i32) {
    %c0_i32 = arith.constant 0 : i32
    %c0_i32_0 = arith.constant 0 : i32
    %c0_i32_1 = arith.constant 0 : i32
    return %c0_i32, %c0_i32_0 : i32, i32
  }
  func.func @transform_18(%arg0: i32) -> (i32, i32) {
    %c0_i32 = arith.constant 0 : i32
    %c0_i32_0 = arith.constant 0 : i32
    %c0_i32_1 = arith.constant 0 : i32
    return %c0_i32, %c0_i32_0 : i32, i32
  }
  func.func @transform_19(%arg0: i32) -> (i32, i32, i32) {
    %c0_i32 = arith.constant 0 : i32
    %c0_i32_0 = arith.constant 0 : i32
    %c0_i32_1 = arith.constant 0 : i32
    return %arg0, %c0_i32, %c0_i32_0 : i32, i32, i32
  }
}

</mosaic_0001>

<bundles_post_ra>
// kernel: _forward_impl.1
= control target key start
LH: loop header
LB: loop body
LE: loop exit
PB: predicated region body
PF: predicated region fallthrough
CT: control target
= control target key end

     0   :  { %s14882_s0 = inlined_call_operand.vmem [shape: bf16[2,256,4], index: 0, kind: input, shape index: {}]   ;;  %s14883_s1 = inlined_call_operand.vmem [shape: bf16[4,128], index: 1, kind: input, shape index: {}]   ;;  %s14884_s2 = inlined_call_operand.vmem [shape: f32[1,128], index: 2, kind: input, shape index: {}]   ;;  %s14885_s3 = inlined_call_operand.vmem [shape: f32[1,128], index: 3, kind: input, shape index: {}]   ;;  %s14886_s4 = inlined_call_operand.hbm [shape: bf16[1,128,128], index: 4, kind: input, shape index: {}]   ;;  %s14887_s5 = inlined_call_operand.vmem [shape: f32[1,1,128], index: 5, kind: input, shape index: {}]   ;;  %s14888_s6 = inlined_call_operand.hbm [shape: f32[1,1,128], index: 6, kind: input, shape index: {}]   ;;  %s14889_s7 = inlined_call_operand.vmem [shape: bf16[1,1152,128], index: 7, kind: input, shape index: {}]   ;;  %s14890_s8 = inlined_call_operand.hbm [shape: f32[1,1,128], index: 8, kind: input, shape index: {}]   ;;  %s14891_s9 = inlined_call_operand.hbm [shape: f32[1,1,128], index: 9, kind: input, shape index: {}]   ;;  %s14892_s10 = inlined_call_operand.hbm [shape: bf16[128,128], index: 10, kind: input, shape index: {}]   ;;  %s14893_s11 = inlined_call_operand.hbm [shape: f32[1,128], index: 11, kind: input, shape index: {}]   ;;  %s14894_s12 = inlined_call_operand.hbm [shape: f32[1,128], index: 12, kind: input, shape index: {}]   ;;  %s14895_s13 = inlined_call_operand.vmem [shape: bf16[4,128], index: 13, kind: input, shape index: {}]   ;;  %s14896_s14 = inlined_call_operand.hbm [shape: f32[1,128], index: 14, kind: input, shape index: {}]   ;;  %s14897_s15 = inlined_call_operand.hbm [shape: f32[1,128], index: 15, kind: input, shape index: {}]   ;;  %s14898_s16 = inlined_call_operand.hbm [shape: bf16[256,128], index: 16, kind: input, shape index: {}]   ;;  %s14899_s17 = inlined_call_operand.hbm [shape: f32[1,128], index: 17, kind: input, shape index: {}]   ;;  %s14900_s18 = inlined_call_operand.hbm [shape: f32[1,128], index: 18, kind: input, shape index: {}]   ;;  %s14901_s19 = inlined_call_operand.vmem [shape: f32[2,256,128], index: 19, kind: output, shape index: {}]  }
   0x1   :  { %14937 = sst [smem:[#allocation68_spill]] %s14882_s0 }
   0x2   :  { %14938 = sst [smem:[#allocation69_spill]] %s14883_s1 }
   0x3   :  { %14939 = sst [smem:[#allocation70_spill]] %s14884_s2 }
   0x4   :  { %14940 = sst [smem:[#allocation71_spill]] %s14885_s3 }
   0x5   :  { %14941 = sst [smem:[#allocation72_spill]] %s14888_s6 }
   0x6   :  { %14942 = sst [smem:[#allocation73_spill]] %s14891_s9 }
   0x7   :  { %14943 = sst [smem:[#allocation74_spill]] %s14895_s13 }
   0x8   :  { %14944 = sst [smem:[#allocation75_spill]] %s14901_s19 }
   0x9   :  { %24 = vsyncpa [#allocation4], 0 }
   0xa   :  { %25 = vsyncpa [#allocation6], 0 }
   0xb   :  { %26 = vsyncpa [#allocation9], 0 }
   0xc   :  { %27 = vsyncpa [#allocation12], 0 }
   0xd   :  { %28 = vsyncpa [#allocation15], 0 }
   0xe   :  { %29 = vsyncpa [#allocation18], 0 }
   0xf   :  { %30 = vsyncpa [#allocation21], 0  ;;  %s11193_s0 = smov 0  }
  0x10 LB: > { %14945 = sst [smem:[#allocation29_spill]] %s11076_s0  ;;  %s11078_s30 = smov [#allocation5]   ;;  %s11076_s0 = sphi %s11193_s0, %s36_s0  }
  0x11   : > { %s509_s20 = sshll.u32 %s11078_s30, 4  ;;  %s11199_s21 = sadd.s32 4294967295, %s11076_s0   ;;  %s11204_s20 = int_to_ptr.vmem [resolvable:$true] %s509_s20 }
  0x12   : > { %p8339_p0 = scmp.ge.s32.totalorder %s11076_s0, 1  ;;  %p471_p1 = scmp.lt.s32.totalorder %s11076_s0, 3 }
  0x13   : > { %p14903_p2 = scmp.eq.s32.totalorder %s11199_s21, 0  ;;  %s11079_s22 = smov [#allocation8]  }
  0x14   : > { %p11206_p3 = pnand %p8339_p0, %p471_p1  ;;  %s534_s2 = sshll.u32 %s11079_s22, 4  ;;  %s11212_s2 = int_to_ptr.vmem [resolvable:$true] %s534_s2 }
  0x15   : > { %s11080_s23 = smov [#allocation11]   ;;  %s11081_s3 = smov [#allocation14]  }
  0x16   : > { %s14946_s1 = scalar_select %p11206_p3, 1, 0 }
  0x17   : > { %p9866_p4 = pneg %p11206_p3  ;;  %s558_s24 = sshll.u32 %s11080_s23, 4  ;;  %s11220_s24 = int_to_ptr.vmem [resolvable:$true] %s558_s24 }
  0x18   : > { %s583_s26 = sshll.u32 %s11081_s3, 4  ;;  %s14948_s6 = sld [smem:[#allocation72_spill]]  ;;  %s11222_s26 = int_to_ptr.vmem [resolvable:$true] %s583_s26 }
  0x19   : > { %p11216_p5 = pnand %p14903_p2, %p9866_p4 }
  0x1b   : > { %p11232_p7 = pneg %p11216_p5 }
  0x1e   : > { %s10706_s29 = scalar_lea.hbm %s14948_s6, 16 }
  0x1f   : > { %p10707_p6 = scmp.ne.s32.totalorder %s14948_s6, %s10706_s29  ;;  %p10713_p10 = scmp.lt.u32.totalorder %s10706_s29, %s14948_s6 }
  0x21   : > { %p10709_p8 = pnand %p11232_p7, %p10707_p6 }
  0x23   : > { %p10710_p9 = pneg %p10709_p8 }
  0x25   : > { %p10715_p11 = pnand %p10713_p10, %p10710_p9 }
  0x27   : > { %10718 = shalt.err (!%p10715_p11)
}
  0x28   : > { %s10719_s27 = scalar_lea.vmem %s11204_s20, 16  ;;  %s10726_s28 = scalar_lea.vmem %s11204_s20, 32 }
  0x29   : > { %p10720_p12 = scmp.ne.s32.totalorder %s11204_s20, %s10719_s27  ;;  %p10727_p1 = scmp.lt.s32.totalorder %s11204_s20, %s11204_s20 }
  0x2a   : > { %p10728_p4 = scmp.lt.s32.totalorder %s10726_s28, %s10719_s27 }
  0x2b   : > { %p10722_p13 = pnand %p10720_p12, %p11232_p7 }
  0x2c   : > { %p10729_p6 = por %p10728_p4, %p10727_p1 }
  0x2d   : > { %p10723_p0 = pneg %p10722_p13 }
  0x2f   : > { %p10730_p8 = pnand %p10729_p6, %p10723_p0 }
  0x31   : > { %10733 = shalt.err (!%p10730_p8)
}
  0x32   : > { %9872 = dma.hbm_to_vmem [thread:$0]  (!%p11216_p5), %s14948_s6, 16, %s11204_s20, [#allocation6]  }
  0x33   : > { %s14950_s9 = sld [smem:[#allocation73_spill]] }
  0x39   : > { %s10734_s3 = scalar_lea.hbm %s14950_s9, 16 }
  0x3a   : > { %p10735_p9 = scmp.ne.s32.totalorder %s14950_s9, %s10734_s3  ;;  %p10741_p12 = scmp.lt.u32.totalorder %s10734_s3, %s14950_s9 }
  0x3c   : > { %p10737_p10 = pnand %p10735_p9, %p11232_p7 }
  0x3e   : > { %p10738_p11 = pneg %p10737_p10 }
  0x40   : > { %p10743_p13 = pnand %p10741_p12, %p10738_p11 }
  0x42   : > { %10746 = shalt.err (!%p10743_p13)
}
  0x43   : > { %s10747_s20 = scalar_lea.vmem %s11212_s2, 16  ;;  %s10754_s13 = scalar_lea.vmem %s11212_s2, 32 }
  0x44   : > { %p10748_p0 = scmp.ne.s32.totalorder %s11212_s2, %s10747_s20  ;;  %p10755_p6 = scmp.lt.s32.totalorder %s11212_s2, %s11212_s2 }
  0x45   : > { %p10756_p8 = scmp.lt.s32.totalorder %s10754_s13, %s10747_s20 }
  0x46   : > { %p10750_p1 = pnand %p10748_p0, %p11232_p7 }
  0x47   : > { %p10757_p9 = por %p10756_p8, %p10755_p6 }
  0x48   : > { %p10751_p4 = pneg %p10750_p1 }
  0x4a   : > { %p10758_p10 = pnand %p10757_p9, %p10751_p4 }
  0x4c   : > { %10761 = shalt.err (!%p10758_p10)
}
  0x4d   : > { %9878 = dma.hbm_to_vmem [thread:$0]  (!%p11216_p5), %s14950_s9, 16, %s11212_s2, [#allocation9]  }
  0x4e   : > { %s10762_s22 = scalar_lea.hbm %s14893_s11, 16 }
  0x4f   : > { %p10763_p11 = scmp.ne.s32.totalorder %s14893_s11, %s10762_s22  ;;  %p10769_p0 = scmp.lt.u32.totalorder %s10762_s22, %s14893_s11 }
  0x51   : > { %p10765_p12 = pnand %p10763_p11, %p11232_p7 }
  0x53   : > { %p10766_p13 = pneg %p10765_p12 }
  0x55   : > { %p10771_p1 = pnand %p10769_p0, %p10766_p13 }
  0x57   : > { %10774 = shalt.err (!%p10771_p1)
}
  0x58   : > { %s10775_s2 = scalar_lea.vmem %s11220_s24, 16  ;;  %s10782_s13 = scalar_lea.vmem %s11220_s24, 32 }
  0x59   : > { %p10776_p4 = scmp.ne.s32.totalorder %s11220_s24, %s10775_s2  ;;  %p10783_p9 = scmp.lt.s32.totalorder %s11220_s24, %s11220_s24 }
  0x5a   : > { %p10784_p10 = scmp.lt.s32.totalorder %s10782_s13, %s10775_s2 }
  0x5b   : > { %p10778_p6 = pnand %p10776_p4, %p11232_p7 }
  0x5c   : > { %p10785_p11 = por %p10784_p10, %p10783_p9 }
  0x5d   : > { %p10779_p8 = pneg %p10778_p6 }
  0x5f   : > { %p10786_p12 = pnand %p10785_p11, %p10779_p8 }
  0x61   : > { %10789 = shalt.err (!%p10786_p12)
}
  0x62   : > { %9884 = dma.hbm_to_vmem [thread:$0]  (!%p11216_p5), %s14893_s11, 16, %s11220_s24, [#allocation12]  }
  0x63   : > { %s10790_s22 = scalar_lea.hbm %s14896_s14, 16 }
  0x64   : > { %p10791_p13 = scmp.ne.s32.totalorder %s14896_s14, %s10790_s22  ;;  %p10797_p4 = scmp.lt.u32.totalorder %s10790_s22, %s14896_s14 }
  0x66   : > { %p10793_p0 = pnand %p10791_p13, %p11232_p7 }
  0x68   : > { %p10794_p1 = pneg %p10793_p0 }
  0x6a   : > { %p10799_p6 = pnand %p10797_p4, %p10794_p1 }
  0x6c   : > { %10802 = shalt.err (!%p10799_p6)
}
  0x6d   : > { %s10803_s24 = scalar_lea.vmem %s11222_s26, 16  ;;  %s10810_s2 = scalar_lea.vmem %s11222_s26, 32 }
  0x6e   : > { %p10804_p8 = scmp.ne.s32.totalorder %s11222_s26, %s10803_s24  ;;  %p10811_p11 = scmp.lt.s32.totalorder %s11222_s26, %s11222_s26 }
  0x6f   : > { %p10812_p12 = scmp.lt.s32.totalorder %s10810_s2, %s10803_s24 }
  0x70   : > { %p10806_p9 = pnand %p10804_p8, %p11232_p7 }
  0x71   : > { %p10813_p13 = por %p10812_p12, %p10811_p11 }
  0x72   : > { %p10807_p10 = pneg %p10806_p9 }
  0x74   : > { %p10814_p0 = pnand %p10813_p13, %p10807_p10 }
  0x76   : > { %10817 = shalt.err (!%p10814_p0)
}
  0x77   : > { %9890 = dma.hbm_to_vmem [thread:$0]  (!%p11216_p5), %s14896_s14, 16, %s11222_s26, [#allocation15]  }
  0x78   : > { %s11082_s0 = smov [#allocation17]   ;;  %s11083_s30 = smov [#allocation3]  }
  0x79   : > { %s604_s29 = sshll.u32 %s11082_s0, 4  ;;  %s492_s22 = sshll.u32 %s11083_s30, 4  ;;  %s605_s29 = int_to_ptr.vmem [resolvable:$true] %s604_s29  ;;  %s493_s22 = int_to_ptr.vmem [resolvable:$true] %s492_s22 }
  0x7a   : > { %s10818_s28 = scalar_lea.hbm %s14898_s16, 2048 }
  0x7b   : > { %p10819_p1 = scmp.ne.s32.totalorder %s14898_s16, %s10818_s28  ;;  %p10825_p8 = scmp.lt.u32.totalorder %s10818_s28, %s14898_s16 }
  0x7d   : > { %p10821_p4 = pnand %p10819_p1, %p11232_p7 }
  0x7f   : > { %p10822_p6 = pneg %p10821_p4 }
  0x81   : > { %p10827_p9 = pnand %p10825_p8, %p10822_p6 }
  0x83   : > { %10830 = shalt.err (!%p10827_p9)
}
  0x84   : > { %s10831_s26 = scalar_lea.vmem %s605_s29, 2048  ;;  %p10839_p13 = scmp.lt.s32.totalorder %s605_s29, %s605_s29 }
  0x85   : > { %p10832_p10 = scmp.ne.s32.totalorder %s605_s29, %s10831_s26  ;;  %p10840_p0 = scmp.lt.s32.totalorder %s10831_s26, %s10831_s26 }
  0x87   : > { %p10834_p11 = pnand %p10832_p10, %p11232_p7  ;;  %p10841_p2 = por %p10840_p0, %p10839_p13 }
  0x89   : > { %p10835_p12 = pneg %p10834_p11 }
  0x8b   : > { %p10842_p3 = pnand %p10841_p2, %p10835_p12 }
  0x8d   : > { %10845 = shalt.err (!%p10842_p3)
}
  0x8e   : > { %s11084_s19 = smov 64   ;;  %s11085_s0 = smov 4  }
  0x8f   : > { %9896 = dma.hbm_to_vmem [thread:$0]  (!%p11216_p5), %s14898_s16, 2048, %s605_s29, [#allocation18], %s11084_s19, %s11084_s19, %s11085_s0  }
  0x90   : > { %s10846_s20 = scalar_lea.hbm %s14886_s4, 1024 }
  0x91   : > { %p10847_p2 = scmp.ne.s32.totalorder %s14886_s4, %s10846_s20  ;;  %p10853_p4 = scmp.lt.u32.totalorder %s10846_s20, %s14886_s4 }
  0x93   : > { %p10849_p3 = pnand %p10847_p2, %p11232_p7 }
  0x95   : > { %p10850_p1 = pneg %p10849_p3 }
  0x97   : > { %p10855_p6 = pnand %p10853_p4, %p10850_p1 }
  0x99   : > { %10858 = shalt.err (!%p10855_p6)
}
  0x9a   : > { %s10859_s30 = scalar_lea.vmem %s493_s22, 1024  ;;  %p10867_p11 = scmp.lt.s32.totalorder %s493_s22, %s493_s22 }
  0x9b   : > { %p10860_p8 = scmp.ne.s32.totalorder %s493_s22, %s10859_s30  ;;  %p10868_p12 = scmp.lt.s32.totalorder %s10859_s30, %s10859_s30 }
  0x9d   : > { %p10862_p9 = pnand %p10860_p8, %p11232_p7  ;;  %p10869_p13 = por %p10868_p12, %p10867_p11 }
  0x9f   : > { %p10863_p10 = pneg %p10862_p9 }
  0xa1   : > { %p10870_p0 = pnand %p10869_p13, %p10863_p10 }
  0xa3   : > { %10873 = shalt.err (!%p10870_p0)
}
  0xa4   : > { %9869 = dma.hbm_to_vmem [thread:$0]  (!%p11216_p5), %s14886_s4, 1024, %s493_s22, [#allocation4], %s11084_s19, %s11084_s19, %s11085_s0  }
  0xa5   : > { %s11086_s27 = smov [#allocation7]   ;;  %s11087_s20 = smov [#allocation10]  }
  0xa6   : > { %s523_s28 = sshll.u32 %s11086_s27, 4  ;;  %s544_s24 = sshll.u32 %s11087_s20, 4  ;;  %s524_s28 = int_to_ptr.vmem [resolvable:$true] %s523_s28  ;;  %s545_s24 = int_to_ptr.vmem [resolvable:$true] %s544_s24 }
  0xa7   : > { %s10874_s26 = scalar_lea.hbm %s14890_s8, 16 }
  0xa8   : > { %p10875_p2 = scmp.ne.s32.totalorder %s14890_s8, %s10874_s26  ;;  %p10881_p4 = scmp.lt.u32.totalorder %s10874_s26, %s14890_s8 }
  0xaa   : > { %p10877_p3 = pnand %p10875_p2, %p11232_p7 }
  0xac   : > { %p10878_p1 = pneg %p10877_p3 }
  0xae   : > { %p10883_p6 = pnand %p10881_p4, %p10878_p1 }
  0xb0   : > { %10886 = shalt.err (!%p10883_p6)
}
  0xb1   : > { %s10887_s22 = scalar_lea.vmem %s524_s28, 16  ;;  %s10894_s3 = scalar_lea.vmem %s524_s28, 32 }
  0xb2   : > { %p10888_p8 = scmp.ne.s32.totalorder %s524_s28, %s10887_s22  ;;  %p10895_p11 = scmp.lt.s32.totalorder %s524_s28, %s524_s28 }
  0xb3   : > { %p10896_p12 = scmp.lt.s32.totalorder %s10894_s3, %s10887_s22 }
  0xb4   : > { %p10890_p9 = pnand %p10888_p8, %p11232_p7 }
  0xb5   : > { %p10897_p13 = por %p10896_p12, %p10895_p11 }
  0xb6   : > { %p10891_p10 = pneg %p10890_p9 }
  0xb8   : > { %p10898_p0 = pnand %p10897_p13, %p10891_p10 }
  0xba   : > { %10901 = shalt.err (!%p10898_p0)
}
  0xbb   : > { %9875 = dma.hbm_to_vmem [thread:$0]  (!%p11216_p5), %s14890_s8, 16, %s524_s28, [#allocation6]  }
  0xbc   : > { %s10902_s2 = scalar_lea.hbm %s14892_s10, 1024 }
  0xbd   : > { %p10903_p2 = scmp.ne.s32.totalorder %s14892_s10, %s10902_s2  ;;  %p10909_p4 = scmp.lt.u32.totalorder %s10902_s2, %s14892_s10 }
  0xbf   : > { %p10905_p3 = pnand %p10903_p2, %p11232_p7 }
  0xc1   : > { %p10906_p1 = pneg %p10905_p3 }
  0xc3   : > { %p10911_p6 = pnand %p10909_p4, %p10906_p1 }
  0xc5   : > { %10914 = shalt.err (!%p10911_p6)
}
  0xc6   : > { %s10915_s22 = scalar_lea.vmem %s545_s24, 1024  ;;  %p10923_p11 = scmp.lt.s32.totalorder %s545_s24, %s545_s24 }
  0xc7   : > { %p10916_p8 = scmp.ne.s32.totalorder %s545_s24, %s10915_s22  ;;  %p10924_p12 = scmp.lt.s32.totalorder %s10915_s22, %s10915_s22 }
  0xc9   : > { %p10918_p9 = pnand %p10916_p8, %p11232_p7  ;;  %p10925_p13 = por %p10924_p12, %p10923_p11 }
  0xcb   : > { %p10919_p10 = pneg %p10918_p9 }
  0xcd   : > { %p10926_p0 = pnand %p10925_p13, %p10919_p10 }
  0xcf   : > { %10929 = shalt.err (!%p10926_p0)
}
  0xd0   : > { %9881 = dma.hbm_to_vmem [thread:$0]  (!%p11216_p5), %s14892_s10, 1024, %s545_s24, [#allocation9], %s11084_s19, %s11084_s19, %s11085_s0  }
  0xd1   : > { %s11088_s6 = smov [#allocation13]   ;;  %s11089_s9 = smov [#allocation16]  }
  0xd2   : > { %s569_s27 = sshll.u32 %s11088_s6, 4  ;;  %s594_s20 = sshll.u32 %s11089_s9, 4  ;;  %s570_s27 = int_to_ptr.vmem [resolvable:$true] %s569_s27  ;;  %s595_s20 = int_to_ptr.vmem [resolvable:$true] %s594_s20 }
  0xd3   : > { %s10930_s26 = scalar_lea.hbm %s14894_s12, 16 }
  0xd4   : > { %p10931_p2 = scmp.ne.s32.totalorder %s14894_s12, %s10930_s26  ;;  %p10937_p4 = scmp.lt.u32.totalorder %s10930_s26, %s14894_s12 }
  0xd6   : > { %p10933_p3 = pnand %p10931_p2, %p11232_p7 }
  0xd8   : > { %p10934_p1 = pneg %p10933_p3 }
  0xda   : > { %p10939_p6 = pnand %p10937_p4, %p10934_p1 }
  0xdc   : > { %10942 = shalt.err (!%p10939_p6)
}
  0xdd   : > { %s10943_s19 = scalar_lea.vmem %s570_s27, 16  ;;  %s10950_s0 = scalar_lea.vmem %s570_s27, 32 }
  0xde   : > { %p10944_p8 = scmp.ne.s32.totalorder %s570_s27, %s10943_s19  ;;  %p10951_p11 = scmp.lt.s32.totalorder %s570_s27, %s570_s27 }
  0xdf   : > { %p10952_p12 = scmp.lt.s32.totalorder %s10950_s0, %s10943_s19 }
  0xe0   : > { %p10946_p9 = pnand %p10944_p8, %p11232_p7 }
  0xe1   : > { %p10953_p13 = por %p10952_p12, %p10951_p11 }
  0xe2   : > { %p10947_p10 = pneg %p10946_p9 }
  0xe4   : > { %p10954_p0 = pnand %p10953_p13, %p10947_p10 }
  0xe6   : > { %10957 = shalt.err (!%p10954_p0)
}
  0xe7   : > { %9887 = dma.hbm_to_vmem [thread:$0]  (!%p11216_p5), %s14894_s12, 16, %s570_s27, [#allocation12]  }
  0xe8   : > { %s10958_s2 = scalar_lea.hbm %s14897_s15, 16 }
  0xe9   : > { %p10959_p2 = scmp.ne.s32.totalorder %s14897_s15, %s10958_s2  ;;  %p10965_p4 = scmp.lt.u32.totalorder %s10958_s2, %s14897_s15 }
  0xeb   : > { %p10961_p3 = pnand %p10959_p2, %p11232_p7 }
  0xed   : > { %p10962_p1 = pneg %p10961_p3 }
  0xef   : > { %p10967_p6 = pnand %p10965_p4, %p10962_p1 }
  0xf1   : > { %10970 = shalt.err (!%p10967_p6)
}
  0xf2   : > { %s10971_s22 = scalar_lea.vmem %s595_s20, 16  ;;  %s10978_s27 = scalar_lea.vmem %s595_s20, 32 }
  0xf3   : > { %p10972_p8 = scmp.ne.s32.totalorder %s595_s20, %s10971_s22  ;;  %p10979_p11 = scmp.lt.s32.totalorder %s595_s20, %s595_s20 }
  0xf4   : > { %p10980_p12 = scmp.lt.s32.totalorder %s10978_s27, %s10971_s22 }
  0xf5   : > { %p10974_p9 = pnand %p10972_p8, %p11232_p7 }
  0xf6   : > { %p10981_p13 = por %p10980_p12, %p10979_p11 }
  0xf7   : > { %p10975_p10 = pneg %p10974_p9 }
  0xf9   : > { %p10982_p0 = pnand %p10981_p13, %p10975_p10 }
  0xfb   : > { %10985 = shalt.err (!%p10982_p0)
}
  0xfc   : > { %9893 = dma.hbm_to_vmem [thread:$0]  (!%p11216_p5), %s14897_s15, 16, %s595_s20, [#allocation15]  }
  0xfd   : > { %s11090_s0 = smov [#allocation19]   ;;  %s11091_s3 = smov [#allocation20]  }
  0xfe   : > { %s618_s24 = sshll.u32 %s11090_s0, 4  ;;  %s629_s6 = sshll.u32 %s11091_s3, 4  ;;  %s619_s24 = int_to_ptr.vmem [resolvable:$true] %s618_s24  ;;  %s630_s6 = int_to_ptr.vmem [resolvable:$true] %s629_s6 }
  0xff   : > { %s10986_s13 = scalar_lea.hbm %s14899_s17, 16 }
 0x100   : > { %p10987_p2 = scmp.ne.s32.totalorder %s14899_s17, %s10986_s13  ;;  %p10993_p4 = scmp.lt.u32.totalorder %s10986_s13, %s14899_s17 }
 0x102   : > { %p10989_p3 = pnand %p10987_p2, %p11232_p7 }
 0x104   : > { %p10990_p1 = pneg %p10989_p3 }
 0x106   : > { %p10995_p6 = pnand %p10993_p4, %p10990_p1 }
 0x108   : > { %10998 = shalt.err (!%p10995_p6)
}
 0x109   : > { %s10999_s20 = scalar_lea.vmem %s619_s24, 16  ;;  %s11006_s27 = scalar_lea.vmem %s619_s24, 32 }
 0x10a   : > { %p11000_p8 = scmp.ne.s32.totalorder %s619_s24, %s10999_s20  ;;  %p11007_p11 = scmp.lt.s32.totalorder %s619_s24, %s619_s24 }
 0x10b   : > { %p11008_p12 = scmp.lt.s32.totalorder %s11006_s27, %s10999_s20 }
 0x10c   : > { %p11002_p9 = pnand %p11000_p8, %p11232_p7 }
 0x10d   : > { %p11009_p13 = por %p11008_p12, %p11007_p11 }
 0x10e   : > { %p11003_p10 = pneg %p11002_p9 }
 0x110   : > { %p11010_p0 = pnand %p11009_p13, %p11003_p10 }
 0x112   : > { %11013 = shalt.err (!%p11010_p0)
}
 0x113   : > { %9899 = dma.hbm_to_vmem [thread:$0]  (!%p11216_p5), %s14899_s17, 16, %s619_s24, [#allocation18]  }
 0x114   : > { %s11014_s9 = scalar_lea.hbm %s14900_s18, 16 }
 0x115   : > { %p11015_p2 = scmp.ne.s32.totalorder %s14900_s18, %s11014_s9  ;;  %p11021_p4 = scmp.lt.u32.totalorder %s11014_s9, %s14900_s18 }
 0x117   : > { %p11017_p3 = pnand %p11015_p2, %p11232_p7 }
 0x119   : > { %p11018_p1 = pneg %p11017_p3 }
 0x11b   : > { %p11023_p6 = pnand %p11021_p4, %p11018_p1 }
 0x11d   : > { %11026 = shalt.err (!%p11023_p6)
}
 0x11e   : > { %s11027_s29 = scalar_lea.vmem %s630_s6, 16  ;;  %s11034_s24 = scalar_lea.vmem %s630_s6, 32 }
 0x11f   : > { %p11028_p8 = scmp.ne.s32.totalorder %s630_s6, %s11027_s29  ;;  %p11035_p11 = scmp.lt.s32.totalorder %s630_s6, %s630_s6 }
 0x120   : > { %p11036_p12 = scmp.lt.s32.totalorder %s11034_s24, %s11027_s29 }
 0x121   : > { %p11030_p9 = pnand %p11028_p8, %p11232_p7 }
 0x122   : > { %p11037_p13 = por %p11036_p12, %p11035_p11 }
 0x123   : > { %p11031_p10 = pneg %p11030_p9 }
 0x125   : > { %p11038_p0 = pnand %p11037_p13, %p11031_p10 }
 0x127   : > { %11041 = shalt.err (!%p11038_p0)
}
 0x128   : > { %9902 = dma.hbm_to_vmem [thread:$0]  (!%p11216_p5), %s14900_s18, 16, %s630_s6, [#allocation21]  }
 0x129   : > { %p14951_p2 = scmp.ne.s32.totalorder %s14946_s1, 0 }
 0x12b   : > { %650 = sbr.rel (%p14951_p2) target bundleno = 2091 (0x82b), region = 96 }
 0x132   : > { %p14952_p3 = scmp.eq.s32.totalorder %s11199_s21, 0 }
 0x134   : > { %11047 = dma.done.wait (%p14952_p3), [#allocation4], 1024   ;;  %p14953_p7 = pmov %p14952_p3 }
 0x135   : > { %p14954_p1 = pmov %p14952_p3 }
 0x136   : > { %11049 = vsyncadd (%p14953_p7), [#allocation4], 4294966272 }
 0x137   : > { %11051 = dma.done.wait (%p14954_p1), [#allocation6], 32   ;;  %p14955_p4 = pmov %p14954_p1 }
 0x138   : > { %p14956_p6 = pmov %p14954_p1 }
 0x139   : > { %11053 = vsyncadd (%p14955_p4), [#allocation6], 4294967264 }
 0x13a   : > { %11055 = dma.done.wait (%p14956_p6), [#allocation9], 1040   ;;  %p14957_p5 = pmov %p14954_p1 }
 0x13b   : > { %p14958_p8 = pmov %p14954_p1 }
 0x13c   : > { %11057 = vsyncadd (%p14957_p5), [#allocation9], 4294966256 }
 0x13d   : > { %11059 = dma.done.wait (%p14958_p8), [#allocation12], 32   ;;  %p14959_p9 = pmov %p14954_p1 }
 0x13e   : > { %p14960_p10 = pmov %p14954_p1 }
 0x13f   : > { %11061 = vsyncadd (%p14959_p9), [#allocation12], 4294967264 }
 0x140   : > { %11063 = dma.done.wait (%p14960_p10), [#allocation15], 32   ;;  %p14961_p11 = pmov %p14954_p1 }
 0x141   : > { %p14962_p12 = pmov %p14954_p1 }
 0x142   : > { %11065 = vsyncadd (%p14961_p11), [#allocation15], 4294967264 }
 0x143   : > { %11067 = dma.done.wait (%p14962_p12), [#allocation18], 2064   ;;  %p14963_p13 = pmov %p14954_p1 }
 0x144   : > { %p14964_p0 = pmov %p14954_p1 }
 0x145   : > { %11069 = vsyncadd (%p14963_p13), [#allocation18], 4294965232 }
 0x146   : > { %11071 = dma.done.wait (%p14964_p0), [#allocation21], 16   ;;  %p14965_p2 = pmov %p14964_p0 }
 0x147   : > { %p750_p3 = scmp.lt.s32.totalorder %s11199_s21, 1  ;;  %vm923_vm0 = vcmask 1041408   ;;  %s14966_s6 = sld [smem:[#allocation68_spill]]  ;;  %vm874_vm1 = vcmask 31744   ;;  %v9966_v18 = vld [vmem:[#allocation3] sm:$0xff]   ;;  %v9967_v19 = vld [vmem:[#allocation3 + $0x8] sm:$0xff]  }
 0x148   : > { %11073 = vsyncadd (%p14965_p2), [#allocation21], 4294967280  ;;  %s14967_s0 = sld [smem:[#allocation69_spill]]  ;;  %9622 = vmatprep.subr.bf16.mxu1 %v9966_v18  ;;  %v9968_v20 = vld [vmem:[#allocation3 + $0x10] sm:$0xff]   ;;  %v9969_v21 = vld [vmem:[#allocation3 + $0x18] sm:$0xff]   ;;  %vm1397_vm2 = vcmask 1040384  }
 0x149   : > { %s15075_s21 = smov (!%p750_p3, %s11199_s21), 1  ;;  %9623 = vmatpush3.bf16.msra.mxu1 %v9966_v18  ;;  %v9970_v22 = vld [vmem:[#allocation3 + $0x20] sm:$0xff]   ;;  %v9971_v23 = vld [vmem:[#allocation3 + $0x28] sm:$0xff]   ;;  %v9972_v24 = vld [vmem:[#allocation3 + $0x30] sm:$0xff]   ;;  %vm1398_vm3 = vsmask.f32 256 }
 0x14a   : > { %s8888_s1 = sshll.u32 %s15075_s21, 7  ;;  %9624 = vmatprep.subr.bf16.mxu1 %v9967_v19  ;;  %v9973_v25 = vld [vmem:[#allocation3 + $0x38] sm:$0xff]   ;;  %v9974_v26 = vld [vmem:[%s14889_s7 + $0x40] sm:$0xff]   ;;  %vm11564_vm4 = vmand %vm1397_vm2, %vm1398_vm3  ;;  %s14970_s29 = sld [smem:[#allocation70_spill]]  ;;  %vm1454_vm5 = vsmask.f32 7938 }
 0x14b   : > { %v9975_v27 = vld [vmem:[%s14889_s7] sm:$0xff]   ;;  %v1406_v29 = vld [vmem:[#allocation2 + $0x18] sm:$0x1]  ;;  %s14971_s20 = sld [smem:[#allocation71_spill]]  ;;  %vm11882_vm6 = vmand %vm1397_vm2, %vm1454_vm5  ;;  %vm2634_vm7 = vsmask.f32 3328 }
 0x14c   : > { %v1407_v30 = vsel %vm11564_vm4, 0, %v1406_v29  ;;  %vm2635_vm8 = vsmask.f32 7440  ;;  %vm2472_vm10 = vcmask 1043456   ;;  %vm2149_vm11 = vsmask.f32 4368 }
 0x14d   : > { %s11517_s27 = scalar_lea.vmem %s14966_s6, %s8888_s1  ;;  %9625 = vmatpush3.bf16.msra.mxu1 %v9967_v19  ;;  %1408 = vst [vmem:[#allocation2 + $0x18] sm:$0x1] %v1407_v30  ;;  %vm11962_vm9 = vmor %vm2634_vm7, %vm2635_vm8  ;;  %vm3085_vm14 = vcmask 1042432   ;;  %vm3086_vm15 = vcmask 1046532   ;;  %s15027_s9 = sld [smem:[#allocation74_spill]] }
 0x14e   : > { %v793_v0 = vld [vmem:[%s14967_s0] sm:$0x3]  ;;  %v9951_v3 = vld [vmem:[%s11517_s27 + $0x8] sm:$0xff]   ;;  %v9952_v4 = vld [vmem:[%s11517_s27 + $0x10] sm:$0xff]   ;;  %9626 = vmatprep.subr.bf16.mxu1 %v9968_v20  ;;  %s15072_s26 = sld [smem:[#allocation75_spill]] }
 0x14f   : > { %9816 = vmatprep.subr.msk.bf16.mxu0 %vm923_vm0, %v793_v0  ;;  %v925_v1 = vsel %vm923_vm0, %v793_v0, 0  ;;  %v9950_v2 = vld [vmem:[%s11517_s27] sm:$0xff]   ;;  %v9953_v5 = vld [vmem:[%s11517_s27 + $0x18] sm:$0xff]   ;;  %v9955_v7 = vld [vmem:[%s11517_s27 + $0x28] sm:$0xff]  }
 0x150   : > { %9589 = vmatpush3.bf16.msra.mxu0 %v925_v1  ;;  %9590 = vmatprep.mubr.msk.bf16.mxu0 %vm874_vm1, %v9950_v2  ;;  %v9954_v6 = vld [vmem:[%s11517_s27 + $0x20] sm:$0xff]   ;;  %v9956_v8 = vld [vmem:[%s11517_s27 + $0x30] sm:$0xff]   ;;  %v9957_v9 = vld [vmem:[%s11517_s27 + $0x38] sm:$0xff]  }
 0x151   : > { %v9958_v10 = vld [vmem:[%s11517_s27 + $0x40] sm:$0xff]   ;;  %v9959_v11 = vld [vmem:[%s11517_s27 + $0x48] sm:$0xff]   ;;  %v9960_v12 = vld [vmem:[%s11517_s27 + $0x50] sm:$0xff]   ;;  %9627 = vmatpush3.bf16.msra.mxu1 %v9968_v20  ;;  %8963 = vmatprep.subr.bf16.mxu0 %v9974_v26 }
 0x152   : > { %v9961_v13 = vld [vmem:[%s11517_s27 + $0x58] sm:$0xff]   ;;  %v9962_v14 = vld [vmem:[%s11517_s27 + $0x60] sm:$0xff]   ;;  %v9963_v15 = vld [vmem:[%s11517_s27 + $0x68] sm:$0xff]   ;;  %9628 = vmatprep.subr.bf16.mxu1 %v9969_v21 }
 0x153   : > { %9591 = vmatmul.mubr.msk.bf16.vlgmr.msra.gmra.mrb[0].mxu0 %vm874_vm1, %v9951_v3  ;;  %v9964_v16 = vld [vmem:[%s11517_s27 + $0x70] sm:$0xff]   ;;  %v9965_v17 = vld [vmem:[%s11517_s27 + $0x78] sm:$0xff]   ;;  %v11573_v31 = vld [vmem:[%s14970_s29] ss:$0 sm:$0xff] }
 0x154   : > { %9594 = vmatprep.mubr.msk.bf16.mxu0 %vm874_vm1, %v9952_v4  ;;  %8964 = vmatpush3.bf16.msra.mxu0 %v9975_v27  ;;  %v11578_v33 = vld [vmem:[%s14971_s20] ss:$0 sm:$0xff]  ;;  %vm12144_vm12 = vmand %vm2472_vm10, %vm1454_vm5 }
 0x155   : > { %9629 = vmatpush3.bf16.msra.mxu1 %v9969_v21  ;;  %vm12150_vm13 = vmor %vm1398_vm3, %vm2149_vm11 }
 0x156   : > { %9630 = vmatprep.subr.bf16.mxu1 %v9970_v22  ;;  %vm12486_vm2 = vmor %vm3085_vm14, %vm3086_vm15 }
 0x159   : > { %9631 = vmatpush3.bf16.msra.mxu1 %v9970_v22 }
 0x15a   : > { %9632 = vmatprep.subr.bf16.mxu1 %v9971_v23 }
 0x15b   : > { %9595 = vmatmul.mubr.msk.bf16.gmra.mrb[4].mxu0 %vm874_vm1, %v9953_v5 }
 0x15c   : > { %9598 = vmatprep.mubr.msk.bf16.mxu0 %vm874_vm1, %v9954_v6 }
 0x15d   : > { %9633 = vmatpush3.bf16.msra.mxu1 %v9971_v23 }
 0x15e   : > { %9634 = vmatprep.subr.bf16.mxu1 %v9972_v24 }
 0x161   : > { %9635 = vmatpush3.bf16.msra.mxu1 %v9972_v24 }
 0x162   : > { %9636 = vmatprep.subr.bf16.mxu1 %v9973_v25 }
 0x163   : > { %9599 = vmatmul.mubr.msk.bf16.gmra.mrb[8].mxu0 %vm874_vm1, %v9955_v7 }
 0x164   : > { %9602 = vmatprep.mubr.msk.bf16.mxu0 %vm874_vm1, %v9956_v8 }
 0x165   : > { %9637 = vmatpush3.bf16.msra.mxu1 %v9973_v25 }
 0x16b   : > { %9603 = vmatmul.mubr.msk.bf16.gmra.mrb[12].mxu0 %vm874_vm1, %v9957_v9 }
 0x16c   : > { %9606 = vmatprep.mubr.msk.bf16.mxu0 %vm874_vm1, %v9958_v10 }
 0x173   : > { %9607 = vmatmul.mubr.msk.bf16.gmra.mrb[16].mxu0 %vm874_vm1, %v9959_v11 }
 0x174   : > { %9610 = vmatprep.mubr.msk.bf16.mxu0 %vm874_vm1, %v9960_v12 }
 0x17b   : > { %9611 = vmatmul.mubr.msk.bf16.gmra.mrb[20].mxu0 %vm874_vm1, %v9961_v13 }
 0x17c   : > { %9614 = vmatprep.mubr.msk.bf16.mxu0 %vm874_vm1, %v9962_v14 }
 0x183   : > { %9615 = vmatmul.mubr.msk.bf16.gmra.mrb[24].mxu0 %vm874_vm1, %v9963_v15 }
 0x184   : > { %9618 = vmatprep.mubr.msk.bf16.mxu0 %vm874_vm1, %v9964_v16 }
 0x18b   : > { %9619 = vmatmul.mubr.msk.bf16.gmra.mrb[28].mxu0 %vm874_vm1, %v9965_v17 }
 0x226   : > { %v9592_v32 = vpop.f32.mrb[0].mxu0 }
 0x227   : > { %v1097_v34 = vmul.f32 %v9592_v32, %v11573_v31  ;;  %v961_v35 = vpop.f32.mrb[1].mxu0 }
 0x228   : > { %v1095_v36 = vmul.f32 %v11573_v31, %v961_v35  ;;  %v9593_v37 = vpop.f32.mrb[2].mxu0 }
 0x229   : > { %v11583_v38 = vadd.f32 %v11578_v33, %v1097_v34  ;;  %v1098_v39 = vmul.f32 %v9593_v37, %v11573_v31  ;;  %v964_v40 = vpop.f32.mrb[3].mxu0 }
 0x22a   : > { %v11587_v41 = vadd.f32 %v11578_v33, %v1095_v36  ;;  %v1096_v42 = vmul.f32 %v11573_v31, %v964_v40 }
 0x22b   : > { %v8406_v43 = vmul.f32 -1.442695, %v11583_v38  ;;  %v11592_v44 = vadd.f32 %v11578_v33, %v1098_v39 }
 0x22c   : > { %v8404_v45 = vmul.f32 -1.442695, %v11587_v41  ;;  %v11596_v46 = vadd.f32 %v11578_v33, %v1096_v42 }
 0x22d   : > { %10118 = vpow2.f32 %v8406_v43  ;;  %v8407_v47 = vmul.f32 -1.442695, %v11592_v44 }
 0x22e   : > { %10120 = vpow2.f32 %v8404_v45  ;;  %v8405_v48 = vmul.f32 -1.442695, %v11596_v46  ;;  %v9596_v49 = vpop.f32.mrb[4].mxu0 }
 0x22f   : > { %10122 = vpow2.f32 %v8407_v47  ;;  %v1101_v50 = vmul.f32 %v9596_v49, %v11573_v31  ;;  %v977_v51 = vpop.f32.mrb[5].mxu0 }
 0x230   : > { %10124 = vpow2.f32 %v8405_v48  ;;  %v1099_v52 = vmul.f32 %v11573_v31, %v977_v51  ;;  %v9597_v53 = vpop.f32.mrb[6].mxu0 }
 0x231   : > { %v11603_v54 = vadd.f32 %v11578_v33, %v1101_v50  ;;  %v1102_v55 = vmul.f32 %v9597_v53, %v11573_v31  ;;  %v980_v56 = vpop.f32.mrb[7].mxu0 }
 0x232   : > { %v11607_v57 = vadd.f32 %v11578_v33, %v1099_v52  ;;  %v1100_v58 = vmul.f32 %v11573_v31, %v980_v56 }
 0x233   : > { %v8410_v59 = vmul.f32 -1.442695, %v11603_v54  ;;  %v11612_v60 = vadd.f32 %v11578_v33, %v1102_v55 }
 0x234   : > { %v8408_v61 = vmul.f32 -1.442695, %v11607_v57  ;;  %v11616_v62 = vadd.f32 %v11578_v33, %v1100_v58 }
 0x235   : > { %10126 = vpow2.f32 %v8410_v59  ;;  %v8411_v63 = vmul.f32 -1.442695, %v11612_v60 }
 0x236   : > { %10128 = vpow2.f32 %v8408_v61  ;;  %v8409_v0 = vmul.f32 -1.442695, %v11616_v62  ;;  %v9600_v1 = vpop.f32.mrb[8].mxu0 }
 0x237   : > { %v10119_v2 = vpop.eup %10118  ;;  %10130 = vpow2.f32 %v8411_v63  ;;  %v1105_v3 = vmul.f32 %v9600_v1, %v11573_v31  ;;  %v993_v4 = vpop.f32.mrb[9].mxu0 }
 0x238   : > { %v10121_v5 = vpop.eup %10120  ;;  %v1264_v6 = vadd.f32 1.0, %v10119_v2  ;;  %10132 = vpow2.f32 %v8409_v0  ;;  %v1103_v7 = vmul.f32 %v11573_v31, %v993_v4  ;;  %v9601_v8 = vpop.f32.mrb[10].mxu0 }
 0x239   : > { %v10123_v9 = vpop.eup %10122  ;;  %v1262_v10 = vadd.f32 1.0, %v10121_v5  ;;  %v11623_v11 = vadd.f32 %v11578_v33, %v1105_v3  ;;  %v1106_v12 = vmul.f32 %v9601_v8, %v11573_v31  ;;  %v996_v13 = vpop.f32.mrb[11].mxu0 }
 0x23a   : > { %v10125_v14 = vpop.eup %10124  ;;  %10134 = vrcp.f32 %v1264_v6  ;;  %v1265_v15 = vadd.f32 1.0, %v10123_v9  ;;  %v11627_v16 = vadd.f32 %v11578_v33, %v1103_v7  ;;  %v1104_v17 = vmul.f32 %v11573_v31, %v996_v13 }
 0x23b   : > { %10136 = vrcp.f32 %v1262_v10  ;;  %v1263_v18 = vadd.f32 1.0, %v10125_v14  ;;  %v8414_v19 = vmul.f32 -1.442695, %v11623_v11  ;;  %v11632_v20 = vadd.f32 %v11578_v33, %v1106_v12 }
 0x23c   : > { %10138 = vrcp.f32 %v1265_v15  ;;  %v8412_v21 = vmul.f32 -1.442695, %v11627_v16  ;;  %v11636_v22 = vadd.f32 %v11578_v33, %v1104_v17 }
 0x23d   : > { %10140 = vrcp.f32 %v1263_v18  ;;  %v8415_v23 = vmul.f32 -1.442695, %v11632_v20 }
 0x23e   : > { %10142 = vpow2.f32 %v8414_v19  ;;  %v8413_v24 = vmul.f32 -1.442695, %v11636_v22  ;;  %v9604_v25 = vpop.f32.mrb[12].mxu0 }
 0x23f   : > { %v10127_v26 = vpop.eup %10126  ;;  %10144 = vpow2.f32 %v8412_v21  ;;  %v1109_v27 = vmul.f32 %v9604_v25, %v11573_v31  ;;  %v1009_v29 = vpop.f32.mrb[13].mxu0 }
 0x240   : > { %v10129_v30 = vpop.eup %10128  ;;  %v1268_v32 = vadd.f32 1.0, %v10127_v26  ;;  %10146 = vpow2.f32 %v8415_v23  ;;  %v1107_v34 = vmul.f32 %v11573_v31, %v1009_v29  ;;  %v9605_v35 = vpop.f32.mrb[14].mxu0 }
 0x241   : > { %v10131_v36 = vpop.eup %10130  ;;  %v1266_v37 = vadd.f32 1.0, %v10129_v30  ;;  %10148 = vpow2.f32 %v8413_v24  ;;  %v11643_v39 = vadd.f32 %v11578_v33, %v1109_v27  ;;  %v1110_v40 = vmul.f32 %v9605_v35, %v11573_v31  ;;  %v1012_v42 = vpop.f32.mrb[15].mxu0 }
 0x242   : > { %v10133_v43 = vpop.eup %10132  ;;  %10150 = vrcp.f32 %v1268_v32  ;;  %v1269_v45 = vadd.f32 1.0, %v10131_v36  ;;  %v11647_v47 = vadd.f32 %v11578_v33, %v1107_v34  ;;  %v1108_v48 = vmul.f32 %v11573_v31, %v1012_v42 }
 0x243   : > { %10152 = vrcp.f32 %v1266_v37  ;;  %v1267_v49 = vadd.f32 1.0, %v10133_v43  ;;  %v8418_v50 = vmul.f32 -1.442695, %v11643_v39  ;;  %v11652_v51 = vadd.f32 %v11578_v33, %v1110_v40 }
 0x244   : > { %v10135_v52 = vpop.eup %10134  ;;  %10154 = vrcp.f32 %v1269_v45  ;;  %v8416_v53 = vmul.f32 -1.442695, %v11647_v47  ;;  %v11656_v55 = vadd.f32 %v11578_v33, %v1108_v48 }
 0x245   : > { %v10137_v56 = vpop.eup %10136  ;;  %10156 = vrcp.f32 %v1267_v49  ;;  %v8419_v58 = vmul.f32 -1.442695, %v11652_v51  ;;  %v11661_v1 = vmul.f32 %v10135_v52, %v11583_v38 }
 0x246   : > { %v10139_v59 = vpop.eup %10138  ;;  %10158 = vpow2.f32 %v8418_v50  ;;  %v8417_v61 = vmul.f32 -1.442695, %v11656_v55  ;;  %v9608_v63 = vpop.f32.mrb[16].mxu0  ;;  %v11665_v4 = vmul.f32 %v10137_v56, %v11587_v41 }
 0x247   : > { %v10141_v0 = vpop.eup %10140  ;;  %14972 = vst [vmem:[#allocation30_spill] sm:$0xff] %v11661_v1  ;;  %10160 = vpow2.f32 %v8416_v53  ;;  %v1113_v2 = vmul.f32 %v9608_v63, %v11573_v31  ;;  %v1025_v3 = vpop.f32.mrb[17].mxu0  ;;  %v11668_v6 = vmul.f32 %v10139_v59, %v11592_v44 }
 0x248   : > { %14973 = vst [vmem:[#allocation31_spill] sm:$0xff] %v11665_v4  ;;  %v10143_v5 = vpop.eup %10142  ;;  %10162 = vpow2.f32 %v8419_v58  ;;  %v1111_v7 = vmul.f32 %v11573_v31, %v1025_v3  ;;  %v9609_v8 = vpop.f32.mrb[18].mxu0  ;;  %v11672_v9 = vmul.f32 %v10141_v0, %v11596_v46 }
 0x249   : > { %14974 = vst [vmem:[#allocation32_spill] sm:$0xff] %v11668_v6  ;;  %v10145_v38 = vpop.eup %10144  ;;  %v1272_v10 = vadd.f32 1.0, %v10143_v5  ;;  %10164 = vpow2.f32 %v8417_v61  ;;  %v11675_v12 = vadd.f32 %v11578_v33, %v1113_v2  ;;  %v1114_v41 = vmul.f32 %v9609_v8, %v11573_v31  ;;  %v1028_v13 = vpop.f32.mrb[19].mxu0 }
 0x24a   : > { %14975 = vst [vmem:[#allocation33_spill] sm:$0xff] %v11672_v9  ;;  %v10147_v14 = vpop.eup %10146  ;;  %v1270_v15 = vadd.f32 1.0, %v10145_v38  ;;  %v11679_v44 = vadd.f32 %v11578_v33, %v1111_v7  ;;  %v1112_v17 = vmul.f32 %v11573_v31, %v1028_v13  ;;  %v1510_v46 = vpack.c.bf16 %v11672_v9, %v11665_v4 }
 0x24b   : > { %v10149_v18 = vpop.eup %10148  ;;  %10166 = vrcp.f32 %v1272_v10  ;;  %v1273_v19 = vadd.f32 1.0, %v10147_v14  ;;  %v8422_v21 = vmul.f32 -1.442695, %v11675_v12  ;;  %v11686_v23 = vadd.f32 %v11578_v33, %v1114_v41 }
 0x24c   : > { %v10151_v24 = vpop.eup %10150  ;;  %10168 = vrcp.f32 %v1270_v15  ;;  %v1271_v25 = vadd.f32 1.0, %v10149_v18  ;;  %v8420_v26 = vmul.f32 -1.442695, %v11679_v44  ;;  %v11690_v27 = vadd.f32 %v11578_v33, %v1112_v17  ;;  %9638 = vmatprep.mubr.bf16.mxu1 %v1510_v46 }
 0x24d   : > { %v10153_v29 = vpop.eup %10152  ;;  %10170 = vrcp.f32 %v1273_v19  ;;  %v8423_v30 = vmul.f32 -1.442695, %v11686_v23  ;;  %v1511_v32 = vpack.c.bf16 %v11668_v6, %v11661_v1  ;;  %v11697_v40 = vmul.f32 %v10151_v24, %v11603_v54 }
 0x24e   : > { %v10155_v34 = vpop.eup %10154  ;;  %10172 = vrcp.f32 %v1271_v25  ;;  %v8421_v35 = vmul.f32 -1.442695, %v11690_v27  ;;  %v9612_v36 = vpop.f32.mrb[20].mxu0  ;;  %v11700_v42 = vmul.f32 %v10153_v29, %v11607_v57 }
 0x24f   : > { %v10157_v37 = vpop.eup %10156  ;;  %14976 = vst [vmem:[#allocation34_spill] sm:$0xff] %v11697_v40  ;;  %10174 = vpow2.f32 %v8422_v21  ;;  %9639 = vmatmul.mubr.bf16.vlgmr.msra.gmra.mrb[0].mxu1 %v1511_v32  ;;  %v1117_v43 = vmul.f32 %v9612_v36, %v11573_v31  ;;  %v1041_v45 = vpop.f32.mrb[21].mxu0  ;;  %v11704_v49 = vmul.f32 %v10155_v34, %v11612_v60 }
 0x250   : > { %14977 = vst [vmem:[#allocation35_spill] sm:$0xff] %v11700_v42  ;;  %v10159_v48 = vpop.eup %10158  ;;  %v11707_v50 = vmul.f32 %v10157_v37, %v11616_v62  ;;  %10176 = vpow2.f32 %v8420_v26  ;;  %v1115_v52 = vmul.f32 %v11573_v31, %v1041_v45  ;;  %v9613_v54 = vpop.f32.mrb[22].mxu0 }
 0x251   : > { %14978 = vst [vmem:[#allocation36_spill] sm:$0xff] %v11704_v49  ;;  %v10161_v53 = vpop.eup %10160  ;;  %v1276_v56 = vadd.f32 1.0, %v10159_v48  ;;  %10178 = vpow2.f32 %v8423_v30  ;;  %v11711_v57 = vadd.f32 %v11578_v33, %v1117_v43  ;;  %v1118_v58 = vmul.f32 %v9613_v54, %v11573_v31  ;;  %v1044_v59 = vpop.f32.mrb[23].mxu0 }
 0x252   : > { %14979 = vst [vmem:[#allocation37_spill] sm:$0xff] %v11707_v50  ;;  %v10163_v61 = vpop.eup %10162  ;;  %v1274_v63 = vadd.f32 1.0, %v10161_v53  ;;  %10180 = vpow2.f32 %v8421_v35  ;;  %v11715_v60 = vadd.f32 %v11578_v33, %v1115_v52  ;;  %v1116_v62 = vmul.f32 %v11573_v31, %v1044_v59 }
 0x253   : > { %v10165_v0 = vpop.eup %10164  ;;  %10182 = vrcp.f32 %v1276_v56  ;;  %v1277_v2 = vadd.f32 1.0, %v10163_v61  ;;  %v8426_v3 = vmul.f32 -1.442695, %v11711_v57  ;;  %v11720_v5 = vadd.f32 %v11578_v33, %v1118_v58 }
 0x254   : > { %10184 = vrcp.f32 %v1274_v63  ;;  %v1275_v7 = vadd.f32 1.0, %v10165_v0  ;;  %v8424_v8 = vmul.f32 -1.442695, %v11715_v60  ;;  %v11724_v38 = vadd.f32 %v11578_v33, %v1116_v62 }
 0x255   : > { %v10167_v10 = vpop.eup %10166  ;;  %10186 = vrcp.f32 %v1277_v2  ;;  %v8427_v41 = vmul.f32 -1.442695, %v11720_v5  ;;  %v1512_v13 = vpack.c.bf16 %v11707_v50, %v11700_v42  ;;  %v1513_v17 = vpack.c.bf16 %v11704_v49, %v11697_v40  ;;  %v10075_v42 = vld [vmem:[%s14889_s7 + $0x178] sm:$0xff]  }
 0x256   : > { %v10169_v14 = vpop.eup %10168  ;;  %10188 = vrcp.f32 %v1275_v7  ;;  %v8425_v15 = vmul.f32 -1.442695, %v11724_v38  ;;  %v9616_v46 = vpop.f32.mrb[24].mxu0  ;;  %v11752_v52 = vmul.f32 %v10167_v10, %v11623_v11 }
 0x257   : > { %v10171_v18 = vpop.eup %10170  ;;  %10190 = vpow2.f32 %v8426_v3  ;;  %9642 = vmatprep.mubr.bf16.mxu1 %v1512_v13  ;;  %v1121_v19 = vmul.f32 %v9616_v46, %v11573_v31  ;;  %v1057_v21 = vpop.f32.mrb[25].mxu0  ;;  %v11734_v25 = vmul.f32 %v10169_v14, %v11627_v16 }
 0x258   : > { %v10173_v24 = vpop.eup %10172  ;;  %v11737_v26 = vmul.f32 %v10171_v18, %v11632_v20  ;;  %10192 = vpow2.f32 %v8424_v8  ;;  %9643 = vmatmul.mubr.bf16.gmra.mrb[4].mxu1 %v1513_v17  ;;  %v1119_v29 = vmul.f32 %v11573_v31, %v1057_v21  ;;  %v9617_v30 = vpop.f32.mrb[26].mxu0  ;;  %14983 = vst [vmem:[#allocation41_spill] sm:$0xff] %v11752_v52 }
 0x259   : > { %14980 = vst [vmem:[#allocation38_spill] sm:$0xff] %v11734_v25  ;;  %v10175_v32 = vpop.eup %10174  ;;  %v11741_v34 = vmul.f32 %v10173_v24, %v11636_v22  ;;  %10194 = vpow2.f32 %v8427_v41  ;;  %v11744_v35 = vadd.f32 %v11578_v33, %v1121_v19  ;;  %v1122_v36 = vmul.f32 %v9617_v30, %v11573_v31  ;;  %v1060_v16 = vpop.f32.mrb[27].mxu0 }
 0x25a   : > { %14981 = vst [vmem:[#allocation39_spill] sm:$0xff] %v11737_v26  ;;  %v10177_v37 = vpop.eup %10176  ;;  %v1280_v43 = vadd.f32 1.0, %v10175_v32  ;;  %10196 = vpow2.f32 %v8425_v15  ;;  %v11748_v20 = vadd.f32 %v11578_v33, %v1119_v29  ;;  %v1120_v45 = vmul.f32 %v11573_v31, %v1060_v16 }
 0x25b   : > { %14982 = vst [vmem:[#allocation40_spill] sm:$0xff] %v11741_v34  ;;  %v10179_v48 = vpop.eup %10178  ;;  %v1278_v22 = vadd.f32 1.0, %v10177_v37  ;;  %v11755_v54 = vadd.f32 %v11578_v33, %v1122_v36  ;;  %v1514_v53 = vpack.c.bf16 %v11741_v34, %v11734_v25  ;;  %v8430_v59 = vmul.f32 -1.442695, %v11744_v35 }
 0x25c   : > { %v10181_v56 = vpop.eup %10180  ;;  %10198 = vrcp.f32 %v1280_v43  ;;  %v1281_v58 = vadd.f32 1.0, %v10179_v48  ;;  %v11761_v61 = vadd.f32 %v11578_v33, %v1120_v45  ;;  %v8428_v11 = vmul.f32 -1.442695, %v11748_v20 }
 0x25d   : > { %v10183_v63 = vpop.eup %10182  ;;  %10200 = vrcp.f32 %v1278_v22  ;;  %v1279_v62 = vadd.f32 1.0, %v10181_v56  ;;  %9646 = vmatprep.mubr.bf16.mxu1 %v1514_v53  ;;  %v8431_v2 = vmul.f32 -1.442695, %v11755_v54  ;;  %v1515_v3 = vpack.c.bf16 %v11737_v26, %v11752_v52 }
 0x25e   : > { %v10185_v0 = vpop.eup %10184  ;;  %10202 = vrcp.f32 %v1281_v58  ;;  %v9620_v7 = vpop.f32.mrb[28].mxu0  ;;  %v8429_v10 = vmul.f32 -1.442695, %v11761_v61  ;;  %v11770_v15 = vmul.f32 %v10183_v63, %v11643_v39 }
 0x25f   : > { %v10187_v8 = vpop.eup %10186  ;;  %10204 = vrcp.f32 %v1279_v62  ;;  %v1125_v41 = vmul.f32 %v9620_v7, %v11573_v31  ;;  %v1073_v13 = vpop.f32.mrb[29].mxu0  ;;  %v11788_v37 = vmul.f32 %v10185_v0, %v11647_v47 }
 0x260   : > { %v10189_v14 = vpop.eup %10188  ;;  %14984 = vst [vmem:[#allocation42_spill] sm:$0xff] %v11770_v15  ;;  %v11773_v17 = vmul.f32 %v10187_v8, %v11652_v51  ;;  %10206 = vpow2.f32 %v8430_v59  ;;  %9647 = vmatmul.mubr.bf16.gmra.mrb[8].mxu1 %v1515_v3  ;;  %v1123_v46 = vmul.f32 %v11573_v31, %v1073_v13  ;;  %v9621_v18 = vpop.f32.mrb[30].mxu0 }
 0x261   : > { %v10191_v19 = vpop.eup %10190  ;;  %v11777_v21 = vmul.f32 %v10189_v14, %v11656_v55  ;;  %10208 = vpow2.f32 %v8428_v11  ;;  %v11780_v24 = vadd.f32 %v11578_v33, %v1125_v41  ;;  %v1126_v29 = vmul.f32 %v9621_v18, %v11573_v31  ;;  %v1076_v39 = vpop.f32.mrb[31].mxu0  ;;  %14987 = vst [vmem:[#allocation45_spill] sm:$0xff] %v11788_v37 }
 0x262   : > { %14985 = vst [vmem:[#allocation43_spill] sm:$0xff] %v11773_v17  ;;  %v10193_v30 = vpop.eup %10192  ;;  %v1284_v32 = vadd.f32 1.0, %v10191_v19  ;;  %10210 = vpow2.f32 %v8431_v2  ;;  %v11784_v51 = vadd.f32 %v11578_v33, %v1123_v46  ;;  %v1124_v36 = vmul.f32 %v11573_v31, %v1076_v39 }
 0x263   : > { %14986 = vst [vmem:[#allocation44_spill] sm:$0xff] %v11777_v21  ;;  %v10195_v16 = vpop.eup %10194  ;;  %v1282_v55 = vadd.f32 1.0, %v10193_v30  ;;  %10212 = vpow2.f32 %v8429_v10  ;;  %v11791_v43 = vadd.f32 %v11578_v33, %v1126_v29  ;;  %v8434_v22 = vmul.f32 -1.442695, %v11780_v24 }
 0x264   : > { %v10197_v45 = vpop.eup %10196  ;;  %10214 = vrcp.f32 %v1284_v32  ;;  %v1285_v48 = vadd.f32 1.0, %v10195_v16  ;;  %v11795_v53 = vadd.f32 %v11578_v33, %v1124_v36  ;;  %v8432_v31 = vmul.f32 -1.442695, %v11784_v51 }
 0x265   : > { %10216 = vrcp.f32 %v1282_v55  ;;  %v1283_v56 = vadd.f32 1.0, %v10197_v45  ;;  %v1516_v47 = vpack.c.bf16 %v11777_v21, %v11788_v37  ;;  %v8435_v59 = vmul.f32 -1.442695, %v11791_v43 }
 0x266   : > { %v10199_v58 = vpop.eup %10198  ;;  %10218 = vrcp.f32 %v1285_v48  ;;  %v1517_v63 = vpack.c.bf16 %v11773_v17, %v11770_v15  ;;  %v8433_v11 = vmul.f32 -1.442695, %v11795_v53 }
 0x267   : > { %v10201_v62 = vpop.eup %10200  ;;  %10220 = vrcp.f32 %v1283_v56  ;;  %9650 = vmatprep.mubr.bf16.mxu1 %v1516_v47  ;;  %v11805_v0 = vmul.f32 %v10199_v58, %v11675_v12 }
 0x268   : > { %v10203_v33 = vpop.eup %10202  ;;  %v11808_v2 = vmul.f32 %v10201_v62, %v11679_v44  ;;  %10222 = vpow2.f32 %v8434_v22  ;;  %9651 = vmatmul.mubr.bf16.gmra.mrb[12].mxu1 %v1517_v63 }
 0x269   : > { %14988 = vst [vmem:[#allocation46_spill] sm:$0xff] %v11805_v0  ;;  %v10205_v3 = vpop.eup %10204  ;;  %v11811_v7 = vmul.f32 %v10203_v33, %v11686_v23  ;;  %10224 = vpow2.f32 %v8432_v31 }
 0x26a   : > { %14989 = vst [vmem:[#allocation47_spill] sm:$0xff] %v11808_v2  ;;  %v10207_v8 = vpop.eup %10206  ;;  %v11814_v10 = vmul.f32 %v10205_v3, %v11690_v27  ;;  %10226 = vpow2.f32 %v8435_v59 }
 0x26b   : > { %14990 = vst [vmem:[#allocation48_spill] sm:$0xff] %v11811_v7  ;;  %v10209_v41 = vpop.eup %10208  ;;  %v1288_v13 = vadd.f32 1.0, %v10207_v8  ;;  %10228 = vpow2.f32 %v8433_v11  ;;  %v1519_v46 = vpack.c.bf16 %v11811_v7, %v11805_v0 }
 0x26c   : > { %14991 = vst [vmem:[#allocation49_spill] sm:$0xff] %v11814_v10  ;;  %v10211_v12 = vpop.eup %10210  ;;  %v1286_v14 = vadd.f32 1.0, %v10209_v41  ;;  %v1518_v44 = vpack.c.bf16 %v11814_v10, %v11808_v2 }
 0x26d   : > { %v10213_v18 = vpop.eup %10212  ;;  %10230 = vrcp.f32 %v1288_v13  ;;  %v1289_v23 = vadd.f32 1.0, %v10211_v12 }
 0x26e   : > { %v10215_v19 = vpop.eup %10214  ;;  %10232 = vrcp.f32 %v1286_v14  ;;  %v1287_v29 = vadd.f32 1.0, %v10213_v18  ;;  %9654 = vmatprep.mubr.bf16.mxu1 %v1518_v44 }
 0x26f   : > { %v10217_v27 = vpop.eup %10216  ;;  %10234 = vrcp.f32 %v1289_v23  ;;  %v11821_v30 = vmul.f32 %v10215_v19, %v11711_v57 }
 0x270   : > { %v10219_v39 = vpop.eup %10218  ;;  %v11824_v32 = vmul.f32 %v10217_v27, %v11715_v60  ;;  %10236 = vrcp.f32 %v1287_v29  ;;  %9655 = vmatmul.mubr.bf16.gmra.mrb[16].mxu1 %v1519_v46  ;;  %v1403_v29 = vld [vmem:[#allocation2 + $0xc] sm:$0x1] }
 0x271   : > { %14992 = vst [vmem:[#allocation50_spill] sm:$0xff] %v11821_v30  ;;  %v10221_v36 = vpop.eup %10220  ;;  %v11827_v16 = vmul.f32 %v10219_v39, %v11720_v5  ;;  %v1404_v27 = vsel %vm11564_vm4, 0, %v1403_v29  ;;  %v1462_v39 = vld [vmem:[#allocation2 + $0x20] sm:$0x1]  ;;  %v1421_v29 = vld [vmem:[#allocation2 + $0x54] sm:$0x1] }
 0x272   : > { %14993 = vst [vmem:[#allocation51_spill] sm:$0xff] %v11824_v32  ;;  %v10223_v55 = vpop.eup %10222  ;;  %v11830_v45 = vmul.f32 %v10221_v36, %v11724_v38  ;;  %v9980_v36 = vld [vmem:[%s14889_s7 + $0x58] sm:$0xff]   ;;  %1405 = vst [vmem:[#allocation2 + $0xc] sm:$0x1] %v1404_v27 }
 0x273   : > { %14994 = vst [vmem:[#allocation52_spill] sm:$0xff] %v11827_v16  ;;  %v10225_v48 = vpop.eup %10224  ;;  %v1292_v22 = vadd.f32 1.0, %v10223_v55  ;;  %v1521_v60 = vpack.c.bf16 %v11827_v16, %v11821_v30  ;;  %v1463_v55 = vsel %vm11882_vm6, 0, %v1462_v39  ;;  %v1422_v39 = vsel %vm11564_vm4, 0, %v1421_v29 }
 0x274   : > { %14995 = vst [vmem:[#allocation53_spill] sm:$0xff] %v11830_v45  ;;  %v10227_v56 = vpop.eup %10226  ;;  %v1290_v31 = vadd.f32 1.0, %v10225_v48  ;;  %v1520_v57 = vpack.c.bf16 %v11830_v45, %v11824_v32  ;;  %v1459_v48 = vld [vmem:[#allocation2 + $0x14] sm:$0x1]  ;;  %1464 = vst [vmem:[#allocation2 + $0x20] sm:$0x1] %v1463_v55 }
 0x275   : > { %v10229_v47 = vpop.eup %10228  ;;  %10238 = vrcp.f32 %v1292_v22  ;;  %v1293_v58 = vadd.f32 1.0, %v10227_v56  ;;  %v9981_v22 = vld [vmem:[%s14889_s7 + $0x18] sm:$0xff]   ;;  %v1460_v56 = vsel %vm11882_vm6, 0, %v1459_v48  ;;  %1423 = vst [vmem:[#allocation2 + $0x54] sm:$0x1] %v1422_v39 }
 0x276   : > { %10240 = vrcp.f32 %v1290_v31  ;;  %v1291_v5 = vadd.f32 1.0, %v10229_v47  ;;  %9658 = vmatprep.mubr.bf16.mxu1 %v1520_v57  ;;  %1461 = vst [vmem:[#allocation2 + $0x14] sm:$0x1] %v1460_v56  ;;  %v1412_v31 = vld [vmem:[#allocation2 + $0x30] sm:$0x1] }
 0x277   : > { %v10231_v59 = vpop.eup %10230  ;;  %10242 = vrcp.f32 %v1293_v58  ;;  %v1413_v57 = vsel %vm11564_vm4, 0, %v1412_v31  ;;  %v1468_v58 = vld [vmem:[#allocation2 + $0x38] sm:$0x1]  ;;  %v1480_v48 = vld [vmem:[#allocation2 + $0x68] sm:$0x1] }
 0x278   : > { %v10233_v38 = vpop.eup %10232  ;;  %v11837_v63 = vmul.f32 %v10231_v59, %v11744_v35  ;;  %10244 = vrcp.f32 %v1291_v5  ;;  %9659 = vmatmul.mubr.bf16.gmra.mrb[20].mxu1 %v1521_v60  ;;  %v1409_v60 = vld [vmem:[#allocation2 + $0x24] sm:$0x1]  ;;  %1414 = vst [vmem:[#allocation2 + $0x30] sm:$0x1] %v1413_v57  ;;  %v1469_v5 = vsel %vm11882_vm6, 0, %v1468_v58  ;;  %v1481_v56 = vsel %vm11882_vm6, 0, %v1480_v48 }
 0x279   : > { %v10235_v62 = vpop.eup %10234  ;;  %v11840_v11 = vmul.f32 %v10233_v38, %v11748_v20  ;;  %v1410_v47 = vsel %vm11564_vm4, 0, %v1409_v60  ;;  %v1465_v59 = vld [vmem:[#allocation2 + $0x2c] sm:$0x1]  ;;  %v9982_v38 = vld [vmem:[%s14889_s7 + $0x60] sm:$0xff]   ;;  %1470 = vst [vmem:[#allocation2 + $0x38] sm:$0x1] %v1469_v5 }
 0x27a   : > { %14996 = vst [vmem:[#allocation54_spill] sm:$0xff] %v11837_v63  ;;  %v10237_v33 = vpop.eup %10236  ;;  %v11843_v3 = vmul.f32 %v10235_v62, %v11755_v54  ;;  %1411 = vst [vmem:[#allocation2 + $0x24] sm:$0x1] %v1410_v47  ;;  %v1466_v62 = vsel %vm11882_vm6, 0, %v1465_v59  ;;  %v9988_v57 = vld [vmem:[%s14889_s7 + $0xc0] sm:$0xff]   ;;  %v9986_v60 = vld [vmem:[%s14889_s7 + $0x70] sm:$0xff]  }
 0x27b   : > { %14997 = vst [vmem:[#allocation55_spill] sm:$0xff] %v11840_v11  ;;  %v11846_v8 = vmul.f32 %v10237_v33, %v11761_v61  ;;  %1467 = vst [vmem:[#allocation2 + $0x2c] sm:$0x1] %v1466_v62  ;;  %v9983_v33 = vld [vmem:[%s14889_s7 + $0x20] sm:$0xff]   ;;  %v9987_v58 = vld [vmem:[%s14889_s7 + $0x30] sm:$0xff]   ;;  %9800 = vmatprep.subr.bf16.mxu1 %v9988_v57 }
 0x27c   : > { %14998 = vst [vmem:[#allocation56_spill] sm:$0xff] %v11843_v3  ;;  %v1523_v41 = vpack.c.bf16 %v11843_v3, %v11837_v63  ;;  %1482 = vst [vmem:[#allocation2 + $0x68] sm:$0x1] %v1481_v56  ;;  %v9989_v47 = vld [vmem:[%s14889_s7 + $0x80] sm:$0xff]   ;;  %v9994_v56 = vld [vmem:[%s14889_s7 + $0xd0] sm:$0xff]  }
 0x27d   : > { %14999 = vst [vmem:[#allocation57_spill] sm:$0xff] %v11846_v8  ;;  %v1522_v35 = vpack.c.bf16 %v11846_v8, %v11840_v11  ;;  %9808 = vmatpush3.bf16.msra.mxu1 %v9989_v47  ;;  %v2474_v10 = vld [vmem:[#allocation2 + $0xc] sm:$0xf]  ;;  %v2485_v17 = vld [vmem:[#allocation2 + $0x20] sm:$0x1] }
 0x27f   : > { %v10239_v13 = vpop.eup %10238  ;;  %9662 = vmatprep.mubr.bf16.mxu1 %v1522_v35 }
 0x280   : > { %v10241_v12 = vpop.eup %10240  ;;  %v11853_v14 = vmul.f32 %v10239_v13, %v11780_v24  ;;  %9663 = vmatmul.mubr.bf16.gmra.mrb[24].mxu1 %v1523_v41  ;;  %v9976_v24 = vld [vmem:[%s14889_s7 + $0x48] sm:$0xff]   ;;  %v1415_v13 = vld [vmem:[#allocation2 + $0x3c] sm:$0x1] }
 0x281   : > { %v10243_v20 = vpop.eup %10242  ;;  %v11856_v54 = vmul.f32 %v10241_v12, %v11784_v51  ;;  %v9977_v51 = vld [vmem:[%s14889_s7 + $0x8] sm:$0xff]   ;;  %8965 = vmatprep.subr.bf16.mxu0 %v9976_v24  ;;  %v1416_v12 = vsel %vm11564_vm4, 0, %v1415_v13 }
 0x282   : > { %15000 = vst [vmem:[#allocation58_spill] sm:$0xff] %v11853_v14  ;;  %v10245_v44 = vpop.eup %10244  ;;  %v11859_v61 = vmul.f32 %v10243_v20, %v11791_v43  ;;  %8966 = vmatpush3.bf16.msra.mxu0 %v9977_v51  ;;  %v9978_v43 = vld [vmem:[%s14889_s7 + $0x50] sm:$0xff]   ;;  %v1418_v41 = vld [vmem:[#allocation2 + $0x48] sm:$0x1]  ;;  %1417 = vst [vmem:[#allocation2 + $0x3c] sm:$0x1] %v1416_v12 }
 0x283   : > { %15001 = vst [vmem:[#allocation59_spill] sm:$0xff] %v11856_v54  ;;  %v11862_v46 = vmul.f32 %v10245_v44, %v11795_v53  ;;  %v9979_v53 = vld [vmem:[%s14889_s7 + $0x10] sm:$0xff]   ;;  %8967 = vmatprep.subr.bf16.mxu0 %v9978_v43  ;;  %v1419_v35 = vsel %vm11564_vm4, 0, %v1418_v41  ;;  %v1424_v51 = vld [vmem:[#allocation2 + $0x60] sm:$0x1]  ;;  %v9984_v43 = vld [vmem:[%s14889_s7 + $0x68] sm:$0xff]  }
 0x284   : > { %15002 = vst [vmem:[#allocation60_spill] sm:$0xff] %v11859_v61  ;;  %v1525_v18 = vpack.c.bf16 %v11859_v61, %v11853_v14  ;;  %1420 = vst [vmem:[#allocation2 + $0x48] sm:$0x1] %v1419_v35  ;;  %v1474_v20 = vld [vmem:[#allocation2 + $0x50] sm:$0x1]  ;;  %v9993_v13 = vld [vmem:[%s14889_s7 + $0x88] sm:$0xff]  }
 0x285   : > { %15003 = vst [vmem:[#allocation61_spill] sm:$0xff] %v11862_v46  ;;  %v1524_v23 = vpack.c.bf16 %v11862_v46, %v11856_v54  ;;  %v1475_v44 = vsel %vm11882_vm6, 0, %v1474_v20  ;;  %v9990_v12 = vld [vmem:[%s14889_s7 + $0x78] sm:$0xff]  }
 0x286   : > { %8968 = vmatpush3.bf16.msra.mxu0 %v9979_v53  ;;  %1476 = vst [vmem:[#allocation2 + $0x50] sm:$0x1] %v1475_v44  ;;  %v1425_v53 = vsel %vm11564_vm4, 0, %v1424_v51 }
 0x287   : > { %9666 = vmatprep.mubr.bf16.mxu1 %v1524_v23  ;;  %8969 = vmatprep.subr.bf16.mxu0 %v9980_v36  ;;  %v11092_v23 = vmov 0   ;;  %1426 = vst [vmem:[#allocation2 + $0x60] sm:$0x1] %v1425_v53  ;;  %v9985_v36 = vld [vmem:[%s14889_s7 + $0x28] sm:$0xff]  }
 0x288   : > { %9667 = vmatmul.mubr.bf16.gmra.mrb[28].mxu1 %v1525_v18  ;;  %v1471_v18 = vld [vmem:[#allocation2 + $0x44] sm:$0x1]  ;;  %1390 = vst [vmem:[#allocation2] sm:$0xf] %v11092_v23  ;;  %1391 = vst [vmem:[#allocation2 + $0x4] sm:$0xf] %v11092_v23 }
 0x289   : > { %1392 = vst [vmem:[#allocation2 + $0x8] sm:$0x1] %v11092_v23  ;;  %1394 = vst [vmem:[#allocation2 + $0xcc] sm:$0xf] %v11092_v23  ;;  %v1472_v24 = vsel %vm11882_vm6, 0, %v1471_v18 }
 0x28a   : > { %8970 = vmatpush3.bf16.msra.mxu0 %v9981_v22  ;;  %1395 = vst [vmem:[#allocation2 + $0xd0] sm:$0xf] %v11092_v23  ;;  %1396 = vst [vmem:[#allocation2 + $0xd4] sm:$0x1] %v11092_v23 }
 0x28b   : > { %8971 = vmatprep.subr.bf16.mxu0 %v9982_v38  ;;  %1473 = vst [vmem:[#allocation2 + $0x44] sm:$0x1] %v1472_v24  ;;  %v9991_v38 = vld [vmem:[%s14889_s7 + $0xc8] sm:$0xff]   ;;  %v9992_v24 = vld [vmem:[%s14889_s7 + $0x38] sm:$0xff]  }
 0x28c   : > { %9801 = vmatprep.subr.bf16.mxu1 %v9991_v38 }
 0x28d   : > { %9809 = vmatpush3.bf16.msra.mxu1 %v9993_v13 }
 0x28e   : > { %8972 = vmatpush3.bf16.msra.mxu0 %v9983_v33  ;;  %9802 = vmatprep.subr.bf16.mxu1 %v9994_v56 }
 0x28f   : > { %v1400_v27 = vld [vmem:[#allocation2] sm:$0x1]  ;;  %8973 = vmatprep.subr.bf16.mxu0 %v9984_v43  ;;  %v2587_v59 = vld [vmem:[#allocation2 + $0x4] sm:$0xf] }
 0x290   : > { %v1401_v55 = vsel %vm11564_vm4, 0, %v1400_v27  ;;  %v1456_v22 = vld [vmem:[#allocation2 + $0x8] sm:$0x1]  ;;  %v2647_v41 = vshll.u32 %v2587_v59, 16  ;;  %v2651_v35 = vshrl.u32 %v2587_v59, 16 }
 0x291   : > { %1402 = vst [vmem:[#allocation2] sm:$0x1] %v1401_v55  ;;  %v1457_v31 = vsel %vm11882_vm6, 0, %v1456_v22  ;;  %v1477_v27 = vld [vmem:[#allocation2 + $0x5c] sm:$0x1] }
 0x292   : > { %8974 = vmatpush3.bf16.msra.mxu0 %v9985_v36  ;;  %1458 = vst [vmem:[#allocation2 + $0x8] sm:$0x1] %v1457_v31  ;;  %v2649_v18 = vrot.slane %v2647_v41, 5  ;;  %v2653_v23 = vrot.slane %v2651_v35, 4  ;;  %v1478_v39 = vsel %vm11882_vm6, 0, %v1477_v27  ;;  %v9999_v27 = vld [vmem:[%s14889_s7 + $0xe0] sm:$0xff]  }
 0x293   : > { %8975 = vmatprep.subr.bf16.mxu0 %v9986_v60  ;;  %1479 = vst [vmem:[#allocation2 + $0x5c] sm:$0x1] %v1478_v39  ;;  %v1427_v35 = vld [vmem:[#allocation2 + $0x6c] sm:$0x1]  ;;  %v10000_v39 = vld [vmem:[%s14889_s7 + $0xa0] sm:$0xff]  }
 0x294   : > { %v2654_v53 = vor.u32 %v2653_v23, %v2649_v18 }
 0x296   : > { %8976 = vmatpush3.bf16.msra.mxu0 %v9987_v58  ;;  %v2655_v48 = vrot.slane %v2654_v53, 4  ;;  %v1489_v53 = vld [vmem:[#allocation2 + $0x8c] sm:$0x1] }
 0x297   : > { %8977 = vmatprep.subr.bf16.mxu0 %v9990_v12  ;;  %v1428_v12 = vsel %vm11564_vm4, 0, %v1427_v35 }
 0x298   : > { %v2586_v5 = vld [vmem:[#allocation2] sm:$0xf]  ;;  %1429 = vst [vmem:[#allocation2 + $0x6c] sm:$0x1] %v1428_v12  ;;  %v12019_v12 = vld [vmem:[#allocation5] ss:$0 sm:$0xff] }
 0x299   : > { %v2638_v62 = vshrl.u32 %v2586_v5, 16  ;;  %v2641_v33 = vshll.u32 %v2586_v5, 16  ;;  %v2618_v51 = vld [vmem:[#allocation2 + $0x8] sm:$0x1] }
 0x29a   : > { %v2657_v29 = vshll.u32 %v2618_v51, 16  ;;  %8978 = vmatpush3.bf16.msra.mxu0 %v9992_v24  ;;  %v1433_v24 = vld [vmem:[#allocation2 + $0x84] sm:$0x1]  ;;  %v1492_v51 = vld [vmem:[#allocation2 + $0x98] sm:$0x1] }
 0x29b   : > { %v2640_v20 = vrot.slane %v2638_v62, 4  ;;  %v2643_v44 = vrot.slane %v2641_v33, 5  ;;  %9075 = vmatprep.subr.bf16.mxu0 %v9988_v57  ;;  %v9995_v57 = vld [vmem:[%s14889_s7 + $0x90] sm:$0xff]   ;;  %v8558_v62 = vcombine.low %v2586_v5, %v2587_v59  ;;  %v1430_v33 = vld [vmem:[#allocation2 + $0x78] sm:$0x1] }
 0x29c   : > { %v2659_v22 = vrot.slane %v2657_v29, 5  ;;  %9810 = vmatpush3.bf16.msra.mxu1 %v9995_v57  ;;  %v1431_v41 = vsel %vm11564_vm4, 0, %v1430_v33  ;;  %v1483_v5 = vld [vmem:[#allocation2 + $0x74] sm:$0x1]  ;;  %v1490_v29 = vsel %vm11882_vm6, 0, %v1489_v53 }
 0x29d   : > { %v2644_v43 = vor.u32 %v2643_v44, %v2640_v20  ;;  %1432 = vst [vmem:[#allocation2 + $0x78] sm:$0x1] %v1431_v41  ;;  %v1486_v20 = vld [vmem:[#allocation2 + $0x80] sm:$0x1]  ;;  %v1484_v59 = vsel %vm11882_vm6, 0, %v1483_v5 }
 0x29e   : > { %v2660_v60 = vsel %vm11962_vm9, %v2655_v48, %v2659_v22  ;;  %v1487_v44 = vsel %vm11882_vm6, 0, %v1486_v20  ;;  %1485 = vst [vmem:[#allocation2 + $0x74] sm:$0x1] %v1484_v59  ;;  %1491 = vst [vmem:[#allocation2 + $0x8c] sm:$0x1] %v1490_v29 }
 0x29f   : > { %v2645_v36 = vrot.slane %v2644_v43, 4  ;;  %1488 = vst [vmem:[#allocation2 + $0x80] sm:$0x1] %v1487_v44  ;;  %v1493_v43 = vsel %vm11882_vm6, 0, %v1492_v51  ;;  %v1439_v22 = vld [vmem:[#allocation2 + $0x9c] sm:$0x1] }
 0x2a0   : > { %1494 = vst [vmem:[#allocation2 + $0x98] sm:$0x1] %v1493_v43  ;;  %v12017_v41 = vld [vmem:[%s14887_s5] ss:$0 sm:$0xff] }
 0x2a1   : > { %v2650_v31 = vsel %vm11962_vm9, %v2645_v36, %v2649_v18  ;;  %v9997_v18 = vld [vmem:[%s14889_s7 + $0xd8] sm:$0xff]   ;;  %v1442_v36 = vld [vmem:[#allocation2 + $0xa8] sm:$0x1] }
 0x2a2   : > { %v8574_v58 = vcombine.low %v2650_v31, %v2660_v60  ;;  %9803 = vmatprep.subr.bf16.mxu1 %v9997_v18  ;;  %v1443_v48 = vsel %vm11564_vm4, 0, %v1442_v36  ;;  %v1498_v31 = vld [vmem:[#allocation2 + $0xb0] sm:$0x1] }
 0x2a3   : > { %1444 = vst [vmem:[#allocation2 + $0xa8] sm:$0x1] %v1443_v48  ;;  %v1499_v60 = vsel %vm11882_vm6, 0, %v1498_v31 }
 0x2a4   : > { %5649 = vmatprep.mubr.bf16.mxu0 %v8574_v58  ;;  %1500 = vst [vmem:[#allocation2 + $0xb0] sm:$0x1] %v1499_v60  ;;  %v1501_v60 = vld [vmem:[#allocation2 + $0xbc] sm:$0x1] }
 0x2a5   : > { %5650 = vmatmul.mubr.bf16.vlgmr.msra.gmra.mrb[32].mxu0 %v8558_v62  ;;  %v1448_v62 = vld [vmem:[#allocation2 + $0xc0] sm:$0x1] }
 0x2a6   : > { %9076 = vmatpush3.bf16.msra.mxu0 %v9989_v47  ;;  %v1436_v47 = vld [vmem:[#allocation2 + $0x90] sm:$0x1]  ;;  %v1449_v33 = vsel %vm11564_vm4, 0, %v1448_v62 }
 0x2a7   : > { %9077 = vmatprep.subr.bf16.mxu0 %v9991_v38  ;;  %v9998_v38 = vld [vmem:[%s14889_s7 + $0x98] sm:$0xff]   ;;  %v1437_v23 = vsel %vm11564_vm4, 0, %v1436_v47  ;;  %1450 = vst [vmem:[#allocation2 + $0xc0] sm:$0x1] %v1449_v33 }
 0x2a8   : > { %1438 = vst [vmem:[#allocation2 + $0x90] sm:$0x1] %v1437_v23  ;;  %9811 = vmatpush3.bf16.msra.mxu1 %v9998_v38 }
 0x2a9   : > { %9804 = vmatprep.subr.bf16.mxu1 %v9999_v27 }
 0x2aa   : > { %9078 = vmatpush3.bf16.msra.mxu0 %v9993_v13  ;;  %v1434_v13 = vsel %vm11564_vm4, 0, %v1433_v24  ;;  %v1445_v24 = vld [vmem:[#allocation2 + $0xb4] sm:$0x1] }
 0x2ab   : > { %9079 = vmatprep.subr.bf16.mxu0 %v9994_v56  ;;  %1435 = vst [vmem:[#allocation2 + $0x84] sm:$0x1] %v1434_v13  ;;  %v1440_v56 = vsel %vm11564_vm4, 0, %v1439_v22  ;;  %v1446_v43 = vsel %vm11564_vm4, 0, %v1445_v24  ;;  %v10003_v22 = vld [vmem:[%s14889_s7 + $0xa8] sm:$0xff]  }
 0x2ac   : > { %9812 = vmatpush3.bf16.msra.mxu1 %v10000_v39  ;;  %1441 = vst [vmem:[#allocation2 + $0x9c] sm:$0x1] %v1440_v56  ;;  %1447 = vst [vmem:[#allocation2 + $0xb4] sm:$0x1] %v1446_v43 }
 0x2ae   : > { %9080 = vmatpush3.bf16.msra.mxu0 %v9995_v57  ;;  %v1495_v57 = vld [vmem:[#allocation2 + $0xa4] sm:$0x1] }
 0x2af   : > { %9081 = vmatprep.subr.bf16.mxu0 %v9997_v18  ;;  %v1496_v58 = vsel %vm11882_vm6, 0, %v1495_v57  ;;  %v10001_v18 = vld [vmem:[%s14889_s7 + $0xe8] sm:$0xff]  }
 0x2b0   : > { %1497 = vst [vmem:[#allocation2 + $0xa4] sm:$0x1] %v1496_v58  ;;  %9805 = vmatprep.subr.bf16.mxu1 %v10001_v18  ;;  %v1502_v58 = vsel %vm11882_vm6, 0, %v1501_v60 }
 0x2b1   : > { %9813 = vmatpush3.bf16.msra.mxu1 %v10003_v22  ;;  %1503 = vst [vmem:[#allocation2 + $0xbc] sm:$0x1] %v1502_v58 }
 0x2b2   : > { %9082 = vmatpush3.bf16.msra.mxu0 %v9998_v38 }
 0x2b3   : > { %9083 = vmatprep.subr.bf16.mxu0 %v9999_v27  ;;  %v1504_v27 = vld [vmem:[#allocation2 + $0xc8] sm:$0x1] }
 0x2b4   : > { %v1505_v48 = vsel %vm11882_vm6, 0, %v1504_v27  ;;  %v10005_v27 = vld [vmem:[%s14889_s7 + $0xb0] sm:$0xff]  }
 0x2b5   : > { %1506 = vst [vmem:[#allocation2 + $0xc8] sm:$0x1] %v1505_v48 }
 0x2b6   : > { %9084 = vmatpush3.bf16.msra.mxu0 %v10000_v39 }
 0x2b7   : > { %9085 = vmatprep.subr.bf16.mxu0 %v10001_v18 }
 0x2ba   : > { %9086 = vmatpush3.bf16.msra.mxu0 %v10003_v22 }
 0x322   : > { %v9640_v35 = vpop.f32.mrb[0].mxu1 }
 0x323   : > { %v1760_v20 = vmul.f32 %v9640_v35, %v12017_v41  ;;  %v1624_v44 = vpop.f32.mrb[1].mxu1 }
 0x324   : > { %v1758_v5 = vmul.f32 %v12017_v41, %v1624_v44  ;;  %v9641_v59 = vpop.f32.mrb[2].mxu1 }
 0x325   : > { %v12027_v47 = vadd.f32 %v12019_v12, %v1760_v20  ;;  %v1761_v38 = vmul.f32 %v9641_v59, %v12017_v41  ;;  %v1627_v23 = vpop.f32.mrb[3].mxu1 }
 0x326   : > { %v12031_v13 = vadd.f32 %v12019_v12, %v1758_v5  ;;  %v1759_v51 = vmul.f32 %v12017_v41, %v1627_v23 }
 0x327   : > { %v8448_v53 = vmul.f32 -1.442695, %v12027_v47  ;;  %v12038_v29 = vadd.f32 %v12019_v12, %v1761_v38 }
 0x328   : > { %v8446_v39 = vmul.f32 -1.442695, %v12031_v13  ;;  %v12042_v36 = vadd.f32 %v12019_v12, %v1759_v51  ;;  %v10004_v51 = vld [vmem:[%s14889_s7 + $0xf0] sm:$0xff]  }
 0x329   : > { %10246 = vpow2.f32 %v8448_v53  ;;  %v8449_v56 = vmul.f32 -1.442695, %v12038_v29  ;;  %9806 = vmatprep.subr.bf16.mxu1 %v10004_v51  ;;  %9087 = vmatprep.subr.bf16.mxu0 %v10004_v51 }
 0x32a   : > { %10248 = vpow2.f32 %v8446_v39  ;;  %v8447_v31 = vmul.f32 -1.442695, %v12042_v36  ;;  %9814 = vmatpush3.bf16.msra.mxu1 %v10005_v27  ;;  %9088 = vmatpush3.bf16.msra.mxu0 %v10005_v27  ;;  %v10009_v27 = vld [vmem:[%s14889_s7 + $0xb8] sm:$0xff]  }
 0x32b   : > { %10250 = vpow2.f32 %v8449_v56  ;;  %v9644_v57 = vpop.f32.mrb[4].mxu1 }
 0x32c   : > { %10252 = vpow2.f32 %v8447_v31  ;;  %v1764_v62 = vmul.f32 %v9644_v57, %v12017_v41  ;;  %v1640_v33 = vpop.f32.mrb[5].mxu1 }
 0x32d   : > { %v1762_v35 = vmul.f32 %v12017_v41, %v1640_v33  ;;  %v9645_v20 = vpop.f32.mrb[6].mxu1 }
 0x32e   : > { %v12056_v44 = vadd.f32 %v12019_v12, %v1764_v62  ;;  %v1765_v5 = vmul.f32 %v9645_v20, %v12017_v41  ;;  %v1643_v59 = vpop.f32.mrb[7].mxu1  ;;  %v10007_v62 = vld [vmem:[%s14889_s7 + $0xf8] sm:$0xff]  }
 0x32f   : > { %v12060_v18 = vadd.f32 %v12019_v12, %v1762_v35  ;;  %v1763_v38 = vmul.f32 %v12017_v41, %v1643_v59  ;;  %9807 = vmatprep.subr.bf16.mxu1 %v10007_v62  ;;  %9089 = vmatprep.subr.bf16.mxu0 %v10007_v62 }
 0x330   : > { %v8452_v23 = vmul.f32 -1.442695, %v12056_v44  ;;  %v12065_v24 = vadd.f32 %v12019_v12, %v1765_v5  ;;  %9815 = vmatpush3.bf16.msra.mxu1 %v10009_v27  ;;  %9090 = vmatpush3.bf16.msra.mxu0 %v10009_v27 }
 0x331   : > { %v8450_v43 = vmul.f32 -1.442695, %v12060_v18  ;;  %v12072_v53 = vadd.f32 %v12019_v12, %v1763_v38 }
 0x332   : > { %10254 = vpow2.f32 %v8452_v23  ;;  %v8453_v39 = vmul.f32 -1.442695, %v12065_v24 }
 0x333   : > { %v10247_v48 = vpop.eup %10246  ;;  %10256 = vpow2.f32 %v8450_v43  ;;  %v8451_v22 = vmul.f32 -1.442695, %v12072_v53  ;;  %v9648_v56 = vpop.f32.mrb[8].mxu1 }
 0x334   : > { %v10249_v31 = vpop.eup %10248  ;;  %v1927_v60 = vadd.f32 1.0, %v10247_v48  ;;  %10258 = vpow2.f32 %v8453_v39  ;;  %v1768_v57 = vmul.f32 %v9648_v56, %v12017_v41  ;;  %v1656_v58 = vpop.f32.mrb[9].mxu1 }
 0x335   : > { %v10251_v33 = vpop.eup %10250  ;;  %v1925_v35 = vadd.f32 1.0, %v10249_v31  ;;  %10260 = vpow2.f32 %v8451_v22  ;;  %v1766_v20 = vmul.f32 %v12017_v41, %v1656_v58  ;;  %v9649_v5 = vpop.f32.mrb[10].mxu1 }
 0x336   : > { %v10253_v59 = vpop.eup %10252  ;;  %10262 = vrcp.f32 %v1927_v60  ;;  %v1928_v38 = vadd.f32 1.0, %v10251_v33  ;;  %v12085_v23 = vadd.f32 %v12019_v12, %v1768_v57  ;;  %v1769_v51 = vmul.f32 %v9649_v5, %v12017_v41  ;;  %v1659_v43 = vpop.f32.mrb[11].mxu1 }
 0x337   : > { %10264 = vrcp.f32 %v1925_v35  ;;  %v1926_v39 = vadd.f32 1.0, %v10253_v59  ;;  %v12092_v48 = vadd.f32 %v12019_v12, %v1766_v20  ;;  %v1767_v22 = vmul.f32 %v12017_v41, %v1659_v43 }
 0x338   : > { %10266 = vrcp.f32 %v1928_v38  ;;  %v8456_v56 = vmul.f32 -1.442695, %v12085_v23  ;;  %v12097_v31 = vadd.f32 %v12019_v12, %v1769_v51 }
 0x339   : > { %10268 = vrcp.f32 %v1926_v39  ;;  %v8454_v60 = vmul.f32 -1.442695, %v12092_v48  ;;  %v12101_v57 = vadd.f32 %v12019_v12, %v1767_v22 }
 0x33a   : > { %10270 = vpow2.f32 %v8456_v56  ;;  %v8457_v58 = vmul.f32 -1.442695, %v12097_v31 }
 0x33b   : > { %10272 = vpow2.f32 %v8454_v60  ;;  %v8455_v62 = vmul.f32 -1.442695, %v12101_v57  ;;  %v9652_v33 = vpop.f32.mrb[12].mxu1 }
 0x33c   : > { %v10255_v35 = vpop.eup %10254  ;;  %10274 = vpow2.f32 %v8457_v58  ;;  %v1772_v20 = vmul.f32 %v9652_v33, %v12017_v41  ;;  %v1672_v5 = vpop.f32.mrb[13].mxu1 }
 0x33d   : > { %v10257_v59 = vpop.eup %10256  ;;  %v1931_v38 = vadd.f32 1.0, %v10255_v35  ;;  %v1770_v51 = vmul.f32 %v12017_v41, %v1672_v5  ;;  %v9653_v43 = vpop.f32.mrb[14].mxu1  ;;  %10276 = vpow2.f32 %v8455_v62 }
 0x33e   : > { %v10259_v27 = vpop.eup %10258  ;;  %v1929_v39 = vadd.f32 1.0, %v10257_v59  ;;  %v12108_v22 = vadd.f32 %v12019_v12, %v1772_v20  ;;  %v1773_v56 = vmul.f32 %v9653_v43, %v12017_v41  ;;  %v1675_v60 = vpop.f32.mrb[15].mxu1 }
 0x33f   : > { %v10261_v46 = vpop.eup %10260  ;;  %10278 = vrcp.f32 %v1931_v38  ;;  %v1932_v58 = vadd.f32 1.0, %v10259_v27  ;;  %v12112_v33 = vadd.f32 %v12019_v12, %v1770_v51  ;;  %v1771_v35 = vmul.f32 %v12017_v41, %v1675_v60 }
 0x340   : > { %v10263_v54 = vpop.eup %10262  ;;  %10280 = vrcp.f32 %v1929_v39  ;;  %v1930_v5 = vadd.f32 1.0, %v10261_v46  ;;  %v8460_v59 = vmul.f32 -1.442695, %v12108_v22  ;;  %v12117_v62 = vadd.f32 %v12019_v12, %v1773_v56 }
 0x341   : > { %v10265_v20 = vpop.eup %10264  ;;  %v2023_v43 = vmul.f32 %v10263_v54, %v12027_v47  ;;  %10282 = vrcp.f32 %v1932_v58  ;;  %v8458_v38 = vmul.f32 -1.442695, %v12112_v33  ;;  %v12122_v27 = vadd.f32 %v12019_v12, %v1771_v35 }
 0x342   : > { %v10267_v51 = vpop.eup %10266  ;;  %v2021_v60 = vmul.f32 %v10265_v20, %v12031_v13  ;;  %10284 = vrcp.f32 %v1930_v5  ;;  %v12126_v46 = vmul.f32 -1.442695, %v12117_v62 }
 0x343   : > { %v10269_v39 = vpop.eup %10268  ;;  %v8892_v56 = vpack.c.bf16 %v2023_v43, %v2023_v43  ;;  %v2024_v61 = vmul.f32 %v10267_v51, %v12038_v29  ;;  %10286 = vpow2.f32 %v8460_v59  ;;  %v12130_v54 = vmul.f32 -1.442695, %v12122_v27  ;;  %v9656_v47 = vpop.f32.mrb[16].mxu1 }
 0x344   : > { %v10271_v58 = vpop.eup %10270  ;;  %v8890_v35 = vpack.c.bf16 %v2021_v60, %v2021_v60  ;;  %v2022_v14 = vmul.f32 %v10269_v39, %v12042_v36  ;;  %10288 = vpow2.f32 %v8458_v38  ;;  %v12134_v13 = vmul.f32 %v9656_v47, %v12017_v41  ;;  %v12136_v5 = vpop.f32.mrb[17].mxu1 }
 0x345   : > { %v10273_v20 = vpop.eup %10272  ;;  %v2169_v8 = vshrl.u32 %v8892_v56, 16  ;;  %v2172_v43 = vshll.u32 %v8892_v56, 16  ;;  %v8893_v11 = vpack.c.bf16 %v2024_v61, %v2024_v61  ;;  %v1935_v29 = vadd.f32 1.0, %v10271_v58  ;;  %v12138_v59 = vpop.f32.mrb[18].mxu1  ;;  %v2481_v61 = vld [vmem:[#allocation2 + $0x18] sm:$0xf] }
 0x346   : > { %v10275_v51 = vpop.eup %10274  ;;  %v2152_v3 = vshrl.u32 %v8890_v35, 16  ;;  %v2155_v63 = vshll.u32 %v8890_v35, 16  ;;  %v8891_v45 = vpack.c.bf16 %v2022_v14, %v2022_v14  ;;  %v1933_v60 = vadd.f32 1.0, %v10273_v20  ;;  %v12140_v32 = vpop.f32.mrb[19].mxu1 }
 0x347   : > { %v2171_v36 = vrot.slane %v2169_v8, 7  ;;  %v2177_v38 = vshrl.u32 %v8893_v11, 16  ;;  %v2180_v39 = vshll.u32 %v8893_v11, 16  ;;  %10290 = vrcp.f32 %v1935_v29  ;;  %v10277_v47 = vpop.eup %10276 }
 0x348   : > { %v2154_v58 = vrot.slane %v2152_v3, 7  ;;  %v2160_v16 = vshrl.u32 %v8891_v45, 16  ;;  %v2163_v30 = vshll.u32 %v8891_v45, 16  ;;  %10292 = vrcp.f32 %v1933_v60 }
 0x349   : > { %v10279_v14 = vpop.eup %10278  ;;  %v2174_v35 = vor.u32 %v2172_v43, %v2171_v36  ;;  %v2175_v20 = vrot.slane %v2171_v36, 4  ;;  %v2179_v8 = vrot.slane %v2177_v38, 7  ;;  %v1936_v2 = vadd.f32 1.0, %v10275_v51  ;;  %v2478_v51 = vld [vmem:[#allocation2 + $0x14] sm:$0x1] }
 0x34a   : > { %v10281_v11 = vpop.eup %10280  ;;  %v2157_v29 = vor.u32 %v2155_v63, %v2154_v58  ;;  %v2158_v7 = vrot.slane %v2154_v58, 4  ;;  %v2162_v3 = vrot.slane %v2160_v16, 7  ;;  %v2027_v45 = vmul.f32 %v10279_v14, %v12056_v44 }
 0x34b   : > { %v10283_v60 = vpop.eup %10282  ;;  %v2482_v43 = vsel %vm12144_vm12, %v2174_v35, %v2481_v61  ;;  %v2182_v36 = vor.u32 %v2180_v39, %v2179_v8  ;;  %v2184_v38 = vrot.slane %v2179_v8, 4  ;;  %v2025_v63 = vmul.f32 %v10281_v11, %v12060_v18  ;;  %v12158_v58 = vpop.f32.mrb[20].mxu1 }
 0x34c   : > { %v10285_v15 = vpop.eup %10284  ;;  %2483 = vst [vmem:[#allocation2 + $0x18] sm:$0xf] %v2482_v43  ;;  %v2475_v21 = vsel %vm12144_vm12, %v2157_v29, %v2474_v10  ;;  %v2165_v37 = vor.u32 %v2163_v30, %v2162_v3  ;;  %v2167_v16 = vrot.slane %v2162_v3, 4  ;;  %v8896_v26 = vpack.c.bf16 %v2027_v45, %v2027_v45  ;;  %v12162_v44 = vpop.f32.mrb[21].mxu1 }
 0x34d   : > { %v10287_v14 = vpop.eup %10286  ;;  %2476 = vst [vmem:[#allocation2 + $0xc] sm:$0xf] %v2475_v21  ;;  %v2183_v39 = vsel %vm12150_vm13, %v2175_v20, %v2182_v36  ;;  %v2486_v18 = vsel %vm11564_vm4, %v2184_v38, %v2485_v17  ;;  %v8894_v61 = vpack.c.bf16 %v2025_v63, %v2025_v63  ;;  %v2028_v35 = vmul.f32 %v10283_v60, %v12065_v24  ;;  %v12169_v8 = vpop.f32.mrb[22].mxu1 }
 0x34e   : > { %v10289_v11 = vpop.eup %10288  ;;  %2484 = vst [vmem:[#allocation2 + $0x1c] sm:$0xf] %v2183_v39  ;;  %2487 = vst [vmem:[#allocation2 + $0x20] sm:$0x1] %v2486_v18  ;;  %v2166_v10 = vsel %vm12150_vm13, %v2158_v7, %v2165_v37  ;;  %v2479_v21 = vsel %vm11564_vm4, %v2167_v16, %v2478_v51  ;;  %v2203_v30 = vshrl.u32 %v8896_v26, 16  ;;  %v2206_v29 = vshll.u32 %v8896_v26, 16 }
 0x34f   : > { %v12175_v20 = vpop.f32.mrb[23].mxu1  ;;  %2477 = vst [vmem:[#allocation2 + $0x10] sm:$0xf] %v2166_v10  ;;  %2480 = vst [vmem:[#allocation2 + $0x14] sm:$0x1] %v2479_v21  ;;  %v2186_v17 = vshrl.u32 %v8894_v61, 16  ;;  %v8897_v24 = vpack.c.bf16 %v2028_v35, %v2028_v35  ;;  %v2026_v45 = vmul.f32 %v10285_v15, %v12072_v53  ;;  %10294 = vrcp.f32 %v1936_v2 }
 0x350   : > { %v2189_v3 = vshll.u32 %v8894_v61, 16  ;;  %v2205_v60 = vrot.slane %v2203_v30, 7  ;;  %v1934_v43 = vadd.f32 1.0, %v10277_v47  ;;  %v1939_v36 = vadd.f32 1.0, %v10287_v14  ;;  %v2495_v37 = vld [vmem:[#allocation2 + $0x30] sm:$0xf] }
 0x351   : > { %v10291_v38 = vpop.eup %10290  ;;  %v2188_v7 = vrot.slane %v2186_v17, 7  ;;  %v2211_v63 = vshrl.u32 %v8897_v24, 16  ;;  %v2214_v51 = vshll.u32 %v8897_v24, 16  ;;  %v8895_v16 = vpack.c.bf16 %v2026_v45, %v2026_v45  ;;  %v2488_v10 = vld [vmem:[#allocation2 + $0x24] sm:$0xf] }
 0x352   : > { %v10293_v26 = vpop.eup %10292  ;;  %v2208_v39 = vor.u32 %v2206_v29, %v2205_v60  ;;  %v2209_v18 = vrot.slane %v2205_v60, 4  ;;  %v2031_v21 = vmul.f32 %v10291_v38, %v12085_v23  ;;  %10296 = vrcp.f32 %v1934_v43  ;;  %v2499_v14 = vld [vmem:[#allocation2 + $0x38] sm:$0x1]  ;;  %v2492_v38 = vld [vmem:[#allocation2 + $0x2c] sm:$0x1] }
 0x353   : > { %v2191_v61 = vor.u32 %v2189_v3, %v2188_v7  ;;  %v2192_v35 = vrot.slane %v2188_v7, 4  ;;  %v2213_v15 = vrot.slane %v2211_v63, 7  ;;  %v2194_v53 = vshrl.u32 %v8895_v16, 16  ;;  %v12179_v2 = vpop.f32.mrb[24].mxu1 }
 0x354   : > { %v2496_v47 = vsel %vm12144_vm12, %v2208_v39, %v2495_v37  ;;  %v2197_v30 = vshll.u32 %v8895_v16, 16  ;;  %v8900_v17 = vpack.c.bf16 %v2031_v21, %v2031_v21  ;;  %v2029_v24 = vmul.f32 %v10293_v26, %v12092_v48  ;;  %v12184_v29 = vpop.f32.mrb[25].mxu1 }
 0x355   : > { %2497 = vst [vmem:[#allocation2 + $0x30] sm:$0xf] %v2496_v47  ;;  %v2489_v23 = vsel %vm12144_vm12, %v2191_v61, %v2488_v10  ;;  %v2216_v3 = vor.u32 %v2214_v51, %v2213_v15  ;;  %v2218_v45 = vrot.slane %v2213_v15, 4  ;;  %v2196_v60 = vrot.slane %v2194_v53, 7  ;;  %v12188_v43 = vpop.f32.mrb[26].mxu1 }
 0x356   : > { %2490 = vst [vmem:[#allocation2 + $0x24] sm:$0xf] %v2489_v23  ;;  %v2237_v7 = vshrl.u32 %v8900_v17, 16  ;;  %v2240_v37 = vshll.u32 %v8900_v17, 16  ;;  %v8898_v63 = vpack.c.bf16 %v2029_v24, %v2029_v24  ;;  %10298 = vrcp.f32 %v1939_v36  ;;  %v12190_v16 = vpop.f32.mrb[27].mxu1 }
 0x357   : > { %v2217_v48 = vsel %vm12150_vm13, %v2209_v18, %v2216_v3  ;;  %v2500_v26 = vsel %vm11564_vm4, %v2218_v45, %v2499_v14  ;;  %v2199_v39 = vor.u32 %v2197_v30, %v2196_v60  ;;  %v2201_v51 = vrot.slane %v2196_v60, 4  ;;  %v2509_v47 = vld [vmem:[#allocation2 + $0x48] sm:$0xf]  ;;  %v10634_v52 = vld [vmem:[#allocation2 + $0x14] sm:$0x1] }
 0x358   : > { %2498 = vst [vmem:[#allocation2 + $0x34] sm:$0xf] %v2217_v48  ;;  %2501 = vst [vmem:[#allocation2 + $0x38] sm:$0x1] %v2500_v26  ;;  %v12196_v10 = vrot.slane %v2237_v7, 7  ;;  %v2220_v21 = vshrl.u32 %v8898_v63, 16  ;;  %10300 = vpow2.f32 %v12126_v46  ;;  %v12205_v18 = vadd.f32 %v12019_v12, %v12134_v13 }
 0x359   : > { %v2223_v61 = vshll.u32 %v8898_v63, 16  ;;  %v1937_v15 = vadd.f32 1.0, %v10289_v11  ;;  %v2200_v36 = vsel %vm12150_vm13, %v2192_v35, %v2199_v39  ;;  %v2493_v53 = vsel %vm11564_vm4, %v2201_v51, %v2492_v38  ;;  %v10295_v14 = vpop.eup %10294  ;;  %v2502_v35 = vld [vmem:[#allocation2 + $0x3c] sm:$0xf] }
 0x35a   : > { %2491 = vst [vmem:[#allocation2 + $0x28] sm:$0xf] %v2200_v36  ;;  %2494 = vst [vmem:[#allocation2 + $0x2c] sm:$0x1] %v2493_v53  ;;  %v2242_v30 = vor.u32 %v2240_v37, %v12196_v10  ;;  %v2243_v11 = vrot.slane %v12196_v10, 4  ;;  %v12209_v17 = vrot.slane %v2220_v21, 7  ;;  %v2032_v24 = vmul.f32 %v10295_v14, %v12097_v31 }
 0x35b   : > { %10302 = vrcp.f32 %v1937_v15  ;;  %v8464_v46 = vmul.f32 -1.442695, %v12205_v18  ;;  %v1774_v13 = vmul.f32 %v12017_v41, %v12136_v5  ;;  %v12216_v23 = vpop.f32.mrb[28].mxu1  ;;  %v1777_v31 = vmul.f32 %v12138_v59, %v12017_v41 }
 0x35c   : > { %10304 = vpow2.f32 %v12130_v54  ;;  %v10297_v3 = vpop.eup %10296  ;;  %v2510_v45 = vsel %vm12144_vm12, %v2242_v30, %v2509_v47  ;;  %v2225_v60 = vor.u32 %v2223_v61, %v12209_v17  ;;  %v2226_v38 = vrot.slane %v12209_v17, 4  ;;  %v12224_v7 = vpop.f32.mrb[29].mxu1 }
 0x35d   : > { %2511 = vst [vmem:[#allocation2 + $0x48] sm:$0xf] %v2510_v45  ;;  %v8901_v54 = vpack.c.bf16 %v2032_v24, %v2032_v24  ;;  %v2030_v37 = vmul.f32 %v10297_v3, %v12101_v57  ;;  %10306 = vpow2.f32 %v8464_v46  ;;  %v12228_v5 = vadd.f32 %v12019_v12, %v1774_v13  ;;  %v12230_v63 = vpop.f32.mrb[30].mxu1 }
 0x35e   : > { %v2503_v48 = vsel %vm12144_vm12, %v2225_v60, %v2502_v35  ;;  %v12235_v26 = vadd.f32 %v12019_v12, %v1777_v31  ;;  %v1775_v59 = vmul.f32 %v12017_v41, %v12140_v32  ;;  %v1780_v39 = vmul.f32 %v12158_v58, %v12017_v41  ;;  %v12241_v51 = vpop.f32.mrb[31].mxu1  ;;  %v2513_v35 = vld [vmem:[#allocation2 + $0x50] sm:$0x1] }
 0x35f   : > { %2504 = vst [vmem:[#allocation2 + $0x3c] sm:$0xf] %v2503_v48  ;;  %v2245_v57 = vshrl.u32 %v8901_v54, 16  ;;  %v2248_v10 = vshll.u32 %v8901_v54, 16  ;;  %v8899_v21 = vpack.c.bf16 %v2030_v37, %v2030_v37  ;;  %v8462_v61 = vmul.f32 -1.442695, %v12228_v5 }
 0x360   : > { %v10299_v15 = vpop.eup %10298  ;;  %v8465_v36 = vmul.f32 -1.442695, %v12235_v26  ;;  %v12246_v53 = vadd.f32 %v12019_v12, %v1775_v59  ;;  %v12249_v47 = vadd.f32 %v12019_v12, %v1780_v39  ;;  %v1778_v32 = vmul.f32 %v12017_v41, %v12162_v44  ;;  %v2506_v37 = vld [vmem:[#allocation2 + $0x44] sm:$0x1]  ;;  %v10640_v9 = vld [vmem:[#allocation2 + $0x38] sm:$0x1] }
 0x361   : > { %v2247_v58 = vrot.slane %v2245_v57, 7  ;;  %v2228_v14 = vshrl.u32 %v8899_v21, 16  ;;  %v2231_v30 = vshll.u32 %v8899_v21, 16  ;;  %v2035_v17 = vmul.f32 %v10299_v15, %v12108_v22  ;;  %v10637_v49 = vld [vmem:[#allocation2 + $0x28] sm:$0xf] }
 0x362   : > { %10308 = vpow2.f32 %v8462_v61  ;;  %v8463_v24 = vmul.f32 -1.442695, %v12246_v53  ;;  %v8468_v46 = vmul.f32 -1.442695, %v12249_v47  ;;  %v12257_v13 = vadd.f32 %v12019_v12, %v1778_v32  ;;  %v10301_v3 = vpop.eup %10300  ;;  %v10638_v50 = vld [vmem:[#allocation2 + $0x2c] sm:$0x1] }
 0x363   : > { %v2250_v45 = vor.u32 %v2248_v10, %v2247_v58  ;;  %v2252_v60 = vrot.slane %v2247_v58, 4  ;;  %v2230_v31 = vrot.slane %v2228_v14, 7  ;;  %v8904_v54 = vpack.c.bf16 %v2035_v17, %v2035_v17 }
 0x364   : > { %v1940_v48 = vadd.f32 1.0, %v10301_v3  ;;  %10310 = vpow2.f32 %v8465_v36  ;;  %v8466_v22 = vmul.f32 -1.442695, %v12257_v13  ;;  %v1781_v59 = vmul.f32 %v12169_v8, %v12017_v41  ;;  %v2523_v3 = vld [vmem:[#allocation2 + $0x60] sm:$0xf] }
 0x365   : > { %v10303_v44 = vpop.eup %10302  ;;  %v2251_v57 = vsel %vm12150_vm13, %v2243_v11, %v2250_v45  ;;  %v2514_v21 = vsel %vm11564_vm4, %v2252_v60, %v2513_v35  ;;  %v2233_v10 = vor.u32 %v2231_v30, %v2230_v31  ;;  %v2235_v61 = vrot.slane %v2230_v31, 4 }
 0x366   : > { %v10305_v39 = vpop.eup %10304  ;;  %2512 = vst [vmem:[#allocation2 + $0x4c] sm:$0xf] %v2251_v57  ;;  %2515 = vst [vmem:[#allocation2 + $0x50] sm:$0x1] %v2514_v21  ;;  %v2271_v15 = vshrl.u32 %v8904_v54, 16  ;;  %v2274_v32 = vshll.u32 %v8904_v54, 16  ;;  %v2033_v36 = vmul.f32 %v10303_v44, %v12112_v33  ;;  %10312 = vrcp.f32 %v1940_v48 }
 0x367   : > { %v10307_v58 = vpop.eup %10306  ;;  %v2234_v8 = vsel %vm12150_vm13, %v2226_v38, %v2233_v10  ;;  %v2507_v14 = vsel %vm11564_vm4, %v2235_v61, %v2506_v37  ;;  %v1938_v11 = vadd.f32 1.0, %v10305_v39  ;;  %10314 = vpow2.f32 %v8463_v24  ;;  %v2516_v39 = vld [vmem:[#allocation2 + $0x54] sm:$0xf] }
 0x368   : > { %2505 = vst [vmem:[#allocation2 + $0x40] sm:$0xf] %v2234_v8  ;;  %2508 = vst [vmem:[#allocation2 + $0x44] sm:$0x1] %v2507_v14  ;;  %v12271_v30 = vrot.slane %v2271_v15, 7  ;;  %v8902_v17 = vpack.c.bf16 %v2033_v36, %v2033_v36  ;;  %v1943_v35 = vadd.f32 1.0, %v10307_v58  ;;  %10316 = vpow2.f32 %v8468_v46 }
 0x369   : > { %10318 = vrcp.f32 %v1938_v11  ;;  %v12274_v33 = vadd.f32 %v12019_v12, %v1781_v59  ;;  %v1779_v38 = vmul.f32 %v12017_v41, %v12175_v20  ;;  %v1784_v45 = vmul.f32 %v12179_v2, %v12017_v41 }
 0x36a   : > { %v2276_v24 = vor.u32 %v2274_v32, %v12271_v30  ;;  %v2254_v60 = vshrl.u32 %v8902_v17, 16  ;;  %v2257_v31 = vshll.u32 %v8902_v17, 16  ;;  %10320 = vrcp.f32 %v1943_v35 }
 0x36b   : > { %v8469_v54 = vmul.f32 -1.442695, %v12274_v33  ;;  %v12283_v46 = vadd.f32 %v12019_v12, %v1779_v38  ;;  %v12286_v44 = vadd.f32 %v12019_v12, %v1784_v45  ;;  %10322 = vpow2.f32 %v8466_v22 }
 0x36c   : > { %v10309_v37 = vpop.eup %10308  ;;  %v2524_v20 = vsel %vm12144_vm12, %v2276_v24, %v2523_v3  ;;  %v12290_v48 = vrot.slane %v2254_v60, 7  ;;  %v1782_v2 = vmul.f32 %v12017_v41, %v12184_v29  ;;  %v2277_v59 = vrot.slane %v12271_v30, 4 }
 0x36d   : > { %2525 = vst [vmem:[#allocation2 + $0x60] sm:$0xf] %v2524_v20  ;;  %v1941_v57 = vadd.f32 1.0, %v10309_v37  ;;  %10324 = vpow2.f32 %v8469_v54  ;;  %v8467_v21 = vmul.f32 -1.442695, %v12283_v46  ;;  %v1785_v22 = vmul.f32 %v12188_v43, %v12017_v41  ;;  %v10024_v43 = vld [vmem:[%s14889_s7 + $0x1c0] sm:$0xff]  }
 0x36e   : > { %v10311_v10 = vpop.eup %10310  ;;  %v2259_v61 = vor.u32 %v2257_v31, %v12290_v48  ;;  %v8472_v15 = vmul.f32 -1.442695, %v12286_v44  ;;  %v12299_v32 = vadd.f32 %v12019_v12, %v1782_v2  ;;  %v1783_v36 = vmul.f32 %v12017_v41, %v12190_v16  ;;  %9299 = vmatprep.subr.bf16.mxu1 %v10024_v43 }
 0x36f   : > { %10326 = vrcp.f32 %v1941_v57  ;;  %v1944_v29 = vadd.f32 1.0, %v10311_v10  ;;  %v1788_v58 = vmul.f32 %v12216_v23, %v12017_v41  ;;  %v12311_v17 = vadd.f32 %v12019_v12, %v1785_v22 }
 0x370   : > { %v10313_v8 = vpop.eup %10312  ;;  %v2517_v14 = vsel %vm12144_vm12, %v2259_v61, %v2516_v39  ;;  %10328 = vpow2.f32 %v8467_v21  ;;  %v8470_v11 = vmul.f32 -1.442695, %v12299_v32  ;;  %v12318_v23 = vadd.f32 %v12019_v12, %v1783_v36 }
 0x371   : > { %v10315_v35 = vpop.eup %10314  ;;  %2518 = vst [vmem:[#allocation2 + $0x54] sm:$0xf] %v2517_v14  ;;  %v2036_v16 = vmul.f32 %v10313_v8, %v12117_v62  ;;  %10330 = vrcp.f32 %v1944_v29  ;;  %v12321_v3 = vadd.f32 %v12019_v12, %v1788_v58  ;;  %v8473_v24 = vmul.f32 -1.442695, %v12311_v17  ;;  %v2527_v8 = vld [vmem:[#allocation2 + $0x68] sm:$0x1] }
 0x372   : > { %v10317_v38 = vpop.eup %10316  ;;  %v1942_v45 = vadd.f32 1.0, %v10315_v35  ;;  %10332 = vpow2.f32 %v8472_v15  ;;  %v1786_v60 = vmul.f32 %v12017_v41, %v12224_v7  ;;  %v8471_v62 = vmul.f32 -1.442695, %v12318_v23 }
 0x373   : > { %v10319_v31 = vpop.eup %10318  ;;  %v8905_v54 = vpack.c.bf16 %v2036_v16, %v2036_v16  ;;  %v1947_v37 = vadd.f32 1.0, %v10317_v38  ;;  %10334 = vpow2.f32 %v8470_v11  ;;  %v2260_v20 = vrot.slane %v12290_v48, 4 }
 0x374   : > { %v2034_v2 = vmul.f32 %v10319_v31, %v12122_v27  ;;  %10336 = vrcp.f32 %v1942_v45  ;;  %v12330_v39 = vadd.f32 %v12019_v12, %v1786_v60  ;;  %v10321_v57 = vpop.eup %10320  ;;  %v12333_v7 = vmul.f32 -1.442695, %v12321_v3 }
 0x375   : > { %v2279_v21 = vshrl.u32 %v8905_v54, 16  ;;  %10338 = vrcp.f32 %v1947_v37  ;;  %v1789_v10 = vmul.f32 %v12230_v63, %v12017_v41  ;;  %v10323_v61 = vpop.eup %10322  ;;  %v2282_v15 = vshll.u32 %v8905_v54, 16 }
 0x376   : > { %v8903_v22 = vpack.c.bf16 %v2034_v2, %v2034_v2  ;;  %v2039_v48 = vmul.f32 %v10321_v57, %v12205_v18  ;;  %10340 = vpow2.f32 %v8473_v24  ;;  %v1945_v36 = vadd.f32 1.0, %v10323_v61  ;;  %v2520_v2 = vld [vmem:[#allocation2 + $0x5c] sm:$0x1] }
 0x377   : > { %v10325_v27 = vpop.eup %10324  ;;  %v2281_v29 = vrot.slane %v2279_v21, 7  ;;  %10342 = vpow2.f32 %v8471_v62  ;;  %v12339_v58 = vmul.f32 -1.442695, %v12330_v39  ;;  %v12342_v35 = vadd.f32 %v12019_v12, %v1789_v10 }
 0x378   : > { %v2262_v14 = vshrl.u32 %v8903_v22, 16  ;;  %v8908_v11 = vpack.c.bf16 %v2039_v48, %v2039_v48  ;;  %v1948_v43 = vadd.f32 1.0, %v10325_v27  ;;  %v2265_v45 = vshll.u32 %v8903_v22, 16  ;;  %v2537_v48 = vld [vmem:[#allocation2 + $0x78] sm:$0xf] }
 0x379   : > { %v10327_v63 = vpop.eup %10326  ;;  %v2284_v16 = vor.u32 %v2282_v15, %v2281_v29  ;;  %v2286_v38 = vrot.slane %v2281_v29, 4  ;;  %10344 = vrcp.f32 %v1945_v36  ;;  %v3111_v40 = vrot.slane %v10637_v49, 5  ;;  %v3632_v49 = vld [vmem:[#allocation2 + $0xc] sm:$0xe] }
 0x37a   : > { %v10329_v18 = vpop.eup %10328  ;;  %v2264_v24 = vrot.slane %v2262_v14, 7  ;;  %v2305_v60 = vshrl.u32 %v8908_v11, 16  ;;  %v2308_v31 = vshll.u32 %v8908_v11, 16  ;;  %v2037_v54 = vmul.f32 %v10327_v63, %v12228_v5 }
 0x37b   : > { %v10331_v37 = vpop.eup %10330  ;;  %v2285_v62 = vsel %vm12150_vm13, %v2277_v59, %v2284_v16  ;;  %v2528_v12 = vsel %vm11564_vm4, %v2286_v38, %v2527_v8  ;;  %10346 = vrcp.f32 %v1948_v43  ;;  %v1946_v57 = vadd.f32 1.0, %v10329_v18 }
 0x37c   : > { %v10333_v21 = vpop.eup %10332  ;;  %2526 = vst [vmem:[#allocation2 + $0x64] sm:$0xf] %v2285_v62  ;;  %2529 = vst [vmem:[#allocation2 + $0x68] sm:$0x1] %v2528_v12  ;;  %v2267_v10 = vor.u32 %v2265_v45, %v2264_v24  ;;  %v2269_v61 = vrot.slane %v2264_v24, 4  ;;  %v2307_v15 = vrot.slane %v2305_v60, 7  ;;  %v8906_v22 = vpack.c.bf16 %v2037_v54, %v2037_v54 }
 0x37d   : > { %v10335_v5 = vpop.eup %10334  ;;  %v2040_v30 = vmul.f32 %v10331_v37, %v12235_v26  ;;  %10348 = vrcp.f32 %v1946_v57  ;;  %v1951_v27 = vadd.f32 1.0, %v10333_v21  ;;  %v12354_v59 = vmul.f32 %v12017_v41, %v12241_v51  ;;  %v2530_v37 = vld [vmem:[#allocation2 + $0x6c] sm:$0xf] }
 0x37e   : > { %v10337_v29 = vpop.eup %10336  ;;  %v2268_v36 = vsel %vm12150_vm13, %v2260_v20, %v2267_v10  ;;  %v2521_v8 = vsel %vm11564_vm4, %v2269_v61, %v2520_v2  ;;  %v2310_v14 = vor.u32 %v2308_v31, %v2307_v15  ;;  %v2311_v11 = vrot.slane %v2307_v15, 4  ;;  %v2541_v15 = vld [vmem:[#allocation2 + $0x80] sm:$0x1] }
 0x37f   : > { %v10339_v43 = vpop.eup %10338  ;;  %2519 = vst [vmem:[#allocation2 + $0x58] sm:$0xf] %v2268_v36  ;;  %2522 = vst [vmem:[#allocation2 + $0x5c] sm:$0x1] %v2521_v8  ;;  %v2288_v63 = vshrl.u32 %v8906_v22, 16  ;;  %v2291_v26 = vshll.u32 %v8906_v22, 16  ;;  %v8909_v16 = vpack.c.bf16 %v2040_v30, %v2040_v30  ;;  %v2038_v38 = vmul.f32 %v10337_v29, %v12246_v53 }
 0x380   : > { %v10341_v45 = vpop.eup %10340  ;;  %v2538_v41 = vsel %vm12144_vm12, %v2310_v14, %v2537_v48  ;;  %v2043_v51 = vmul.f32 %v10339_v43, %v12249_v47  ;;  %10350 = vrcp.f32 %v1951_v27  ;;  %v1949_v20 = vadd.f32 1.0, %v10335_v5  ;;  %v2534_v14 = vld [vmem:[#allocation2 + $0x74] sm:$0x1] }
 0x381   : > { %v10343_v18 = vpop.eup %10342  ;;  %2539 = vst [vmem:[#allocation2 + $0x78] sm:$0xf] %v2538_v41  ;;  %v2290_v24 = vrot.slane %v2288_v63, 7  ;;  %v2313_v60 = vshrl.u32 %v8909_v16, 16  ;;  %v2316_v31 = vshll.u32 %v8909_v16, 16  ;;  %v8907_v54 = vpack.c.bf16 %v2038_v38, %v2038_v38 }
 0x382   : > { %v8912_v62 = vpack.c.bf16 %v2043_v51, %v2043_v51  ;;  %10352 = vrcp.f32 %v1949_v20  ;;  %v1952_v12 = vadd.f32 1.0, %v10341_v45  ;;  %v1950_v2 = vadd.f32 1.0, %v10343_v18  ;;  %v2551_v51 = vld [vmem:[#allocation2 + $0x90] sm:$0xf] }
 0x383   : > { %v10345_v53 = vpop.eup %10344  ;;  %v2293_v57 = vor.u32 %v2291_v26, %v2290_v24  ;;  %v2294_v21 = vrot.slane %v2290_v24, 4  ;;  %v2315_v10 = vrot.slane %v2313_v60, 7  ;;  %v2296_v61 = vshrl.u32 %v8907_v54, 16 }
 0x384   : > { %v2299_v47 = vshll.u32 %v8907_v54, 16  ;;  %v2339_v22 = vshrl.u32 %v8912_v62, 16  ;;  %v2342_v5 = vshll.u32 %v8912_v62, 16  ;;  %v2041_v48 = vmul.f32 %v10345_v53, %v12257_v13  ;;  %v10630_v53 = vld [vmem:[#allocation5] ss:$0 sm:$0xff] }
 0x385   : > { %v10347_v30 = vpop.eup %10346  ;;  %v2531_v27 = vsel %vm12144_vm12, %v2293_v57, %v2530_v37  ;;  %v2318_v29 = vor.u32 %v2316_v31, %v2315_v10  ;;  %v2320_v36 = vrot.slane %v2315_v10, 4  ;;  %v2298_v8 = vrot.slane %v2296_v61, 7 }
 0x386   : > { %2532 = vst [vmem:[#allocation2 + $0x6c] sm:$0xf] %v2531_v27  ;;  %v2341_v43 = vrot.slane %v2339_v22, 7  ;;  %v8910_v63 = vpack.c.bf16 %v2041_v48, %v2041_v48  ;;  %v2044_v26 = vmul.f32 %v10347_v30, %v12274_v33  ;;  %10354 = vrcp.f32 %v1952_v12 }
 0x387   : > { %v10349_v16 = vpop.eup %10348  ;;  %v2319_v38 = vsel %vm12150_vm13, %v2311_v11, %v2318_v29  ;;  %v2542_v13 = vsel %vm11564_vm4, %v2320_v36, %v2541_v15  ;;  %v2301_v45 = vor.u32 %v2299_v47, %v2298_v8  ;;  %v2303_v41 = vrot.slane %v2298_v8, 4  ;;  %v2555_v8 = vld [vmem:[#allocation2 + $0x98] sm:$0x1] }
 0x388   : > { %2540 = vst [vmem:[#allocation2 + $0x7c] sm:$0xf] %v2319_v38  ;;  %2543 = vst [vmem:[#allocation2 + $0x80] sm:$0x1] %v2542_v13  ;;  %v2344_v20 = vor.u32 %v2342_v5, %v2341_v43  ;;  %v2322_v18 = vshrl.u32 %v8910_v63, 16  ;;  %v2325_v24 = vshll.u32 %v8910_v63, 16  ;;  %v8913_v11 = vpack.c.bf16 %v2044_v26, %v2044_v26 }
 0x389   : > { %v8477_v60 = vmul.f32 -1.442695, %v12342_v35  ;;  %v2302_v33 = vsel %vm12150_vm13, %v2294_v21, %v2301_v45  ;;  %v2535_v31 = vsel %vm11564_vm4, %v2303_v41, %v2534_v14  ;;  %v2042_v54 = vmul.f32 %v10349_v16, %v12283_v46  ;;  %v2544_v21 = vld [vmem:[#allocation2 + $0x84] sm:$0xf]  ;;  %v12384_v46 = vld [vmem:[#allocation2 + $0xc] sm:$0xf] }
 0x38a   : > { %v10351_v37 = vpop.eup %10350  ;;  %2533 = vst [vmem:[#allocation2 + $0x70] sm:$0xf] %v2302_v33  ;;  %2536 = vst [vmem:[#allocation2 + $0x74] sm:$0x1] %v2535_v31  ;;  %v2552_v62 = vsel %vm12144_vm12, %v2344_v20, %v2551_v51  ;;  %v2324_v12 = vrot.slane %v2322_v18, 7  ;;  %10356 = vrcp.f32 %v1950_v2  ;;  %v12381_v57 = vadd.f32 %v10630_v53, %v12354_v59 }
 0x38b   : > { %v2345_v10 = vrot.slane %v2341_v43, 4  ;;  %2553 = vst [vmem:[#allocation2 + $0x90] sm:$0xf] %v2552_v62  ;;  %v2347_v61 = vshrl.u32 %v8913_v11, 16  ;;  %v8911_v15 = vpack.c.bf16 %v2042_v54, %v2042_v54  ;;  %v2047_v47 = vmul.f32 %v10351_v37, %v12286_v44  ;;  %v2548_v13 = vld [vmem:[#allocation2 + $0x8c] sm:$0x1] }
 0x38c   : > { %v10353_v22 = vpop.eup %10352  ;;  %v2327_v5 = vor.u32 %v2325_v24, %v2324_v12  ;;  %v2350_v48 = vshll.u32 %v8913_v11, 16  ;;  %10358 = vpow2.f32 %v12333_v7  ;;  %v8475_v2 = vmul.f32 -1.442695, %v12381_v57  ;;  %v12398_v31 = vld [vmem:[#allocation2 + $0x10] sm:$0xf] }
 0x38d   : > { %v2349_v30 = vrot.slane %v2347_v61, 7  ;;  %v2330_v27 = vshrl.u32 %v8911_v15, 16  ;;  %v2333_v59 = vshll.u32 %v8911_v15, 16  ;;  %v8916_v29 = vpack.c.bf16 %v2047_v47, %v2047_v47  ;;  %v2565_v37 = vld [vmem:[#allocation2 + $0xa8] sm:$0xf] }
 0x38e   : > { %v2545_v36 = vsel %vm12144_vm12, %v2327_v5, %v2544_v21  ;;  %v2045_v14 = vmul.f32 %v10353_v22, %v12299_v32  ;;  %10360 = vpow2.f32 %v12339_v58  ;;  %v2662_v44 = vshrl.u32 %v12384_v46, 16  ;;  %v2558_v61 = vld [vmem:[#allocation2 + $0x9c] sm:$0xf] }
 0x38f   : > { %2546 = vst [vmem:[#allocation2 + $0x84] sm:$0xf] %v2545_v36  ;;  %v2352_v43 = vor.u32 %v2350_v48, %v2349_v30  ;;  %v2354_v63 = vrot.slane %v2349_v30, 4  ;;  %v2332_v7 = vrot.slane %v2330_v27, 7  ;;  %v2373_v26 = vshrl.u32 %v8916_v29, 16 }
 0x390   : > { %v10355_v16 = vpop.eup %10354  ;;  %v2328_v38 = vrot.slane %v2324_v12, 4  ;;  %v2376_v45 = vshll.u32 %v8916_v29, 16  ;;  %v8914_v41 = vpack.c.bf16 %v2045_v14, %v2045_v14  ;;  %10362 = vpow2.f32 %v8477_v60 }
 0x391   : > { %v2353_v51 = vsel %vm12150_vm13, %v2345_v10, %v2352_v43  ;;  %v2556_v32 = vsel %vm11564_vm4, %v2354_v63, %v2555_v8  ;;  %v2335_v58 = vor.u32 %v2333_v59, %v2332_v7  ;;  %v2337_v20 = vrot.slane %v2332_v7, 4  ;;  %v2619_v63 = vld [vmem:[#allocation2 + $0x14] sm:$0x1] }
 0x392   : > { %2554 = vst [vmem:[#allocation2 + $0x94] sm:$0xf] %v2353_v51  ;;  %2557 = vst [vmem:[#allocation2 + $0x98] sm:$0x1] %v2556_v32  ;;  %v2375_v18 = vrot.slane %v2373_v26, 7  ;;  %v2356_v24 = vshrl.u32 %v8914_v41, 16  ;;  %v2048_v33 = vmul.f32 %v10355_v16, %v12311_v17  ;;  %10364 = vpow2.f32 %v8475_v2 }
 0x393   : > { %v2664_v11 = vrot.slane %v2662_v44, 4  ;;  %v2336_v60 = vsel %vm12150_vm13, %v2328_v38, %v2335_v58  ;;  %v2549_v54 = vsel %vm11564_vm4, %v2337_v20, %v2548_v13  ;;  %v2665_v62 = vshll.u32 %v12384_v46, 16  ;;  %v2569_v16 = vld [vmem:[#allocation2 + $0xb0] sm:$0x1] }
 0x394   : > { %v10357_v12 = vpop.eup %10356  ;;  %2547 = vst [vmem:[#allocation2 + $0x88] sm:$0xf] %v2336_v60  ;;  %2550 = vst [vmem:[#allocation2 + $0x8c] sm:$0x1] %v2549_v54  ;;  %v2378_v53 = vor.u32 %v2376_v45, %v2375_v18  ;;  %v2358_v10 = vrot.slane %v2356_v24, 7  ;;  %v2359_v21 = vshll.u32 %v8914_v41, 16  ;;  %v8917_v17 = vpack.c.bf16 %v2048_v33, %v2048_v33 }
 0x395   : > { %v2046_v15 = vmul.f32 %v10357_v12, %v12318_v23  ;;  %v2667_v47 = vrot.slane %v2665_v62, 5  ;;  %v2671_v22 = vshll.u32 %v12398_v31, 16  ;;  %v2675_v5 = vshrl.u32 %v12398_v31, 16  ;;  %v2562_v62 = vld [vmem:[#allocation2 + $0xa4] sm:$0x1] }
 0x396   : > { %v10359_v48 = vpop.eup %10358  ;;  %v2379_v30 = vrot.slane %v2375_v18, 4  ;;  %v2566_v2 = vsel %vm12144_vm12, %v2378_v53, %v2565_v37  ;;  %v2361_v27 = vor.u32 %v2359_v21, %v2358_v10  ;;  %v2381_v59 = vshrl.u32 %v8917_v17, 16  ;;  %v12418_v53 = vld [vmem:[#allocation2 + $0x1c] sm:$0xf] }
 0x397   : > { %2567 = vst [vmem:[#allocation2 + $0xa8] sm:$0xf] %v2566_v2  ;;  %v2384_v29 = vshll.u32 %v8917_v17, 16  ;;  %v8915_v36 = vpack.c.bf16 %v2046_v15, %v2046_v15  ;;  %v1955_v8 = vadd.f32 1.0, %v10359_v48  ;;  %v2668_v14 = vor.u32 %v2667_v47, %v2664_v11  ;;  %v12412_v11 = vld [vmem:[#allocation2 + $0x18] sm:$0xf] }
 0x398   : > { %v10361_v44 = vpop.eup %10360  ;;  %v2559_v23 = vsel %vm12144_vm12, %v2361_v27, %v2558_v61  ;;  %v2383_v43 = vrot.slane %v2381_v59, 7  ;;  %v2673_v7 = vrot.slane %v2671_v22, 5  ;;  %v2677_v26 = vrot.slane %v2675_v5, 4  ;;  %v2620_v22 = vld [vmem:[#allocation2 + $0x20] sm:$0x1] }
 0x399   : > { %2560 = vst [vmem:[#allocation2 + $0x9c] sm:$0xf] %v2559_v23  ;;  %v2364_v38 = vshrl.u32 %v8915_v36, 16  ;;  %v2367_v13 = vshll.u32 %v8915_v36, 16  ;;  %10366 = vrcp.f32 %v1955_v8  ;;  %v1953_v45 = vadd.f32 1.0, %v10361_v44 }
 0x39a   : > { %v10363_v41 = vpop.eup %10362  ;;  %v2386_v51 = vor.u32 %v2384_v29, %v2383_v43  ;;  %v2388_v32 = vrot.slane %v2383_v43, 4  ;;  %v2669_v58 = vrot.slane %v2668_v14, 4  ;;  %v2678_v20 = vor.u32 %v2677_v26, %v2673_v7  ;;  %v12431_v29 = vld [vmem:[#allocation2 + $0x4c] sm:$0xf]  ;;  %v12433_v44 = vld [vmem:[#allocation2 + $0x24] sm:$0xf] }
 0x39b   : > { %v2366_v18 = vrot.slane %v2364_v38, 7  ;;  %10368 = vrcp.f32 %v1953_v45  ;;  %v1956_v24 = vadd.f32 1.0, %v10363_v41  ;;  %v2681_v33 = vshll.u32 %v2619_v63, 16  ;;  %v12438_v26 = vld [vmem:[#allocation2 + $0x48] sm:$0xf] }
 0x39c   : > { %v2362_v60 = vrot.slane %v2358_v10, 4  ;;  %v2387_v54 = vsel %vm12150_vm13, %v2379_v30, %v2386_v51  ;;  %v2570_v37 = vsel %vm11564_vm4, %v2388_v32, %v2569_v16  ;;  %v2679_v12 = vrot.slane %v2678_v20, 4  ;;  %v10365_v21 = vpop.eup %10364 }
 0x39d   : > { %2568 = vst [vmem:[#allocation2 + $0xac] sm:$0xf] %v2387_v54  ;;  %2571 = vst [vmem:[#allocation2 + $0xb0] sm:$0x1] %v2570_v37  ;;  %v2369_v17 = vor.u32 %v2367_v13, %v2366_v18  ;;  %v2371_v61 = vrot.slane %v2366_v18, 4  ;;  %10370 = vrcp.f32 %v1956_v24  ;;  %v2683_v15 = vrot.slane %v2681_v33, 5 }
 0x39e   : > { %v1954_v47 = vadd.f32 1.0, %v10365_v21  ;;  %v2674_v10 = vsel %vm11962_vm9, %v2669_v58, %v2673_v7  ;;  %v2686_v5 = vshrl.u32 %v12412_v11, 16  ;;  %v2689_v48 = vshll.u32 %v12412_v11, 16  ;;  %v12442_v13 = vld [vmem:[#allocation2 + $0x28] sm:$0xf] }
 0x39f   : > { %v2370_v30 = vsel %vm12150_vm13, %v2362_v60, %v2369_v17  ;;  %v2563_v2 = vsel %vm11564_vm4, %v2371_v61, %v2562_v62  ;;  %v2684_v27 = vsel %vm11962_vm9, %v2679_v12, %v2683_v15  ;;  %v2695_v59 = vshll.u32 %v12418_v53, 16  ;;  %v10053_v12 = vld [vmem:[%s14889_s7 + $0x140] sm:$0xff]  }
 0x3a0   : > { %2561 = vst [vmem:[#allocation2 + $0xa0] sm:$0xf] %v2370_v30  ;;  %2564 = vst [vmem:[#allocation2 + $0xa4] sm:$0x1] %v2563_v2  ;;  %10372 = vrcp.f32 %v1954_v47  ;;  %v8575_v36 = vcombine.low %v2674_v10, %v2684_v27  ;;  %v2688_v8 = vrot.slane %v2686_v5, 4  ;;  %v2691_v14 = vrot.slane %v2689_v48, 5  ;;  %9187 = vmatprep.subr.bf16.mxu0 %v10053_v12 }
 0x3a1   : > { %v8559_v23 = vcombine.low %v12384_v46, %v12398_v31  ;;  %v2697_v43 = vrot.slane %v2695_v59, 5  ;;  %v2699_v63 = vshrl.u32 %v12418_v53, 16  ;;  %v2705_v7 = vshll.u32 %v2620_v22, 16 }
 0x3a2   : > { %5657 = vmatprep.mubr.bf16.mxu0 %v8575_v36  ;;  %v2692_v16 = vor.u32 %v2691_v14, %v2688_v8  ;;  %v8611_v38 = vcombine.low %v12438_v26, %v12431_v29  ;;  %v2710_v31 = vshrl.u32 %v12433_v44, 16  ;;  %v2713_v18 = vshll.u32 %v12433_v44, 16  ;;  %v2579_v14 = vld [vmem:[#allocation2 + $0xc0] sm:$0xf] }
 0x3a3   : > { %v10367_v45 = vpop.eup %10366  ;;  %5658 = vmatmul.mubr.bf16.gmra.mrb[36].mxu0 %v8559_v23  ;;  %v2701_v41 = vrot.slane %v2699_v63, 4  ;;  %v2707_v46 = vrot.slane %v2705_v7, 5  ;;  %v2719_v24 = vshll.u32 %v12442_v13, 16  ;;  %v2723_v33 = vshrl.u32 %v12442_v13, 16 }
 0x3a4   : > { %v2051_v51 = vmul.f32 %v10367_v45, %v12321_v3  ;;  %v2693_v32 = vrot.slane %v2692_v16, 4  ;;  %5850 = vmatprep.mubr.bf16.mxu1 %v8611_v38  ;;  %v8560_v37 = vcombine.low %v12412_v11, %v12418_v53  ;;  %v2621_v3 = vld [vmem:[#allocation2 + $0x2c] sm:$0x1]  ;;  %v2712_v62 = vrot.slane %v2710_v31, 4 }
 0x3a5   : > { %v10369_v58 = vpop.eup %10368  ;;  %v2702_v20 = vor.u32 %v2701_v41, %v2697_v43  ;;  %v2715_v61 = vrot.slane %v2713_v18, 5  ;;  %v2721_v15 = vrot.slane %v2719_v24, 5  ;;  %v2725_v47 = vrot.slane %v2723_v33, 4  ;;  %v2572_v41 = vld [vmem:[#allocation2 + $0xb4] sm:$0xf] }
 0x3a6   : > { %v8920_v60 = vpack.c.bf16 %v2051_v51, %v2051_v51  ;;  %v2049_v54 = vmul.f32 %v10369_v58, %v12330_v39  ;;  %v2698_v39 = vsel %vm11962_vm9, %v2693_v32, %v2697_v43  ;;  %v2729_v30 = vshll.u32 %v2621_v3, 16  ;;  %v2583_v24 = vld [vmem:[#allocation2 + $0xc8] sm:$0x1]  ;;  %v3026_v3 = vld [vmem:[#allocation2 + $0x3c] sm:$0xe] }
 0x3a7   : > { %v10371_v21 = vpop.eup %10370  ;;  %v2703_v17 = vrot.slane %v2702_v20, 4  ;;  %v2716_v53 = vor.u32 %v2715_v61, %v2712_v62  ;;  %v2726_v48 = vor.u32 %v2725_v47, %v2721_v15  ;;  %v12471_v61 = vld [vmem:[#allocation2 + $0x44] sm:$0x1]  ;;  %v8526_v1 = vrot.slane %v3632_v49, 9 }
 0x3a8   : > { %v2407_v10 = vshrl.u32 %v8920_v60, 16  ;;  %v8918_v22 = vpack.c.bf16 %v2049_v54, %v2049_v54  ;;  %v2052_v5 = vmul.f32 %v10371_v21, %v12342_v35  ;;  %v2410_v59 = vshll.u32 %v8920_v60, 16 }
 0x3a9   : > { %v2708_v11 = vsel %vm11962_vm9, %v2703_v17, %v2707_v46  ;;  %v2717_v35 = vrot.slane %v2716_v53, 4  ;;  %v2727_v7 = vrot.slane %v2726_v48, 4  ;;  %v2731_v32 = vrot.slane %v2729_v30, 5  ;;  %v2576_v17 = vld [vmem:[#allocation2 + $0xbc] sm:$0x1] }
 0x3aa   : > { %v10373_v2 = vpop.eup %10372  ;;  %v2409_v27 = vrot.slane %v2407_v10, 7  ;;  %v2390_v36 = vshrl.u32 %v8918_v22, 16  ;;  %v8921_v8 = vpack.c.bf16 %v2052_v5, %v2052_v5  ;;  %v8576_v63 = vcombine.low %v2698_v39, %v2708_v11  ;;  %v12474_v5 = vld [vmem:[#allocation2 + $0x58] sm:$0xf]  ;;  %v12480_v53 = vld [vmem:[#allocation2 + $0x30] sm:$0xf] }
 0x3ab   : > { %v2050_v23 = vmul.f32 %v10373_v2, %v12381_v57  ;;  %v2393_v38 = vshll.u32 %v8918_v22, 16  ;;  %v12463_v57 = vld [vmem:[#allocation2 + $0x40] sm:$0xf]  ;;  %v2722_v60 = vsel %vm11962_vm9, %v2717_v35, %v2721_v15  ;;  %v2732_v54 = vsel %vm11962_vm9, %v2727_v7, %v2731_v32  ;;  %v12482_v48 = vld [vmem:[#allocation2 + $0x34] sm:$0xf] }
 0x3ac   : > { %v2412_v16 = vor.u32 %v2410_v59, %v2409_v27  ;;  %v2392_v43 = vrot.slane %v2390_v36, 7  ;;  %v2415_v45 = vshrl.u32 %v8921_v8, 16  ;;  %5665 = vmatprep.mubr.bf16.mxu0 %v8576_v63  ;;  %v2418_v20 = vshll.u32 %v8921_v8, 16  ;;  %v12491_v8 = vld [vmem:[#allocation2 + $0x54] sm:$0xf] }
 0x3ad   : > { %v8919_v51 = vpack.c.bf16 %v2050_v23, %v2050_v23  ;;  %5666 = vmatmul.mubr.bf16.gmra.mrb[40].mxu0 %v8560_v37  ;;  %v2413_v18 = vrot.slane %v2409_v27, 4  ;;  %v8577_v37 = vcombine.low %v2722_v60, %v2732_v54  ;;  %v3125_v22 = vrot.slane %v12463_v57, 5  ;;  %v2622_v35 = vld [vmem:[#allocation2 + $0x38] sm:$0x1]  ;;  %v12499_v7 = vld [vmem:[#allocation2 + $0x4c] sm:$0xf] }
 0x3ae   : > { %v2580_v46 = vsel %vm12144_vm12, %v2412_v16, %v2579_v14  ;;  %v2395_v31 = vor.u32 %v2393_v38, %v2392_v43  ;;  %v2417_v58 = vrot.slane %v2415_v45, 7  ;;  %v2396_v15 = vrot.slane %v2392_v43, 4  ;;  %v12514_v32 = vld [vmem:[#allocation2 + $0x50] sm:$0x1] }
 0x3af   : > { %2581 = vst [vmem:[#allocation2 + $0xc0] sm:$0xf] %v2580_v46  ;;  %v2398_v33 = vshrl.u32 %v8919_v51, 16  ;;  %v2401_v10 = vshll.u32 %v8919_v51, 16  ;;  %5673 = vmatprep.mubr.bf16.mxu0 %v8577_v37  ;;  %v8515_v11 = vrot.slane %v3026_v3, 9  ;;  %v3127_v59 = vrot.slane %v3125_v22, 4 }
 0x3b0   : > { %v2573_v62 = vsel %vm12144_vm12, %v2395_v31, %v2572_v41  ;;  %v2420_v12 = vor.u32 %v2418_v20, %v2417_v58  ;;  %v2422_v21 = vrot.slane %v2417_v58, 4  ;;  %v3128_v36 = vrot.slane %v12471_v61, 5  ;;  %v10026_v41 = vld [vmem:[%s14889_s7 + $0x180] sm:$0xff]   ;;  %v10027_v46 = vld [vmem:[%s14889_s7 + $0x1c8] sm:$0xff]  }
 0x3b1   : > { %2574 = vst [vmem:[#allocation2 + $0xb4] sm:$0xf] %v2573_v62  ;;  %v2400_v47 = vrot.slane %v2398_v33, 7  ;;  %v3126_v14 = vsel %vm12486_vm2, %v8515_v11, %v3125_v22  ;;  %v8612_v23 = vcombine.low %v12491_v8, %v12474_v5  ;;  %v8561_v63 = vcombine.low %v12433_v44, %v12442_v13  ;;  %v3027_v20 = vld [vmem:[#allocation2 + $0x48] sm:$0xe] }
 0x3b2   : > { %v2421_v39 = vsel %vm12150_vm13, %v2413_v18, %v2420_v12  ;;  %v2584_v56 = vsel %vm11564_vm4, %v2422_v21, %v2583_v24  ;;  %v3129_v38 = vsel %vm12486_vm2, %v3127_v59, %v3128_v36  ;;  %v2734_v45 = vshrl.u32 %v12480_v53, 16  ;;  %v12521_v62 = vld [vmem:[#allocation2 + $0x64] sm:$0xf]  ;;  %v10029_v12 = vld [vmem:[%s14889_s7 + $0x188] sm:$0xff]  }
 0x3b3   : > { %2582 = vst [vmem:[#allocation2 + $0xc4] sm:$0xf] %v2421_v39  ;;  %2585 = vst [vmem:[#allocation2 + $0xc8] sm:$0x1] %v2584_v56  ;;  %v2403_v30 = vor.u32 %v2401_v10, %v2400_v47  ;;  %v2405_v2 = vrot.slane %v2400_v47, 4  ;;  %v8595_v44 = vcombine.low %v3126_v14, %v3129_v38  ;;  %v2737_v13 = vshll.u32 %v12480_v53, 16 }
 0x3b4   : > { %v2743_v0 = vshll.u32 %v12482_v48, 16  ;;  %v2747_v51 = vshrl.u32 %v12482_v48, 16  ;;  %v2736_v31 = vrot.slane %v2734_v45, 4  ;;  %v2753_v58 = vshll.u32 %v2622_v35, 16  ;;  %v12526_v47 = vld [vmem:[#allocation2 + $0x3c] sm:$0xf] }
 0x3b5   : > { %v2404_v16 = vsel %vm12150_vm13, %v2396_v15, %v2403_v30  ;;  %v2577_v43 = vsel %vm11564_vm4, %v2405_v2, %v2576_v17  ;;  %5674 = vmatmul.mubr.bf16.gmra.mrb[44].mxu0 %v8561_v63  ;;  %v3132_v18 = vrot.slane %v12499_v7, 5  ;;  %5851 = vmatmul.mubr.bf16.vlgmr.msra.gmra.mrb[32].mxu1 %v8595_v44  ;;  %v2739_v24 = vrot.slane %v2737_v13, 5  ;;  %v10030_v10 = vld [vmem:[%s14889_s7 + $0x1d0] sm:$0xff]   ;;  %v12533_v39 = vld [vmem:[#allocation2 + $0x60] sm:$0xf] }
 0x3b6   : > { %2575 = vst [vmem:[#allocation2 + $0xb8] sm:$0xf] %v2404_v16  ;;  %2578 = vst [vmem:[#allocation2 + $0xbc] sm:$0x1] %v2577_v43  ;;  %v2745_v33 = vrot.slane %v2743_v0, 5  ;;  %v2749_v60 = vrot.slane %v2747_v51, 4  ;;  %5858 = vmatprep.mubr.bf16.mxu1 %v8612_v23  ;;  %9300 = vmatpush3.bf16.msra.mxu1 %v10026_v41  ;;  %v8613_v2 = vcombine.low %v12533_v39, %v12521_v62 }
 0x3b7   : > { %v3134_v54 = vrot.slane %v3132_v18, 4  ;;  %v3135_v3 = vrot.slane %v12514_v32, 5  ;;  %v2740_v21 = vor.u32 %v2739_v24, %v2736_v31  ;;  %v8516_v37 = vrot.slane %v3027_v20, 9  ;;  %9301 = vmatprep.subr.bf16.mxu1 %v10027_v46  ;;  %v12543_v63 = vld [vmem:[#allocation2 + $0x58] sm:$0xf]  ;;  %v10032_v41 = vld [vmem:[%s14889_s7 + $0x190] sm:$0xff]  }
 0x3b8   : > { %v2750_v17 = vor.u32 %v2749_v60, %v2745_v33  ;;  %v2755_v22 = vrot.slane %v2753_v58, 5  ;;  %v2758_v59 = vshrl.u32 %v12526_v47, 16  ;;  %v2761_v36 = vshll.u32 %v12526_v47, 16  ;;  %v3028_v45 = vld [vmem:[#allocation2 + $0x54] sm:$0xe]  ;;  %v10033_v31 = vld [vmem:[%s14889_s7 + $0x1d8] sm:$0xff]  }
 0x3b9   : > { %v3136_v15 = vsel %vm12486_vm2, %v3134_v54, %v3135_v3  ;;  %v2741_v56 = vrot.slane %v2740_v21, 4  ;;  %v3133_v30 = vsel %vm12486_vm2, %v8516_v37, %v3132_v18  ;;  %v2767_v14 = vshll.u32 %v12463_v57, 16  ;;  %v12553_v46 = vld [vmem:[#allocation2 + $0x5c] sm:$0x1]  ;;  %v10036_v37 = vld [vmem:[%s14889_s7 + $0x1e0] sm:$0xff]  }
 0x3ba   : > { %v2751_v11 = vrot.slane %v2750_v17, 4  ;;  %v2771_v23 = vshrl.u32 %v12463_v57, 16  ;;  %9302 = vmatpush3.bf16.msra.mxu1 %v10029_v12  ;;  %v8596_v43 = vcombine.low %v3133_v30, %v3136_v15  ;;  %v2777_v38 = vshll.u32 %v12471_v61, 16  ;;  %v3217_v12 = vld [vmem:[#allocation2 + $0x70] sm:$0xf] }
 0x3bb   : > { %v2746_v35 = vsel %vm11962_vm9, %v2741_v56, %v2745_v33  ;;  %9303 = vmatprep.subr.bf16.mxu1 %v10030_v10  ;;  %v2760_v13 = vrot.slane %v2758_v59, 4  ;;  %v2763_v0 = vrot.slane %v2761_v36, 5  ;;  %v2769_v51 = vrot.slane %v2767_v14, 5  ;;  %v12561_v33 = vld [vmem:[#allocation2 + $0x48] sm:$0xf] }
 0x3bc   : > { %v2756_v16 = vsel %vm11962_vm9, %v2751_v11, %v2755_v22  ;;  %v8562_v61 = vcombine.low %v12480_v53, %v12482_v48  ;;  %v2773_v58 = vrot.slane %v2771_v23, 4  ;;  %v3139_v20 = vrot.slane %v12543_v63, 5  ;;  %v10035_v53 = vld [vmem:[%s14889_s7 + $0x198] sm:$0xff]   ;;  %v3216_v15 = vld [vmem:[#allocation2 + $0x6c] sm:$0xf] }
 0x3bd   : > { %v8578_v44 = vcombine.low %v2746_v35, %v2756_v16  ;;  %5859 = vmatmul.mubr.bf16.gmra.mrb[36].mxu1 %v8596_v43  ;;  %v2764_v18 = vor.u32 %v2763_v0, %v2760_v13  ;;  %v8517_v24 = vrot.slane %v3028_v45, 9  ;;  %v3142_v3 = vrot.slane %v12553_v46, 5  ;;  %v12580_v14 = vld [vmem:[#allocation2 + $0x64] sm:$0xf] }
 0x3be   : > { %5866 = vmatprep.mubr.bf16.mxu1 %v8613_v2  ;;  %v2774_v60 = vor.u32 %v2773_v58, %v2769_v51  ;;  %v3141_v54 = vrot.slane %v3139_v20, 4  ;;  %9304 = vmatpush3.bf16.msra.mxu1 %v10032_v41  ;;  %v2779_v21 = vrot.slane %v2777_v38, 5  ;;  %v2782_v56 = vshrl.u32 %v12561_v33, 16  ;;  %v3029_v38 = vld [vmem:[#allocation2 + $0x60] sm:$0xe] }
 0x3bf   : > { %5681 = vmatprep.mubr.bf16.mxu0 %v8578_v44  ;;  %v2765_v48 = vrot.slane %v2764_v18, 4  ;;  %v3140_v17 = vsel %vm12486_vm2, %v8517_v24, %v3139_v20  ;;  %9305 = vmatprep.subr.bf16.mxu1 %v10033_v31  ;;  %v2785_v11 = vshll.u32 %v12561_v33, 16  ;;  %v8614_v2 = vcombine.low %v3216_v15, %v3217_v12  ;;  %v10038_v45 = vld [vmem:[%s14889_s7 + $0x1a0] sm:$0xff]   ;;  %v10039_v31 = vld [vmem:[%s14889_s7 + $0x1e8] sm:$0xff]  }
 0x3c0   : > { %5682 = vmatmul.mubr.bf16.gmra.mrb[48].mxu0 %v8562_v61  ;;  %v2775_v10 = vrot.slane %v2774_v60, 4  ;;  %v3143_v22 = vsel %vm12486_vm2, %v3141_v54, %v3142_v3  ;;  %v2791_v59 = vshll.u32 %v12499_v7, 16  ;;  %v2795_v36 = vshrl.u32 %v12499_v7, 16  ;;  %v3219_v60 = vld [vmem:[#allocation2 + $0x7c] sm:$0xf] }
 0x3c1   : > { %v2770_v30 = vsel %vm11962_vm9, %v2765_v48, %v2769_v51  ;;  %v8597_v35 = vcombine.low %v3140_v17, %v3143_v22  ;;  %v2784_v16 = vrot.slane %v2782_v56, 4  ;;  %v2787_v43 = vrot.slane %v2785_v11, 5  ;;  %v12588_v51 = vld [vmem:[#allocation2 + $0x68] sm:$0x1]  ;;  %v10042_v17 = vld [vmem:[%s14889_s7 + $0x1f0] sm:$0xff]  }
 0x3c2   : > { %v2780_v23 = vsel %vm11962_vm9, %v2775_v10, %v2779_v21  ;;  %9306 = vmatpush3.bf16.msra.mxu1 %v10035_v53  ;;  %v2793_v44 = vrot.slane %v2791_v59, 5  ;;  %v2797_v13 = vrot.slane %v2795_v36, 4  ;;  %v2801_v0 = vshll.u32 %v12514_v32, 16  ;;  %v12596_v32 = vld [vmem:[#allocation2 + $0x54] sm:$0xf] }
 0x3c3   : > { %v8579_v41 = vcombine.low %v2770_v30, %v2780_v23  ;;  %9307 = vmatprep.subr.bf16.mxu1 %v10036_v37  ;;  %v8563_v61 = vcombine.low %v12526_v47, %v12463_v57  ;;  %v2788_v58 = vor.u32 %v2787_v43, %v2784_v16  ;;  %v3146_v20 = vrot.slane %v12580_v14, 5  ;;  %v10041_v57 = vld [vmem:[%s14889_s7 + $0x1a8] sm:$0xff]   ;;  %v3218_v21 = vld [vmem:[#allocation2 + $0x78] sm:$0xf]  ;;  %v12611_v56 = vld [vmem:[#allocation2 + $0x70] sm:$0xf] }
 0x3c4   : > { %v2798_v18 = vor.u32 %v2797_v13, %v2793_v44  ;;  %v8518_v24 = vrot.slane %v3029_v38, 9  ;;  %v3149_v12 = vrot.slane %v12588_v51, 5  ;;  %v2803_v53 = vrot.slane %v2801_v0, 5  ;;  %v12619_v43 = vld [vmem:[#allocation2 + $0x74] sm:$0x1] }
 0x3c5   : > { %5867 = vmatmul.mubr.bf16.gmra.mrb[40].mxu1 %v8597_v35  ;;  %5689 = vmatprep.mubr.bf16.mxu0 %v8579_v41  ;;  %v2789_v54 = vrot.slane %v2788_v58, 4  ;;  %v3148_v3 = vrot.slane %v3146_v20, 4  ;;  %v8615_v10 = vcombine.low %v3218_v21, %v3219_v60  ;;  %v2806_v22 = vshrl.u32 %v12596_v32, 16  ;;  %v10043_v38 = vld [vmem:[%s14889_s7 + $0x1b0] sm:$0xff]   ;;  %v3030_v0 = vld [vmem:[#allocation2 + $0x6c] sm:$0xe] }
 0x3c6   : > { %5874 = vmatprep.mubr.bf16.mxu1 %v8614_v2  ;;  %9308 = vmatpush3.bf16.msra.mxu1 %v10038_v45  ;;  %v2799_v47 = vrot.slane %v2798_v18, 4  ;;  %v3147_v48 = vsel %vm12486_vm2, %v8518_v24, %v3146_v20  ;;  %v2809_v15 = vshll.u32 %v12596_v32, 16  ;;  %v2815_v2 = vshll.u32 %v12543_v63, 16  ;;  %v10044_v45 = vld [vmem:[%s14889_s7 + $0x1f8] sm:$0xff]   ;;  %v3221_v60 = vld [vmem:[#allocation2 + $0x88] sm:$0xf] }
 0x3c7   : > { %9309 = vmatprep.subr.bf16.mxu1 %v10039_v31  ;;  %v3150_v37 = vsel %vm12486_vm2, %v3148_v3, %v3149_v12  ;;  %v2794_v11 = vsel %vm11962_vm9, %v2789_v54, %v2793_v44  ;;  %v2819_v59 = vshrl.u32 %v12543_v63, 16  ;;  %v2808_v35 = vrot.slane %v2806_v22, 4  ;;  %v12632_v54 = vld [vmem:[#allocation2 + $0x60] sm:$0xf]  ;;  %v10046_v12 = vld [vmem:[%s14889_s7 + $0x1b8] sm:$0xff]  }
 0x3c8   : > { %5690 = vmatmul.mubr.bf16.gmra.mrb[52].mxu0 %v8563_v61  ;;  %v2804_v30 = vsel %vm11962_vm9, %v2799_v47, %v2803_v53  ;;  %v8598_v23 = vcombine.low %v3147_v48, %v3150_v37  ;;  %v2811_v16 = vrot.slane %v2809_v15, 5  ;;  %v2817_v41 = vrot.slane %v2815_v2, 5  ;;  %v12643_v37 = vld [vmem:[#allocation2 + $0x7c] sm:$0xf] }
 0x3c9   : > { %v8580_v36 = vcombine.low %v2794_v11, %v2804_v30  ;;  %v2821_v44 = vrot.slane %v2819_v59, 4  ;;  %v2825_v13 = vshll.u32 %v12553_v46, 16  ;;  %v3153_v31 = vrot.slane %v12611_v56, 5 }
 0x3ca   : > { %9310 = vmatpush3.bf16.msra.mxu1 %v10041_v57  ;;  %v8564_v61 = vcombine.low %v12561_v33, %v12499_v7  ;;  %v2812_v58 = vor.u32 %v2811_v16, %v2808_v35  ;;  %v3156_v24 = vrot.slane %v12619_v43, 5  ;;  %v8519_v3 = vrot.slane %v3030_v0, 9  ;;  %v3220_v33 = vld [vmem:[#allocation2 + $0x84] sm:$0xf]  ;;  %v12657_v0 = vld [vmem:[#allocation2 + $0x6c] sm:$0xf] }
 0x3cb   : > { %9311 = vmatprep.subr.bf16.mxu1 %v10042_v17  ;;  %5697 = vmatprep.mubr.bf16.mxu0 %v8580_v36  ;;  %v2822_v20 = vor.u32 %v2821_v44, %v2817_v41  ;;  %v3155_v18 = vrot.slane %v3153_v31, 4  ;;  %v2827_v47 = vrot.slane %v2825_v13, 5  ;;  %v8616_v48 = vcombine.low %v3220_v33, %v3221_v60 }
 0x3cc   : > { %v2813_v46 = vrot.slane %v2812_v58, 4  ;;  %v3154_v53 = vsel %vm12486_vm2, %v8519_v3, %v3153_v31  ;;  %v2830_v21 = vshrl.u32 %v12632_v54, 16  ;;  %v2833_v17 = vshll.u32 %v12632_v54, 16  ;;  %v3223_v3 = vld [vmem:[#allocation2 + $0x94] sm:$0xf] }
 0x3cd   : > { %5875 = vmatmul.mubr.bf16.gmra.mrb[44].mxu1 %v8598_v23  ;;  %v2823_v57 = vrot.slane %v2822_v20, 4  ;;  %v3157_v7 = vsel %vm12486_vm2, %v3155_v18, %v3156_v24  ;;  %v2839_v15 = vshll.u32 %v12580_v14, 16  ;;  %v2843_v11 = vshrl.u32 %v12580_v14, 16  ;;  %v12651_v23 = vld [vmem:[#allocation2 + $0x80] sm:$0x1] }
 0x3ce   : > { %5882 = vmatprep.mubr.bf16.mxu1 %v8615_v10  ;;  %9312 = vmatpush3.bf16.msra.mxu1 %v10043_v38  ;;  %v2818_v10 = vsel %vm11962_vm9, %v2813_v46, %v2817_v41  ;;  %v8599_v2 = vcombine.low %v3154_v53, %v3157_v7  ;;  %v2832_v59 = vrot.slane %v2830_v21, 4  ;;  %v2835_v36 = vrot.slane %v2833_v17, 5  ;;  %v3222_v53 = vld [vmem:[#allocation2 + $0x90] sm:$0xf] }
 0x3cf   : > { %9313 = vmatprep.subr.bf16.mxu1 %v10044_v45  ;;  %v2828_v22 = vsel %vm11962_vm9, %v2823_v57, %v2827_v47  ;;  %v2841_v35 = vrot.slane %v2839_v15, 5  ;;  %v2845_v16 = vrot.slane %v2843_v11, 4  ;;  %v2849_v38 = vshll.u32 %v12588_v51, 16  ;;  %v3031_v45 = vld [vmem:[#allocation2 + $0x78] sm:$0xe] }
 0x3d0   : > { %5698 = vmatmul.mubr.bf16.gmra.mrb[56].mxu0 %v8564_v61  ;;  %v8581_v30 = vcombine.low %v2818_v10, %v2828_v22  ;;  %v3160_v41 = vrot.slane %v12643_v37, 5  ;;  %v8565_v44 = vcombine.low %v12596_v32, %v12543_v63  ;;  %v2836_v13 = vor.u32 %v2835_v36, %v2832_v59  ;;  %v12669_v47 = vld [vmem:[#allocation2 + $0x88] sm:$0xf]  ;;  %v12675_v11 = vld [vmem:[#allocation2 + $0x8c] sm:$0x1] }
 0x3d1   : > { %v2846_v31 = vor.u32 %v2845_v16, %v2841_v35  ;;  %v3163_v58 = vrot.slane %v12651_v23, 5  ;;  %v8520_v18 = vrot.slane %v3031_v45, 9  ;;  %v2851_v24 = vrot.slane %v2849_v38, 5  ;;  %v3032_v59 = vld [vmem:[#allocation2 + $0x84] sm:$0xe] }
 0x3d2   : > { %9314 = vmatpush3.bf16.msra.mxu1 %v10046_v12  ;;  %5705 = vmatprep.mubr.bf16.mxu0 %v8581_v30  ;;  %v3162_v61 = vrot.slane %v3160_v41, 4  ;;  %v2837_v20 = vrot.slane %v2836_v13, 4  ;;  %v2854_v46 = vshrl.u32 %v12657_v0, 16  ;;  %v2857_v12 = vshll.u32 %v12657_v0, 16 }
 0x3d3   : > { %v2847_v51 = vrot.slane %v2846_v31, 4  ;;  %v3161_v32 = vsel %vm12486_vm2, %v8520_v18, %v3160_v41  ;;  %v2863_v57 = vshll.u32 %v12611_v56, 16  ;;  %v2867_v21 = vshrl.u32 %v12611_v56, 16  ;;  %v12683_v41 = vld [vmem:[#allocation2 + $0x78] sm:$0xf] }
 0x3d4   : > { %v3164_v60 = vsel %vm12486_vm2, %v3162_v61, %v3163_v58  ;;  %v2842_v63 = vsel %vm11962_vm9, %v2837_v20, %v2841_v35  ;;  %v2859_v10 = vrot.slane %v2857_v12, 5  ;;  %v2873_v15 = vshll.u32 %v12619_v43, 16  ;;  %v12678_v35 = vld [vmem:[#allocation2 + $0x8] sm:$0x1] }
 0x3d5   : > { %5883 = vmatmul.mubr.bf16.gmra.mrb[48].mxu1 %v8599_v2  ;;  %v2852_v7 = vsel %vm11962_vm9, %v2847_v51, %v2851_v24  ;;  %v8600_v33 = vcombine.low %v3161_v32, %v3164_v60  ;;  %v2865_v22 = vrot.slane %v2863_v57, 5  ;;  %v8617_v30 = vcombine.low %v3222_v53, %v3223_v3  ;;  %v12698_v3 = vld [vmem:[#allocation2 + $0x94] sm:$0xf]  ;;  %v12702_v53 = vld [vmem:[#allocation2 + $0x98] sm:$0x1] }
 0x3d6   : > { %5890 = vmatprep.mubr.bf16.mxu1 %v8616_v48  ;;  %v2856_v48 = vrot.slane %v2854_v46, 4  ;;  %v8582_v17 = vcombine.low %v2842_v63, %v2852_v7  ;;  %v2869_v2 = vrot.slane %v2867_v21, 4  ;;  %v3167_v36 = vrot.slane %v12669_v47, 5  ;;  %v3225_v63 = vld [vmem:[#allocation2 + $0xa0] sm:$0xf] }
 0x3d7   : > { %v3093_v16 = vrot.slane %v12678_v35, 5  ;;  %v8566_v38 = vcombine.low %v12632_v54, %v12580_v14  ;;  %v3369_v43 = vshrl.u32 %v12438_v26, 16  ;;  %v3170_v31 = vrot.slane %v12675_v11, 5 }
 0x3d8   : > { %5706 = vmatmul.mubr.bf16.gmra.mrb[60].mxu0 %v8565_v44  ;;  %v2860_v45 = vor.u32 %v2859_v10, %v2856_v48  ;;  %v2870_v44 = vor.u32 %v2869_v2, %v2865_v22  ;;  %v3169_v13 = vrot.slane %v3167_v36, 4  ;;  %v3372_v61 = vshll.u32 %v12438_v26, 16  ;;  %v3033_v48 = vld [vmem:[#allocation2 + $0x90] sm:$0xe] }
 0x3d9   : > { %5713 = vmatprep.mubr.bf16.mxu0 %v8582_v17  ;;  %v2875_v20 = vrot.slane %v2873_v15, 5  ;;  %v8521_v18 = vrot.slane %v3032_v59, 9  ;;  %v2878_v54 = vshrl.u32 %v12683_v41, 16  ;;  %v2881_v24 = vshll.u32 %v12683_v41, 16  ;;  %v3224_v17 = vld [vmem:[#allocation2 + $0x9c] sm:$0xf] }
 0x3da   : > { %v2861_v58 = vrot.slane %v2860_v45, 4  ;;  %v2871_v51 = vrot.slane %v2870_v44, 4  ;;  %v3171_v14 = vsel %vm12486_vm2, %v3169_v13, %v3170_v31  ;;  %v2887_v26 = vshll.u32 %v12643_v37, 16  ;;  %v12713_v31 = vld [vmem:[#allocation2 + $0x84] sm:$0xf] }
 0x3db   : > { %v3168_v46 = vsel %vm12486_vm2, %v8521_v18, %v3167_v36  ;;  %v2891_v32 = vshrl.u32 %v12643_v37, 16  ;;  %v2880_v7 = vrot.slane %v2878_v54, 4  ;;  %v2897_v15 = vshll.u32 %v12651_v23, 16 }
 0x3dc   : > { %v2866_v60 = vsel %vm11962_vm9, %v2861_v58, %v2865_v22  ;;  %v2876_v12 = vsel %vm11962_vm9, %v2871_v51, %v2875_v20  ;;  %v8601_v57 = vcombine.low %v3168_v46, %v3171_v14  ;;  %v2889_v10 = vrot.slane %v2887_v26, 5 }
 0x3dd   : > { %5891 = vmatmul.mubr.bf16.gmra.mrb[52].mxu1 %v8600_v33  ;;  %v2883_v33 = vrot.slane %v2881_v24, 5  ;;  %v8583_v21 = vcombine.low %v2866_v60, %v2876_v12  ;;  %v2893_v22 = vrot.slane %v2891_v32, 4  ;;  %v8618_v2 = vcombine.low %v3224_v17, %v3225_v63  ;;  %v12724_v60 = vld [vmem:[#allocation2 + $0xa0] sm:$0xf]  ;;  %v3227_v63 = vld [vmem:[#allocation2 + $0xac] sm:$0xf] }
 0x3de   : > { %5898 = vmatprep.mubr.bf16.mxu1 %v8617_v30  ;;  %v3174_v36 = vrot.slane %v12698_v3, 5  ;;  %v12709_v45 = vrot.slane %v3372_v61, 5  ;;  %v8567_v44 = vcombine.low %v12657_v0, %v12611_v56  ;;  %v8522_v58 = vrot.slane %v3033_v48, 9 }
 0x3df   : > { %v2884_v59 = vor.u32 %v2883_v33, %v2880_v7  ;;  %v2894_v13 = vor.u32 %v2893_v22, %v2889_v10  ;;  %v3177_v18 = vrot.slane %v12702_v53, 5  ;;  %v3393_v51 = vshrl.u32 %v12491_v8, 16  ;;  %v3226_v7 = vld [vmem:[#allocation2 + $0xa8] sm:$0xf] }
 0x3e0   : > { %5714 = vmatmul.mubr.bf16.gmra.mrb[64].mxu0 %v8566_v38  ;;  %v12707_v38 = vrot.slane %v3369_v43, 4  ;;  %v3176_v20 = vrot.slane %v3174_v36, 4  ;;  %v3396_v43 = vshll.u32 %v12491_v8, 16  ;;  %v2899_v14 = vrot.slane %v2897_v15, 5 }
 0x3e1   : > { %5721 = vmatprep.mubr.bf16.mxu0 %v8583_v21  ;;  %v2885_v23 = vrot.slane %v2884_v59, 4  ;;  %v2895_v61 = vrot.slane %v2894_v13, 4  ;;  %v3175_v54 = vsel %vm12486_vm2, %v8522_v58, %v3174_v36  ;;  %v2902_v0 = vshrl.u32 %v12713_v31, 16  ;;  %v3034_v21 = vld [vmem:[#allocation2 + $0x9c] sm:$0xe] }
 0x3e2   : > { %v3178_v56 = vsel %vm12486_vm2, %v3176_v20, %v3177_v18  ;;  %v2905_v24 = vshll.u32 %v12713_v31, 16  ;;  %v2911_v26 = vshll.u32 %v12669_v47, 16  ;;  %v2915_v32 = vshrl.u32 %v12669_v47, 16 }
 0x3e3   : > { %v2890_v46 = vsel %vm11962_vm9, %v2885_v23, %v2889_v10  ;;  %v2900_v8 = vsel %vm11962_vm9, %v2895_v61, %v2899_v14  ;;  %v2904_v33 = vrot.slane %v2902_v0, 4  ;;  %v2921_v15 = vshll.u32 %v12675_v11, 16  ;;  %v12743_v11 = vld [vmem:[#allocation2 + $0x90] sm:$0xf] }
 0x3e4   : > { %v8584_v12 = vcombine.low %v2890_v46, %v2900_v8  ;;  %v2907_v48 = vrot.slane %v2905_v24, 5  ;;  %v2913_v17 = vrot.slane %v2911_v26, 5  ;;  %v2917_v22 = vrot.slane %v2915_v32, 4  ;;  %v3035_v26 = vld [vmem:[#allocation2 + $0xa8] sm:$0xe] }
 0x3e5   : > { %5899 = vmatmul.mubr.bf16.gmra.mrb[56].mxu1 %v8601_v57  ;;  %v8602_v57 = vcombine.low %v3175_v54, %v3178_v56  ;;  %v3181_v10 = vrot.slane %v12724_v60, 5  ;;  %v12736_v59 = vrot.slane %v3393_v51, 4  ;;  %v12739_v23 = vrot.slane %v3396_v43, 5 }
 0x3e6   : > { %5906 = vmatprep.mubr.bf16.mxu1 %v8618_v2  ;;  %v12733_v2 = vld [vmem:[#allocation2 + $0xa4] sm:$0x1]  ;;  %v2908_v13 = vor.u32 %v2907_v48, %v2904_v33  ;;  %v8568_v58 = vcombine.low %v12683_v41, %v12643_v37  ;;  %v2918_v20 = vor.u32 %v2917_v22, %v2913_v17  ;;  %v3417_v61 = vshrl.u32 %v12533_v39, 16  ;;  %v12763_v48 = vld [vmem:[#allocation2 + $0xb0] sm:$0x1] }
 0x3e7   : > { %v3183_v18 = vrot.slane %v3181_v10, 4  ;;  %v8523_v14 = vrot.slane %v3034_v21, 9  ;;  %v3184_v54 = vrot.slane %v12733_v2, 5  ;;  %v3420_v56 = vshll.u32 %v12533_v39, 16  ;;  %v3228_v22 = vld [vmem:[#allocation2 + $0xb4] sm:$0xf] }
 0x3e8   : > { %5722 = vmatmul.mubr.bf16.gmra.mrb[68].mxu0 %v8567_v44  ;;  %v8619_v44 = vcombine.low %v3226_v7, %v3227_v63  ;;  %v2909_v51 = vrot.slane %v2908_v13, 4  ;;  %v2919_v0 = vrot.slane %v2918_v20, 4  ;;  %v2923_v24 = vrot.slane %v2921_v15, 5  ;;  %v12755_v63 = vld [vmem:[#allocation2 + $0xac] sm:$0xf] }
 0x3e9   : > { %5729 = vmatprep.mubr.bf16.mxu0 %v8584_v12  ;;  %v3182_v37 = vsel %vm12486_vm2, %v8523_v14, %v3181_v10  ;;  %v3185_v41 = vsel %vm12486_vm2, %v3183_v18, %v3184_v54  ;;  %v2926_v46 = vshrl.u32 %v12743_v11, 16  ;;  %v2929_v8 = vshll.u32 %v12743_v11, 16  ;;  %v3231_v18 = vld [vmem:[#allocation2 + $0xc4] sm:$0xf] }
 0x3ea   : > { %v2914_v32 = vsel %vm11962_vm9, %v2909_v51, %v2913_v17  ;;  %v2924_v12 = vsel %vm11962_vm9, %v2919_v0, %v2923_v24  ;;  %v2935_v7 = vshll.u32 %v12698_v3, 16  ;;  %v2939_v33 = vshrl.u32 %v12698_v3, 16  ;;  %v12769_v24 = vld [vmem:[#allocation2 + $0x9c] sm:$0xf] }
 0x3eb   : > { %v8585_v21 = vcombine.low %v2914_v32, %v2924_v12  ;;  %v2928_v15 = vrot.slane %v2926_v46, 4  ;;  %v2931_v10 = vrot.slane %v2929_v8, 5  ;;  %v8603_v13 = vcombine.low %v3182_v37, %v3185_v41  ;;  %v3230_v41 = vld [vmem:[#allocation2 + $0xc0] sm:$0xf] }
 0x3ec   : > { %v2941_v20 = vrot.slane %v2939_v33, 4  ;;  %v3188_v17 = vrot.slane %v12755_v63, 5  ;;  %v12767_v51 = vrot.slane %v3417_v61, 4  ;;  %v8524_v0 = vrot.slane %v3035_v26, 9  ;;  %v3036_v33 = vld [vmem:[#allocation2 + $0xb4] sm:$0xe] }
 0x3ed   : > { %5907 = vmatmul.mubr.bf16.gmra.mrb[60].mxu1 %v8602_v57  ;;  %v3229_v57 = vld [vmem:[#allocation2 + $0xb8] sm:$0xf]  ;;  %v2932_v54 = vor.u32 %v2931_v10, %v2928_v15  ;;  %v8569_v46 = vcombine.low %v12713_v31, %v12669_v47  ;;  %v3191_v37 = vrot.slane %v12763_v48, 5  ;;  %v8570_v47 = vcombine.low %v12743_v11, %v12698_v3 }
 0x3ee   : > { %5914 = vmatprep.mubr.bf16.mxu1 %v8619_v44  ;;  %v2945_v44 = vshll.u32 %v12702_v53, 16  ;;  %v8620_v14 = vcombine.low %v3228_v22, %v3229_v57  ;;  %v3190_v53 = vrot.slane %v3188_v17, 4  ;;  %v3189_v61 = vsel %vm12486_vm2, %v8524_v0, %v3188_v17  ;;  %v12783_v22 = vpop.f32.mrb[32].mxu0  ;;  %v12791_v17 = vld [vmem:[#allocation2 + $0xbc] sm:$0x1] }
 0x3ef   : > { %v2933_v32 = vrot.slane %v2932_v54, 4  ;;  %v8621_v57 = vcombine.low %v3230_v41, %v3231_v18  ;;  %v2950_v31 = vshrl.u32 %v12769_v24, 16  ;;  %v2963_v18 = vshrl.u32 %v12724_v60, 16  ;;  %v12797_v54 = vld [vmem:[#allocation2 + $0x1c] sm:$0xf] }
 0x3f0   : > { %5730 = vmatmul.mubr.bf16.gmra.mrb[72].mxu0 %v8568_v58  ;;  %v2937_v58 = vrot.slane %v2935_v7, 5  ;;  %v2947_v12 = vrot.slane %v2945_v44, 5  ;;  %v3192_v7 = vsel %vm12486_vm2, %v3190_v53, %v3191_v37  ;;  %v2953_v44 = vshll.u32 %v12769_v24, 16 }
 0x3f1   : > { %5737 = vmatprep.mubr.bf16.mxu0 %v8585_v21  ;;  %v12781_v21 = vld [vmem:[#allocation2 + $0x18] sm:$0xf]  ;;  %v8604_v10 = vcombine.low %v3189_v61, %v3192_v7  ;;  %v2952_v11 = vrot.slane %v2950_v31, 4  ;;  %v8525_v53 = vrot.slane %v3036_v33, 9  ;;  %v2965_v41 = vrot.slane %v2963_v18, 4 }
 0x3f2   : > { %v2942_v8 = vor.u32 %v2941_v20, %v2937_v58  ;;  %v2938_v15 = vsel %vm11962_vm9, %v2933_v32, %v2937_v58  ;;  %v12789_v20 = vld [vmem:[#allocation2 + $0xb8] sm:$0xf]  ;;  %v12799_v58 = vpop.f32.mrb[33].mxu0  ;;  %v3841_v7 = vld [vmem:[#allocation2 + $0x20] sm:$0x1]  ;;  %v3858_v31 = vshrl.u32 %v12781_v21, 16 }
 0x3f3   : > { %v12801_v37 = vpop.f32.mrb[34].mxu0  ;;  %v3195_v61 = vrot.slane %v12789_v20, 5  ;;  %v3871_v18 = vshrl.u32 %v12797_v54, 16 }
 0x3f4   : > { %v2943_v26 = vrot.slane %v2942_v8, 4  ;;  %v3860_v43 = vrot.slane %v3858_v31, 4 }
 0x3f5   : > { %5915 = vmatmul.mubr.bf16.gmra.mrb[64].mxu1 %v8603_v13  ;;  %v2959_v13 = vshll.u32 %v12724_v60, 16 }
 0x3f6   : > { %5922 = vmatprep.mubr.bf16.mxu1 %v8620_v14  ;;  %v2948_v3 = vsel %vm11962_vm9, %v2943_v26, %v2947_v12  ;;  %v2969_v14 = vshll.u32 %v12733_v2, 16  ;;  %v3198_v12 = vrot.slane %v12791_v17, 5  ;;  %v12805_v26 = vpop.f32.mrb[35].mxu0 }
 0x3f7   : > { %v8586_v0 = vcombine.low %v2938_v15, %v2948_v3  ;;  %v2961_v8 = vrot.slane %v2959_v13, 5  ;;  %v3861_v15 = vshll.u32 %v12781_v21, 16  ;;  %v3196_v13 = vsel %vm12486_vm2, %v8525_v53, %v3195_v61 }
 0x3f8   : > { %5738 = vmatmul.mubr.bf16.gmra.mrb[76].mxu0 %v8569_v46  ;;  %v2955_v46 = vrot.slane %v2953_v44, 5  ;;  %v2971_v32 = vrot.slane %v2969_v14, 5  ;;  %v3867_v44 = vshll.u32 %v12797_v54, 16  ;;  %v3197_v3 = vrot.slane %v3195_v61, 4 }
 0x3f9   : > { %5745 = vmatprep.mubr.bf16.mxu0 %v8586_v0  ;;  %v2966_v33 = vor.u32 %v2965_v41, %v2961_v8  ;;  %v3863_v0 = vrot.slane %v3861_v15, 5  ;;  %v3877_v41 = vshll.u32 %v3841_v7, 16  ;;  %v12819_v53 = vrot.slane %v3420_v56, 5 }
 0x3fa   : > { %v2956_v2 = vor.u32 %v2955_v46, %v2952_v11  ;;  %v3869_v11 = vrot.slane %v3867_v44, 5  ;;  %v12813_v46 = vld [vmem:[#allocation2 + $0xa8] sm:$0xf]  ;;  %v3199_v30 = vsel %vm12486_vm2, %v3197_v3, %v3198_v12  ;;  %v2983_v56 = vshll.u32 %v12755_v63, 16 }
 0x3fb   : > { %v2967_v36 = vrot.slane %v2966_v33, 4  ;;  %v8605_v61 = vcombine.low %v3196_v13, %v3199_v30  ;;  %v2974_v12 = vshrl.u32 %v12813_v46, 16  ;;  %v2977_v39 = vshll.u32 %v12813_v46, 16  ;;  %v12830_v33 = vld [vmem:[#allocation2 + $0x24] sm:$0xf] }
 0x3fc   : > { %v2957_v14 = vrot.slane %v2956_v2, 4  ;;  %v3864_v2 = vor.u32 %v3863_v0, %v3860_v43  ;;  %v3879_v30 = vrot.slane %v3877_v41, 5  ;;  %v2987_v13 = vshrl.u32 %v12755_v63, 16 }
 0x3fd   : > { %5923 = vmatmul.mubr.bf16.gmra.mrb[68].mxu1 %v8604_v10  ;;  %v3873_v10 = vrot.slane %v3871_v18, 4  ;;  %v2972_v31 = vsel %vm11962_vm9, %v2967_v36, %v2971_v32  ;;  %v2976_v43 = vrot.slane %v2974_v12, 4  ;;  %v12833_v36 = vld [vmem:[#allocation2 + $0x28] sm:$0xf]  ;;  %v2985_v32 = vrot.slane %v2983_v56, 5 }
 0x3fe   : > { %5930 = vmatprep.mubr.bf16.mxu1 %v8621_v57  ;;  %v2962_v57 = vsel %vm11962_vm9, %v2957_v14, %v2961_v8  ;;  %v3865_v7 = vrot.slane %v3864_v2, 4  ;;  %v2993_v3 = vshll.u32 %v12763_v48, 16  ;;  %v3842_v18 = vld [vmem:[#allocation2 + $0x2c] sm:$0x1]  ;;  %v2989_v0 = vrot.slane %v2987_v13, 4 }
 0x3ff   : > { %v3874_v15 = vor.u32 %v3873_v10, %v3869_v11  ;;  %v8587_v44 = vcombine.low %v2962_v57, %v2972_v31  ;;  %v8654_v10 = vcombine.low %v12781_v21, %v12797_v54  ;;  %v3882_v41 = vshrl.u32 %v12830_v33, 16 }
 0x400   : > { %5746 = vmatmul.mubr.bf16.gmra.mrb[80].mxu0 %v8570_v47  ;;  %v8571_v47 = vcombine.low %v12769_v24, %v12724_v60  ;;  %v3870_v60 = vsel %vm11962_vm9, %v3865_v7, %v3869_v11  ;;  %v2979_v24 = vrot.slane %v2977_v39, 5  ;;  %v3885_v31 = vshll.u32 %v12830_v33, 16 }
 0x401   : > { %v3875_v8 = vrot.slane %v3874_v15, 4  ;;  %5753 = vmatprep.mubr.bf16.mxu0 %v8587_v44  ;;  %v3891_v11 = vshll.u32 %v12833_v36, 16  ;;  %v2990_v15 = vor.u32 %v2989_v0, %v2985_v32  ;;  %v3884_v48 = vrot.slane %v3882_v41, 4  ;;  %v12846_v44 = vld [vmem:[#allocation2 + $0xb4] sm:$0xf] }
 0x402   : > { %v2980_v2 = vor.u32 %v2979_v24, %v2976_v43  ;;  %v3901_v12 = vshll.u32 %v3842_v18, 16  ;;  %v2995_v39 = vrot.slane %v2993_v3, 5  ;;  %v3887_v21 = vrot.slane %v3885_v31, 5  ;;  %v12858_v41 = vld [vmem:[#allocation2 + $0x30] sm:$0xf] }
 0x403   : > { %v3880_v14 = vsel %vm11962_vm9, %v3875_v8, %v3879_v30  ;;  %v3893_v54 = vrot.slane %v3891_v11, 5  ;;  %v2991_v56 = vrot.slane %v2990_v15, 4  ;;  %v8572_v43 = vcombine.low %v12813_v46, %v12755_v63 }
 0x404   : > { %v8670_v57 = vcombine.low %v3870_v60, %v3880_v14  ;;  %v2981_v7 = vrot.slane %v2980_v2, 4  ;;  %v3903_v30 = vrot.slane %v3901_v12, 5  ;;  %v3888_v13 = vor.u32 %v3887_v21, %v3884_v48  ;;  %v12861_v48 = vld [vmem:[#allocation2 + $0x34] sm:$0xf] }
 0x405   : > { %5931 = vmatmul.mubr.bf16.gmra.mrb[72].mxu1 %v8605_v61  ;;  %v3895_v61 = vshrl.u32 %v12833_v36, 16  ;;  %v2998_v60 = vshrl.u32 %v12846_v44, 16  ;;  %v3001_v24 = vshll.u32 %v12846_v44, 16  ;;  %v2996_v18 = vsel %vm11962_vm9, %v2991_v56, %v2995_v39  ;;  %v3843_v39 = vld [vmem:[#allocation2 + $0x38] sm:$0x1] }
 0x406   : > { %6132 = vmatprep.mubr.bf16.mxu1 %v8670_v57  ;;  %v3007_v14 = vshll.u32 %v12789_v20, 16  ;;  %v3011_v0 = vshrl.u32 %v12789_v20, 16  ;;  %v3889_v63 = vrot.slane %v3888_v13, 4  ;;  %v3017_v15 = vshll.u32 %v12791_v17, 16 }
 0x407   : > { %v3897_v8 = vrot.slane %v3895_v61, 4  ;;  %v3000_v46 = vrot.slane %v2998_v60, 4  ;;  %v3003_v2 = vrot.slane %v3001_v24, 5  ;;  %v3906_v21 = vshrl.u32 %v12858_v41, 16 }
 0x408   : > { %5754 = vmatmul.mubr.bf16.gmra.mrb[84].mxu0 %v8571_v47  ;;  %v2986_v47 = vsel %vm11962_vm9, %v2981_v7, %v2985_v32  ;;  %v3009_v31 = vrot.slane %v3007_v14, 5  ;;  %v3013_v11 = vrot.slane %v3011_v0, 4  ;;  %v3894_v61 = vsel %vm11962_vm9, %v3889_v63, %v3893_v54  ;;  %v12873_v14 = vld [vmem:[#allocation2 + $0x10] sm:$0xf] }
 0x409   : > { %v3898_v3 = vor.u32 %v3897_v8, %v3893_v54  ;;  %v8588_v57 = vcombine.low %v2986_v47, %v2996_v18  ;;  %v3004_v12 = vor.u32 %v3003_v2, %v3000_v46  ;;  %v8655_v7 = vcombine.low %v12830_v33, %v12833_v36  ;;  %v3200_v47 = vld [vmem:[#allocation2 + $0xc] sm:$0xf] }
 0x40a   : > { %v3014_v56 = vor.u32 %v3013_v11, %v3009_v31  ;;  %v3019_v8 = vrot.slane %v3017_v15, 5  ;;  %v3909_v17 = vshll.u32 %v12858_v41, 16  ;;  %v3908_v24 = vrot.slane %v3906_v21, 4  ;;  %v12881_v11 = vld [vmem:[#allocation2 + $0x3c] sm:$0xf] }
 0x40b   : > { %v3899_v32 = vrot.slane %v3898_v3, 4  ;;  %5761 = vmatprep.mubr.bf16.mxu0 %v8588_v57  ;;  %v3005_v60 = vrot.slane %v3004_v12, 4  ;;  %v3915_v54 = vshll.u32 %v12861_v48, 16  ;;  %v3919_v33 = vshrl.u32 %v12861_v48, 16 }
 0x40c   : > { %v3015_v18 = vrot.slane %v3014_v56, 4  ;;  %v3911_v3 = vrot.slane %v3909_v17, 5  ;;  %v3925_v36 = vshll.u32 %v3843_v39, 16  ;;  %v8573_v0 = vcombine.low %v12846_v44, %v12789_v20  ;;  %v12886_v44 = vld [vmem:[#allocation2 + $0x40] sm:$0xf] }
 0x40d   : > { %6133 = vmatmul.mubr.bf16.vlgmr.msra.gmra.mrb[76].mxu1 %v8654_v10  ;;  %v3904_v10 = vsel %vm11962_vm9, %v3899_v32, %v3903_v30  ;;  %v3010_v30 = vsel %vm11962_vm9, %v3005_v60, %v3009_v31  ;;  %v3249_v57 = vshrl.u32 %v3200_v47, 16  ;;  %v3921_v2 = vrot.slane %v3919_v33, 4 }
 0x40e   : > { %v8671_v13 = vcombine.low %v3894_v61, %v3904_v10  ;;  %v3020_v63 = vsel %vm11962_vm9, %v3015_v18, %v3019_v8  ;;  %v3912_v46 = vor.u32 %v3911_v3, %v3908_v24  ;;  %v3927_v32 = vrot.slane %v3925_v36, 5 }
 0x40f   : > { %v8589_v15 = vcombine.low %v3010_v30, %v3020_v63  ;;  %v3251_v61 = vrot.slane %v3249_v57, 4  ;;  %v3252_v12 = vshll.u32 %v3200_v47, 16  ;;  %v3258_v39 = vshll.u32 %v12873_v14, 16  ;;  %v3021_v30 = vld [vmem:[#allocation2] sm:$0xe] }
 0x410   : > { %5762 = vmatmul.mubr.bf16.gmra.mrb[88].mxu0 %v8572_v43  ;;  %6140 = vmatprep.mubr.bf16.mxu1 %v8671_v13  ;;  %v3917_v43 = vrot.slane %v3915_v54, 5  ;;  %v3913_v31 = vrot.slane %v3912_v46, 4  ;;  %v3262_v10 = vshrl.u32 %v12873_v14, 16  ;;  %v8606_v20 = vcombine.low %v3200_v47, %v12873_v14  ;;  %v3844_v13 = vld [vmem:[#allocation2 + $0x44] sm:$0x1] }
 0x411   : > { %5769 = vmatprep.mubr.bf16.mxu0 %v8589_v15  ;;  %v3254_v56 = vrot.slane %v3252_v12, 5  ;;  %v12888_v8 = vrot.slane %v3258_v39, 5  ;;  %v8656_v17 = vcombine.low %v12858_v41, %v12861_v48  ;;  %v3930_v60 = vshrl.u32 %v12881_v11, 16  ;;  %v3202_v63 = vld [vmem:[#allocation2 + $0x18] sm:$0xf] }
 0x412   : > { %v3922_v21 = vor.u32 %v3921_v2, %v3917_v43  ;;  %v3264_v54 = vrot.slane %v3262_v10, 4  ;;  %v3933_v47 = vshll.u32 %v12881_v11, 16  ;;  %v3939_v33 = vshll.u32 %v12886_v44, 16 }
 0x413   : > { %v3255_v18 = vor.u32 %v3254_v56, %v3251_v61  ;;  %v3932_v3 = vrot.slane %v3930_v60, 4  ;;  %v3943_v36 = vshrl.u32 %v12886_v44, 16  ;;  %v12903_v61 = vld [vmem:[#allocation2 + $0x1c] sm:$0xf]  ;;  %v3273_v56 = vshrl.u32 %v3202_v63, 16 }
 0x414   : > { %v3923_v24 = vrot.slane %v3922_v21, 4  ;;  %v3265_v48 = vor.u32 %v3264_v54, %v12888_v8  ;;  %v3935_v57 = vrot.slane %v3933_v47, 5  ;;  %v3941_v2 = vrot.slane %v3939_v33, 5 }
 0x415   : > { %6141 = vmatmul.mubr.bf16.gmra.mrb[80].mxu1 %v8655_v7  ;;  %v3918_v7 = vsel %vm11962_vm9, %v3913_v31, %v3917_v43  ;;  %v3949_v43 = vshll.u32 %v3844_v13, 16  ;;  %v12901_v46 = vrot.slane %v3255_v18, 4  ;;  %v3945_v15 = vrot.slane %v3943_v36, 4  ;;  %v12907_v13 = vld [vmem:[#allocation2 + $0x48] sm:$0xf] }
 0x416   : > { %v3928_v41 = vsel %vm11962_vm9, %v3923_v24, %v3927_v32  ;;  %v12905_v12 = vrot.slane %v3265_v48, 4  ;;  %v3936_v39 = vor.u32 %v3935_v57, %v3932_v3  ;;  %v8510_v21 = vrot.slane %v3021_v30, 9  ;;  %v10632_v32 = vld [vmem:[#allocation2 + $0x4] sm:$0xf]  ;;  %v12913_v18 = vld [vmem:[#allocation2 + $0x4c] sm:$0xf] }
 0x417   : > { %v3951_v31 = vrot.slane %v3949_v43, 5  ;;  %v3946_v10 = vor.u32 %v3945_v15, %v3941_v2  ;;  %v3276_v60 = vshll.u32 %v3202_v63, 16  ;;  %v8607_v54 = vcombine.low %v3202_v63, %v12903_v61 }
 0x418   : > { %5770 = vmatmul.mubr.bf16.gmra.mrb[92].mxu0 %v8573_v0  ;;  %v8672_v0 = vcombine.low %v3918_v7, %v3928_v41  ;;  %v3937_v7 = vrot.slane %v3936_v39, 4  ;;  %v8657_v47 = vcombine.low %v12881_v11, %v12886_v44  ;;  %v12917_v30 = vrot.slane %v3273_v56, 4  ;;  %v3845_v41 = vld [vmem:[#allocation2 + $0x50] sm:$0x1]  ;;  %v3022_v11 = vld [vmem:[#allocation2 + $0xc] sm:$0xe] }
 0x419   : > { %5810 = vmatprep.mubr.bf16.mxu0 %v8606_v20  ;;  %v3090_v20 = vrot.slane %v10632_v32, 5  ;;  %v3947_v3 = vrot.slane %v3946_v10, 4  ;;  %v12921_v48 = vrot.slane %v3276_v60, 5  ;;  %v3954_v57 = vshrl.u32 %v12907_v13, 16  ;;  %v12936_v39 = vld [vmem:[#allocation2 + $0x24] sm:$0xf] }
 0x41a   : > { %6148 = vmatprep.mubr.bf16.mxu1 %v8672_v0  ;;  %v3957_v43 = vshll.u32 %v12907_v13, 16  ;;  %v10054_v0 = vld [vmem:[%s14889_s7 + $0x100] sm:$0xff]   ;;  %v3967_v15 = vshrl.u32 %v12913_v18, 16  ;;  %v3973_v60 = vshll.u32 %v3845_v41, 16  ;;  %v3300_v41 = vshll.u32 %v12936_v39, 16 }
 0x41b   : > { %v3091_v33 = vsel %vm12486_vm2, %v8510_v21, %v3090_v20  ;;  %v3092_v36 = vrot.slane %v3090_v20, 4  ;;  %v3952_v44 = vsel %vm11962_vm9, %v3947_v3, %v3951_v31  ;;  %v10057_v31 = vld [vmem:[%s14889_s7 + $0x148] sm:$0xff]   ;;  %v3956_v35 = vrot.slane %v3954_v57, 4 }
 0x41c   : > { %v3959_v32 = vrot.slane %v3957_v43, 5  ;;  %v12941_v20 = vld [vmem:[#allocation2 + $0x28] sm:$0xf]  ;;  %v3969_v56 = vrot.slane %v3967_v15, 4  ;;  %v3975_v57 = vrot.slane %v3973_v60, 5  ;;  %v10060_v15 = vld [vmem:[%s14889_s7 + $0x150] sm:$0xff]  }
 0x41d   : > { %6149 = vmatmul.mubr.bf16.gmra.mrb[84].mxu1 %v8656_v17  ;;  %v3942_v17 = vsel %vm11962_vm9, %v3937_v7, %v3941_v2  ;;  %v3094_v63 = vsel %vm12486_vm2, %v3092_v36, %v3093_v16  ;;  %v3963_v2 = vshll.u32 %v12913_v18, 16  ;;  %v8511_v7 = vrot.slane %v3022_v11, 9  ;;  %v10633_v36 = vld [vmem:[#allocation2 + $0x10] sm:$0xf]  ;;  %v10058_v43 = vld [vmem:[%s14889_s7 + $0x108] sm:$0xff]  }
 0x41e   : > { %v8673_v21 = vcombine.low %v3942_v17, %v3952_v44  ;;  %v8590_v10 = vcombine.low %v3091_v33, %v3094_v63  ;;  %v3960_v3 = vor.u32 %v3959_v32, %v3956_v35  ;;  %v3097_v24 = vrot.slane %v10633_v36, 5  ;;  %v12949_v63 = vld [vmem:[#allocation2 + $0x54] sm:$0xf]  ;;  %v3846_v32 = vld [vmem:[#allocation2 + $0x5c] sm:$0x1] }
 0x41f   : > { %v3965_v16 = vrot.slane %v3963_v2, 5  ;;  %v3100_v17 = vrot.slane %v10634_v52, 5  ;;  %v3297_v33 = vshrl.u32 %v12936_v39, 16  ;;  %v12960_v35 = vrot.slane %v3300_v41, 5  ;;  %v12984_v11 = vld [vmem:[#allocation2 + $0x34] sm:$0xf] }
 0x420   : > { %6156 = vmatprep.mubr.bf16.mxu1 %v8673_v21  ;;  %5811 = vmatmul.mubr.bf16.vlgmr.msra.gmra.mrb[96].mxu0 %v8590_v10  ;;  %v3961_v2 = vrot.slane %v3960_v3, 4  ;;  %v3098_v52 = vsel %vm12486_vm2, %v8511_v7, %v3097_v24  ;;  %v12958_v21 = vld [vmem:[#allocation2 + $0x58] sm:$0xf]  ;;  %v3978_v60 = vshrl.u32 %v12949_v63, 16  ;;  %v3981_v7 = vshll.u32 %v12949_v63, 16 }
 0x421   : > { %9188 = vmatpush3.bf16.msra.mxu0 %v10054_v0  ;;  %5818 = vmatprep.mubr.bf16.mxu0 %v8607_v54  ;;  %v3970_v44 = vor.u32 %v3969_v56, %v3965_v16  ;;  %v3099_v0 = vrot.slane %v3097_v24, 4  ;;  %v12953_v54 = vrot.slane %v3297_v33, 4  ;;  %v3023_v3 = vld [vmem:[#allocation2 + $0x18] sm:$0xe]  ;;  %v12979_v33 = vld [vmem:[#allocation2 + $0x30] sm:$0xf] }
 0x422   : > { %9189 = vmatprep.subr.bf16.mxu0 %v10057_v31  ;;  %v8658_v31 = vcombine.low %v12907_v13, %v12913_v18  ;;  %v3966_v24 = vsel %vm11962_vm9, %v3961_v2, %v3965_v16  ;;  %v10061_v13 = vld [vmem:[%s14889_s7 + $0x110] sm:$0xff]   ;;  %v3987_v18 = vshll.u32 %v12958_v21, 16  ;;  %v3991_v16 = vshrl.u32 %v12958_v21, 16 }
 0x423   : > { %v3971_v10 = vrot.slane %v3970_v44, 4  ;;  %v3101_v56 = vsel %vm12486_vm2, %v3099_v0, %v3100_v17  ;;  %v3980_v44 = vrot.slane %v3978_v60, 4  ;;  %v3983_v41 = vrot.slane %v3981_v7, 5 }
 0x424   : > { %v3997_v2 = vshll.u32 %v3846_v32, 16  ;;  %v8512_v0 = vrot.slane %v3023_v3, 9  ;;  %v10636_v32 = vld [vmem:[#allocation2 + $0x20] sm:$0x1]  ;;  %v3321_v60 = vshrl.u32 %v12979_v33, 16 }
 0x425   : > { %6157 = vmatmul.mubr.bf16.gmra.mrb[88].mxu1 %v8657_v47  ;;  %v8608_v47 = vcombine.low %v12936_v39, %v12941_v20  ;;  %v3976_v36 = vsel %vm11962_vm9, %v3971_v10, %v3975_v57  ;;  %9190 = vmatpush3.bf16.msra.mxu0 %v10058_v43  ;;  %v8591_v39 = vcombine.low %v3098_v52, %v3101_v56  ;;  %v10063_v57 = vld [vmem:[%s14889_s7 + $0x158] sm:$0xff]   ;;  %v3989_v43 = vrot.slane %v3987_v18, 5 }
 0x426   : > { %v8674_v17 = vcombine.low %v3966_v24, %v3976_v36  ;;  %9191 = vmatprep.subr.bf16.mxu0 %v10060_v15  ;;  %v3993_v52 = vrot.slane %v3991_v16, 4  ;;  %v10635_v10 = vld [vmem:[#allocation2 + $0x1c] sm:$0xf]  ;;  %v3984_v34 = vor.u32 %v3983_v41, %v3980_v44  ;;  %v3999_v25 = vrot.slane %v3997_v2, 5  ;;  %v12995_v16 = vld [vmem:[#allocation2 + $0x64] sm:$0xf] }
 0x427   : > { %v3104_v56 = vrot.slane %v10635_v10, 5  ;;  %v10064_v15 = vld [vmem:[%s14889_s7 + $0x118] sm:$0xff]   ;;  %v3107_v24 = vrot.slane %v10636_v32, 5  ;;  %v3324_v18 = vshll.u32 %v12979_v33, 16  ;;  %v12997_v44 = vrot.slane %v3321_v60, 4 }
 0x428   : > { %6164 = vmatprep.mubr.bf16.mxu1 %v8674_v17  ;;  %5819 = vmatmul.mubr.bf16.gmra.mrb[100].mxu0 %v8591_v39  ;;  %v3994_v7 = vor.u32 %v3993_v52, %v3989_v43  ;;  %v12993_v39 = vld [vmem:[#allocation2 + $0x60] sm:$0xf]  ;;  %v3985_v17 = vrot.slane %v3984_v34, 4  ;;  %v3847_v2 = vld [vmem:[#allocation2 + $0x68] sm:$0x1]  ;;  %v8659_v34 = vcombine.low %v12949_v63, %v12958_v21  ;;  %v4015_v63 = vshrl.u32 %v12995_v16, 16 }
 0x429   : > { %5826 = vmatprep.mubr.bf16.mxu0 %v8608_v47  ;;  %9192 = vmatpush3.bf16.msra.mxu0 %v10061_v13  ;;  %v3105_v3 = vsel %vm12486_vm2, %v8512_v0, %v3104_v56  ;;  %v3106_v36 = vrot.slane %v3104_v56, 4  ;;  %v8609_v47 = vcombine.low %v12979_v33, %v12984_v11  ;;  %v10066_v13 = vld [vmem:[%s14889_s7 + $0x160] sm:$0xff]   ;;  %v13007_v10 = vrot.slane %v3324_v18, 5 }
 0x42a   : > { %9193 = vmatprep.subr.bf16.mxu0 %v10063_v57  ;;  %v3995_v52 = vrot.slane %v3994_v7, 4  ;;  %v3990_v57 = vsel %vm11962_vm9, %v3985_v17, %v3989_v43  ;;  %v4002_v33 = vshrl.u32 %v12993_v39, 16  ;;  %v4005_v32 = vshll.u32 %v12993_v39, 16 }
 0x42b   : > { %v3108_v0 = vsel %vm12486_vm2, %v3106_v36, %v3107_v24  ;;  %v10068_v24 = vld [vmem:[%s14889_s7 + $0x120] sm:$0xff]   ;;  %v4011_v7 = vshll.u32 %v12995_v16, 16  ;;  %v4021_v21 = vshll.u32 %v3847_v2, 16  ;;  %v13022_v36 = vld [vmem:[#allocation2 + $0x3c] sm:$0xf] }
 0x42c   : > { %v8592_v56 = vcombine.low %v3105_v3, %v3108_v0  ;;  %v4000_v60 = vsel %vm11962_vm9, %v3995_v52, %v3999_v25  ;;  %v4004_v3 = vrot.slane %v4002_v33, 4  ;;  %v4007_v18 = vrot.slane %v4005_v32, 5  ;;  %v10069_v25 = vld [vmem:[%s14889_s7 + $0x168] sm:$0xff]  }
 0x42d   : > { %6165 = vmatmul.mubr.bf16.gmra.mrb[92].mxu1 %v8658_v31  ;;  %v3024_v31 = vld [vmem:[#allocation2 + $0x24] sm:$0xe]  ;;  %9194 = vmatpush3.bf16.msra.mxu0 %v10064_v15  ;;  %v8675_v43 = vcombine.low %v3990_v57, %v4000_v60  ;;  %v13027_v15 = vld [vmem:[#allocation2 + $0x40] sm:$0xf]  ;;  %v4013_v52 = vrot.slane %v4011_v7, 5  ;;  %v4017_v0 = vrot.slane %v4015_v63, 4 }
 0x42e   : > { %9195 = vmatprep.subr.bf16.mxu0 %v10066_v13  ;;  %v8513_v17 = vrot.slane %v3024_v31, 9  ;;  %v4023_v41 = vrot.slane %v4021_v21, 5  ;;  %v4008_v2 = vor.u32 %v4007_v18, %v4004_v3  ;;  %v3114_v57 = vrot.slane %v10638_v50, 5  ;;  %v13031_v33 = vld [vmem:[#allocation2 + $0x6c] sm:$0xf] }
 0x42f   : > { %6172 = vmatprep.mubr.bf16.mxu1 %v8675_v43  ;;  %v3345_v13 = vshrl.u32 %v13022_v36, 16  ;;  %v3348_v31 = vshll.u32 %v13022_v36, 16  ;;  %v4018_v32 = vor.u32 %v4017_v0, %v4013_v52  ;;  %v3113_v7 = vrot.slane %v3111_v40, 4  ;;  %v13039_v50 = vld [vmem:[#allocation2 + $0x70] sm:$0xf] }
 0x430   : > { %5827 = vmatmul.mubr.bf16.gmra.mrb[104].mxu0 %v8592_v56  ;;  %v3112_v60 = vsel %vm12486_vm2, %v8513_v17, %v3111_v40  ;;  %v10071_v56 = vld [vmem:[%s14889_s7 + $0x128] sm:$0xff]   ;;  %v4009_v63 = vrot.slane %v4008_v2, 4  ;;  %v3848_v43 = vld [vmem:[#allocation2 + $0x74] sm:$0x1]  ;;  %v4026_v17 = vshrl.u32 %v13031_v33, 16 }
 0x431   : > { %5834 = vmatprep.mubr.bf16.mxu0 %v8609_v47  ;;  %9196 = vmatpush3.bf16.msra.mxu0 %v10068_v24  ;;  %v13041_v21 = vrot.slane %v3345_v13, 4  ;;  %v13043_v47 = vrot.slane %v3348_v31, 5  ;;  %v8610_v24 = vcombine.low %v13022_v36, %v13027_v15  ;;  %v10073_v40 = vld [vmem:[%s14889_s7 + $0x170] sm:$0xff]   ;;  %v4019_v3 = vrot.slane %v4018_v32, 4 }
 0x432   : > { %9197 = vmatprep.subr.bf16.mxu0 %v10069_v25  ;;  %v3115_v18 = vsel %vm12486_vm2, %v3113_v7, %v3114_v57  ;;  %v3025_v25 = vld [vmem:[#allocation2 + $0x30] sm:$0xe]  ;;  %v4014_v0 = vsel %vm11962_vm9, %v4009_v63, %v4013_v52  ;;  %v4029_v36 = vshll.u32 %v13031_v33, 16  ;;  %v4035_v13 = vshll.u32 %v13039_v50, 16  ;;  %v3232_v31 = vld [vmem:[#allocation2 + $0x14] sm:$0x1] }
 0x433   : > { %v8593_v2 = vcombine.low %v3112_v60, %v3115_v18  ;;  %v4024_v32 = vsel %vm11962_vm9, %v4019_v3, %v4023_v41  ;;  %v4028_v57 = vrot.slane %v4026_v17, 4  ;;  %v4039_v7 = vshrl.u32 %v13039_v50, 16  ;;  %v10639_v3 = vld [vmem:[#allocation2 + $0x34] sm:$0xf] }
 0x434   : > { %v8676_v52 = vcombine.low %v4014_v0, %v4024_v32  ;;  %v4031_v60 = vrot.slane %v4029_v36, 5  ;;  %v4037_v63 = vrot.slane %v4035_v13, 5  ;;  %v8514_v18 = vrot.slane %v3025_v25, 9  ;;  %v13069_v36 = vld [vmem:[#allocation2 + $0x78] sm:$0xf] }
 0x435   : > { %6173 = vmatmul.mubr.bf16.gmra.mrb[96].mxu1 %v8659_v34  ;;  %v8660_v34 = vcombine.low %v12993_v39, %v12995_v16  ;;  %9198 = vmatpush3.bf16.msra.mxu0 %v10071_v56  ;;  %v4045_v39 = vshll.u32 %v3848_v43, 16  ;;  %v10074_v16 = vld [vmem:[%s14889_s7 + $0x130] sm:$0xff]   ;;  %v4041_v41 = vrot.slane %v4039_v7, 4  ;;  %v3118_v17 = vrot.slane %v10639_v3, 5  ;;  %v13083_v7 = vld [vmem:[%s14889_s7 + $0x200] sm:$0xff]  }
 0x436   : > { %9199 = vmatprep.subr.bf16.mxu0 %v10073_v40  ;;  %v3121_v43 = vrot.slane %v10640_v9, 5  ;;  %6180 = vmatprep.mubr.bf16.mxu1 %v8676_v52  ;;  %v4032_v4 = vor.u32 %v4031_v60, %v4028_v57  ;;  %v3268_v6 = vshll.u32 %v3232_v31, 16  ;;  %v3698_v0 = vrot.slane %v12873_v14, 5  ;;  %v10076_v9 = vld [vmem:[%s14889_s7 + $0x138] sm:$0xff]  }
 0x437   : > { %v4047_v56 = vrot.slane %v4045_v39, 5  ;;  %v4042_v40 = vor.u32 %v4041_v41, %v4037_v63  ;;  %v3119_v25 = vsel %vm12486_vm2, %v8514_v18, %v3118_v17  ;;  %v3120_v13 = vrot.slane %v3118_v17, 4  ;;  %v3633_v60 = vld [vmem:[#allocation2 + $0x18] sm:$0xe] }
 0x438   : > { %5835 = vmatmul.mubr.bf16.gmra.mrb[108].mxu0 %v8593_v2  ;;  %v3701_v32 = vrot.slane %v3232_v31, 5  ;;  %v4033_v2 = vrot.slane %v4032_v4, 4  ;;  %v3270_v57 = vrot.slane %v3268_v6, 5  ;;  %v3699_v14 = vsel %vm12486_vm2, %v8526_v1, %v3698_v0  ;;  %v3849_v6 = vld [vmem:[#allocation2 + $0x80] sm:$0x1] }
 0x439   : > { %5842 = vmatprep.mubr.bf16.mxu0 %v8610_v24  ;;  %9200 = vmatpush3.bf16.msra.mxu0 %v10074_v16  ;;  %v3700_v49 = vrot.slane %v3698_v0, 4  ;;  %v13078_v24 = vld [vmem:[#allocation2 + $0x7c] sm:$0xf]  ;;  %v4043_v31 = vrot.slane %v4042_v40, 4  ;;  %v3122_v39 = vsel %vm12486_vm2, %v3120_v13, %v3121_v43  ;;  %v8661_v4 = vcombine.low %v13031_v33, %v13039_v50  ;;  %v13098_v50 = vld [vmem:[#allocation2 + $0x20] sm:$0x1] }
 0x43a   : > { %9201 = vmatprep.subr.bf16.mxu0 %v10075_v42  ;;  %v4038_v1 = vsel %vm11962_vm9, %v4033_v2, %v4037_v63  ;;  %v8594_v42 = vcombine.low %v3119_v25, %v3122_v39  ;;  %v4053_v52 = vshll.u32 %v13069_v36, 16  ;;  %v4059_v33 = vshll.u32 %v13078_v24, 16  ;;  %v13102_v40 = vld [vmem:[#allocation2 + $0x84] sm:$0xf] }
 0x43b   : > { %v3702_v16 = vsel %vm12486_vm2, %v3700_v49, %v3701_v32  ;;  %v4048_v18 = vsel %vm11962_vm9, %v4043_v31, %v4047_v56  ;;  %v4063_v63 = vshrl.u32 %v13078_v24, 16  ;;  %v4069_v0 = vshll.u32 %v3849_v6, 16 }
 0x43c   : > { %v8638_v41 = vcombine.low %v3699_v14, %v3702_v16  ;;  %v8677_v17 = vcombine.low %v4038_v1, %v4048_v18  ;;  %v4055_v43 = vrot.slane %v4053_v52, 5  ;;  %v4061_v25 = vrot.slane %v4059_v33, 5 }
 0x43d   : > { %6181 = vmatmul.mubr.bf16.gmra.mrb[100].mxu1 %v8660_v34  ;;  %v4050_v34 = vshrl.u32 %v13069_v36, 16  ;;  %9202 = vmatpush3.bf16.msra.mxu0 %v10076_v9  ;;  %v3261_v56 = vsel %vm11962_vm9, %v12901_v46, %v12888_v8  ;;  %v3271_v13 = vsel %vm11962_vm9, %v12905_v12, %v3270_v57  ;;  %v8527_v32 = vrot.slane %v3633_v60, 9  ;;  %v13111_v9 = vld [vmem:[#allocation2 + $0x88] sm:$0xf] }
 0x43e   : > { %9670 = vmatprep.subr.bf16.mxu0 %v13083_v7  ;;  %6188 = vmatprep.mubr.bf16.mxu1 %v8677_v17  ;;  %v4065_v14 = vrot.slane %v4063_v63, 4  ;;  %v4071_v49 = vrot.slane %v4069_v0, 5  ;;  %v8622_v31 = vcombine.low %v3261_v56, %v3271_v13  ;;  %v3705_v39 = vrot.slane %v12903_v61, 5 }
 0x43f   : > { %v4052_v3 = vrot.slane %v4050_v34, 4  ;;  %v3708_v6 = vrot.slane %v13098_v50, 5  ;;  %v8662_v8 = vcombine.low %v13069_v36, %v13078_v24  ;;  %v4074_v46 = vshrl.u32 %v13102_v40, 16  ;;  %v3850_v34 = vld [vmem:[#allocation2 + $0x8c] sm:$0x1] }
 0x440   : > { %5843 = vmatmul.mubr.bf16.gmra.mrb[112].mxu0 %v8594_v42  ;;  %v4066_v57 = vor.u32 %v4065_v14, %v4061_v25  ;;  %v4077_v1 = vshll.u32 %v13102_v40, 16  ;;  %v4083_v42 = vshll.u32 %v13111_v9, 16  ;;  %v3706_v16 = vsel %vm12486_vm2, %v8527_v32, %v3705_v39  ;;  %v13132_v32 = vld [vmem:[#allocation2 + $0x2c] sm:$0x1] }
 0x441   : > { %v4056_v2 = vor.u32 %v4055_v43, %v4052_v3  ;;  %5971 = vmatprep.mubr.bf16.mxu0 %v8638_v41  ;;  %v3707_v52 = vrot.slane %v3705_v39, 4  ;;  %v4076_v60 = vrot.slane %v4074_v46, 4  ;;  %v4087_v18 = vshrl.u32 %v13111_v9, 16 }
 0x442   : > { %v4067_v24 = vrot.slane %v4066_v57, 4  ;;  %v4079_v41 = vrot.slane %v4077_v1, 5  ;;  %v4093_v17 = vshll.u32 %v3850_v34, 16  ;;  %v3279_v43 = vor.u32 %v12921_v48, %v12917_v30 }
 0x443   : > { %v4057_v12 = vrot.slane %v4056_v2, 4  ;;  %v3709_v3 = vsel %vm12486_vm2, %v3707_v52, %v3708_v6  ;;  %v4089_v33 = vrot.slane %v4087_v18, 4  ;;  %v3282_v13 = vshll.u32 %v12903_v61, 16  ;;  %v10081_v6 = vld [vmem:[%s14889_s7 + $0x208] sm:$0xff]   ;;  %v13143_v52 = vld [vmem:[#allocation2 + $0x90] sm:$0xf] }
 0x444   : > { %v4072_v63 = vsel %vm11962_vm9, %v4067_v24, %v4071_v49  ;;  %v8639_v0 = vcombine.low %v3706_v16, %v3709_v3  ;;  %v4080_v56 = vor.u32 %v4079_v41, %v4076_v60  ;;  %v4095_v39 = vrot.slane %v4093_v17, 5  ;;  %v13149_v18 = vld [vmem:[#allocation2 + $0x94] sm:$0xf] }
 0x445   : > { %6189 = vmatmul.mubr.bf16.gmra.mrb[104].mxu1 %v8661_v4  ;;  %v4062_v36 = vsel %vm11962_vm9, %v4057_v12, %v4061_v25  ;;  %v4085_v4 = vrot.slane %v4083_v42, 5  ;;  %v3634_v25 = vld [vmem:[#allocation2 + $0x24] sm:$0xe]  ;;  %v3280_v46 = vrot.slane %v3279_v43, 4  ;;  %v3284_v48 = vrot.slane %v3282_v13, 5 }
 0x446   : > { %v8678_v2 = vcombine.low %v4062_v36, %v4072_v63  ;;  %v4081_v30 = vrot.slane %v4080_v56, 4  ;;  %v15014_v49 = vshrl.u32 %v12903_v61, 16  ;;  %v3292_v57 = vshll.u32 %v13098_v50, 16  ;;  %v10084_v36 = vld [vmem:[%s14889_s7 + $0x210] sm:$0xff]  }
 0x447   : > { %v4090_v14 = vor.u32 %v4089_v33, %v4085_v4  ;;  %v8528_v1 = vrot.slane %v3634_v25, 9  ;;  %v3712_v42 = vrot.slane %v12941_v20, 5  ;;  %v3715_v16 = vrot.slane %v13132_v32, 5 }
 0x448   : > { %5972 = vmatmul.mubr.bf16.vlgmr.msra.gmra.mrb[116].mxu0 %v8622_v31  ;;  %v3288_v12 = vrot.slane %v15014_v49, 4  ;;  %6196 = vmatprep.mubr.bf16.mxu1 %v8678_v2  ;;  %v4086_v31 = vsel %vm11962_vm9, %v4081_v30, %v4085_v4  ;;  %v3285_v61 = vsel %vm11962_vm9, %v3280_v46, %v3284_v48  ;;  %v3294_v60 = vrot.slane %v3292_v57, 5  ;;  %v13168_v49 = vld [vmem:[#allocation2 + $0x38] sm:$0x1] }
 0x449   : > { %9671 = vmatpush3.bf16.msra.mxu0 %v13083_v7  ;;  %v4091_v34 = vrot.slane %v4090_v14, 4  ;;  %5979 = vmatprep.mubr.bf16.mxu0 %v8639_v0  ;;  %v3851_v7 = vld [vmem:[#allocation2 + $0x98] sm:$0x1]  ;;  %v3714_v41 = vrot.slane %v3712_v42, 4  ;;  %v8663_v4 = vcombine.low %v13102_v40, %v13111_v9  ;;  %v4098_v17 = vshrl.u32 %v13143_v52, 16 }
 0x44a   : > { %v3289_v50 = vor.u32 %v3288_v12, %v3284_v48  ;;  %9672 = vmatprep.subr.bf16.mxu0 %v10081_v6  ;;  %v4101_v43 = vshll.u32 %v13143_v52, 16  ;;  %v4107_v0 = vshll.u32 %v13149_v18, 16  ;;  %v4111_v56 = vshrl.u32 %v13149_v18, 16  ;;  %v3635_v14 = vld [vmem:[#allocation2 + $0x30] sm:$0xe] }
 0x44b   : > { %v4096_v24 = vsel %vm11962_vm9, %v4091_v34, %v4095_v39  ;;  %v3716_v63 = vsel %vm12486_vm2, %v3714_v41, %v3715_v16  ;;  %v4117_v13 = vshll.u32 %v3851_v7, 16  ;;  %v4100_v25 = vrot.slane %v4098_v17, 4 }
 0x44c   : > { %v8679_v3 = vcombine.low %v4086_v31, %v4096_v24  ;;  %v3290_v33 = vrot.slane %v3289_v50, 4  ;;  %v4103_v2 = vrot.slane %v4101_v43, 5  ;;  %v4109_v46 = vrot.slane %v4107_v0, 5  ;;  %v10089_v0 = vld [vmem:[%s14889_s7 + $0x220] sm:$0xff]  }
 0x44d   : > { %6197 = vmatmul.mubr.bf16.gmra.mrb[108].mxu1 %v8662_v8  ;;  %v3713_v8 = vsel %vm12486_vm2, %v8528_v1, %v3712_v42  ;;  %9673 = vmatpush3.bf16.msra.mxu0 %v10081_v6  ;;  %v4113_v30 = vrot.slane %v4111_v56, 4  ;;  %v4119_v48 = vrot.slane %v4117_v13, 5  ;;  %v3303_v57 = vor.u32 %v12960_v35, %v12953_v54  ;;  %v10087_v42 = vld [vmem:[%s14889_s7 + $0x218] sm:$0xff]  }
 0x44e   : > { %6204 = vmatprep.mubr.bf16.mxu1 %v8679_v3  ;;  %v3295_v40 = vsel %vm11962_vm9, %v3290_v33, %v3294_v60  ;;  %v8640_v9 = vcombine.low %v3713_v8, %v3716_v63  ;;  %9674 = vmatprep.subr.bf16.mxu0 %v10084_v36  ;;  %v4104_v12 = vor.u32 %v4103_v2, %v4100_v25  ;;  %v3306_v6 = vshll.u32 %v12941_v20, 16  ;;  %v13185_v33 = vld [vmem:[#allocation2 + $0xa0] sm:$0xf]  ;;  %v3852_v63 = vld [vmem:[#allocation2 + $0xa4] sm:$0x1] }
 0x44f   : > { %v8623_v39 = vcombine.low %v3285_v61, %v3295_v40  ;;  %v15015_v34 = vshrl.u32 %v12941_v20, 16  ;;  %v4114_v16 = vor.u32 %v4113_v30, %v4109_v46  ;;  %v3316_v31 = vshll.u32 %v13132_v32, 16  ;;  %v13181_v20 = vld [vmem:[#allocation2 + $0x9c] sm:$0xf] }
 0x450   : > { %v8529_v61 = vrot.slane %v3635_v14, 9  ;;  %v3719_v50 = vrot.slane %v12984_v11, 5  ;;  %v4105_v60 = vrot.slane %v4104_v12, 4  ;;  %v3304_v54 = vrot.slane %v3303_v57, 4 }
 0x451   : > { %v3312_v1 = vrot.slane %v15015_v34, 4  ;;  %5980 = vmatmul.mubr.bf16.gmra.mrb[120].mxu0 %v8623_v39  ;;  %v3308_v35 = vrot.slane %v3306_v6, 5  ;;  %v3722_v7 = vrot.slane %v13168_v49, 5  ;;  %v4115_v24 = vrot.slane %v4114_v16, 4  ;;  %v3636_v6 = vld [vmem:[#allocation2 + $0x3c] sm:$0xe] }
 0x452   : > { %5987 = vmatprep.mubr.bf16.mxu0 %v8640_v9  ;;  %v3318_v8 = vrot.slane %v3316_v31, 5  ;;  %v3720_v41 = vsel %vm12486_vm2, %v8529_v61, %v3719_v50  ;;  %v3721_v3 = vrot.slane %v3719_v50, 4  ;;  %9675 = vmatpush3.bf16.msra.mxu0 %v10084_v36  ;;  %v4110_v32 = vsel %vm11962_vm9, %v4105_v60, %v4109_v46  ;;  %v13209_v61 = vld [vmem:[#allocation2 + $0x44] sm:$0x1] }
 0x453   : > { %v3313_v17 = vor.u32 %v3312_v1, %v3308_v35  ;;  %v8664_v43 = vcombine.low %v13143_v52, %v13149_v18  ;;  %9676 = vmatprep.subr.bf16.mxu0 %v10087_v42  ;;  %v4120_v56 = vsel %vm11962_vm9, %v4115_v24, %v4119_v48  ;;  %v4122_v13 = vshrl.u32 %v13181_v20, 16 }
 0x454   : > { %v3723_v36 = vsel %vm12486_vm2, %v3721_v3, %v3722_v7  ;;  %v4125_v40 = vshll.u32 %v13181_v20, 16  ;;  %v8680_v9 = vcombine.low %v4110_v32, %v4120_v56  ;;  %v4131_v52 = vshll.u32 %v13185_v33, 16 }
 0x455   : > { %6205 = vmatmul.mubr.bf16.gmra.mrb[112].mxu1 %v8663_v4  ;;  %v3309_v4 = vsel %vm11962_vm9, %v3304_v54, %v3308_v35  ;;  %v3314_v25 = vrot.slane %v3313_v17, 4  ;;  %v8641_v2 = vcombine.low %v3720_v41, %v3723_v36  ;;  %v4124_v18 = vrot.slane %v4122_v13, 4  ;;  %v13218_v41 = vld [vmem:[#allocation2 + $0xa8] sm:$0xf]  ;;  %v10091_v36 = vld [vmem:[%s14889_s7 + $0x230] sm:$0xff]  }
 0x456   : > { %v4127_v14 = vrot.slane %v4125_v40, 5  ;;  %v4135_v39 = vshrl.u32 %v13185_v33, 16  ;;  %v4141_v46 = vshll.u32 %v3852_v63, 16  ;;  %9677 = vmatpush3.bf16.msra.mxu0 %v10087_v42  ;;  %6212 = vmatprep.mubr.bf16.mxu1 %v8680_v9  ;;  %v4133_v48 = vrot.slane %v4131_v52, 5  ;;  %v10090_v42 = vld [vmem:[%s14889_s7 + $0x228] sm:$0xff]  }
 0x457   : > { %v3319_v30 = vsel %vm11962_vm9, %v3314_v25, %v3318_v8  ;;  %v3327_v12 = vor.u32 %v13007_v10, %v12997_v44  ;;  %v3330_v57 = vshll.u32 %v12984_v11, 16  ;;  %9678 = vmatprep.subr.bf16.mxu0 %v10089_v0  ;;  %v15016_v54 = vshrl.u32 %v12984_v11, 16  ;;  %v13223_v11 = vld [vmem:[#allocation2 + $0xac] sm:$0xf]  ;;  %v3853_v52 = vld [vmem:[#allocation2 + $0xb0] sm:$0x1] }
 0x458   : > { %v8624_v34 = vcombine.low %v3309_v4, %v3319_v30  ;;  %v4128_v1 = vor.u32 %v4127_v14, %v4124_v18  ;;  %v4137_v16 = vrot.slane %v4135_v39, 4  ;;  %v4143_v31 = vrot.slane %v4141_v46, 5  ;;  %v3637_v30 = vld [vmem:[#allocation2 + $0x48] sm:$0xe] }
 0x459   : > { %v3328_v50 = vrot.slane %v3327_v12, 4  ;;  %v3332_v60 = vrot.slane %v3330_v57, 5  ;;  %v3336_v44 = vrot.slane %v15016_v54, 4  ;;  %v3340_v10 = vshll.u32 %v13168_v49, 16 }
 0x45a   : > { %5988 = vmatmul.mubr.bf16.gmra.mrb[124].mxu0 %v8624_v34  ;;  %v4129_v35 = vrot.slane %v4128_v1, 4  ;;  %v4138_v7 = vor.u32 %v4137_v16, %v4133_v48  ;;  %v8530_v24 = vrot.slane %v3636_v6, 9  ;;  %v3726_v8 = vrot.slane %v13027_v15, 5  ;;  %v10092_v34 = vld [vmem:[%s14889_s7 + $0x238] sm:$0xff]  }
 0x45b   : > { %5995 = vmatprep.mubr.bf16.mxu0 %v8641_v2  ;;  %v3333_v3 = vsel %vm11962_vm9, %v3328_v50, %v3332_v60  ;;  %v3337_v32 = vor.u32 %v3336_v44, %v3332_v60  ;;  %v3342_v4 = vrot.slane %v3340_v10, 5  ;;  %v3729_v17 = vrot.slane %v13209_v61, 5  ;;  %9679 = vmatpush3.bf16.msra.mxu0 %v10089_v0 }
 0x45c   : > { %v4134_v49 = vsel %vm11962_vm9, %v4129_v35, %v4133_v48  ;;  %v3727_v63 = vsel %vm12486_vm2, %v8530_v24, %v3726_v8  ;;  %v3728_v56 = vrot.slane %v3726_v8, 4  ;;  %9680 = vmatprep.subr.bf16.mxu0 %v10090_v42  ;;  %v8665_v40 = vcombine.low %v13181_v20, %v13185_v33 }
 0x45d   : > { %6213 = vmatmul.mubr.bf16.gmra.mrb[116].mxu1 %v8664_v43  ;;  %v4139_v43 = vrot.slane %v4138_v7, 4  ;;  %v3338_v13 = vrot.slane %v3337_v32, 4  ;;  %v4146_v9 = vshrl.u32 %v13218_v41, 16  ;;  %v4149_v0 = vshll.u32 %v13218_v41, 16 }
 0x45e   : > { %v3730_v2 = vsel %vm12486_vm2, %v3728_v56, %v3729_v17  ;;  %v4155_v18 = vshll.u32 %v13223_v11, 16  ;;  %v4159_v14 = vshrl.u32 %v13223_v11, 16  ;;  %v4165_v1 = vshll.u32 %v3853_v52, 16  ;;  %v13262_v56 = vld [vmem:[#allocation2 + $0xb8] sm:$0xf] }
 0x45f   : > { %v4144_v25 = vsel %vm11962_vm9, %v4139_v43, %v4143_v31  ;;  %v3343_v46 = vsel %vm11962_vm9, %v3338_v13, %v3342_v4  ;;  %v8642_v20 = vcombine.low %v3727_v63, %v3730_v2  ;;  %v4148_v33 = vrot.slane %v4146_v9, 4  ;;  %9681 = vmatpush3.bf16.msra.mxu0 %v10090_v42  ;;  %v13252_v42 = vld [vmem:[#allocation2 + $0x50] sm:$0x1]  ;;  %v3854_v9 = vld [vmem:[#allocation2 + $0xbc] sm:$0x1] }
 0x460   : > { %v8681_v39 = vcombine.low %v4134_v49, %v4144_v25  ;;  %v8625_v48 = vcombine.low %v3333_v3, %v3343_v46  ;;  %v4151_v12 = vrot.slane %v4149_v0, 5  ;;  %v4157_v57 = vrot.slane %v4155_v18, 5  ;;  %9682 = vmatprep.subr.bf16.mxu0 %v10091_v36  ;;  %v10641_v3 = vld [vmem:[#allocation2 + $0x4c] sm:$0xf] }
 0x461   : > { %v4161_v6 = vrot.slane %v4159_v14, 4  ;;  %v3351_v16 = vor.u32 %v13043_v47, %v13041_v21  ;;  %v3354_v31 = vshll.u32 %v13027_v15, 16  ;;  %v15017_v50 = vshrl.u32 %v13027_v15, 16  ;;  %v13255_v47 = vld [vmem:[#allocation2 + $0xb4] sm:$0xf] }
 0x462   : > { %6220 = vmatprep.mubr.bf16.mxu1 %v8681_v39  ;;  %5996 = vmatmul.mubr.bf16.gmra.mrb[128].mxu0 %v8625_v48  ;;  %v4152_v54 = vor.u32 %v4151_v12, %v4148_v33  ;;  %v3364_v10 = vshll.u32 %v13209_v61, 16  ;;  %v8531_v35 = vrot.slane %v3637_v30, 9  ;;  %v4167_v7 = vrot.slane %v4165_v1, 5  ;;  %v3638_v48 = vld [vmem:[#allocation2 + $0x54] sm:$0xe] }
 0x463   : > { %v3360_v60 = vrot.slane %v15017_v50, 4  ;;  %v4162_v44 = vor.u32 %v4161_v6, %v4157_v57  ;;  %6003 = vmatprep.mubr.bf16.mxu0 %v8642_v20  ;;  %v3352_v24 = vrot.slane %v3351_v16, 4  ;;  %v3356_v8 = vrot.slane %v3354_v31, 5  ;;  %9683 = vmatpush3.bf16.msra.mxu0 %v10091_v36  ;;  %v13280_v1 = vld [vmem:[#allocation2 + $0x5c] sm:$0x1] }
 0x464   : > { %v3733_v21 = vrot.slane %v10641_v3, 5  ;;  %v4153_v15 = vrot.slane %v4152_v54, 4  ;;  %v3366_v4 = vrot.slane %v3364_v10, 5  ;;  %v3736_v17 = vrot.slane %v13252_v42, 5  ;;  %9684 = vmatprep.subr.bf16.mxu0 %v10092_v34 }
 0x465   : > { %6221 = vmatmul.mubr.bf16.gmra.mrb[120].mxu1 %v8665_v40  ;;  %v4163_v32 = vrot.slane %v4162_v44, 4  ;;  %v3357_v49 = vsel %vm11962_vm9, %v3352_v24, %v3356_v8  ;;  %v3361_v61 = vor.u32 %v3360_v60, %v3356_v8  ;;  %v8666_v40 = vcombine.low %v13218_v41, %v13223_v11  ;;  %v10642_v24 = vld [vmem:[#allocation2 + $0x58] sm:$0xf] }
 0x466   : > { %v3734_v43 = vsel %vm12486_vm2, %v8531_v35, %v3733_v21  ;;  %v3735_v63 = vrot.slane %v3733_v21, 4  ;;  %v4158_v13 = vsel %vm11962_vm9, %v4153_v15, %v4157_v57  ;;  %v4170_v0 = vshrl.u32 %v13255_v47, 16  ;;  %v13290_v21 = vld [vmem:[#allocation2 + $0xc0] sm:$0xf] }
 0x467   : > { %v4168_v36 = vsel %vm11962_vm9, %v4163_v32, %v4167_v7  ;;  %v3362_v2 = vrot.slane %v3361_v61, 4  ;;  %v4173_v18 = vshll.u32 %v13255_v47, 16  ;;  %9685 = vmatpush3.bf16.msra.mxu0 %v10092_v34  ;;  %v4179_v46 = vshll.u32 %v13262_v56, 16 }
 0x468   : > { %v8682_v25 = vcombine.low %v4158_v13, %v4168_v36  ;;  %v3737_v52 = vsel %vm12486_vm2, %v3735_v63, %v3736_v17  ;;  %v4172_v39 = vrot.slane %v4170_v0, 4  ;;  %v4183_v20 = vshrl.u32 %v13262_v56, 16  ;;  %v3855_v36 = vld [vmem:[#allocation2 + $0xc8] sm:$0x1] }
 0x469   : > { %v8643_v14 = vcombine.low %v3734_v43, %v3737_v52  ;;  %v3367_v41 = vsel %vm11962_vm9, %v3362_v2, %v3366_v4  ;;  %v4175_v11 = vrot.slane %v4173_v18, 5  ;;  %v4189_v33 = vshll.u32 %v3854_v9, 16 }
 0x46a   : > { %6228 = vmatprep.mubr.bf16.mxu1 %v8682_v25  ;;  %v3375_v30 = vor.u32 %v12709_v45, %v12707_v38  ;;  %v8626_v12 = vcombine.low %v3357_v49, %v3367_v41  ;;  %v4181_v57 = vrot.slane %v4179_v46, 5  ;;  %v4185_v6 = vrot.slane %v4183_v20, 4 }
 0x46b   : > { %v3378_v34 = vshll.u32 %v10641_v3, 16  ;;  %v4176_v16 = vor.u32 %v4175_v11, %v4172_v39  ;;  %v4191_v31 = vrot.slane %v4189_v33, 5  ;;  %v15018_v60 = vshrl.u32 %v12431_v29, 16 }
 0x46c   : > { %v3376_v50 = vrot.slane %v3375_v30, 4  ;;  %6004 = vmatmul.mubr.bf16.gmra.mrb[132].mxu0 %v8626_v12  ;;  %v4186_v44 = vor.u32 %v4185_v6, %v4181_v57  ;;  %v3388_v35 = vshll.u32 %v13252_v42, 16  ;;  %v13287_v38 = vadd.f32 %v12799_v58, %v12783_v22  ;;  %v13294_v42 = vld [vmem:[#allocation2 + $0xc4] sm:$0xf]  ;;  %v10643_v6 = vld [vmem:[#allocation2 + $0x6c] sm:$0xf] }
 0x46d   : > { %6229 = vmatmul.mubr.bf16.gmra.mrb[124].mxu1 %v8666_v40  ;;  %v3384_v54 = vrot.slane %v15018_v60, 4  ;;  %v3380_v10 = vrot.slane %v3378_v34, 5  ;;  %6011 = vmatprep.mubr.bf16.mxu0 %v8643_v14  ;;  %v4177_v45 = vrot.slane %v4176_v16, 4  ;;  %v8532_v7 = vrot.slane %v3638_v48, 9  ;;  %v3239_v60 = vld [vmem:[#allocation2 + $0x68] sm:$0x1] }
 0x46e   : > { %v3740_v8 = vrot.slane %v10642_v24, 5  ;;  %v3743_v3 = vrot.slane %v13280_v1, 5  ;;  %v4187_v29 = vrot.slane %v4186_v44, 4  ;;  %v3390_v4 = vrot.slane %v3388_v35, 5 }
 0x46f   : > { %v3381_v15 = vsel %vm11962_vm9, %v3376_v50, %v3380_v10  ;;  %v3385_v32 = vor.u32 %v3384_v54, %v3380_v10  ;;  %v4182_v22 = vsel %vm11962_vm9, %v4177_v45, %v4181_v57  ;;  %v13302_v49 = vadd.f32 %v12805_v26, %v12801_v37  ;;  %v3639_v57 = vld [vmem:[#allocation2 + $0x60] sm:$0xe]  ;;  %v13321_v54 = vld [vmem:[#allocation2 + $0x70] sm:$0xf] }
 0x470   : > { %v3741_v58 = vsel %vm12486_vm2, %v8532_v7, %v3740_v8  ;;  %v3742_v17 = vrot.slane %v3740_v8, 4  ;;  %v4192_v43 = vsel %vm11962_vm9, %v4187_v29, %v4191_v31  ;;  %v8667_v13 = vcombine.low %v13255_v47, %v13262_v56 }
 0x471   : > { %v3386_v63 = vrot.slane %v3385_v32, 4  ;;  %v4194_v40 = vshrl.u32 %v13290_v21, 16  ;;  %v8683_v0 = vcombine.low %v4182_v22, %v4192_v43  ;;  %v4197_v2 = vshll.u32 %v13290_v21, 16 }
 0x472   : > { %v3744_v25 = vsel %vm12486_vm2, %v3742_v17, %v3743_v3  ;;  %v4203_v37 = vshll.u32 %v13294_v42, 16  ;;  %v4207_v47 = vshrl.u32 %v13294_v42, 16  ;;  %v4213_v41 = vshll.u32 %v3855_v36, 16 }
 0x473   : > { %v3391_v52 = vsel %vm11962_vm9, %v3386_v63, %v3390_v4  ;;  %v8644_v18 = vcombine.low %v3741_v58, %v3744_v25  ;;  %v4196_v14 = vrot.slane %v4194_v40, 4  ;;  %6236 = vmatprep.mubr.bf16.mxu1 %v8683_v0  ;;  %v4199_v46 = vrot.slane %v4197_v2, 5 }
 0x474   : > { %v8627_v39 = vcombine.low %v3381_v15, %v3391_v52  ;;  %v4205_v20 = vrot.slane %v4203_v37, 5  ;;  %v4209_v11 = vrot.slane %v4207_v47, 4  ;;  %v3399_v33 = vor.u32 %v12739_v23, %v12736_v59  ;;  %v10645_v23 = vld [vmem:[#allocation2 + $0x64] sm:$0xf] }
 0x475   : > { %6237 = vmatmul.mubr.bf16.gmra.mrb[128].mxu1 %v8667_v13  ;;  %v3402_v30 = vshll.u32 %v10642_v24, 16  ;;  %v15019_v48 = vshrl.u32 %v12474_v5, 16  ;;  %v3441_v34 = vshrl.u32 %v10643_v6, 16  ;;  %v3444_v16 = vshll.u32 %v10643_v6, 16 }
 0x476   : > { %v8985_v61 = vpop.f32.mrb[36].mxu0  ;;  %6012 = vmatmul.mubr.bf16.gmra.mrb[136].mxu0 %v8627_v39  ;;  %v4200_v31 = vor.u32 %v4199_v46, %v4196_v14  ;;  %v3412_v50 = vshll.u32 %v13280_v1, 16  ;;  %v3454_v44 = vshrl.u32 %v13321_v54, 16  ;;  %v4210_v10 = vor.u32 %v4209_v11, %v4205_v20  ;;  %v3240_v14 = vld [vmem:[#allocation2 + $0x74] sm:$0x1] }
 0x477   : > { %v8986_v9 = vpop.f32.mrb[37].mxu0  ;;  %v3408_v12 = vrot.slane %v15019_v48, 4  ;;  %6019 = vmatprep.mubr.bf16.mxu0 %v8644_v18  ;;  %v3404_v59 = vrot.slane %v3402_v30, 5  ;;  %v3747_v35 = vrot.slane %v10645_v23, 5  ;;  %v4215_v45 = vrot.slane %v4213_v41, 5 }
 0x478   : > { %v8988_v26 = vpop.f32.mrb[38].mxu0  ;;  %v4201_v5 = vrot.slane %v4200_v31, 4  ;;  %v3400_v7 = vrot.slane %v3399_v33, 4  ;;  %v8533_v24 = vrot.slane %v3639_v57, 9  ;;  %v4211_v8 = vrot.slane %v4210_v10, 4 }
 0x479   : > { %v8989_v56 = vpop.f32.mrb[39].mxu0  ;;  %v3409_v3 = vor.u32 %v3408_v12, %v3404_v59  ;;  %v3414_v29 = vrot.slane %v3412_v50, 5  ;;  %v3750_v15 = vrot.slane %v3239_v60, 5  ;;  %v3749_v32 = vrot.slane %v3747_v35, 4  ;;  %v3640_v41 = vld [vmem:[#allocation2 + $0x6c] sm:$0xe] }
 0x47a   : > { %v4206_v1 = vsel %vm11962_vm9, %v4201_v5, %v4205_v20  ;;  %v13326_v4 = vadd.f32 %v8986_v9, %v8985_v61  ;;  %v13328_v22 = vadd.f32 %v8989_v56, %v8988_v26  ;;  %v4216_v58 = vsel %vm11962_vm9, %v4211_v8, %v4215_v45  ;;  %v10648_v45 = vld [vmem:[#allocation2 + $0x84] sm:$0xf] }
 0x47b   : > { %v3410_v17 = vrot.slane %v3409_v3, 4  ;;  %v3423_v43 = vor.u32 %v12819_v53, %v12767_v51  ;;  %v3426_v63 = vshll.u32 %v10645_v23, 16  ;;  %v8684_v36 = vcombine.low %v4206_v1, %v4216_v58 }
 0x47c   : > { %v3751_v40 = vsel %vm12486_vm2, %v3749_v32, %v3750_v15  ;;  %v15020_v0 = vshrl.u32 %v12521_v62, 16  ;;  %v3436_v61 = vshll.u32 %v3239_v60, 16  ;;  %v3405_v2 = vsel %vm11962_vm9, %v3400_v7, %v3404_v59  ;;  %v13354_v60 = vld [vmem:[#allocation2 + $0x7c] sm:$0xf] }
 0x47d   : > { %v3415_v37 = vsel %vm11962_vm9, %v3410_v17, %v3414_v29  ;;  %v8668_v51 = vcombine.low %v13290_v21, %v13294_v42  ;;  %v3428_v53 = vrot.slane %v3426_v63, 5  ;;  %v13344_v52 = vrot.slane %v3441_v34, 4  ;;  %6244 = vmatprep.mubr.bf16.mxu1 %v8684_v36  ;;  %v10646_v34 = vld [vmem:[#allocation2 + $0x78] sm:$0xf] }
 0x47e   : > { %v3432_v25 = vrot.slane %v15020_v0, 4  ;;  %v8628_v18 = vcombine.low %v3405_v2, %v3415_v37  ;;  %v3748_v62 = vsel %vm12486_vm2, %v8533_v24, %v3747_v35  ;;  %v3754_v47 = vrot.slane %v13321_v54, 5 }
 0x47f   : > { %v3446_v39 = vrot.slane %v3444_v16, 5  ;;  %v8645_v46 = vcombine.low %v3748_v62, %v3751_v40  ;;  %6245 = vmatmul.mubr.bf16.gmra.mrb[132].mxu1 %v8668_v51  ;;  %v3424_v21 = vrot.slane %v3423_v43, 4  ;;  %v3438_v42 = vrot.slane %v3436_v61, 5 }
 0x480   : > { %v8991_v13 = vpop.f32.mrb[40].mxu0  ;;  %v3433_v20 = vor.u32 %v3432_v25, %v3428_v53  ;;  %6020 = vmatmul.mubr.bf16.gmra.mrb[140].mxu0 %v8628_v18  ;;  %v3756_v33 = vrot.slane %v3754_v47, 4  ;;  %v3757_v12 = vrot.slane %v3240_v14, 5  ;;  %v3450_v57 = vshll.u32 %v13321_v54, 16 }
 0x481   : > { %v8992_v9 = vpop.f32.mrb[41].mxu0  ;;  %6027 = vmatprep.mubr.bf16.mxu0 %v8645_v46  ;;  %v3456_v6 = vrot.slane %v3454_v44, 4  ;;  %v3465_v16 = vshrl.u32 %v10646_v34, 16  ;;  %v3468_v31 = vshll.u32 %v10646_v34, 16  ;;  %v8534_v50 = vrot.slane %v3640_v41, 9 }
 0x482   : > { %v8994_v26 = vpop.f32.mrb[42].mxu0  ;;  %v13349_v11 = vadd.f32 %v8992_v9, %v8991_v13  ;;  %v3434_v48 = vrot.slane %v3433_v20, 4  ;;  %v3478_v10 = vshrl.u32 %v13354_v60, 16  ;;  %v3758_v23 = vsel %vm12486_vm2, %v3756_v33, %v3757_v12  ;;  %v3241_v9 = vld [vmem:[#allocation2 + $0x80] sm:$0x1] }
 0x483   : > { %v8995_v56 = vpop.f32.mrb[43].mxu0  ;;  %v3452_v35 = vrot.slane %v3450_v57, 5  ;;  %v3489_v7 = vshrl.u32 %v10648_v45, 16  ;;  %v3429_v54 = vsel %vm11962_vm9, %v3424_v21, %v3428_v53  ;;  %v3755_v44 = vsel %vm12486_vm2, %v8534_v50, %v3754_v47  ;;  %v10649_v20 = vld [vmem:[#allocation2 + $0x88] sm:$0xf] }
 0x484   : > { %v13351_v30 = vadd.f32 %v8995_v56, %v8994_v26  ;;  %v3439_v59 = vsel %vm11962_vm9, %v3434_v48, %v3438_v42  ;;  %v3761_v24 = vrot.slane %v13354_v60, 5  ;;  %v3447_v29 = vor.u32 %v3446_v39, %v13344_v52  ;;  %v3641_v56 = vld [vmem:[#allocation2 + $0x78] sm:$0xe]  ;;  %v10650_v42 = vld [vmem:[#allocation2 + $0x90] sm:$0xf] }
 0x485   : > { %v3457_v15 = vor.u32 %v3456_v6, %v3452_v35  ;;  %v3460_v1 = vshll.u32 %v3240_v14, 16  ;;  %v3492_v17 = vshll.u32 %v10648_v45, 16  ;;  %v8629_v43 = vcombine.low %v3429_v54, %v3439_v59  ;;  %v13387_v50 = vld [vmem:[#allocation2 + $0x94] sm:$0xf] }
 0x486   : > { %v8646_v63 = vcombine.low %v3755_v44, %v3758_v23  ;;  %v3474_v40 = vshll.u32 %v13354_v60, 16  ;;  %v3480_v37 = vrot.slane %v3478_v10, 4  ;;  %v3467_v51 = vrot.slane %v3465_v16, 4 }
 0x487   : > { %v3458_v61 = vrot.slane %v3457_v15, 4  ;;  %v3763_v26 = vrot.slane %v3761_v24, 4  ;;  %v3470_v18 = vrot.slane %v3468_v31, 5  ;;  %v3448_v62 = vrot.slane %v3447_v29, 4 }
 0x488   : > { %v8997_v5 = vpop.f32.mrb[44].mxu0  ;;  %v9121_v3 = vpop.f32.mrb[32].mxu1  ;;  %6028 = vmatmul.mubr.bf16.gmra.mrb[144].mxu0 %v8629_v43  ;;  %v13374_v52 = vrot.slane %v3474_v40, 5  ;;  %v3462_v14 = vrot.slane %v3460_v1, 5  ;;  %v13378_v39 = vrot.slane %v3489_v7, 4  ;;  %v13380_v46 = vrot.slane %v3492_v17, 5 }
 0x489   : > { %v8998_v8 = vpop.f32.mrb[45].mxu0  ;;  %v9122_v13 = vpop.f32.mrb[33].mxu1  ;;  %6035 = vmatprep.mubr.bf16.mxu0 %v8646_v63  ;;  %v3502_v41 = vshrl.u32 %v10649_v20, 16  ;;  %v3764_v21 = vrot.slane %v3241_v9, 5  ;;  %v3513_v33 = vshrl.u32 %v10650_v42, 16  ;;  %v3498_v57 = vshll.u32 %v10649_v20, 16 }
 0x48a   : > { %v13367_v32 = vadd.f32 %v8998_v8, %v8997_v5  ;;  %v9000_v58 = vpop.f32.mrb[46].mxu0  ;;  %v13370_v0 = vadd.f32 %v9122_v13, %v9121_v3  ;;  %v9124_v25 = vpop.f32.mrb[34].mxu1  ;;  %v3463_v48 = vsel %vm11962_vm9, %v3458_v61, %v3462_v14  ;;  %v3481_v12 = vor.u32 %v3480_v37, %v13374_v52  ;;  %v3242_v17 = vld [vmem:[#allocation2 + $0x8c] sm:$0x1]  ;;  %v10652_v43 = vld [vmem:[#allocation2 + $0x9c] sm:$0xf] }
 0x48b   : > { %v9001_v36 = vpop.f32.mrb[47].mxu0  ;;  %v9125_v53 = vpop.f32.mrb[35].mxu1  ;;  %v3516_v6 = vshll.u32 %v10650_v42, 16  ;;  %v8535_v34 = vrot.slane %v3641_v56, 9  ;;  %v3765_v16 = vsel %vm12486_vm2, %v3763_v26, %v3764_v21  ;;  %v3768_v31 = vrot.slane %v10649_v20, 5 }
 0x48c   : > { %v13372_v2 = vadd.f32 %v9001_v36, %v9000_v58  ;;  %v13376_v47 = vadd.f32 %v9125_v53, %v9124_v25  ;;  %v3526_v60 = vshrl.u32 %v13387_v50, 16  ;;  %v3453_v10 = vsel %vm11962_vm9, %v3448_v62, %v3452_v35  ;;  %v3642_v36 = vld [vmem:[#allocation2 + $0x84] sm:$0xe] }
 0x48d   : > { %v3471_v23 = vor.u32 %v3470_v18, %v3467_v51  ;;  %v3484_v5 = vshll.u32 %v3241_v9, 16  ;;  %v8630_v45 = vcombine.low %v3453_v10, %v3463_v48  ;;  %v3762_v7 = vsel %vm12486_vm2, %v8535_v34, %v3761_v24 }
 0x48e   : > { %v13394_v44 = vrot.slane %v3498_v57, 5  ;;  %v3504_v8 = vrot.slane %v3502_v41, 4  ;;  %v13396_v3 = vrot.slane %v3513_v33, 4  ;;  %v8647_v29 = vcombine.low %v3762_v7, %v3765_v16 }
 0x48f   : > { %v3482_v58 = vrot.slane %v3481_v12, 4  ;;  %v3537_v63 = vshrl.u32 %v10652_v43, 16  ;;  %v3770_v40 = vrot.slane %v3768_v31, 4  ;;  %v3472_v25 = vrot.slane %v3471_v23, 4 }
 0x490   : > { %v9127_v59 = vpop.f32.mrb[36].mxu1  ;;  %6036 = vmatmul.mubr.bf16.gmra.mrb[148].mxu0 %v8630_v45  ;;  %v3486_v61 = vrot.slane %v3484_v5, 5  ;;  %v13404_v53 = vrot.slane %v3516_v6, 5  ;;  %v3771_v26 = vrot.slane %v3242_v17, 5  ;;  %v3505_v62 = vor.u32 %v3504_v8, %v13394_v44  ;;  %v13419_v6 = vld [vmem:[#allocation2 + $0xa0] sm:$0xf] }
 0x491   : > { %v9128_v54 = vpop.f32.mrb[37].mxu1  ;;  %6043 = vmatprep.mubr.bf16.mxu0 %v8647_v29  ;;  %v3522_v14 = vshll.u32 %v13387_v50, 16  ;;  %v3540_v56 = vshll.u32 %v10652_v43, 16  ;;  %v8536_v41 = vrot.slane %v3642_v36, 9  ;;  %v3495_v33 = vor.u32 %v13380_v46, %v13378_v39  ;;  %v3243_v46 = vld [vmem:[#allocation2 + $0x98] sm:$0x1] }
 0x492   : > { %v13398_v15 = vadd.f32 %v9128_v54, %v9127_v59  ;;  %v9130_v1 = vpop.f32.mrb[38].mxu1  ;;  %v3487_v20 = vsel %vm11962_vm9, %v3482_v58, %v3486_v61  ;;  %v3772_v42 = vsel %vm12486_vm2, %v3770_v40, %v3771_v26  ;;  %v3508_v48 = vshll.u32 %v3242_v17, 16  ;;  %v10654_v54 = vld [vmem:[#allocation2 + $0xa8] sm:$0xf]  ;;  %v13433_v40 = vld [vmem:[#allocation2 + $0xac] sm:$0xf] }
 0x493   : > { %v9003_v35 = vpop.f32.mrb[48].mxu0  ;;  %v9131_v13 = vpop.f32.mrb[39].mxu1  ;;  %v3775_v12 = vrot.slane %v13387_v50, 5  ;;  %v13417_v57 = vrot.slane %v3537_v63, 4  ;;  %v3550_v34 = vshrl.u32 %v13419_v6, 16  ;;  %v3477_v16 = vsel %vm11962_vm9, %v3472_v25, %v13374_v52 }
 0x494   : > { %v9004_v24 = vpop.f32.mrb[49].mxu0  ;;  %v13400_v9 = vadd.f32 %v9131_v13, %v9130_v1  ;;  %v3769_v10 = vsel %vm12486_vm2, %v8536_v41, %v3768_v31  ;;  %v8631_v23 = vcombine.low %v3477_v16, %v3487_v20  ;;  %v3506_v39 = vrot.slane %v3505_v62, 4  ;;  %v3643_v52 = vld [vmem:[#allocation2 + $0x90] sm:$0xe] }
 0x495   : > { %v13402_v37 = vadd.f32 %v9004_v24, %v9003_v35  ;;  %v9006_v51 = vpop.f32.mrb[50].mxu0  ;;  %v13427_v45 = vrot.slane %v3522_v14, 5  ;;  %v3528_v50 = vrot.slane %v3526_v60, 4  ;;  %v13429_v7 = vrot.slane %v3540_v56, 5 }
 0x496   : > { %v9007_v18 = vpop.f32.mrb[51].mxu0  ;;  %v3561_v8 = vshrl.u32 %v10654_v54, 16  ;;  %v8648_v29 = vcombine.low %v3769_v10, %v3772_v42  ;;  %v3564_v35 = vshll.u32 %v10654_v54, 16  ;;  %v3496_v31 = vrot.slane %v3495_v33, 4  ;;  %v13460_v54 = vld [vmem:[#allocation2 + $0xa4] sm:$0x1] }
 0x497   : > { %v13410_v21 = vadd.f32 %v9007_v18, %v9006_v51  ;;  %v3510_v43 = vrot.slane %v3508_v48, 5  ;;  %v3777_v13 = vrot.slane %v3775_v12, 4  ;;  %v3574_v60 = vshrl.u32 %v13433_v40, 16  ;;  %v10656_v48 = vld [vmem:[#allocation2 + $0xb4] sm:$0xf] }
 0x498   : > { %v9133_v59 = vpop.f32.mrb[40].mxu1  ;;  %6044 = vmatmul.mubr.bf16.gmra.mrb[152].mxu0 %v8631_v23  ;;  %v3778_v25 = vrot.slane %v3243_v46, 5  ;;  %v3529_v62 = vor.u32 %v3528_v50, %v13427_v45  ;;  %v3782_v14 = vrot.slane %v13419_v6, 5  ;;  %v3546_v56 = vshll.u32 %v13419_v6, 16 }
 0x499   : > { %v9134_v5 = vpop.f32.mrb[41].mxu1  ;;  %6051 = vmatprep.mubr.bf16.mxu0 %v8648_v29  ;;  %v3511_v26 = vsel %vm11962_vm9, %v3506_v39, %v3510_v43  ;;  %v13443_v20 = vrot.slane %v3561_v8, 4  ;;  %v8537_v41 = vrot.slane %v3643_v52, 9  ;;  %v3585_v16 = vshrl.u32 %v10656_v48, 16  ;;  %v3644_v43 = vld [vmem:[#allocation2 + $0x9c] sm:$0xe] }
 0x49a   : > { %v13431_v1 = vadd.f32 %v9134_v5, %v9133_v59  ;;  %v9136_v58 = vpop.f32.mrb[42].mxu1  ;;  %v3501_v10 = vsel %vm11962_vm9, %v3496_v31, %v13394_v44  ;;  %v3779_v59 = vsel %vm12486_vm2, %v3777_v13, %v3778_v25  ;;  %v3532_v23 = vshll.u32 %v3243_v46, 16 }
 0x49b   : > { %v9009_v17 = vpop.f32.mrb[52].mxu0  ;;  %v9137_v63 = vpop.f32.mrb[43].mxu1  ;;  %v8632_v5 = vcombine.low %v3501_v10, %v3511_v26  ;;  %v3776_v6 = vsel %vm12486_vm2, %v8537_v41, %v3775_v12  ;;  %v3519_v50 = vor.u32 %v13404_v53, %v13396_v3  ;;  %v3530_v29 = vrot.slane %v3529_v62, 4  ;;  %v13470_v3 = vld [vmem:[#allocation2 + $0xb8] sm:$0xf] }
 0x49c   : > { %v9010_v36 = vpop.f32.mrb[53].mxu0  ;;  %v13436_v24 = vadd.f32 %v9137_v63, %v9136_v58  ;;  %v3784_v44 = vrot.slane %v3782_v14, 4  ;;  %v13462_v58 = vrot.slane %v3546_v56, 5  ;;  %v3552_v52 = vrot.slane %v3550_v34, 4 }
 0x49d   : > { %v9011_v61 = vadd.f32 %v9010_v36, %v9009_v17  ;;  %v9012_v51 = vpop.f32.mrb[54].mxu0  ;;  %v13464_v46 = vrot.slane %v3564_v35, 5  ;;  %v3588_v17 = vshll.u32 %v10656_v48, 16  ;;  %v8649_v31 = vcombine.low %v3776_v6, %v3779_v59 }
 0x49e   : > { %v9013_v18 = vpop.f32.mrb[55].mxu0  ;;  %v13468_v13 = vrot.slane %v3585_v16, 4  ;;  %v3598_v53 = vshrl.u32 %v13470_v3, 16  ;;  %v3534_v36 = vrot.slane %v3532_v23, 5  ;;  %v3785_v34 = vrot.slane %v13460_v54, 5 }
 0x49f   : > { %v13446_v42 = vadd.f32 %v13370_v0, %v9011_v61  ;;  %v9014_v33 = vadd.f32 %v9013_v18, %v9012_v51  ;;  %v3520_v61 = vrot.slane %v3519_v50, 4  ;;  %v3543_v62 = vor.u32 %v13429_v7, %v13417_v57  ;;  %v13490_v57 = vld [vmem:[#allocation2 + $0xc0] sm:$0xf] }
 0x4a0   : > { %v9139_v0 = vpop.f32.mrb[44].mxu1  ;;  %6052 = vmatmul.mubr.bf16.gmra.mrb[156].mxu0 %v8632_v5  ;;  %v3535_v56 = vsel %vm11962_vm9, %v3530_v29, %v3534_v36  ;;  %v8538_v41 = vrot.slane %v3644_v43, 9  ;;  %v3553_v16 = vor.u32 %v3552_v52, %v13462_v58  ;;  %v3789_v23 = vrot.slane %v13433_v40, 5 }
 0x4a1   : > { %v13456_v39 = vadd.f32 %v13376_v47, %v9014_v33  ;;  %v9140_v8 = vpop.f32.mrb[45].mxu1  ;;  %6059 = vmatprep.mubr.bf16.mxu0 %v8649_v31  ;;  %v3786_v33 = vsel %vm12486_vm2, %v3784_v44, %v3785_v34  ;;  %v3570_v5 = vshll.u32 %v13433_v40, 16  ;;  %v13488_v6 = vrot.slane %v3588_v17, 5  ;;  %v13503_v17 = vld [vmem:[#allocation2 + $0xb0] sm:$0x1] }
 0x4a2   : > { %v13466_v12 = vadd.f32 %v9140_v8, %v9139_v0  ;;  %v9142_v47 = vpop.f32.mrb[46].mxu1  ;;  %v3609_v7 = vshrl.u32 %v13490_v57, 16  ;;  %v3612_v0 = vshll.u32 %v13490_v57, 16  ;;  %v3556_v50 = vshll.u32 %v13460_v54, 16  ;;  %v3645_v31 = vld [vmem:[#allocation2 + $0xa8] sm:$0xe] }
 0x4a3   : > { %v9015_v63 = vpop.f32.mrb[56].mxu0  ;;  %v9143_v25 = vpop.f32.mrb[47].mxu1  ;;  %v3783_v8 = vsel %vm12486_vm2, %v8538_v41, %v3782_v14  ;;  %v3544_v52 = vrot.slane %v3543_v62, 4  ;;  %v3554_v36 = vrot.slane %v3553_v16, 4  ;;  %v3567_v54 = vor.u32 %v13464_v46, %v13443_v20 }
 0x4a4   : > { %v9016_v35 = vpop.f32.mrb[57].mxu0  ;;  %v13474_v51 = vadd.f32 %v9143_v25, %v9142_v47  ;;  %v8650_v43 = vcombine.low %v3783_v8, %v3786_v33  ;;  %v1451_v25 = vld [vmem:[#allocation2 + $0xcc] sm:$0x1]  ;;  %v3791_v14 = vrot.slane %v3789_v23, 4  ;;  %v8539_v20 = vrot.slane %v3645_v31, 9 }
 0x4a5   : > { %v9017_v26 = vadd.f32 %v9016_v35, %v9015_v63  ;;  %v9018_v18 = vpop.f32.mrb[58].mxu0  ;;  %v3792_v46 = vrot.slane %v13503_v17, 5  ;;  %v3796_v40 = vrot.slane %v13470_v3, 5  ;;  %v3594_v31 = vshll.u32 %v13470_v3, 16 }
 0x4a6   : > { %v9019_v48 = vpop.f32.mrb[59].mxu0  ;;  %v3600_v19 = vrot.slane %v3598_v53, 4 }
 0x4a7   : > { %v13484_v10 = vadd.f32 %v13398_v15, %v9017_v26  ;;  %v9020_v59 = vadd.f32 %v9019_v48, %v9018_v18  ;;  %v3525_v15 = vsel %vm11962_vm9, %v3520_v61, %v13427_v45  ;;  %v3576_v61 = vrot.slane %v3574_v60, 4  ;;  %v1507_v26 = vld [vmem:[#allocation2 + $0xd4] sm:$0x1]  ;;  %v13513_v18 = vld [vmem:[#allocation2 + $0xc4] sm:$0xf] }
 0x4a8   : > { %v9145_v44 = vpop.f32.mrb[48].mxu1  ;;  %v8633_v47 = vcombine.low %v3525_v15, %v3535_v56  ;;  %v3622_v62 = vshrl.u32 %v13513_v18, 16  ;;  %v3558_v56 = vrot.slane %v3556_v50, 5  ;;  %v1452_v60 = vsel %vm11564_vm4, 0, %v1451_v25 }
 0x4a9   : > { %v13501_v29 = vadd.f32 %v13400_v9, %v9020_v59  ;;  %v9146_v63 = vpop.f32.mrb[49].mxu1  ;;  %v13509_v9 = vrot.slane %v3570_v5, 5  ;;  %v13522_v5 = vld [vmem:[#allocation2 + $0xd0] sm:$0xf]  ;;  %v3549_v50 = vsel %vm11962_vm9, %v3544_v52, %v13462_v58  ;;  %1453 = vst [vmem:[#allocation2 + $0xcc] sm:$0x1] %v1452_v60 }
 0x4aa   : > { %v13507_v45 = vadd.f32 %v9146_v63, %v9145_v44  ;;  %v9148_v34 = vpop.f32.mrb[50].mxu1  ;;  %6060 = vmatmul.mubr.bf16.gmra.mrb[160].mxu0 %v8633_v47  ;;  %v3559_v15 = vsel %vm11962_vm9, %v3554_v36, %v3558_v56  ;;  %v13529_v44 = vrot.slane %v3567_v54, 4  ;;  %v3793_v47 = vsel %vm12486_vm2, %v3791_v14, %v3792_v46  ;;  %v3646_v52 = vld [vmem:[#allocation2 + $0xb4] sm:$0xe]  ;;  %v3246_v56 = vld [vmem:[#allocation2 + $0xbc] sm:$0x1] }
 0x4ab   : > { %v9021_v35 = vpop.f32.mrb[60].mxu0  ;;  %v9149_v41 = vpop.f32.mrb[51].mxu1  ;;  %6067 = vmatprep.mubr.bf16.mxu0 %v8650_v43  ;;  %v3577_v63 = vor.u32 %v3576_v61, %v13509_v9  ;;  %v3580_v58 = vshll.u32 %v13503_v17, 16  ;;  %v1508_v36 = vsel %vm11882_vm6, 0, %v1507_v26  ;;  %v4227_v54 = vshll.u32 %v13522_v5, 16 }
 0x4ac   : > { %v9022_v33 = vpop.f32.mrb[61].mxu0  ;;  %v13517_v48 = vadd.f32 %v9149_v41, %v9148_v34  ;;  %v4231_v25 = vshrl.u32 %v13522_v5, 16  ;;  %v8634_v34 = vcombine.low %v3549_v50, %v3559_v15  ;;  %v3790_v14 = vsel %vm12486_vm2, %v8539_v20, %v3789_v23  ;;  %1509 = vst [vmem:[#allocation2 + $0xd4] sm:$0x1] %v1508_v36 }
 0x4ad   : > { %v9023_v16 = vadd.f32 %v9022_v33, %v9021_v35  ;;  %v9024_v59 = vpop.f32.mrb[62].mxu0  ;;  %v3798_v61 = vrot.slane %v3796_v40, 4  ;;  %v13548_v41 = vrot.slane %v3594_v31, 5  ;;  %v13552_v26 = vrot.slane %v4227_v54, 5 }
 0x4ae   : > { %v9025_v8 = vpop.f32.mrb[63].mxu0  ;;  %v4233_v46 = vrot.slane %v4231_v25, 4  ;;  %v8651_v33 = vcombine.low %v3790_v14, %v3793_v47  ;;  %v3578_v20 = vrot.slane %v3577_v63, 4  ;;  %v13558_v60 = vrot.slane %v3609_v7, 4 }
 0x4af   : > { %v13535_v28 = vadd.f32 %v13431_v1, %v9023_v16  ;;  %v9026_v43 = vadd.f32 %v9025_v8, %v9024_v59  ;;  %v3573_v3 = vsel %vm11962_vm9, %v13529_v44, %v13509_v9  ;;  %v3582_v53 = vrot.slane %v3580_v58, 5 }
 0x4b0   : > { %v9151_v35 = vpop.f32.mrb[52].mxu1  ;;  %v3799_v15 = vrot.slane %v3246_v56, 5  ;;  %v13568_v7 = vld [vmem:[#allocation2 + $0xcc] sm:$0xf]  ;;  %v3601_v44 = vor.u32 %v3600_v19, %v13548_v41  ;;  %v3618_v14 = vshll.u32 %v13513_v18, 16 }
 0x4b1   : > { %v13546_v1 = vadd.f32 %v13436_v24, %v9026_v43  ;;  %v9152_v17 = vpop.f32.mrb[53].mxu1  ;;  %v8540_v24 = vrot.slane %v3646_v52, 9  ;;  %v4234_v52 = vor.u32 %v4233_v46, %v13552_v26  ;;  %v4218_v58 = vshrl.u32 %v13568_v7, 16 }
 0x4b2   : > { %v13554_v16 = vadd.f32 %v9152_v17, %v9151_v35  ;;  %v9154_v23 = vpop.f32.mrb[54].mxu1  ;;  %6068 = vmatmul.mubr.bf16.gmra.mrb[164].mxu0 %v8634_v34  ;;  %v3800_v36 = vsel %vm12486_vm2, %v3798_v61, %v3799_v15  ;;  %v4221_v54 = vshll.u32 %v13568_v7, 16  ;;  %v3583_v25 = vsel %vm11962_vm9, %v3578_v20, %v3582_v53  ;;  %v3247_v15 = vld [vmem:[#allocation2 + $0xc8] sm:$0x1] }
 0x4b3   : > { %v9027_v59 = vpop.f32.mrb[64].mxu0  ;;  %v9155_v50 = vpop.f32.mrb[55].mxu1  ;;  %6075 = vmatprep.mubr.bf16.mxu0 %v8651_v33  ;;  %v3797_v47 = vsel %vm12486_vm2, %v8540_v24, %v3796_v40  ;;  %v3604_v35 = vshll.u32 %v3246_v56, 16  ;;  %v3803_v17 = vrot.slane %v13513_v18, 5  ;;  %v13583_v61 = vld [vmem:[#allocation2 + $0xd4] sm:$0x1]  ;;  %v3591_v20 = vor.u32 %v13488_v6, %v13468_v13 }
 0x4b4   : > { %v9028_v8 = vpop.f32.mrb[65].mxu0  ;;  %v13564_v31 = vadd.f32 %v9155_v50, %v9154_v23  ;;  %v4220_v46 = vrot.slane %v4218_v58, 4  ;;  %v4223_v19 = vrot.slane %v4221_v54, 5  ;;  %v4235_v24 = vrot.slane %v4234_v52, 4 }
 0x4b5   : > { %v9029_v43 = vadd.f32 %v9028_v8, %v9027_v59  ;;  %v9030_v63 = vpop.f32.mrb[66].mxu0  ;;  %v8635_v59 = vcombine.low %v3573_v3, %v3583_v25  ;;  %v8652_v53 = vcombine.low %v3797_v47, %v3800_v36  ;;  %v3602_v56 = vrot.slane %v3601_v44, 4 }
 0x4b6   : > { %v9031_v9 = vpop.f32.mrb[67].mxu0  ;;  %v4224_v8 = vor.u32 %v4223_v19, %v4220_v46  ;;  %v13593_v58 = vrot.slane %v3618_v14, 5  ;;  %v3614_v13 = vrot.slane %v3612_v0, 5  ;;  %v3606_v6 = vrot.slane %v3604_v35, 5 }
 0x4b7   : > { %v13579_v40 = vadd.f32 %v13466_v12, %v9029_v43  ;;  %v9032_v34 = vadd.f32 %v9031_v9, %v9030_v63  ;;  %v4237_v12 = vshll.u32 %v13583_v61, 16  ;;  %v3805_v47 = vrot.slane %v3803_v17, 4 }
 0x4b8   : > { %v9157_v23 = vpop.f32.mrb[56].mxu1  ;;  %v4225_v36 = vrot.slane %v4224_v8, 4  ;;  %v3592_v44 = vrot.slane %v3591_v20, 4  ;;  %v3607_v57 = vsel %vm11962_vm9, %v3602_v56, %v3606_v6  ;;  %v3806_v0 = vrot.slane %v3247_v15, 5 }
 0x4b9   : > { %v13586_v33 = vadd.f32 %v13474_v51, %v9032_v34  ;;  %v9158_v50 = vpop.f32.mrb[57].mxu1  ;;  %v3624_v51 = vrot.slane %v3622_v62, 4  ;;  %v4239_v54 = vrot.slane %v4237_v12, 5  ;;  %v3647_v34 = vld [vmem:[#allocation2 + $0xc0] sm:$0xe]  ;;  %v8669_v19 = vcombine.low %v13568_v7, %v13522_v5 }
 0x4ba   : > { %v13591_v43 = vadd.f32 %v9158_v50, %v9157_v23  ;;  %v9160_v63 = vpop.f32.mrb[58].mxu1  ;;  %6076 = vmatmul.mubr.bf16.gmra.mrb[168].mxu0 %v8635_v59  ;;  %v4230_v35 = vsel %vm11962_vm9, %v4225_v36, %v13552_v26  ;;  %v10660_v50 = vld [vmem:[#allocation2 + $0x1c] sm:$0xf]  ;;  %v3597_v26 = vsel %vm11962_vm9, %v3592_v44, %v13548_v41 }
 0x4bb   : > { %v9033_v9 = vpop.f32.mrb[68].mxu0  ;;  %v9161_v3 = vpop.f32.mrb[59].mxu1  ;;  %6083 = vmatprep.mubr.bf16.mxu0 %v8652_v53  ;;  %v4240_v18 = vsel %vm11962_vm9, %v4235_v24, %v4239_v54  ;;  %v3625_v12 = vor.u32 %v3624_v51, %v13593_v58  ;;  %v8541_v24 = vrot.slane %v3647_v34, 9  ;;  %v3807_v53 = vsel %vm12486_vm2, %v3805_v47, %v3806_v0  ;;  %v4241_v34 = vld [vmem:[#allocation2 + $0x18] sm:$0xe] }
 0x4bc   : > { %v9034_v52 = vpop.f32.mrb[69].mxu0  ;;  %v13599_v25 = vadd.f32 %v9161_v3, %v9160_v63  ;;  %v8685_v59 = vcombine.low %v4230_v35, %v4240_v18  ;;  %v4307_v56 = vrot.slane %v10660_v50, 5  ;;  %v3628_v63 = vshll.u32 %v3247_v15, 16 }
 0x4bd   : > { %v9035_v14 = vadd.f32 %v9034_v52, %v9033_v9  ;;  %v9036_v46 = vpop.f32.mrb[70].mxu0  ;;  %v8636_v9 = vcombine.low %v3597_v26, %v3607_v57  ;;  %v3804_v51 = vsel %vm12486_vm2, %v8541_v24, %v3803_v17  ;;  %v3626_v52 = vrot.slane %v3625_v12, 4  ;;  %v10663_v24 = vld [vmem:[#allocation2 + $0x34] sm:$0xf] }
 0x4be   : > { %v9037_v62 = vpop.f32.mrb[71].mxu0  ;;  %6252 = vmatprep.mubr.bf16.mxu1 %v8685_v59  ;;  %v8653_v6 = vcombine.low %v3804_v51, %v3807_v53  ;;  %v4309_v36 = vrot.slane %v4307_v56, 4  ;;  %v3630_v15 = vrot.slane %v3628_v63, 5  ;;  %v8542_v12 = vrot.slane %v4241_v34, 9  ;;  %v10665_v34 = vld [vmem:[#allocation2 + $0x38] sm:$0x1] }
 0x4bf   : > { %v13611_v23 = vadd.f32 %v13507_v45, %v9035_v14  ;;  %v9038_v20 = vadd.f32 %v9037_v62, %v9036_v46  ;;  %v3615_v45 = vor.u32 %v3614_v13, %v13558_v60  ;;  %6253 = vmatmul.mubr.bf16.gmra.mrb[136].mxu1 %v8669_v19  ;;  %v10661_v46 = vld [vmem:[#allocation2 + $0x20] sm:$0x1]  ;;  %v10662_v19 = vld [vmem:[#allocation2 + $0x28] sm:$0xf]  ;;  %v4321_v53 = vrot.slane %v10663_v24, 5 }
 0x4c0   : > { %v9163_v7 = vpop.f32.mrb[60].mxu1  ;;  %v4310_v18 = vrot.slane %v10661_v46, 5  ;;  %v3631_v0 = vsel %vm11962_vm9, %v3626_v52, %v3630_v15 }
 0x4c1   : > { %v13620_v8 = vadd.f32 %v13517_v48, %v9038_v20  ;;  %v9164_v54 = vpop.f32.mrb[61].mxu1  ;;  %v3616_v60 = vrot.slane %v3615_v45, 4  ;;  %v4314_v20 = vrot.slane %v10662_v19, 5  ;;  %v4323_v55 = vrot.slane %v4321_v53, 4 }
 0x4c2   : > { %v13625_v3 = vadd.f32 %v9164_v54, %v9163_v7  ;;  %v9166_v47 = vpop.f32.mrb[62].mxu1  ;;  %6084 = vmatmul.mubr.bf16.gmra.mrb[172].mxu0 %v8636_v9  ;;  %v4311_v59 = vsel %vm12486_vm2, %v4309_v36, %v4310_v18 }
 0x4c3   : > { %v9039_v41 = vpop.f32.mrb[72].mxu0  ;;  %v9167_v48 = vpop.f32.mrb[63].mxu1  ;;  %6091 = vmatprep.mubr.bf16.mxu0 %v8653_v6  ;;  %v3621_v50 = vsel %vm11962_vm9, %v3616_v60, %v13593_v58  ;;  %v4242_v6 = vld [vmem:[#allocation2 + $0x24] sm:$0xe] }
 0x4c4   : > { %v9040_v44 = vpop.f32.mrb[73].mxu0  ;;  %v13627_v13 = vadd.f32 %v9167_v48, %v9166_v47  ;;  %v8637_v45 = vcombine.low %v3621_v50, %v3631_v0  ;;  %v4316_v47 = vrot.slane %v4314_v20, 4  ;;  %v10664_v48 = vld [vmem:[#allocation2 + $0x2c] sm:$0x1]  ;;  %v8543_v15 = vrot.slane %v4242_v6, 9 }
 0x4c5   : > { %v9041_v14 = vadd.f32 %v9040_v44, %v9039_v41  ;;  %v9042_v17 = vpop.f32.mrb[74].mxu0  ;;  %v4243_v44 = vld [vmem:[#allocation2 + $0x30] sm:$0xe]  ;;  %v10666_v0 = vld [vmem:[#allocation2 + $0x40] sm:$0xf] }
 0x4c6   : > { %v9043_v57 = vpop.f32.mrb[75].mxu0  ;;  %v8544_v19 = vrot.slane %v4243_v44, 9  ;;  %v4315_v50 = vsel %vm12486_vm2, %v8543_v15, %v4314_v20  ;;  %v4256_v6 = vld [vmem:[#allocation2 + $0xcc] sm:$0xe] }
 0x4c7   : > { %v13632_v62 = vadd.f32 %v13554_v16, %v9041_v14  ;;  %v9044_v35 = vadd.f32 %v9043_v57, %v9042_v17  ;;  %v4308_v16 = vsel %vm12486_vm2, %v8542_v12, %v4307_v56  ;;  %v4324_v14 = vrot.slane %v10665_v34, 5 }
 0x4c8   : > { %v9169_v7 = vpop.f32.mrb[64].mxu1  ;;  %v8686_v9 = vcombine.low %v4308_v16, %v4311_v59  ;;  %v10667_v59 = vld [vmem:[#allocation2 + $0x4c] sm:$0xf]  ;;  %v10094_v16 = vld [vmem:[#allocation10] sm:$0xff]   ;;  %v8557_v34 = vrot.slane %v4256_v6, 9 }
 0x4c9   : > { %v13640_v26 = vadd.f32 %v13564_v31, %v9044_v35  ;;  %v9170_v63 = vpop.f32.mrb[65].mxu1  ;;  %v4317_v31 = vrot.slane %v10664_v48, 5  ;;  %v4328_v35 = vrot.slane %v10666_v0, 5  ;;  %v4325_v12 = vsel %vm12486_vm2, %v4323_v55, %v4324_v14  ;;  %v4244_v55 = vld [vmem:[#allocation2 + $0x3c] sm:$0xe]  ;;  %9718 = vmatprep.subr.bf16.mxu1 %v10094_v16 }
 0x4ca   : > { %v13644_v51 = vadd.f32 %v9170_v63, %v9169_v7  ;;  %v9172_v54 = vpop.f32.mrb[66].mxu1  ;;  %6092 = vmatmul.mubr.bf16.gmra.mrb[176].mxu0 %v8637_v45  ;;  %v4335_v24 = vrot.slane %v10667_v59, 5  ;;  %9719 = vmatpush3.bf16.msra.mxu1 %v10094_v16  ;;  %v4412_v14 = vrot.slane %v13522_v5, 5  ;;  %v10670_v16 = vld [vmem:[#allocation2 + $0x58] sm:$0xf] }
 0x4cb   : > { %v9045_v52 = vpop.f32.mrb[76].mxu0  ;;  %v9173_v41 = vpop.f32.mrb[67].mxu1  ;;  %9686 = vmatprep.mubr.bf16.mxu0 %v8686_v9  ;;  %v4318_v46 = vsel %vm12486_vm2, %v4316_v47, %v4317_v31  ;;  %v10671_v5 = vld [vmem:[#allocation2 + $0x64] sm:$0xf] }
 0x4cc   : > { %v9046_v58 = vpop.f32.mrb[77].mxu0  ;;  %v13646_v36 = vadd.f32 %v9173_v41, %v9172_v54  ;;  %v8687_v63 = vcombine.low %v4315_v50, %v4318_v46  ;;  %v4245_v54 = vld [vmem:[#allocation2 + $0x48] sm:$0xe]  ;;  %v4337_v44 = vrot.slane %v4335_v24, 4  ;;  %v4414_v6 = vrot.slane %v4412_v14, 4 }
 0x4cd   : > { %v9047_v60 = vadd.f32 %v9046_v58, %v9045_v52  ;;  %v9048_v56 = vpop.f32.mrb[78].mxu0  ;;  %v4330_v58 = vrot.slane %v4328_v35, 4  ;;  %v8546_v46 = vrot.slane %v4245_v54, 9  ;;  %v13677_v54 = vsel %vm12486_vm2, %v8557_v34, %v4412_v14 }
 0x4ce   : > { %v9049_v17 = vpop.f32.mrb[79].mxu0 }
 0x4cf   : > { %v13651_v18 = vadd.f32 %v13591_v43, %v9047_v60  ;;  %v9050_v57 = vadd.f32 %v9049_v17, %v9048_v56  ;;  %v4322_v43 = vsel %vm12486_vm2, %v8544_v19, %v4321_v53  ;;  %v8545_v17 = vrot.slane %v4244_v55, 9 }
 0x4d0   : > { %v9175_v45 = vpop.f32.mrb[68].mxu1  ;;  %v8688_v47 = vcombine.low %v4322_v43, %v4325_v12  ;;  %v4415_v12 = vrot.slane %v13583_v61, 5  ;;  %v4336_v55 = vsel %vm12486_vm2, %v8546_v46, %v4335_v24  ;;  %v10672_v24 = vld [vmem:[#allocation2 + $0x5c] sm:$0x1]  ;;  %v4247_v46 = vld [vmem:[#allocation2 + $0x60] sm:$0xe] }
 0x4d1   : > { %v13658_v7 = vadd.f32 %v13599_v25, %v9050_v57  ;;  %v9176_v9 = vpop.f32.mrb[69].mxu1  ;;  %v10668_v25 = vld [vmem:[#allocation2 + $0x44] sm:$0x1]  ;;  %v10669_v57 = vld [vmem:[#allocation2 + $0x50] sm:$0x1]  ;;  %v4329_v61 = vsel %vm12486_vm2, %v8545_v17, %v4328_v35  ;;  %v4345_v14 = vrot.slane %v10672_v24, 5 }
 0x4d2   : > { %v13662_v52 = vadd.f32 %v9176_v9, %v9175_v45  ;;  %v9178_v41 = vpop.f32.mrb[70].mxu1  ;;  %9687 = vmatmul.mubr.bf16.vlgmr.msra.gmra.mrb[180].mxu0 %v8687_v63  ;;  %v4331_v20 = vrot.slane %v10668_v25, 5  ;;  %v4338_v0 = vrot.slane %v10669_v57, 5  ;;  %v4342_v63 = vrot.slane %v10670_v16, 5 }
 0x4d3   : > { %v9051_v48 = vpop.f32.mrb[80].mxu0  ;;  %v9179_v31 = vpop.f32.mrb[71].mxu1  ;;  %9690 = vmatprep.mubr.bf16.mxu0 %v8688_v47  ;;  %v4349_v9 = vrot.slane %v10671_v5, 5 }
 0x4d4   : > { %v9052_v60 = vpop.f32.mrb[81].mxu0  ;;  %v13664_v53 = vadd.f32 %v9179_v31, %v9178_v41  ;;  %v4332_v59 = vsel %vm12486_vm2, %v4330_v58, %v4331_v20  ;;  %v4339_v43 = vsel %vm12486_vm2, %v4337_v44, %v4338_v0  ;;  %v4246_v44 = vld [vmem:[#allocation2 + $0x54] sm:$0xe] }
 0x4d5   : > { %v9053_v56 = vadd.f32 %v9052_v60, %v9051_v48  ;;  %v9054_v15 = vpop.f32.mrb[82].mxu0  ;;  %v8689_v41 = vcombine.low %v4329_v61, %v4332_v59  ;;  %v13688_v48 = vsel %vm12486_vm2, %v4414_v6, %v4415_v12  ;;  %v8690_v25 = vcombine.low %v4336_v55, %v4339_v43  ;;  %v10673_v12 = vld [vmem:[#allocation2 + $0x68] sm:$0x1]  ;;  %v10674_v6 = vld [vmem:[#allocation2 + $0x70] sm:$0xf] }
 0x4d6   : > { %v9055_v19 = vpop.f32.mrb[83].mxu0  ;;  %v4344_v60 = vrot.slane %v4342_v63, 4  ;;  %v4352_v59 = vrot.slane %v10673_v12, 5  ;;  %v4356_v61 = vrot.slane %v10674_v6, 5  ;;  %v10675_v55 = vld [vmem:[#allocation2 + $0x7c] sm:$0xf] }
 0x4d7   : > { %v13671_v50 = vadd.f32 %v13625_v3, %v9053_v56  ;;  %v9056_v45 = vadd.f32 %v9055_v19, %v9054_v15  ;;  %v4351_v15 = vrot.slane %v4349_v9, 4  ;;  %v8547_v19 = vrot.slane %v4246_v44, 9 }
 0x4d8   : > { %v9181_v3 = vpop.f32.mrb[72].mxu1  ;;  %v4346_v16 = vsel %vm12486_vm2, %v4344_v60, %v4345_v14  ;;  %v4358_v14 = vrot.slane %v4356_v61, 4 }
 0x4d9   : > { %v13682_v47 = vadd.f32 %v13627_v13, %v9056_v45  ;;  %v9182_v58 = vpop.f32.mrb[73].mxu1 }
 0x4da   : > { %v13690_v20 = vadd.f32 %v9182_v58, %v9181_v3  ;;  %v9184_v31 = vpop.f32.mrb[74].mxu1  ;;  %9691 = vmatmul.mubr.bf16.gmra.mrb[184].mxu0 %v8689_v41  ;;  %v8548_v3 = vrot.slane %v4247_v46, 9  ;;  %v4353_v41 = vsel %vm12486_vm2, %v4351_v15, %v4352_v59  ;;  %v4363_v58 = vrot.slane %v10675_v55, 5  ;;  %v10095_v46 = vld [vmem:[#allocation10 + $0x8] sm:$0xff]  }
 0x4db   : > { %v9057_v35 = vpop.f32.mrb[84].mxu0  ;;  %v9185_v56 = vpop.f32.mrb[75].mxu1  ;;  %9694 = vmatprep.mubr.bf16.mxu0 %v8690_v25  ;;  %v4343_v25 = vsel %vm12486_vm2, %v8547_v19, %v4342_v63  ;;  %9720 = vmatprep.subr.bf16.mxu1 %v10095_v46 }
 0x4dc   : > { %v9058_v34 = vpop.f32.mrb[85].mxu0  ;;  %v13694_v17 = vadd.f32 %v9185_v56, %v9184_v31  ;;  %v8691_v60 = vcombine.low %v4343_v25, %v4346_v16  ;;  %v4365_v63 = vrot.slane %v4363_v58, 4  ;;  %9721 = vmatpush3.bf16.msra.mxu1 %v10095_v46 }
 0x4dd   : > { %v9059_v57 = vadd.f32 %v9058_v34, %v9057_v35  ;;  %v9060_v0 = vpop.f32.mrb[86].mxu0 }
 0x4de   : > { %v9061_v45 = vpop.f32.mrb[87].mxu0 }
 0x4df   : > { %v13699_v43 = vadd.f32 %v13644_v51, %v9059_v57  ;;  %v9062_v5 = vadd.f32 %v9061_v45, %v9060_v0  ;;  %v4350_v51 = vsel %vm12486_vm2, %v8548_v3, %v4349_v9  ;;  %v4248_v57 = vld [vmem:[#allocation2 + $0x6c] sm:$0xe]  ;;  %v4249_v45 = vld [vmem:[#allocation2 + $0x78] sm:$0xe] }
 0x4e0   : > { %v9315_v44 = vpop.f32.mrb[76].mxu1  ;;  %v8692_v56 = vcombine.low %v4350_v51, %v4353_v41  ;;  %v10678_v41 = vld [vmem:[#allocation2 + $0x88] sm:$0xf]  ;;  %v8549_v25 = vrot.slane %v4248_v57, 9 }
 0x4e1   : > { %v13706_v31 = vadd.f32 %v13646_v36, %v9062_v5  ;;  %v9316_v35 = vpop.f32.mrb[77].mxu1  ;;  %v10676_v36 = vld [vmem:[#allocation2 + $0x74] sm:$0x1]  ;;  %v10677_v5 = vld [vmem:[#allocation2 + $0x80] sm:$0x1]  ;;  %v4370_v55 = vrot.slane %v10678_v41, 5 }
 0x4e2   : > { %v13710_v34 = vadd.f32 %v9316_v35, %v9315_v44  ;;  %v9318_v24 = vpop.f32.mrb[78].mxu1  ;;  %9695 = vmatmul.mubr.bf16.gmra.mrb[188].mxu0 %v8691_v60  ;;  %v4359_v12 = vrot.slane %v10676_v36, 5  ;;  %v4366_v6 = vrot.slane %v10677_v5, 5  ;;  %v8550_v35 = vrot.slane %v4249_v45, 9  ;;  %v10680_v5 = vld [vmem:[#allocation2 + $0x8c] sm:$0x1] }
 0x4e3   : > { %15021 = vst [vmem:[#allocation62_spill] sm:$0xff] %v13706_v31  ;;  %v9063_v15 = vpop.f32.mrb[88].mxu0  ;;  %v9319_v0 = vpop.f32.mrb[79].mxu1  ;;  %9698 = vmatprep.mubr.bf16.mxu0 %v8692_v56  ;;  %v4372_v36 = vrot.slane %v4370_v55, 4 }
 0x4e4   : > { %v9064_v19 = vpop.f32.mrb[89].mxu0  ;;  %v13712_v59 = vadd.f32 %v9319_v0, %v9318_v24  ;;  %v4360_v44 = vsel %vm12486_vm2, %v4358_v14, %v4359_v12  ;;  %v4367_v56 = vsel %vm12486_vm2, %v4365_v63, %v4366_v6  ;;  %v10679_v24 = vld [vmem:[#allocation2 + $0x94] sm:$0xf]  ;;  %v4357_v0 = vsel %vm12486_vm2, %v8549_v25, %v4356_v61  ;;  %v4250_v63 = vld [vmem:[#allocation2 + $0x84] sm:$0xe] }
 0x4e5   : > { %v9065_v9 = vadd.f32 %v9064_v19, %v9063_v15  ;;  %v9066_v16 = vpop.f32.mrb[90].mxu0  ;;  %v4377_v15 = vrot.slane %v10679_v24, 5  ;;  %v8693_v57 = vcombine.low %v4357_v0, %v4360_v44  ;;  %v4364_v14 = vsel %vm12486_vm2, %v8550_v35, %v4363_v58  ;;  %v4251_v25 = vld [vmem:[#allocation2 + $0x90] sm:$0xe] }
 0x4e6   : > { %v9067_v3 = vpop.f32.mrb[91].mxu0  ;;  %v8694_v12 = vcombine.low %v4364_v14, %v4367_v56  ;;  %v4373_v6 = vrot.slane %v10680_v5, 5  ;;  %v10681_v56 = vld [vmem:[#allocation2 + $0x98] sm:$0x1]  ;;  %v10682_v14 = vld [vmem:[#allocation2 + $0xa0] sm:$0xf] }
 0x4e7   : > { %v13717_v60 = vadd.f32 %v13662_v52, %v9065_v9  ;;  %v9068_v51 = vadd.f32 %v9067_v3, %v9066_v16  ;;  %v4379_v3 = vrot.slane %v4377_v15, 4  ;;  %v4380_v24 = vrot.slane %v10681_v56, 5  ;;  %v10683_v5 = vld [vmem:[#allocation2 + $0xac] sm:$0xf] }
 0x4e8   : > { %v9321_v46 = vpop.f32.mrb[80].mxu1  ;;  %v4374_v35 = vsel %vm12486_vm2, %v4372_v36, %v4373_v6 }
 0x4e9   : > { %15022 = vst [vmem:[#allocation63_spill] sm:$0xff] %v13717_v60  ;;  %v13724_v19 = vadd.f32 %v13664_v53, %v9068_v51  ;;  %v9322_v52 = vpop.f32.mrb[81].mxu1  ;;  %v8551_v51 = vrot.slane %v4250_v63, 9  ;;  %v10702_v60 = vld [vmem:[%s11517_s27 + $0x60] sm:$0xff]  }
 0x4ea   : > { %v13728_v45 = vadd.f32 %v9322_v52, %v9321_v46  ;;  %v9324_v9 = vpop.f32.mrb[82].mxu1  ;;  %9699 = vmatmul.mubr.bf16.gmra.mrb[192].mxu0 %v8693_v57  ;;  %v4384_v52 = vrot.slane %v10682_v14, 5 }
 0x4eb   : > { %15023 = vst [vmem:[#allocation64_spill] sm:$0xff] %v13724_v19  ;;  %v9069_v16 = vpop.f32.mrb[92].mxu0  ;;  %v9325_v61 = vpop.f32.mrb[83].mxu1  ;;  %9702 = vmatprep.mubr.bf16.mxu0 %v8694_v12  ;;  %v4391_v12 = vrot.slane %v10683_v5, 5  ;;  %v4371_v63 = vsel %vm12486_vm2, %v8551_v51, %v4370_v55  ;;  %v4253_v55 = vld [vmem:[#allocation2 + $0xa8] sm:$0xe] }
 0x4ec   : > { %v9070_v53 = vpop.f32.mrb[93].mxu0  ;;  %v13730_v41 = vadd.f32 %v9325_v61, %v9324_v9  ;;  %v8552_v9 = vrot.slane %v4251_v25, 9  ;;  %v8695_v61 = vcombine.low %v4371_v63, %v4374_v35  ;;  %v4252_v25 = vld [vmem:[#allocation2 + $0x9c] sm:$0xe]  ;;  %v10685_v35 = vld [vmem:[#allocation2 + $0xb0] sm:$0x1] }
 0x4ed   : > { %v9071_v44 = vadd.f32 %v9070_v53, %v9069_v16  ;;  %v9072_v58 = vpop.f32.mrb[94].mxu0  ;;  %v4381_v16 = vsel %vm12486_vm2, %v4379_v3, %v4380_v24  ;;  %v4393_v14 = vrot.slane %v4391_v12, 4  ;;  %v10096_v3 = vld [vmem:[#allocation10 + $0x10] sm:$0xff]   ;;  %v4394_v5 = vrot.slane %v10685_v35, 5 }
 0x4ee   : > { %v9073_v0 = vpop.f32.mrb[95].mxu0  ;;  %9722 = vmatprep.subr.bf16.mxu1 %v10096_v3 }
 0x4ef   : > { %v13735_v46 = vadd.f32 %v13690_v20, %v9071_v44  ;;  %v9074_v57 = vadd.f32 %v9073_v0, %v9072_v58  ;;  %v4378_v20 = vsel %vm12486_vm2, %v8552_v9, %v4377_v15  ;;  %v4386_v0 = vrot.slane %v4384_v52, 4  ;;  %9723 = vmatpush3.bf16.msra.mxu1 %v10096_v3 }
 0x4f0   : > { %v9327_v6 = vpop.f32.mrb[84].mxu1  ;;  %v8696_v44 = vcombine.low %v4378_v20, %v4381_v16  ;;  %v8553_v15 = vrot.slane %v4252_v25, 9  ;;  %v8554_v16 = vrot.slane %v4253_v55, 9  ;;  %v4395_v63 = vsel %vm12486_vm2, %v4393_v14, %v4394_v5 }
 0x4f1   : > { %15024 = vst [vmem:[#allocation65_spill] sm:$0xff] %v13735_v46  ;;  %v13742_v36 = vadd.f32 %v13694_v17, %v9074_v57  ;;  %v9328_v53 = vpop.f32.mrb[85].mxu1  ;;  %v10684_v17 = vld [vmem:[#allocation2 + $0xa4] sm:$0x1] }
 0x4f2   : > { %v13746_v58 = vadd.f32 %v9328_v53, %v9327_v6  ;;  %v9330_v56 = vpop.f32.mrb[86].mxu1  ;;  %9703 = vmatmul.mubr.bf16.gmra.mrb[196].mxu0 %v8695_v61  ;;  %v4387_v51 = vrot.slane %v10684_v17, 5  ;;  %v10686_v61 = vld [vmem:[#allocation2 + $0xb8] sm:$0xf]  ;;  %v4392_v25 = vsel %vm12486_vm2, %v8554_v16, %v4391_v12 }
 0x4f3   : > { %15025 = vst [vmem:[#allocation66_spill] sm:$0xff] %v13742_v36  ;;  %v9331_v24 = vpop.f32.mrb[87].mxu1  ;;  %9706 = vmatprep.mubr.bf16.mxu0 %v8696_v44  ;;  %v9091_v6 = vpop.f32.mrb[96].mxu0  ;;  %v4398_v20 = vrot.slane %v10686_v61, 5  ;;  %v10687_v44 = vld [vmem:[#allocation2 + $0xc4] sm:$0xf]  ;;  %v8698_v55 = vcombine.low %v4392_v25, %v4395_v63 }
 0x4f4   : > { %v13748_v57 = vadd.f32 %v9331_v24, %v9330_v56  ;;  %v4388_v9 = vsel %vm12486_vm2, %v4386_v0, %v4387_v51  ;;  %v9092_v53 = vpop.f32.mrb[97].mxu0  ;;  %v4405_v17 = vrot.slane %v10687_v44, 5  ;;  %v4385_v56 = vsel %vm12486_vm2, %v8553_v15, %v4384_v52  ;;  %v4254_v52 = vld [vmem:[#allocation2 + $0xb4] sm:$0xe] }
 0x4f5   : > { %v9093_v3 = vadd.f32 %v9092_v53, %v9091_v6  ;;  %v9094_v24 = vpop.f32.mrb[98].mxu0  ;;  %v8697_v0 = vcombine.low %v4385_v56, %v4388_v9  ;;  %v4400_v36 = vrot.slane %v4398_v20, 4  ;;  %v10688_v9 = vld [vmem:[#allocation2 + $0xbc] sm:$0x1]  ;;  %v4255_v6 = vld [vmem:[#allocation2 + $0xc0] sm:$0xe] }
 0x4f6   : > { %v9095_v51 = vpop.f32.mrb[99].mxu0  ;;  %v4407_v46 = vrot.slane %v4405_v17, 4  ;;  %v4401_v16 = vrot.slane %v10688_v9, 5  ;;  %v8555_v56 = vrot.slane %v4254_v52, 9 }
 0x4f7   : > { %v13759_v14 = vadd.f32 %v9093_v3, %v13287_v38  ;;  %v9096_v5 = vadd.f32 %v9095_v51, %v9094_v24  ;;  %v10689_v38 = vld [vmem:[#allocation2 + $0xc8] sm:$0x1]  ;;  %v8556_v3 = vrot.slane %v4255_v6, 9 }
 0x4f8   : > { %v9333_v35 = vpop.f32.mrb[88].mxu1  ;;  %v4408_v53 = vrot.slane %v10689_v38, 5  ;;  %v10097_v38 = vld [vmem:[#allocation10 + $0x18] sm:$0xff]  }
 0x4f9   : > { %v9334_v13 = vpop.f32.mrb[89].mxu1  ;;  %v13764_v12 = vadd.f32 %v9096_v5, %v13302_v49  ;;  %v4399_v49 = vsel %vm12486_vm2, %v8555_v56, %v4398_v20  ;;  %9724 = vmatprep.subr.bf16.mxu1 %v10097_v38 }
 0x4fa   : > { %v13761_v61 = vadd.f32 %v9334_v13, %v9333_v35  ;;  %v9336_v44 = vpop.f32.mrb[90].mxu1  ;;  %9707 = vmatmul.mubr.bf16.gmra.mrb[200].mxu0 %v8697_v0  ;;  %v4402_v13 = vsel %vm12486_vm2, %v4400_v36, %v4401_v16  ;;  %v4409_v24 = vsel %vm12486_vm2, %v4407_v46, %v4408_v53  ;;  %9725 = vmatpush3.bf16.msra.mxu1 %v10097_v38 }
 0x4fb   : > { %v9337_v15 = vpop.f32.mrb[91].mxu1  ;;  %9710 = vmatprep.mubr.bf16.mxu0 %v8698_v55  ;;  %v9097_v25 = vpop.f32.mrb[100].mxu0  ;;  %v8699_v5 = vcombine.low %v4399_v49, %v4402_v13 }
 0x4fc   : > { %v13766_v63 = vadd.f32 %v9337_v15, %v9336_v44  ;;  %v9098_v35 = vpop.f32.mrb[101].mxu0  ;;  %v4406_v44 = vsel %vm12486_vm2, %v8556_v3, %v4405_v17 }
 0x4fd   : > { %v9099_v0 = vadd.f32 %v9098_v35, %v9097_v25  ;;  %v9100_v55 = vpop.f32.mrb[102].mxu0  ;;  %v8700_v9 = vcombine.low %v4406_v44, %v4409_v24 }
 0x4fe   : > { %v9101_v52 = vpop.f32.mrb[103].mxu0 }
 0x4ff   : > { %v13777_v36 = vadd.f32 %v9099_v0, %v13326_v4  ;;  %v9102_v16 = vadd.f32 %v9101_v52, %v9100_v55  ;;  %v15026_v55 = vcombine.low %v13677_v54, %v13688_v48  ;;  %v10690_v52 = vld [vmem:[%s11517_s27] sm:$0xff]  }
 0x500   : > { %v9339_v51 = vpop.f32.mrb[92].mxu1 }
 0x501   : > { %v9340_v15 = vpop.f32.mrb[93].mxu1  ;;  %v13782_v53 = vadd.f32 %v9102_v16, %v13328_v22 }
 0x502   : > { %v13779_v6 = vadd.f32 %v9340_v15, %v9339_v51  ;;  %v9342_v46 = vpop.f32.mrb[94].mxu1  ;;  %9711 = vmatmul.mubr.bf16.gmra.mrb[204].mxu0 %v8699_v5 }
 0x503   : > { %v9343_v20 = vpop.f32.mrb[95].mxu1  ;;  %9714 = vmatprep.mubr.bf16.mxu0 %v8700_v9  ;;  %v9103_v27 = vpop.f32.mrb[104].mxu0 }
 0x504   : > { %v13784_v56 = vadd.f32 %v9343_v20, %v9342_v46  ;;  %v9104_v17 = vpop.f32.mrb[105].mxu0 }
 0x505   : > { %v9105_v4 = vadd.f32 %v9104_v17, %v9103_v27  ;;  %v9106_v13 = vpop.f32.mrb[106].mxu0  ;;  %v7171_v17 = vld [vmem:[%s15027_s9] sm:$0x3] }
 0x506   : > { %v9107_v3 = vpop.f32.mrb[107].mxu0  ;;  %9817 = vmatprep.subr.msk.bf16.mxu0 %vm923_vm0, %v7171_v17 }
 0x507   : > { %v13787_v35 = vadd.f32 %v9105_v4, %v13349_v11  ;;  %v9108_v49 = vadd.f32 %v9107_v3, %v9106_v13  ;;  %v10098_v4 = vld [vmem:[#allocation10 + $0x20] sm:$0xff]  }
 0x508   : > { %v9345_v25 = vpop.f32.mrb[96].mxu1  ;;  %9726 = vmatprep.subr.bf16.mxu1 %v10098_v4 }
 0x509   : > { %v9346_v24 = vpop.f32.mrb[97].mxu1  ;;  %v13795_v5 = vadd.f32 %v9108_v49, %v13351_v30  ;;  %9727 = vmatpush3.bf16.msra.mxu1 %v10098_v4 }
 0x50a   : > { %v13789_v0 = vadd.f32 %v9346_v24, %v9345_v25  ;;  %v9348_v22 = vpop.f32.mrb[98].mxu1  ;;  %9715 = vmatmul.mubr.bf16.gmra.mrb[208].mxu0 %v15026_v55  ;;  %v7173_v25 = vsel %vm923_vm0, %v7171_v17, 0 }
 0x50b   : > { %v9349_v51 = vpop.f32.mrb[99].mxu1  ;;  %9768 = vmatprep.mubr.msk.bf16.mxu0 %vm874_vm1, %v10690_v52  ;;  %v9109_v15 = vpop.f32.mrb[108].mxu0  ;;  %9767 = vmatpush3.bf16.msra.mxu0 %v7173_v25 }
 0x50c   : > { %v13797_v44 = vadd.f32 %v9349_v51, %v9348_v22  ;;  %v9110_v11 = vpop.f32.mrb[109].mxu0  ;;  %v10691_v22 = vld [vmem:[%s11517_s27 + $0x8] sm:$0xff]  }
 0x50d   : > { %v9111_v9 = vadd.f32 %v9110_v11, %v9109_v15  ;;  %v9112_v16 = vpop.f32.mrb[110].mxu0  ;;  %v10692_v15 = vld [vmem:[%s11517_s27 + $0x10] sm:$0xff]  }
 0x50e   : > { %v9113_v38 = vpop.f32.mrb[111].mxu0 }
 0x50f   : > { %v13802_v27 = vadd.f32 %v9111_v9, %v13367_v32  ;;  %v9114_v54 = vadd.f32 %v9113_v38, %v9112_v16 }
 0x510   : > { %v9351_v46 = vpop.f32.mrb[100].mxu1 }
 0x511   : > { %v9352_v20 = vpop.f32.mrb[101].mxu1  ;;  %v13812_v3 = vadd.f32 %v9114_v54, %v13372_v2 }
 0x512   : > { %v13804_v48 = vadd.f32 %v9352_v20, %v9351_v46  ;;  %v9354_v30 = vpop.f32.mrb[102].mxu1  ;;  %9769 = vmatmul.mubr.msk.bf16.vlgmr.msra.gmra.mrb[212].mxu0 %vm874_vm1, %v10691_v22 }
 0x513   : > { %v9355_v13 = vpop.f32.mrb[103].mxu1  ;;  %v9115_v24 = vpop.f32.mrb[112].mxu0  ;;  %9772 = vmatprep.mubr.msk.bf16.mxu0 %vm874_vm1, %v10692_v15 }
 0x514   : > { %v13814_v32 = vadd.f32 %v9355_v13, %v9354_v30  ;;  %v9116_v49 = vpop.f32.mrb[113].mxu0  ;;  %v10693_v13 = vld [vmem:[%s11517_s27 + $0x18] sm:$0xff]  }
 0x515   : > { %v9117_v55 = vadd.f32 %v9116_v49, %v9115_v24  ;;  %v9118_v51 = vpop.f32.mrb[114].mxu0 }
 0x516   : > { %v9119_v11 = vpop.f32.mrb[115].mxu0 }
 0x517   : > { %v13821_v9 = vadd.f32 %v9117_v55, %v13402_v37  ;;  %v9120_v16 = vadd.f32 %v9119_v11, %v9118_v51  ;;  %v10694_v37 = vld [vmem:[%s11517_s27 + $0x20] sm:$0xff]  }
 0x518   : > { %v9357_v52 = vpop.f32.mrb[104].mxu1  ;;  %v10099_v11 = vld [vmem:[#allocation10 + $0x28] sm:$0xff]  }
 0x519   : > { %v9358_v2 = vpop.f32.mrb[105].mxu1  ;;  %v13826_v54 = vadd.f32 %v9120_v16, %v13410_v21  ;;  %9728 = vmatprep.subr.bf16.mxu1 %v10099_v11 }
 0x51a   : > { %v13823_v46 = vadd.f32 %v9358_v2, %v9357_v52  ;;  %v9360_v38 = vpop.f32.mrb[106].mxu1  ;;  %9773 = vmatmul.mubr.msk.bf16.gmra.mrb[216].mxu0 %vm874_vm1, %v10693_v13  ;;  %9729 = vmatpush3.bf16.msra.mxu1 %v10099_v11  ;;  %v10696_v13 = vld [vmem:[%s11517_s27 + $0x30] sm:$0xff]  }
 0x51b   : > { %v9361_v20 = vpop.f32.mrb[107].mxu1  ;;  %v9203_v17 = vpop.f32.mrb[116].mxu0  ;;  %9776 = vmatprep.mubr.msk.bf16.mxu0 %vm874_vm1, %v10694_v37 }
 0x51c   : > { %v13828_v30 = vadd.f32 %v9361_v20, %v9360_v38  ;;  %v9204_v4 = vpop.f32.mrb[117].mxu0 }
 0x51d   : > { %v9205_v25 = vadd.f32 %v9204_v4, %v9203_v17  ;;  %v9206_v24 = vpop.f32.mrb[118].mxu0  ;;  %v10695_v17 = vld [vmem:[%s11517_s27 + $0x28] sm:$0xff]  }
 0x51e   : > { %v9207_v22 = vpop.f32.mrb[119].mxu0 }
 0x51f   : > { %v13835_v21 = vadd.f32 %v9205_v25, %v13759_v14  ;;  %v9208_v51 = vadd.f32 %v9207_v22, %v9206_v24 }
 0x520   : > { %v9363_v49 = vpop.f32.mrb[108].mxu1 }
 0x521   : > { %v9364_v55 = vpop.f32.mrb[109].mxu1  ;;  %v13840_v16 = vadd.f32 %v9208_v51, %v13764_v12 }
 0x522   : > { %v13837_v52 = vadd.f32 %v9364_v55, %v9363_v49  ;;  %v9366_v15 = vpop.f32.mrb[110].mxu1  ;;  %9777 = vmatmul.mubr.msk.bf16.gmra.mrb[220].mxu0 %vm874_vm1, %v10695_v17 }
 0x523   : > { %v9367_v2 = vpop.f32.mrb[111].mxu1  ;;  %9780 = vmatprep.mubr.msk.bf16.mxu0 %vm874_vm1, %v10696_v13  ;;  %v10697_v13 = vld [vmem:[%s11517_s27 + $0x38] sm:$0xff]  }
 0x524   : > { %v13842_v38 = vadd.f32 %v9367_v2, %v9366_v15  ;;  %v9209_v20 = vpop.f32.mrb[120].mxu0 }
 0x525   : > { %v9210_v4 = vpop.f32.mrb[121].mxu0 }
 0x526   : > { %v9211_v25 = vadd.f32 %v9210_v4, %v9209_v20  ;;  %v9212_v24 = vpop.f32.mrb[122].mxu0  ;;  %v10698_v4 = vld [vmem:[%s11517_s27 + $0x40] sm:$0xff]  }
 0x527   : > { %v9213_v12 = vpop.f32.mrb[123].mxu0 }
 0x528   : > { %v9369_v14 = vpop.f32.mrb[112].mxu1  ;;  %v5982_v55 = vadd.f32 %v9211_v25, %v13777_v36  ;;  %v9214_v51 = vadd.f32 %v9213_v12, %v9212_v24 }
 0x529   : > { %v9370_v49 = vpop.f32.mrb[113].mxu1 }
 0x52a   : > { %v13848_v37 = vadd.f32 %v9370_v49, %v9369_v14  ;;  %v9372_v22 = vpop.f32.mrb[114].mxu1  ;;  %v5985_v2 = vadd.f32 %v9214_v51, %v13782_v53  ;;  %v13855_v17 = vadd.f32 %v13728_v45, %v5982_v55  ;;  %9781 = vmatmul.mubr.msk.bf16.gmra.mrb[224].mxu0 %vm874_vm1, %v10697_v13 }
 0x52b   : > { %v9373_v15 = vpop.f32.mrb[115].mxu1  ;;  %9784 = vmatprep.mubr.msk.bf16.mxu0 %vm874_vm1, %v10698_v4  ;;  %v10699_v4 = vld [vmem:[%s11517_s27 + $0x48] sm:$0xff]  }
 0x52c   : > { %v13851_v11 = vadd.f32 %v9373_v15, %v9372_v22  ;;  %15028 = vst [vmem:[#allocation67_spill] sm:$0xff] %v13855_v17  ;;  %v10700_v17 = vld [vmem:[%s11517_s27 + $0x50] sm:$0xff]  }
 0x52d   : > { %v9215_v14 = vpop.f32.mrb[124].mxu0 }
 0x52e   : > { %v9216_v25 = vpop.f32.mrb[125].mxu0 }
 0x52f   : > { %v9217_v12 = vadd.f32 %v9216_v25, %v9215_v14  ;;  %v9218_v53 = vpop.f32.mrb[126].mxu0 }
 0x530   : > { %v9375_v20 = vpop.f32.mrb[116].mxu1  ;;  %v9219_v45 = vpop.f32.mrb[127].mxu0 }
 0x531   : > { %v9376_v36 = vpop.f32.mrb[117].mxu1  ;;  %v5990_v51 = vadd.f32 %v9217_v12, %v13787_v35  ;;  %v9220_v15 = vadd.f32 %v9219_v45, %v9218_v53 }
 0x532   : > { %v13861_v24 = vadd.f32 %v9376_v36, %v9375_v20  ;;  %v9378_v49 = vpop.f32.mrb[118].mxu1  ;;  %9785 = vmatmul.mubr.msk.bf16.gmra.mrb[228].mxu0 %vm874_vm1, %v10699_v4 }
 0x533   : > { %v9379_v22 = vpop.f32.mrb[119].mxu1  ;;  %v13867_v13 = vadd.f32 %v9220_v15, %v13795_v5  ;;  %9788 = vmatprep.mubr.msk.bf16.mxu0 %vm874_vm1, %v10700_v17  ;;  %v10701_v17 = vld [vmem:[%s11517_s27 + $0x58] sm:$0xff]  }
 0x534   : > { %v13863_v55 = vadd.f32 %v9379_v22, %v9378_v49 }
 0x535   : > { %v9221_v20 = vpop.f32.mrb[128].mxu0 }
 0x536   : > { %v9222_v36 = vpop.f32.mrb[129].mxu0 }
 0x537   : > { %v9223_v49 = vadd.f32 %v9222_v36, %v9221_v20  ;;  %v9224_v22 = vpop.f32.mrb[130].mxu0 }
 0x538   : > { %v9381_v14 = vpop.f32.mrb[120].mxu1  ;;  %v9225_v12 = vpop.f32.mrb[131].mxu0 }
 0x539   : > { %v9382_v25 = vpop.f32.mrb[121].mxu1  ;;  %v5998_v53 = vadd.f32 %v9223_v49, %v13802_v27  ;;  %v9226_v45 = vadd.f32 %v9225_v12, %v9224_v22 }
 0x53a   : > { %v13873_v19 = vadd.f32 %v9382_v25, %v9381_v14  ;;  %v9384_v35 = vpop.f32.mrb[122].mxu1  ;;  %9789 = vmatmul.mubr.msk.bf16.gmra.mrb[232].mxu0 %vm874_vm1, %v10701_v17  ;;  %v10703_v17 = vld [vmem:[%s11517_s27 + $0x68] sm:$0xff]  }
 0x53b   : > { %v9385_v5 = vpop.f32.mrb[123].mxu1  ;;  %v6001_v4 = vadd.f32 %v9226_v45, %v13812_v3  ;;  %9792 = vmatprep.mubr.msk.bf16.mxu0 %vm874_vm1, %v10702_v60  ;;  %v10704_v60 = vld [vmem:[%s11517_s27 + $0x70] sm:$0xff]  }
 0x53c   : > { %v13876_v15 = vadd.f32 %v9385_v5, %v9384_v35 }
 0x53f   : > { %v9227_v36 = vpop.f32.mrb[132].mxu0 }
 0x540   : > { %v9387_v20 = vpop.f32.mrb[124].mxu1  ;;  %v9228_v27 = vpop.f32.mrb[133].mxu0 }
 0x541   : > { %v9388_v14 = vpop.f32.mrb[125].mxu1  ;;  %v9229_v22 = vadd.f32 %v9228_v27, %v9227_v36  ;;  %v9230_v35 = vpop.f32.mrb[134].mxu0 }
 0x542   : > { %v13883_v25 = vadd.f32 %v9388_v14, %v9387_v20  ;;  %v9390_v31 = vpop.f32.mrb[126].mxu1  ;;  %v9231_v3 = vpop.f32.mrb[135].mxu0  ;;  %9793 = vmatmul.mubr.msk.bf16.gmra.mrb[236].mxu0 %vm874_vm1, %v10703_v17  ;;  %v13895_v14 = vadd.f32 %v13710_v34, %v13835_v21 }
 0x543   : > { %v9391_v49 = vpop.f32.mrb[127].mxu1  ;;  %v6006_v5 = vadd.f32 %v9229_v22, %v13821_v9  ;;  %v9232_v45 = vadd.f32 %v9231_v3, %v9230_v35  ;;  %9796 = vmatprep.mubr.msk.bf16.mxu0 %vm874_vm1, %v10704_v60  ;;  %v13904_v3 = vadd.f32 %v13712_v59, %v13840_v16  ;;  %v10705_v60 = vld [vmem:[%s11517_s27 + $0x78] sm:$0xff]   ;;  %v13918_v59 = vadd.f32 %v13766_v63, %v6001_v4  ;;  %s8889_s27 = sshll.u32 %s15075_s21, 8 }
 0x544   : > { %v13885_v12 = vadd.f32 %v9391_v49, %v9390_v31  ;;  %v13898_v31 = vadd.f32 %v13730_v41, %v5985_v2  ;;  %v13912_v2 = vadd.f32 %v13746_v58, %v5990_v51  ;;  %v13922_v16 = vadd.f32 %v13748_v57, %v13867_v13  ;;  %s14708_s30 = scalar_lea.vmem %s15072_s26, %s8889_s27 }
 0x545   : > { %v6009_v20 = vadd.f32 %v9232_v45, %v13826_v54  ;;  %v13907_v54 = vadd.f32 %v13761_v61, %v5998_v53  ;;  %v10100_v61 = vld [vmem:[#allocation10 + $0x30] sm:$0xff]   ;;  %v13931_v57 = vadd.f32 %v13779_v6, %v6006_v5 }
 0x546   : > { %9730 = vmatprep.subr.bf16.mxu1 %v10100_v61 }
 0x547   : > { %9731 = vmatpush3.bf16.msra.mxu1 %v10100_v61 }
 0x548   : > { %v9393_v36 = vpop.f32.mrb[128].mxu1 }
 0x549   : > { %v9233_v27 = vpop.f32.mrb[136].mxu0  ;;  %v9394_v9 = vpop.f32.mrb[129].mxu1 }
 0x54a   : > { %v9234_v49 = vpop.f32.mrb[137].mxu0  ;;  %v13900_v22 = vadd.f32 %v9394_v9, %v9393_v36  ;;  %v9396_v35 = vpop.f32.mrb[130].mxu1  ;;  %9797 = vmatmul.mubr.msk.bf16.gmra.mrb[240].mxu0 %vm874_vm1, %v10705_v60  ;;  %v13940_v60 = vadd.f32 %v13784_v56, %v6009_v20 }
 0x54b   : > { %v9235_v34 = vadd.f32 %v9234_v49, %v9233_v27  ;;  %v9236_v21 = vpop.f32.mrb[138].mxu0  ;;  %v9397_v45 = vpop.f32.mrb[131].mxu1 }
 0x54c   : > { %v9237_v17 = vpop.f32.mrb[139].mxu0  ;;  %v13909_v41 = vadd.f32 %v9397_v45, %v9396_v35 }
 0x54d   : > { %v6014_v36 = vadd.f32 %v9235_v34, %v13446_v42  ;;  %v9238_v9 = vadd.f32 %v9237_v17, %v9236_v21 }
 0x54f   : > { %v6017_v53 = vadd.f32 %v9238_v9, %v13456_v39  ;;  %v13926_v27 = vadd.f32 %v13789_v0, %v6014_v36 }
 0x551   : > { %v13936_v0 = vadd.f32 %v13797_v44, %v6017_v53  ;;  %v10101_v53 = vld [vmem:[#allocation10 + $0x38] sm:$0xff]  }
 0x552   : > { %v9399_v58 = vpop.f32.mrb[132].mxu1  ;;  %9732 = vmatprep.subr.bf16.mxu1 %v10101_v53 }
 0x553   : > { %v9239_v51 = vpop.f32.mrb[140].mxu0  ;;  %v9400_v49 = vpop.f32.mrb[133].mxu1  ;;  %9733 = vmatpush3.bf16.msra.mxu1 %v10101_v53 }
 0x554   : > { %v9240_v42 = vpop.f32.mrb[141].mxu0  ;;  %v13928_v35 = vadd.f32 %v9400_v49, %v9399_v58  ;;  %v9402_v63 = vpop.f32.mrb[134].mxu1 }
 0x555   : > { %v9241_v4 = vadd.f32 %v9240_v42, %v9239_v51  ;;  %v9242_v34 = vpop.f32.mrb[142].mxu0  ;;  %v9403_v21 = vpop.f32.mrb[135].mxu1 }
 0x556   : > { %v9243_v13 = vpop.f32.mrb[143].mxu0  ;;  %v13933_v39 = vadd.f32 %v9403_v21, %v9402_v63 }
 0x557   : > { %v6022_v45 = vadd.f32 %v9241_v4, %v13484_v10  ;;  %v9244_v17 = vadd.f32 %v9243_v13, %v9242_v34 }
 0x559   : > { %v6025_v36 = vadd.f32 %v9244_v17, %v13501_v29  ;;  %v13944_v6 = vadd.f32 %v13804_v48, %v6022_v45 }
 0x55b   : > { %v9245_v9 = vpop.f32.mrb[144].mxu0  ;;  %v13948_v10 = vadd.f32 %v13814_v32, %v6025_v36 }
 0x55c   : > { %v9246_v61 = vpop.f32.mrb[145].mxu0 }
 0x55d   : > { %v9247_v58 = vadd.f32 %v9246_v61, %v9245_v9  ;;  %v9248_v51 = vpop.f32.mrb[146].mxu0 }
 0x55e   : > { %v9249_v5 = vpop.f32.mrb[147].mxu0 }
 0x55f   : > { %v6030_v49 = vadd.f32 %v9247_v58, %v13535_v28  ;;  %v9250_v44 = vadd.f32 %v9249_v5, %v9248_v51 }
 0x561   : > { %v6033_v56 = vadd.f32 %v9250_v44, %v13546_v1  ;;  %v13952_v20 = vadd.f32 %v13823_v46, %v6030_v49 }
 0x563   : > { %v9251_v29 = vpop.f32.mrb[148].mxu0  ;;  %v13955_v42 = vadd.f32 %v13828_v30, %v6033_v56 }
 0x564   : > { %v9252_v48 = vpop.f32.mrb[149].mxu0 }
 0x565   : > { %v9253_v63 = vadd.f32 %v9252_v48, %v9251_v29  ;;  %v9254_v4 = vpop.f32.mrb[150].mxu0 }
 0x566   : > { %v9255_v28 = vpop.f32.mrb[151].mxu0 }
 0x567   : > { %v6038_v34 = vadd.f32 %v9253_v63, %v13579_v40  ;;  %v9256_v21 = vadd.f32 %v9255_v28, %v9254_v4 }
 0x569   : > { %v6041_v32 = vadd.f32 %v9256_v21, %v13586_v33  ;;  %v13960_v1 = vadd.f32 %v13837_v52, %v6038_v34 }
 0x56b   : > { %v9257_v46 = vpop.f32.mrb[152].mxu0  ;;  %v13963_v13 = vadd.f32 %v13842_v38, %v6041_v32 }
 0x56c   : > { %v9258_v45 = vpop.f32.mrb[153].mxu0 }
 0x56d   : > { %v9259_v17 = vadd.f32 %v9258_v45, %v9257_v46  ;;  %v9260_v30 = vpop.f32.mrb[154].mxu0 }
 0x56e   : > { %v9261_v36 = vpop.f32.mrb[155].mxu0 }
 0x56f   : > { %v6046_v9 = vadd.f32 %v9259_v17, %v13611_v23  ;;  %v9262_v61 = vadd.f32 %v9261_v36, %v9260_v30 }
 0x571   : > { %v6049_v58 = vadd.f32 %v9262_v61, %v13620_v8  ;;  %v13968_v40 = vadd.f32 %v13848_v37, %v6046_v9 }
 0x573   : > { %v9263_v33 = vpop.f32.mrb[156].mxu0  ;;  %v13971_v52 = vadd.f32 %v13851_v11, %v6049_v58 }
 0x574   : > { %v9264_v51 = vpop.f32.mrb[157].mxu0 }
 0x575   : > { %v9265_v5 = vadd.f32 %v9264_v51, %v9263_v33  ;;  %v9266_v38 = vpop.f32.mrb[158].mxu0  ;;  %v15029_v51 = vld [vmem:[#allocation62_spill] sm:$0xff] }
 0x576   : > { %v9267_v49 = vpop.f32.mrb[159].mxu0 }
 0x577   : > { %v6054_v44 = vadd.f32 %v9265_v5, %v13632_v62  ;;  %v9268_v53 = vadd.f32 %v9267_v49, %v9266_v38 }
 0x579   : > { %v6057_v56 = vadd.f32 %v9268_v53, %v13640_v26  ;;  %v13976_v23 = vadd.f32 %v13861_v24, %v6054_v44 }
 0x57b   : > { %v13979_v37 = vadd.f32 %v13863_v55, %v6057_v56 }
 0x57d   : > { %v9269_v8 = vpop.f32.mrb[160].mxu0 }
 0x57e   : > { %v9270_v29 = vpop.f32.mrb[161].mxu0 }
 0x57f   : > { %v9271_v48 = vadd.f32 %v9270_v29, %v9269_v8  ;;  %v9272_v11 = vpop.f32.mrb[162].mxu0  ;;  %v10102_v8 = vld [vmem:[#allocation17 + $0x40] sm:$0xff]  }
 0x580   : > { %v9273_v63 = vpop.f32.mrb[163].mxu0  ;;  %9476 = vmatprep.subr.bf16.mxu1 %v10102_v8 }
 0x581   : > { %v6062_v4 = vadd.f32 %v9271_v48, %v13651_v18  ;;  %v9274_v28 = vadd.f32 %v9273_v63, %v9272_v11  ;;  %v15030_v63 = vld [vmem:[#allocation63_spill] sm:$0xff] }
 0x583   : > { %v6065_v34 = vadd.f32 %v9274_v28, %v13658_v7  ;;  %v13984_v62 = vadd.f32 %v13873_v19, %v6062_v4 }
 0x585   : > { %v9275_v26 = vpop.f32.mrb[164].mxu0  ;;  %v13987_v24 = vadd.f32 %v13876_v15, %v6065_v34 }
 0x586   : > { %v9276_v21 = vpop.f32.mrb[165].mxu0 }
 0x587   : > { %v9277_v32 = vadd.f32 %v9276_v21, %v9275_v26  ;;  %v9278_v55 = vpop.f32.mrb[166].mxu0 }
 0x588   : > { %v9279_v46 = vpop.f32.mrb[167].mxu0 }
 0x589   : > { %v6070_v45 = vadd.f32 %v9277_v32, %v13671_v50  ;;  %v9280_v17 = vadd.f32 %v9279_v46, %v9278_v55 }
 0x58b   : > { %v6073_v30 = vadd.f32 %v9280_v17, %v13682_v47  ;;  %v13992_v18 = vadd.f32 %v13883_v25, %v6070_v45  ;;  %v15032_v17 = vld [vmem:[#allocation65_spill] sm:$0xff] }
 0x58d   : > { %v9281_v7 = vpop.f32.mrb[168].mxu0  ;;  %v13995_v19 = vadd.f32 %v13885_v12, %v6073_v30 }
 0x58e   : > { %v9282_v36 = vpop.f32.mrb[169].mxu0 }
 0x58f   : > { %v9283_v9 = vadd.f32 %v9282_v36, %v9281_v7  ;;  %v9284_v15 = vpop.f32.mrb[170].mxu0  ;;  %v15033_v36 = vld [vmem:[#allocation66_spill] sm:$0xff] }
 0x590   : > { %v9285_v61 = vpop.f32.mrb[171].mxu0 }
 0x591   : > { %v6078_v58 = vadd.f32 %v9283_v9, %v13699_v43  ;;  %v9286_v33 = vadd.f32 %v9285_v61, %v9284_v15 }
 0x592   : > { %v9405_v50 = vpop.f32.mrb[136].mxu1 }
 0x593   : > { %v6081_v5 = vadd.f32 %v9286_v33, %v15029_v51  ;;  %v14000_v38 = vadd.f32 %v13900_v22, %v6078_v58  ;;  %v9406_v47 = vpop.f32.mrb[137].mxu1  ;;  %v15031_v22 = vld [vmem:[#allocation64_spill] sm:$0xff]  ;;  %v15034_v33 = vld [vmem:[#allocation67_spill] sm:$0xff] }
 0x594   : > { %v9407_v49 = vadd.f32 %v9406_v47, %v9405_v50  ;;  %v9408_v44 = vpop.f32.mrb[138].mxu1  ;;  %v14017_v58 = vld [vmem:[#allocation7] ss:$0 sm:$0xff] }
 0x595   : > { %v9287_v25 = vpop.f32.mrb[172].mxu0  ;;  %v14003_v12 = vadd.f32 %v13909_v41, %v6081_v5  ;;  %v9409_v56 = vpop.f32.mrb[139].mxu1  ;;  %v14022_v5 = vld [vmem:[#allocation8] ss:$0 sm:$0xff] }
 0x596   : > { %v9288_v53 = vpop.f32.mrb[173].mxu0  ;;  %v9410_v43 = vadd.f32 %v9409_v56, %v9408_v44 }
 0x597   : > { %v9289_v29 = vadd.f32 %v9288_v53, %v9287_v25  ;;  %v9290_v48 = vpop.f32.mrb[174].mxu0 }
 0x598   : > { %v9291_v11 = vpop.f32.mrb[175].mxu0 }
 0x599   : > { %v6086_v4 = vadd.f32 %v9289_v29, %v15030_v63  ;;  %v9292_v28 = vadd.f32 %v9291_v11, %v9290_v48 }
 0x59b   : > { %v6089_v34 = vadd.f32 %v9292_v28, %v15031_v22  ;;  %v14008_v26 = vadd.f32 %v13928_v35, %v6086_v4 }
 0x59d   : > { %v9293_v21 = vpop.f32.mrb[176].mxu0  ;;  %v14011_v41 = vadd.f32 %v13933_v39, %v6089_v34 }
 0x59e   : > { %v9294_v32 = vpop.f32.mrb[177].mxu0 }
 0x59f   : > { %v9295_v55 = vadd.f32 %v9294_v32, %v9293_v21  ;;  %v9296_v46 = vpop.f32.mrb[178].mxu0 }
 0x5a0   : > { %v9297_v45 = vpop.f32.mrb[179].mxu0 }
 0x5a1   : > { %v6094_v30 = vadd.f32 %v9295_v55, %v15032_v17  ;;  %v9298_v7 = vadd.f32 %v9297_v45, %v9296_v46 }
 0x5a3   : > { %v6097_v9 = vadd.f32 %v9298_v7, %v15033_v36  ;;  %v14015_v15 = vadd.f32 %v9407_v49, %v6094_v30 }
 0x5a5   : > { %v9688_v61 = vpop.f32.mrb[180].mxu0  ;;  %v14019_v35 = vadd.f32 %v9410_v43, %v6097_v9 }
 0x5a6   : > { %v6304_v51 = vadd.f32 %v9688_v61, %v15034_v33  ;;  %v6295_v39 = vpop.f32.mrb[181].mxu0 }
 0x5a7   : > { %v6296_v50 = vadd.f32 %v6295_v39, %v13895_v14  ;;  %v9689_v47 = vpop.f32.mrb[182].mxu0 }
 0x5a8   : > { %v6431_v25 = vmul.f32 %v14017_v58, %v6304_v51  ;;  %v6307_v44 = vadd.f32 %v9689_v47, %v13898_v31  ;;  %v6298_v53 = vpop.f32.mrb[183].mxu0 }
 0x5a9   : > { %v6429_v49 = vmul.f32 %v14017_v58, %v6296_v50  ;;  %v6299_v56 = vadd.f32 %v6298_v53, %v13904_v3 }
 0x5aa   : > { %v14030_v8 = vadd.f32 %v14022_v5, %v6431_v25  ;;  %v6432_v29 = vmul.f32 %v14017_v58, %v6307_v44 }
 0x5ab   : > { %v14034_v48 = vadd.f32 %v14022_v5, %v6429_v49  ;;  %v6430_v14 = vmul.f32 %v14017_v58, %v6299_v56 }
 0x5ac   : > { %v8778_v43 = vmul.f32 -1.442695, %v14030_v8  ;;  %v14039_v11 = vadd.f32 %v14022_v5, %v6432_v29 }
 0x5ad   : > { %v8776_v31 = vmul.f32 -1.442695, %v14034_v48  ;;  %v14043_v63 = vadd.f32 %v14022_v5, %v6430_v14  ;;  %v9692_v3 = vpop.f32.mrb[184].mxu0 }
 0x5ae   : > { %10374 = vpow2.f32 %v8778_v43  ;;  %v8779_v4 = vmul.f32 -1.442695, %v14039_v11  ;;  %v6320_v28 = vadd.f32 %v9692_v3, %v13907_v54  ;;  %v6311_v22 = vpop.f32.mrb[185].mxu0 }
 0x5af   : > { %10376 = vpow2.f32 %v8776_v31  ;;  %v8777_v34 = vmul.f32 -1.442695, %v14043_v63  ;;  %v6312_v21 = vadd.f32 %v6311_v22, %v13912_v2  ;;  %v9693_v32 = vpop.f32.mrb[186].mxu0 }
 0x5b0   : > { %10378 = vpow2.f32 %v8779_v4  ;;  %v6435_v55 = vmul.f32 %v14017_v58, %v6320_v28  ;;  %v6323_v46 = vadd.f32 %v9693_v32, %v13918_v59  ;;  %v6314_v45 = vpop.f32.mrb[187].mxu0 }
 0x5b1   : > { %10380 = vpow2.f32 %v8777_v34  ;;  %v6433_v17 = vmul.f32 %v14017_v58, %v6312_v21  ;;  %v6315_v30 = vadd.f32 %v6314_v45, %v13922_v16 }
 0x5b2   : > { %v14054_v54 = vadd.f32 %v14022_v5, %v6435_v55  ;;  %v6436_v7 = vmul.f32 %v14017_v58, %v6323_v46 }
 0x5b3   : > { %v14058_v36 = vadd.f32 %v14022_v5, %v6433_v17  ;;  %v6434_v2 = vmul.f32 %v14017_v58, %v6315_v30 }
 0x5b4   : > { %v8782_v9 = vmul.f32 -1.442695, %v14054_v54  ;;  %v14063_v59 = vadd.f32 %v14022_v5, %v6436_v7 }
 0x5b5   : > { %v8780_v61 = vmul.f32 -1.442695, %v14058_v36  ;;  %v14067_v33 = vadd.f32 %v14022_v5, %v6434_v2  ;;  %v9696_v16 = vpop.f32.mrb[188].mxu0 }
 0x5b6   : > { %10382 = vpow2.f32 %v8782_v9  ;;  %v8783_v51 = vmul.f32 -1.442695, %v14063_v59  ;;  %v6336_v39 = vadd.f32 %v9696_v16, %v13926_v27  ;;  %v6327_v50 = vpop.f32.mrb[189].mxu0 }
 0x5b7   : > { %10384 = vpow2.f32 %v8780_v61  ;;  %v8781_v47 = vmul.f32 -1.442695, %v14067_v33  ;;  %v6328_v25 = vadd.f32 %v6327_v50, %v13931_v57  ;;  %v9697_v44 = vpop.f32.mrb[190].mxu0 }
 0x5b8   : > { %v10375_v53 = vpop.eup %10374  ;;  %10386 = vpow2.f32 %v8783_v51  ;;  %v6439_v49 = vmul.f32 %v14017_v58, %v6336_v39  ;;  %v6339_v56 = vadd.f32 %v9697_v44, %v13936_v0  ;;  %v6330_v29 = vpop.f32.mrb[191].mxu0 }
 0x5b9   : > { %v10377_v14 = vpop.eup %10376  ;;  %v6598_v43 = vadd.f32 1.0, %v10375_v53  ;;  %10388 = vpow2.f32 %v8781_v47  ;;  %v6437_v31 = vmul.f32 %v14017_v58, %v6328_v25  ;;  %v6331_v27 = vadd.f32 %v6330_v29, %v13940_v60 }
 0x5ba   : > { %v10379_v3 = vpop.eup %10378  ;;  %v6596_v4 = vadd.f32 1.0, %v10377_v14  ;;  %v14078_v28 = vadd.f32 %v14022_v5, %v6439_v49  ;;  %v6440_v57 = vmul.f32 %v14017_v58, %v6339_v56 }
 0x5bb   : > { %v10381_v22 = vpop.eup %10380  ;;  %10390 = vrcp.f32 %v6598_v43  ;;  %v6599_v34 = vadd.f32 1.0, %v10379_v3  ;;  %v14082_v0 = vadd.f32 %v14022_v5, %v6437_v31  ;;  %v6438_v21 = vmul.f32 %v14017_v58, %v6331_v27 }
 0x5bc   : > { %10392 = vrcp.f32 %v6596_v4  ;;  %v6597_v32 = vadd.f32 1.0, %v10381_v22  ;;  %v8786_v55 = vmul.f32 -1.442695, %v14078_v28  ;;  %v14087_v60 = vadd.f32 %v14022_v5, %v6440_v57 }
 0x5bd   : > { %10394 = vrcp.f32 %v6599_v34  ;;  %v8784_v46 = vmul.f32 -1.442695, %v14082_v0  ;;  %v14091_v45 = vadd.f32 %v14022_v5, %v6438_v21  ;;  %v9700_v17 = vpop.f32.mrb[192].mxu0 }
 0x5be   : > { %10396 = vrcp.f32 %v6597_v32  ;;  %v8787_v30 = vmul.f32 -1.442695, %v14087_v60  ;;  %v6352_v7 = vadd.f32 %v9700_v17, %v13952_v20  ;;  %v6343_v2 = vpop.f32.mrb[193].mxu0 }
 0x5bf   : > { %10398 = vpow2.f32 %v8786_v55  ;;  %v8785_v9 = vmul.f32 -1.442695, %v14091_v45  ;;  %v6344_v61 = vadd.f32 %v6343_v2, %v13944_v6  ;;  %v9701_v16 = vpop.f32.mrb[194].mxu0 }
 0x5c0   : > { %v10383_v51 = vpop.eup %10382  ;;  %10400 = vpow2.f32 %v8784_v46  ;;  %v6443_v39 = vmul.f32 %v14017_v58, %v6352_v7  ;;  %v6355_v50 = vadd.f32 %v9701_v16, %v13955_v42  ;;  %v6346_v47 = vpop.f32.mrb[195].mxu0 }
 0x5c1   : > { %v10385_v25 = vpop.eup %10384  ;;  %v6602_v44 = vadd.f32 1.0, %v10383_v51  ;;  %10402 = vpow2.f32 %v8787_v30  ;;  %v6441_v53 = vmul.f32 %v14017_v58, %v6344_v61  ;;  %v6347_v20 = vadd.f32 %v6346_v47, %v13948_v10  ;;  %v15035_v51 = vld [vmem:[#allocation30_spill] sm:$0xff] }
 0x5c2   : > { %v10387_v49 = vpop.eup %10386  ;;  %v6600_v56 = vadd.f32 1.0, %v10385_v25  ;;  %10404 = vpow2.f32 %v8785_v9  ;;  %v14102_v6 = vadd.f32 %v14022_v5, %v6443_v39  ;;  %v6444_v29 = vmul.f32 %v14017_v58, %v6355_v50 }
 0x5c3   : > { %v10389_v14 = vpop.eup %10388  ;;  %10406 = vrcp.f32 %v6602_v44  ;;  %v6603_v43 = vadd.f32 1.0, %v10387_v49  ;;  %v14106_v42 = vadd.f32 %v14022_v5, %v6441_v53  ;;  %v6442_v31 = vmul.f32 %v14017_v58, %v6347_v20  ;;  %v15036_v53 = vld [vmem:[#allocation32_spill] sm:$0xff] }
 0x5c4   : > { %10408 = vrcp.f32 %v6600_v56  ;;  %v6601_v27 = vadd.f32 1.0, %v10389_v14  ;;  %v8790_v10 = vmul.f32 -1.442695, %v14102_v6  ;;  %v14111_v3 = vadd.f32 %v14022_v5, %v6444_v29 }
 0x5c5   : > { %v10391_v4 = vpop.eup %10390  ;;  %10410 = vrcp.f32 %v6603_v43  ;;  %v8788_v57 = vmul.f32 -1.442695, %v14106_v42  ;;  %v14115_v22 = vadd.f32 %v14022_v5, %v6442_v31  ;;  %v9704_v34 = vpop.f32.mrb[196].mxu0 }
 0x5c6   : > { %v10393_v21 = vpop.eup %10392  ;;  %v6694_v32 = vmul.f32 %v10391_v4, %v14030_v8  ;;  %10412 = vrcp.f32 %v6601_v27  ;;  %v8791_v55 = vmul.f32 -1.442695, %v14111_v3  ;;  %v6368_v46 = vadd.f32 %v9704_v34, %v13968_v40  ;;  %v6359_v17 = vpop.f32.mrb[197].mxu0 }
 0x5c7   : > { %v10395_v30 = vpop.eup %10394  ;;  %v14121_v7 = vmul.f32 %v10393_v21, %v14034_v48  ;;  %10414 = vpow2.f32 %v8790_v10  ;;  %v8789_v2 = vmul.f32 -1.442695, %v14115_v22  ;;  %v6360_v9 = vadd.f32 %v6359_v17, %v13960_v1  ;;  %v9705_v61 = vpop.f32.mrb[198].mxu0 }
 0x5c8   : > { %v10397_v16 = vpop.eup %10396  ;;  %v14126_v39 = vadd.f32 %v6694_v32, %v15035_v51  ;;  %v6695_v8 = vmul.f32 %v10395_v30, %v14039_v11  ;;  %10416 = vpow2.f32 %v8788_v57  ;;  %v6447_v40 = vmul.f32 %v14017_v58, %v6368_v46  ;;  %v6362_v50 = vpop.f32.mrb[199].mxu0 }
 0x5c9   : > { %v10399_v47 = vpop.eup %10398  ;;  %v6693_v48 = vmul.f32 %v10397_v16, %v14043_v63  ;;  %10418 = vpow2.f32 %v8791_v55  ;;  %v6445_v25 = vmul.f32 %v14017_v58, %v6360_v9  ;;  %v6371_v44 = vadd.f32 %v9705_v61, %v13971_v52 }
 0x5ca   : > { %v10401_v1 = vpop.eup %10400  ;;  %v14134_v20 = vadd.f32 %v6695_v8, %v15036_v53  ;;  %v6606_v49 = vadd.f32 1.0, %v10399_v47  ;;  %10420 = vpow2.f32 %v8789_v2  ;;  %v14137_v11 = vadd.f32 %v14022_v5, %v6447_v40 }
 0x5cb   : > { %v10403_v56 = vpop.eup %10402  ;;  %v6604_v29 = vadd.f32 1.0, %v10401_v1  ;;  %v14140_v14 = vadd.f32 %v14022_v5, %v6445_v25  ;;  %v6448_v63 = vmul.f32 %v14017_v58, %v6371_v44  ;;  %v6363_v43 = vadd.f32 %v6362_v50, %v13963_v13 }
 0x5cc   : > { %v10405_v31 = vpop.eup %10404  ;;  %v6757_v52 = vpack.c.bf16 %v14134_v20, %v14126_v39  ;;  %10422 = vrcp.f32 %v6606_v49  ;;  %v6607_v27 = vadd.f32 1.0, %v10403_v56  ;;  %v8794_v10 = vmul.f32 -1.442695, %v14137_v11 }
 0x5cd   : > { %v10407_v4 = vpop.eup %10406  ;;  %10424 = vrcp.f32 %v6604_v29  ;;  %v6605_v57 = vadd.f32 1.0, %v10405_v31  ;;  %v8792_v34 = vmul.f32 -1.442695, %v14140_v14  ;;  %v14149_v21 = vadd.f32 %v14022_v5, %v6448_v63  ;;  %v9708_v32 = vpop.f32.mrb[200].mxu0  ;;  %v15037_v63 = vld [vmem:[#allocation31_spill] sm:$0xff] }
 0x5ce   : > { %v10409_v55 = vpop.eup %10408  ;;  %v14152_v13 = vmul.f32 %v10407_v4, %v14054_v54  ;;  %10426 = vrcp.f32 %v6607_v27  ;;  %v6446_v46 = vmul.f32 %v14017_v58, %v6363_v43  ;;  %v6384_v17 = vadd.f32 %v9708_v32, %v13984_v62  ;;  %v6375_v30 = vpop.f32.mrb[201].mxu0 }
 0x5cf   : > { %v10411_v2 = vpop.eup %10410  ;;  %v14157_v9 = vmul.f32 %v10409_v55, %v14058_v36  ;;  %10428 = vrcp.f32 %v6605_v57  ;;  %v8795_v61 = vmul.f32 -1.442695, %v14149_v21  ;;  %v6376_v16 = vadd.f32 %v6375_v30, %v13976_v23  ;;  %v9709_v51 = vpop.f32.mrb[202].mxu0 }
 0x5d0   : > { %v10413_v8 = vpop.eup %10412  ;;  %v14162_v54 = vmul.f32 %v10411_v2, %v14063_v59  ;;  %10430 = vpow2.f32 %v8794_v10  ;;  %v14165_v40 = vadd.f32 %v14022_v5, %v6446_v46  ;;  %v6451_v62 = vmul.f32 %v14017_v58, %v6384_v17  ;;  %v6378_v50 = vpop.f32.mrb[203].mxu0  ;;  %v15038_v10 = vld [vmem:[#allocation33_spill] sm:$0xff] }
 0x5d1   : > { %v10415_v47 = vpop.eup %10414  ;;  %v14169_v36 = vmul.f32 %v10413_v8, %v14067_v33  ;;  %10432 = vpow2.f32 %v8792_v34  ;;  %v6449_v25 = vmul.f32 %v14017_v58, %v6376_v16  ;;  %v6387_v23 = vadd.f32 %v9709_v51, %v13987_v24 }
 0x5d2   : > { %v10417_v44 = vpop.eup %10416  ;;  %v6610_v1 = vadd.f32 1.0, %v10415_v47  ;;  %10434 = vpow2.f32 %v8795_v61  ;;  %v8793_v59 = vmul.f32 -1.442695, %v14165_v40  ;;  %v14175_v53 = vadd.f32 %v14022_v5, %v6451_v62  ;;  %v10103_v61 = vld [vmem:[#allocation17] sm:$0xff]   ;;  %v10104_v47 = vld [vmem:[#allocation17 + $0x48] sm:$0xff]  }
 0x5d3   : > { %v10419_v49 = vpop.eup %10418  ;;  %v6608_v56 = vadd.f32 1.0, %v10417_v44  ;;  %v14178_v29 = vadd.f32 %v14022_v5, %v6449_v25  ;;  %v6452_v33 = vmul.f32 %v14017_v58, %v6387_v23  ;;  %v6724_v43 = vadd.f32 %v14121_v7, %v15037_v63 }
 0x5d4   : > { %v10421_v31 = vpop.eup %10420  ;;  %10436 = vrcp.f32 %v6610_v1  ;;  %v6611_v24 = vadd.f32 1.0, %v10419_v49  ;;  %v8798_v27 = vmul.f32 -1.442695, %v14175_v53  ;;  %v6725_v4 = vadd.f32 %v6693_v48, %v15038_v10 }
 0x5d5   : > { %10438 = vrcp.f32 %v6608_v56  ;;  %v6609_v57 = vadd.f32 1.0, %v10421_v31  ;;  %v8796_v34 = vmul.f32 -1.442695, %v14178_v29  ;;  %v14187_v32 = vadd.f32 %v14022_v5, %v6452_v33  ;;  %v9712_v55 = vpop.f32.mrb[204].mxu0  ;;  %v10105_v56 = vld [vmem:[#allocation17 + $0x8] sm:$0xff]  }
 0x5d6   : > { %v10423_v46 = vpop.eup %10422  ;;  %10440 = vrcp.f32 %v6611_v24  ;;  %v6756_v17 = vpack.c.bf16 %v6725_v4, %v6724_v43  ;;  %v6379_v7 = vadd.f32 %v6378_v50, %v13979_v37  ;;  %v6400_v30 = vadd.f32 %v9712_v55, %v14000_v38  ;;  %v6391_v2 = vpop.f32.mrb[205].mxu0  ;;  %v15039_v24 = vld [vmem:[#allocation35_spill] sm:$0xff] }
 0x5d7   : > { %v10425_v16 = vpop.eup %10424  ;;  %v14192_v48 = vmul.f32 %v10423_v46, %v14078_v28  ;;  %10442 = vrcp.f32 %v6609_v57  ;;  %v8799_v51 = vmul.f32 -1.442695, %v14187_v32  ;;  %v6392_v8 = vadd.f32 %v6391_v2, %v13992_v18  ;;  %v9713_v62 = vpop.f32.mrb[206].mxu0  ;;  %v15040_v46 = vld [vmem:[#allocation37_spill] sm:$0xff] }
 0x5d8   : > { %v10427_v25 = vpop.eup %10426  ;;  %v14197_v23 = vmul.f32 %v10425_v16, %v14082_v0  ;;  %10444 = vpow2.f32 %v8793_v59  ;;  %9734 = vmatprep.mubr.bf16.mxu1 %v6756_v17  ;;  %v6450_v37 = vmul.f32 %v14017_v58, %v6379_v7  ;;  %v6455_v38 = vmul.f32 %v14017_v58, %v6400_v30  ;;  %v6394_v50 = vpop.f32.mrb[207].mxu0  ;;  %v15041_v30 = vld [vmem:[#allocation34_spill] sm:$0xff] }
 0x5d9   : > { %v10429_v28 = vpop.eup %10428  ;;  %v14202_v44 = vmul.f32 %v10427_v25, %v14087_v60  ;;  %10446 = vpow2.f32 %v8798_v27  ;;  %9735 = vmatmul.mubr.bf16.vlgmr.msra.gmra.mrb[140].mxu1 %v6757_v52  ;;  %v6453_v18 = vmul.f32 %v14017_v58, %v6392_v8  ;;  %v6403_v0 = vadd.f32 %v9713_v62, %v14003_v12  ;;  %v15042_v62 = vld [vmem:[#allocation36_spill] sm:$0xff] }
 0x5da   : > { %v10431_v1 = vpop.eup %10430  ;;  %v14210_v59 = vmul.f32 %v10429_v28, %v14091_v45  ;;  %10448 = vpow2.f32 %v8796_v34  ;;  %v14213_v49 = vadd.f32 %v14022_v5, %v6450_v37  ;;  %v14216_v60 = vadd.f32 %v14022_v5, %v6455_v38  ;;  %9477 = vmatpush3.bf16.msra.mxu1 %v10103_v61  ;;  %v10106_v45 = vld [vmem:[#allocation17 + $0x50] sm:$0xff]  }
 0x5db   : > { %v10433_v33 = vpop.eup %10432  ;;  %v6614_v39 = vadd.f32 1.0, %v10431_v1  ;;  %10450 = vpow2.f32 %v8799_v51  ;;  %v14219_v20 = vadd.f32 %v14022_v5, %v6453_v18  ;;  %v6456_v12 = vmul.f32 %v14017_v58, %v6403_v0  ;;  %9478 = vmatprep.subr.bf16.mxu1 %v10104_v47 }
 0x5dc   : > { %v10435_v52 = vpop.eup %10434  ;;  %v6612_v63 = vadd.f32 1.0, %v10433_v33  ;;  %v8797_v43 = vmul.f32 -1.442695, %v14213_v49  ;;  %v8802_v31 = vmul.f32 -1.442695, %v14216_v60  ;;  %v6728_v27 = vadd.f32 %v14157_v9, %v15039_v24  ;;  %v10107_v9 = vld [vmem:[#allocation17 + $0x10] sm:$0xff]  }
 0x5dd   : > { %10452 = vrcp.f32 %v6614_v39  ;;  %v6615_v10 = vadd.f32 1.0, %v10435_v52  ;;  %v8800_v4 = vmul.f32 -1.442695, %v14219_v20  ;;  %v14228_v57 = vadd.f32 %v14022_v5, %v6456_v12  ;;  %v9716_v34 = vpop.f32.mrb[208].mxu0  ;;  %v10109_v33 = vld [vmem:[#allocation17 + $0x18] sm:$0xff]  }
 0x5de   : > { %v10437_v55 = vpop.eup %10436  ;;  %10454 = vrcp.f32 %v6612_v63  ;;  %v6729_v17 = vadd.f32 %v14169_v36, %v15040_v46  ;;  %v6395_v7 = vadd.f32 %v6394_v50, %v13995_v19  ;;  %v6730_v2 = vadd.f32 %v14152_v13, %v15041_v30  ;;  %v6407_v61 = vpop.f32.mrb[209].mxu0  ;;  %9479 = vmatpush3.bf16.msra.mxu1 %v10105_v56  ;;  %v10108_v36 = vld [vmem:[#allocation17 + $0x58] sm:$0xff]  }
 0x5df   : > { %v10439_v16 = vpop.eup %10438  ;;  %v14236_v51 = vmul.f32 %v10437_v55, %v14102_v6  ;;  %10456 = vrcp.f32 %v6615_v10  ;;  %v8803_v8 = vmul.f32 -1.442695, %v14228_v57  ;;  %v6731_v47 = vadd.f32 %v14162_v54, %v15042_v62  ;;  %v9717_v25 = vpop.f32.mrb[210].mxu0  ;;  %9480 = vmatprep.subr.bf16.mxu1 %v10106_v45  ;;  %v15044_v55 = vld [vmem:[#allocation40_spill] sm:$0xff] }
 0x5e0   : > { %v10441_v19 = vpop.eup %10440  ;;  %v14242_v37 = vmul.f32 %v10439_v16, %v14106_v42  ;;  %10458 = vpow2.f32 %v8797_v43  ;;  %v6758_v13 = vpack.c.bf16 %v6729_v17, %v6728_v27  ;;  %v6454_v38 = vmul.f32 %v14017_v58, %v6395_v7  ;;  %v6410_v50 = vpop.f32.mrb[211].mxu0  ;;  %v10111_v17 = vld [vmem:[#allocation17 + $0x20] sm:$0xff]  }
 0x5e1   : > { %v10443_v6 = vpop.eup %10442  ;;  %v14246_v28 = vmul.f32 %v10441_v19, %v14111_v3  ;;  %10460 = vpow2.f32 %v8802_v31  ;;  %v6759_v18 = vpack.c.bf16 %v6731_v47, %v6730_v2  ;;  %v6416_v54 = vadd.f32 %v9716_v34, %v14015_v15  ;;  %v15043_v31 = vld [vmem:[#allocation38_spill] sm:$0xff] }
 0x5e2   : > { %v10445_v0 = vpop.eup %10444  ;;  %v14250_v1 = vmul.f32 %v10443_v6, %v14115_v22  ;;  %10462 = vpow2.f32 %v8800_v4  ;;  %9738 = vmatprep.mubr.bf16.mxu1 %v6758_v13  ;;  %v14253_v42 = vadd.f32 %v14022_v5, %v6454_v38  ;;  %v6408_v56 = vadd.f32 %v6407_v61, %v14008_v26  ;;  %9481 = vmatpush3.bf16.msra.mxu1 %v10107_v9  ;;  %v10110_v22 = vld [vmem:[#allocation17 + $0x60] sm:$0xff]   ;;  %v10112_v61 = vld [vmem:[#allocation17 + $0x68] sm:$0xff]  }
 0x5e3   : > { %v10447_v39 = vpop.eup %10446  ;;  %v6613_v3 = vadd.f32 1.0, %v10445_v0  ;;  %10464 = vpow2.f32 %v8803_v8  ;;  %9739 = vmatmul.mubr.bf16.gmra.mrb[144].mxu1 %v6759_v18  ;;  %v6459_v12 = vmul.f32 %v14017_v58, %v6416_v54  ;;  %v6419_v15 = vadd.f32 %v9717_v25, %v14019_v35  ;;  %9482 = vmatprep.subr.bf16.mxu1 %v10108_v36  ;;  %v15047_v0 = vld [vmem:[#allocation45_spill] sm:$0xff] }
 0x5e4   : > { %v10449_v45 = vpop.eup %10448  ;;  %v6618_v52 = vadd.f32 1.0, %v10447_v39  ;;  %v8801_v63 = vmul.f32 -1.442695, %v14253_v42  ;;  %v6457_v43 = vmul.f32 %v14017_v58, %v6408_v56  ;;  %v6732_v26 = vadd.f32 %v14197_v23, %v15043_v31  ;;  %v10113_v56 = vld [vmem:[#allocation17 + $0x28] sm:$0xff]  }
 0x5e5   : > { %v10451_v24 = vpop.eup %10450  ;;  %10466 = vrcp.f32 %v6613_v3  ;;  %v6616_v27 = vadd.f32 1.0, %v10449_v45  ;;  %v14263_v10 = vadd.f32 %v14022_v5, %v6459_v12  ;;  %v6460_v4 = vmul.f32 %v14017_v58, %v6419_v15  ;;  %v14281_v19 = vpop.f32.mrb[212].mxu0  ;;  %v15048_v3 = vld [vmem:[#allocation44_spill] sm:$0xff] }
 0x5e6   : > { %10468 = vrcp.f32 %v6618_v52  ;;  %v6619_v35 = vadd.f32 1.0, %v10451_v24  ;;  %v14267_v34 = vadd.f32 %v14022_v5, %v6457_v43  ;;  %v6733_v46 = vadd.f32 %v14210_v59, %v15044_v55  ;;  %9483 = vmatpush3.bf16.msra.mxu1 %v10109_v33  ;;  %v10114_v15 = vld [vmem:[#allocation17 + $0x70] sm:$0xff]  }
 0x5e7   : > { %v10453_v7 = vpop.eup %10452  ;;  %10470 = vrcp.f32 %v6616_v27  ;;  %v8806_v23 = vmul.f32 -1.442695, %v14263_v10  ;;  %v14273_v30 = vadd.f32 %v14022_v5, %v6460_v4  ;;  %v6411_v2 = vadd.f32 %v6410_v50, %v14011_v41  ;;  %9484 = vmatprep.subr.bf16.mxu1 %v10110_v22  ;;  %v15046_v50 = vld [vmem:[#allocation39_spill] sm:$0xff] }
 0x5e8   : > { %v10455_v9 = vpop.eup %10454  ;;  %v6710_v16 = vmul.f32 %v10453_v7, %v14137_v11  ;;  %10472 = vrcp.f32 %v6619_v35  ;;  %v8804_v8 = vmul.f32 -1.442695, %v14267_v34  ;;  %v6760_v59 = vpack.c.bf16 %v6733_v46, %v6732_v26  ;;  %v15045_v11 = vld [vmem:[#allocation41_spill] sm:$0xff]  ;;  %v15050_v26 = vld [vmem:[#allocation43_spill] sm:$0xff]  ;;  %v15052_v35 = vld [vmem:[#allocation48_spill] sm:$0xff] }
 0x5e9   : > { %v10457_v62 = vpop.eup %10456  ;;  %v6708_v47 = vmul.f32 %v10455_v9, %v14140_v14  ;;  %10474 = vpow2.f32 %v8801_v63  ;;  %v8807_v25 = vmul.f32 -1.442695, %v14273_v30  ;;  %v6458_v36 = vmul.f32 %v14017_v58, %v6411_v2  ;;  %v14288_v14 = vpop.f32.mrb[213].mxu0  ;;  %v10115_v46 = vld [vmem:[#allocation17 + $0x30] sm:$0xff]  }
 0x5ea   : > { %v10459_v41 = vpop.eup %10458  ;;  %v6711_v13 = vmul.f32 %v10457_v62, %v14149_v21  ;;  %10476 = vpow2.f32 %v8806_v23  ;;  %9742 = vmatprep.mubr.bf16.mxu1 %v6760_v59  ;;  %v6734_v38 = vadd.f32 %v14192_v48, %v15045_v11  ;;  %v6735_v6 = vadd.f32 %v14202_v44, %v15046_v50  ;;  %9485 = vmatpush3.bf16.msra.mxu1 %v10111_v17  ;;  %v14295_v33 = vpop.f32.mrb[214].mxu0  ;;  %v15053_v9 = vld [vmem:[#allocation47_spill] sm:$0xff] }
 0x5eb   : > { %v10461_v18 = vpop.eup %10460  ;;  %v6617_v54 = vadd.f32 1.0, %v10459_v41  ;;  %10478 = vpow2.f32 %v8804_v8  ;;  %v14291_v58 = vadd.f32 %v14022_v5, %v6458_v36  ;;  %v6736_v21 = vadd.f32 %v14242_v37, %v15047_v0  ;;  %9486 = vmatprep.subr.bf16.mxu1 %v10112_v61  ;;  %v14299_v22 = vpop.f32.mrb[215].mxu0  ;;  %v15049_v37 = vld [vmem:[#allocation42_spill] sm:$0xff]  ;;  %v15054_v8 = vld [vmem:[#allocation49_spill] sm:$0xff] }
 0x5ec   : > { %v10463_v48 = vpop.eup %10462  ;;  %v6622_v39 = vadd.f32 1.0, %v10461_v18  ;;  %10480 = vpow2.f32 %v8807_v25  ;;  %v6761_v44 = vpack.c.bf16 %v6735_v6, %v6734_v38  ;;  %v6737_v12 = vadd.f32 %v14250_v1, %v15048_v3  ;;  %v15051_v1 = vld [vmem:[#allocation46_spill] sm:$0xff]  ;;  %v15057_v3 = vld [vmem:[#allocation51_spill] sm:$0xff] }
 0x5ed   : > { %v10465_v45 = vpop.eup %10464  ;;  %10482 = vrcp.f32 %v6617_v54  ;;  %v6620_v5 = vadd.f32 1.0, %v10463_v48  ;;  %v8805_v52 = vmul.f32 -1.442695, %v14291_v58  ;;  %v6738_v63 = vadd.f32 %v14236_v51, %v15049_v37  ;;  %v15055_v38 = vld [vmem:[#allocation50_spill] sm:$0xff] }
 0x5ee   : > { %10484 = vrcp.f32 %v6622_v39  ;;  %v6623_v43 = vadd.f32 1.0, %v10465_v45  ;;  %9743 = vmatmul.mubr.bf16.gmra.mrb[148].mxu1 %v6761_v44  ;;  %v6762_v31 = vpack.c.bf16 %v6737_v12, %v6736_v21  ;;  %v6739_v24 = vadd.f32 %v14246_v28, %v15050_v26  ;;  %v15060_v26 = vld [vmem:[#allocation56_spill] sm:$0xff] }
 0x5ef   : > { %v10467_v27 = vpop.eup %10466  ;;  %v6742_v4 = vadd.f32 %v6710_v16, %v15051_v1  ;;  %v6743_v55 = vadd.f32 %v6711_v13, %v15052_v35  ;;  %9487 = vmatpush3.bf16.msra.mxu1 %v10113_v56  ;;  %v6740_v16 = vadd.f32 %v6708_v47, %v15053_v9 }
 0x5f0   : > { %v10469_v17 = vpop.eup %10468  ;;  %v6709_v7 = vmul.f32 %v10467_v27, %v14165_v40  ;;  %10486 = vrcp.f32 %v6623_v43  ;;  %9746 = vmatprep.mubr.bf16.mxu1 %v6762_v31  ;;  %v6763_v51 = vpack.c.bf16 %v6739_v24, %v6738_v63  ;;  %9488 = vmatprep.subr.bf16.mxu1 %v10114_v15  ;;  %v15058_v15 = vld [vmem:[#allocation53_spill] sm:$0xff]  ;;  %v15059_v43 = vld [vmem:[#allocation54_spill] sm:$0xff] }
 0x5f1   : > { %v10471_v23 = vpop.eup %10470  ;;  %v6714_v2 = vmul.f32 %v10469_v17, %v14175_v53  ;;  %10488 = vpow2.f32 %v8805_v52  ;;  %v6765_v61 = vpack.c.bf16 %v6743_v55, %v6742_v4  ;;  %v15056_v53 = vld [vmem:[#allocation52_spill] sm:$0xff]  ;;  %v15061_v55 = vld [vmem:[#allocation55_spill] sm:$0xff]  ;;  %v15062_v17 = vld [vmem:[#allocation57_spill] sm:$0xff] }
 0x5f2   : > { %v10473_v28 = vpop.eup %10472  ;;  %10490 = vrcp.f32 %v6620_v5  ;;  %v6741_v59 = vadd.f32 %v6709_v7, %v15054_v8  ;;  %v6712_v54 = vmul.f32 %v10471_v23, %v14178_v29 }
 0x5f3   : > { %v10475_v62 = vpop.eup %10474  ;;  %v6715_v25 = vmul.f32 %v10473_v28, %v14187_v32  ;;  %9489 = vmatpush3.bf16.msra.mxu1 %v10115_v46  ;;  %v6746_v50 = vadd.f32 %v6714_v2, %v15055_v38  ;;  %v15064_v28 = vld [vmem:[#allocation60_spill] sm:$0xff] }
 0x5f4   : > { %v10477_v40 = vpop.eup %10476  ;;  %v6621_v36 = vadd.f32 1.0, %v10475_v62  ;;  %v6764_v41 = vpack.c.bf16 %v6741_v59, %v6740_v16  ;;  %v6744_v12 = vadd.f32 %v6712_v54, %v15057_v3  ;;  %v15065_v59 = vld [vmem:[#allocation59_spill] sm:$0xff]  ;;  %v10117_v54 = vld [vmem:[#allocation17 + $0x38] sm:$0xff]  }
 0x5f5   : > { %v10479_v13 = vpop.eup %10478  ;;  %v6626_v11 = vadd.f32 1.0, %v10477_v40  ;;  %v6747_v6 = vadd.f32 %v6715_v25, %v15056_v53  ;;  %v15066_v25 = vld [vmem:[#allocation61_spill] sm:$0xff] }
 0x5f6   : > { %v10481_v18 = vpop.eup %10480  ;;  %10492 = vrcp.f32 %v6621_v36  ;;  %v6624_v47 = vadd.f32 1.0, %v10479_v13  ;;  %9747 = vmatmul.mubr.bf16.gmra.mrb[152].mxu1 %v6763_v51  ;;  %v14341_v13 = vld [vmem:[#allocation16] ss:$0 sm:$0xff] }
 0x5f7   : > { %v10483_v0 = vpop.eup %10482  ;;  %10494 = vrcp.f32 %v6626_v11  ;;  %v6627_v21 = vadd.f32 1.0, %v10481_v18  ;;  %9750 = vmatprep.mubr.bf16.mxu1 %v6764_v41  ;;  %v6767_v32 = vpack.c.bf16 %v6747_v6, %v6746_v50  ;;  %v10116_v18 = vld [vmem:[#allocation17 + $0x78] sm:$0xff]  }
 0x5f8   : > { %v10485_v56 = vpop.eup %10484  ;;  %v6713_v48 = vmul.f32 %v10483_v0, %v14213_v49  ;;  %9490 = vmatprep.subr.bf16.mxu1 %v10116_v18 }
 0x5f9   : > { %v6718_v39 = vmul.f32 %v10485_v56, %v14216_v60  ;;  %10496 = vrcp.f32 %v6627_v21  ;;  %9491 = vmatpush3.bf16.msra.mxu1 %v10117_v54 }
 0x5fa   : > { %v10487_v44 = vpop.eup %10486  ;;  %10498 = vrcp.f32 %v6624_v47  ;;  %v6745_v29 = vadd.f32 %v6713_v48, %v15058_v15 }
 0x5fb   : > { %v10489_v45 = vpop.eup %10488  ;;  %v6719_v5 = vmul.f32 %v10487_v44, %v14228_v57  ;;  %v6750_v31 = vadd.f32 %v6718_v39, %v15059_v43 }
 0x5fc   : > { %v10491_v52 = vpop.eup %10490  ;;  %v6625_v37 = vadd.f32 1.0, %v10489_v45  ;;  %v6766_v63 = vpack.c.bf16 %v6745_v29, %v6744_v12 }
 0x5fd   : > { %v6751_v24 = vadd.f32 %v6719_v5, %v15060_v26  ;;  %v6716_v49 = vmul.f32 %v10491_v52, %v14219_v20 }
 0x5fe   : > { %10500 = vrcp.f32 %v6625_v37  ;;  %9751 = vmatmul.mubr.bf16.gmra.mrb[156].mxu1 %v6765_v61  ;;  %v15063_v61 = vld [vmem:[#allocation58_spill] sm:$0xff] }
 0x5ff   : > { %9754 = vmatprep.mubr.bf16.mxu1 %v6766_v63  ;;  %v6769_v60 = vpack.c.bf16 %v6751_v24, %v6750_v31  ;;  %v6748_v46 = vadd.f32 %v6716_v49, %v15061_v55 }
 0x600   : > { %v10493_v27 = vpop.eup %10492 }
 0x601   : > { %v10495_v1 = vpop.eup %10494  ;;  %v6717_v4 = vmul.f32 %v10493_v27, %v14253_v42 }
 0x602   : > { %v6722_v35 = vmul.f32 %v10495_v1, %v14263_v10 }
 0x603   : > { %v10497_v57 = vpop.eup %10496  ;;  %v6749_v7 = vadd.f32 %v6717_v4, %v15062_v17 }
 0x604   : > { %v10499_v51 = vpop.eup %10498  ;;  %v6723_v23 = vmul.f32 %v10497_v57, %v14273_v30  ;;  %v6754_v20 = vadd.f32 %v6722_v35, %v15063_v61  ;;  %v14335_v30 = vld [vmem:[#allocation14] ss:$0 sm:$0xff] }
 0x605   : > { %v6768_v2 = vpack.c.bf16 %v6749_v7, %v6748_v46  ;;  %v6720_v16 = vmul.f32 %v10499_v51, %v14267_v34  ;;  %v7343_v41 = vmul.f32 %v14335_v30, %v14288_v14  ;;  %v7344_v34 = vmul.f32 %v14335_v30, %v14299_v22 }
 0x606   : > { %9755 = vmatmul.mubr.bf16.gmra.mrb[160].mxu1 %v6767_v32  ;;  %v6755_v9 = vadd.f32 %v6723_v23, %v15064_v28  ;;  %v7345_v38 = vmul.f32 %v14281_v19, %v14335_v30  ;;  %v7346_v50 = vmul.f32 %v14295_v33, %v14335_v30  ;;  %v9774_v19 = vpop.f32.mrb[216].mxu0 }
 0x607   : > { %9758 = vmatprep.mubr.bf16.mxu1 %v6768_v2  ;;  %v6752_v62 = vadd.f32 %v6720_v16, %v15065_v59  ;;  %v7383_v11 = vadd.f32 %v14341_v13, %v7344_v34  ;;  %v7225_v33 = vpop.f32.mrb[217].mxu0  ;;  %v7349_v52 = vmul.f32 %v9774_v19, %v14335_v30 }
 0x608   : > { %v10501_v42 = vpop.eup %10500  ;;  %v6771_v8 = vpack.c.bf16 %v6755_v9, %v6754_v20  ;;  %v7384_v14 = vadd.f32 %v14341_v13, %v7345_v38  ;;  %v7385_v22 = vadd.f32 %v14341_v13, %v7346_v50  ;;  %v7347_v44 = vmul.f32 %v14335_v30, %v7225_v33  ;;  %v9775_v3 = vpop.f32.mrb[218].mxu0 }
 0x609   : > { %v6721_v10 = vmul.f32 %v10501_v42, %v14291_v58  ;;  %v7382_v58 = vadd.f32 %v14341_v13, %v7343_v41  ;;  %v7447_v6 = vmul.f32 0.1, %v7383_v11  ;;  %vm7415_vm1 = vcmp.gt.f32.partialorder %v7383_v11, 0.0  ;;  %v7228_v15 = vpop.f32.mrb[219].mxu0 }
 0x60a   : > { %v7448_v32 = vmul.f32 0.1, %v7384_v14  ;;  %v7449_v56 = vmul.f32 0.1, %v7385_v22  ;;  %vm7416_vm3 = vcmp.gt.f32.partialorder %v7384_v14, 0.0  ;;  %vm7417_vm4 = vcmp.gt.f32.partialorder %v7385_v22, 0.0 }
 0x60b   : > { %v6753_v40 = vadd.f32 %v6721_v10, %v15066_v25  ;;  %v7446_v53 = vmul.f32 0.1, %v7382_v58  ;;  %vm7414_vm0 = vcmp.gt.f32.partialorder %v7382_v58, 0.0  ;;  %v7479_v0 = vsel %vm7415_vm1, %v7383_v11, %v7447_v6  ;;  %v9778_v4 = vpop.f32.mrb[220].mxu0 }
 0x60c   : > { %v14351_v48 = vsel %vm7416_vm3, %v7384_v14, %v7448_v32  ;;  %v14353_v39 = vsel %vm7417_vm4, %v7385_v22, %v7449_v56  ;;  %v7386_v29 = vadd.f32 %v14341_v13, %v7347_v44  ;;  %v7348_v45 = vmul.f32 %v14335_v30, %v7228_v15  ;;  %v7241_v35 = vpop.f32.mrb[221].mxu0 }
 0x60d   : > { %v6770_v36 = vpack.c.bf16 %v6753_v40, %v6752_v62  ;;  %v7478_v47 = vsel %vm7414_vm0, %v7382_v58, %v7446_v53  ;;  %v7527_v12 = vpack.c.bf16 %v14353_v39, %v14351_v48  ;;  %v7350_v63 = vmul.f32 %v9775_v3, %v14335_v30  ;;  %v9779_v17 = vpop.f32.mrb[222].mxu0 }
 0x60e   : > { %9759 = vmatmul.mubr.bf16.gmra.mrb[164].mxu1 %v6769_v60  ;;  %v7526_v21 = vpack.c.bf16 %v7479_v0, %v7478_v47  ;;  %v7387_v5 = vadd.f32 %v14341_v13, %v7348_v45  ;;  %v7450_v37 = vmul.f32 0.1, %v7386_v29  ;;  %vm7418_vm5 = vcmp.gt.f32.partialorder %v7386_v29, 0.0  ;;  %v7244_v51 = vpop.f32.mrb[223].mxu0 }
 0x60f   : > { %9762 = vmatprep.mubr.bf16.mxu1 %v6770_v36  ;;  %v7388_v31 = vadd.f32 %v14341_v13, %v7349_v52  ;;  %v7389_v26 = vadd.f32 %v14341_v13, %v7350_v63  ;;  %v7351_v46 = vmul.f32 %v14335_v30, %v7241_v35  ;;  %v7352_v2 = vmul.f32 %v14335_v30, %v7244_v51  ;;  %v9782_v36 = vpop.f32.mrb[224].mxu0 }
 0x610   : > { %v7451_v43 = vmul.f32 0.1, %v7387_v5  ;;  %vm7419_vm6 = vcmp.gt.f32.partialorder %v7387_v5, 0.0  ;;  %v14365_v24 = vsel %vm7418_vm5, %v7386_v29, %v7450_v37  ;;  %v7353_v61 = vmul.f32 %v9778_v4, %v14335_v30  ;;  %v7257_v41 = vpop.f32.mrb[225].mxu0 }
 0x611   : > { %v7452_v27 = vmul.f32 0.1, %v7388_v31  ;;  %v7453_v1 = vmul.f32 0.1, %v7389_v26  ;;  %vm7420_vm7 = vcmp.gt.f32.partialorder %v7388_v31, 0.0  ;;  %vm7421_vm8 = vcmp.gt.f32.partialorder %v7389_v26, 0.0 }
 0x612   : > { %v14367_v49 = vsel %vm7419_vm6, %v7387_v5, %v7451_v43  ;;  %v7390_v23 = vadd.f32 %v14341_v13, %v7351_v46  ;;  %v7354_v20 = vmul.f32 %v9779_v17, %v14335_v30  ;;  %v7391_v9 = vadd.f32 %v14341_v13, %v7352_v2  ;;  %v9783_v38 = vpop.f32.mrb[226].mxu0 }
 0x613   : > { %v7528_v60 = vpack.c.bf16 %v14367_v49, %v14365_v24  ;;  %v14371_v57 = vsel %vm7420_vm7, %v7388_v31, %v7452_v27  ;;  %v14373_v55 = vsel %vm7421_vm8, %v7389_v26, %v7453_v1  ;;  %v7392_v42 = vadd.f32 %v14341_v13, %v7353_v61  ;;  %v7260_v53 = vpop.f32.mrb[227].mxu0 }
 0x614   : > { %v7529_v7 = vpack.c.bf16 %v14373_v55, %v14371_v57  ;;  %vm7422_vm9 = vcmp.gt.f32.partialorder %v7390_v23, 0.0  ;;  %v7454_v28 = vmul.f32 0.1, %v7390_v23  ;;  %vm7423_vm10 = vcmp.gt.f32.partialorder %v7391_v9, 0.0  ;;  %v9786_v15 = vpop.f32.mrb[228].mxu0 }
 0x615   : > { %v7455_v16 = vmul.f32 0.1, %v7391_v9  ;;  %v7456_v25 = vmul.f32 0.1, %v7392_v42  ;;  %vm7424_vm11 = vcmp.gt.f32.partialorder %v7392_v42, 0.0  ;;  %v7355_v11 = vmul.f32 %v14335_v30, %v7257_v41  ;;  %v7273_v45 = vpop.f32.mrb[229].mxu0 }
 0x616   : > { %9763 = vmatmul.mubr.bf16.gmra.mrb[168].mxu1 %v6771_v8  ;;  %v7393_v8 = vadd.f32 %v14341_v13, %v7354_v20  ;;  %v14385_v10 = vsel %vm7422_vm9, %v7390_v23, %v7454_v28  ;;  %v7356_v14 = vmul.f32 %v14335_v30, %v7260_v53  ;;  %v7357_v22 = vmul.f32 %v9782_v36, %v14335_v30  ;;  %v9787_v63 = vpop.f32.mrb[230].mxu0 }
 0x617   : > { %7702 = vmatprep.mubr.bf16.mxu1 %v7526_v21  ;;  %v14387_v59 = vsel %vm7423_vm10, %v7391_v9, %v7455_v16  ;;  %v14391_v34 = vsel %vm7424_vm11, %v7392_v42, %v7456_v25  ;;  %v7394_v6 = vadd.f32 %v14341_v13, %v7355_v11  ;;  %v7358_v18 = vmul.f32 %v9783_v38, %v14335_v30  ;;  %v7276_v27 = vpop.f32.mrb[231].mxu0 }
 0x618   : > { %v7530_v62 = vpack.c.bf16 %v14387_v59, %v14385_v10  ;;  %v7457_v40 = vmul.f32 0.1, %v7393_v8  ;;  %vm7425_vm12 = vcmp.gt.f32.partialorder %v7393_v8, 0.0  ;;  %v7395_v47 = vadd.f32 %v14341_v13, %v7356_v14  ;;  %v9790_v35 = vpop.f32.mrb[232].mxu0 }
 0x619   : > { %vm7426_vm13 = vcmp.gt.f32.partialorder %v7394_v6, 0.0  ;;  %v7458_v54 = vmul.f32 0.1, %v7394_v6  ;;  %v7396_v21 = vadd.f32 %v14341_v13, %v7357_v22  ;;  %v7397_v32 = vadd.f32 %v14341_v13, %v7358_v18  ;;  %v7289_v51 = vpop.f32.mrb[233].mxu0 }
 0x61a   : > { %v14393_v58 = vsel %vm7425_vm12, %v7393_v8, %v7457_v40  ;;  %vm7427_vm14 = vcmp.gt.f32.partialorder %v7395_v47, 0.0  ;;  %v7459_v0 = vmul.f32 0.1, %v7395_v47  ;;  %v7361_v29 = vmul.f32 %v9786_v15, %v14335_v30  ;;  %v9791_v20 = vpop.f32.mrb[234].mxu0 }
 0x61b   : > { %v7531_v50 = vpack.c.bf16 %v14393_v58, %v14391_v34  ;;  %v14405_v56 = vsel %vm7426_vm13, %v7394_v6, %v7458_v54  ;;  %v7460_v44 = vmul.f32 0.1, %v7396_v21  ;;  %v7461_v3 = vmul.f32 0.1, %v7397_v32  ;;  %v7292_v28 = vpop.f32.mrb[235].mxu0 }
 0x61c   : > { %v14407_v19 = vsel %vm7427_vm14, %v7395_v47, %v7459_v0  ;;  %vm7428_vm15 = vcmp.gt.f32.partialorder %v7396_v21, 0.0  ;;  %vm7429_vm2 = vcmp.gt.f32.partialorder %v7397_v32, 0.0  ;;  %v7359_v37 = vmul.f32 %v14335_v30, %v7273_v45 }
 0x61d   : > { %v7532_v33 = vpack.c.bf16 %v14407_v19, %v14405_v56  ;;  %v14412_v5 = vsel %vm7428_vm15, %v7396_v21, %v7460_v44  ;;  %v14414_v52 = vsel %vm7429_vm2, %v7397_v32, %v7461_v3  ;;  %v7400_v31 = vadd.f32 %v14341_v13, %v7361_v29  ;;  %v9794_v44 = vpop.f32.mrb[236].mxu0 }
 0x61e   : > { %v7533_v43 = vpack.c.bf16 %v14414_v52, %v14412_v5  ;;  %v7362_v26 = vmul.f32 %v9787_v63, %v14335_v30  ;;  %v7398_v1 = vadd.f32 %v14341_v13, %v7359_v37  ;;  %v7360_v4 = vmul.f32 %v14335_v30, %v7276_v27  ;;  %v7305_v3 = vpop.f32.mrb[237].mxu0 }
 0x61f   : > { %v7464_v46 = vmul.f32 0.1, %v7400_v31  ;;  %v7363_v61 = vmul.f32 %v14335_v30, %v7289_v51  ;;  %vm7432_vm1 = vcmp.gt.f32.partialorder %v7400_v31, 0.0  ;;  %v7364_v25 = vmul.f32 %v14335_v30, %v7292_v28  ;;  %v9795_v15 = vpop.f32.mrb[238].mxu0 }
 0x620   : > { %v7401_v17 = vadd.f32 %v14341_v13, %v7362_v26  ;;  %vm7430_vm0 = vcmp.gt.f32.partialorder %v7398_v1, 0.0  ;;  %v7462_v23 = vmul.f32 0.1, %v7398_v1  ;;  %v7399_v2 = vadd.f32 %v14341_v13, %v7360_v4  ;;  %v7308_v63 = vpop.f32.mrb[239].mxu0 }
 0x621   : > { %v7402_v8 = vadd.f32 %v14341_v13, %v7363_v61  ;;  %v14432_v36 = vsel %vm7432_vm1, %v7400_v31, %v7464_v46  ;;  %v7403_v11 = vadd.f32 %v14341_v13, %v7364_v25  ;;  %v7365_v38 = vmul.f32 %v9790_v35, %v14335_v30 }
 0x622   : > { %v7465_v9 = vmul.f32 0.1, %v7401_v17  ;;  %vm7431_vm3 = vcmp.gt.f32.partialorder %v7399_v2, 0.0  ;;  %v7463_v16 = vmul.f32 0.1, %v7399_v2  ;;  %v14426_v42 = vsel %vm7430_vm0, %v7398_v1, %v7462_v23 }
 0x623   : > { %vm7433_vm4 = vcmp.gt.f32.partialorder %v7401_v17, 0.0  ;;  %v7466_v6 = vmul.f32 0.1, %v7402_v8  ;;  %v7366_v14 = vmul.f32 %v9791_v20, %v14335_v30  ;;  %v7467_v22 = vmul.f32 0.1, %v7403_v11 }
 0x624   : > { %v14430_v40 = vsel %vm7431_vm3, %v7399_v2, %v7463_v16  ;;  %v14438_v53 = vsel %vm7433_vm4, %v7401_v17, %v7465_v9  ;;  %vm7434_vm5 = vcmp.gt.f32.partialorder %v7402_v8, 0.0  ;;  %vm7435_vm6 = vcmp.gt.f32.partialorder %v7403_v11, 0.0  ;;  %v9798_v16 = vpop.f32.mrb[240].mxu0 }
 0x625   : > { %v7534_v41 = vpack.c.bf16 %v14430_v40, %v14426_v42  ;;  %v7535_v18 = vpack.c.bf16 %v14438_v53, %v14432_v36  ;;  %v7404_v54 = vadd.f32 %v14341_v13, %v7365_v38  ;;  %v7405_v47 = vadd.f32 %v14341_v13, %v7366_v14 }
 0x626   : > { %v14445_v0 = vsel %vm7434_vm5, %v7402_v8, %v7466_v6  ;;  %v14447_v21 = vsel %vm7435_vm6, %v7403_v11, %v7467_v22  ;;  %v7367_v37 = vmul.f32 %v14335_v30, %v7305_v3  ;;  %v7368_v31 = vmul.f32 %v14335_v30, %v7308_v63  ;;  %v7321_v8 = vpop.f32.mrb[241].mxu0 }
 0x627   : > { %v7536_v32 = vpack.c.bf16 %v14447_v21, %v14445_v0  ;;  %v7468_v29 = vmul.f32 0.1, %v7404_v54  ;;  %v7469_v45 = vmul.f32 0.1, %v7405_v47  ;;  %vm7436_vm7 = vcmp.gt.f32.partialorder %v7404_v54, 0.0  ;;  %v9799_v25 = vpop.f32.mrb[242].mxu0 }
 0x628   : > { %vm7437_vm8 = vcmp.gt.f32.partialorder %v7405_v47, 0.0  ;;  %v7406_v26 = vadd.f32 %v14341_v13, %v7367_v37  ;;  %v7407_v27 = vadd.f32 %v14341_v13, %v7368_v31  ;;  %v7369_v46 = vmul.f32 %v9794_v44, %v14335_v30  ;;  %v7324_v14 = vpop.f32.mrb[243].mxu0  ;;  %v14661_v21 = vld [vmem:[#allocation19] ss:$0 sm:$0xff] }
 0x629   : > { %v14455_v1 = vsel %vm7436_vm7, %v7404_v54, %v7468_v29  ;;  %v14457_v4 = vsel %vm7437_vm8, %v7405_v47, %v7469_v45  ;;  %v7370_v51 = vmul.f32 %v9795_v15, %v14335_v30  ;;  %v7371_v6 = vmul.f32 %v14335_v30, %v7321_v8  ;;  %v14499_v8 = vld [vmem:[#allocation13] ss:$0 sm:$0xff] }
 0x62a   : > { %v7470_v17 = vmul.f32 0.1, %v7406_v26  ;;  %v7471_v23 = vmul.f32 0.1, %v7407_v27  ;;  %vm7438_vm9 = vcmp.gt.f32.partialorder %v7406_v26, 0.0  ;;  %vm7439_vm10 = vcmp.gt.f32.partialorder %v7407_v27, 0.0 }
 0x62b   : > { %v7408_v2 = vadd.f32 %v14341_v13, %v7369_v46  ;;  %v7409_v61 = vadd.f32 %v14341_v13, %v7370_v51  ;;  %v7372_v22 = vmul.f32 %v14335_v30, %v7324_v14  ;;  %v7410_v54 = vadd.f32 %v14341_v13, %v7371_v6 }
 0x62c   : > { %v14465_v20 = vsel %vm7438_vm9, %v7406_v26, %v7470_v17  ;;  %v14467_v28 = vsel %vm7439_vm10, %v7407_v27, %v7471_v23  ;;  %v7373_v29 = vmul.f32 %v9798_v16, %v14335_v30  ;;  %v7374_v37 = vmul.f32 %v9799_v25, %v14335_v30 }
 0x62d   : > { %v7472_v11 = vmul.f32 0.1, %v7408_v2  ;;  %v7473_v38 = vmul.f32 0.1, %v7409_v61  ;;  %vm7440_vm11 = vcmp.gt.f32.partialorder %v7408_v2, 0.0  ;;  %vm7441_vm12 = vcmp.gt.f32.partialorder %v7409_v61, 0.0 }
 0x62e   : > { %v7411_v47 = vadd.f32 %v14341_v13, %v7372_v22  ;;  %v7474_v45 = vmul.f32 0.1, %v7410_v54  ;;  %vm7442_vm13 = vcmp.gt.f32.partialorder %v7410_v54, 0.0  ;;  %v7412_v31 = vadd.f32 %v14341_v13, %v7373_v29 }
 0x62f   : > { %v14475_v44 = vsel %vm7440_vm11, %v7408_v2, %v7472_v11  ;;  %v14477_v3 = vsel %vm7441_vm12, %v7409_v61, %v7473_v38  ;;  %v7413_v26 = vadd.f32 %v14341_v13, %v7374_v37  ;;  %v14495_v61 = vld [vmem:[#allocation11] ss:$0 sm:$0xff]  ;;  %v15067_v42 = vpack.c.bf16 %v14457_v4, %v14455_v1  ;;  %v14663_v4 = vld [vmem:[#allocation20] ss:$0 sm:$0xff] }
 0x630   : > { %v7475_v63 = vmul.f32 0.1, %v7411_v47  ;;  %vm7443_vm14 = vcmp.gt.f32.partialorder %v7411_v47, 0.0  ;;  %v14485_v27 = vsel %vm7442_vm13, %v7410_v54, %v7474_v45  ;;  %v7476_v51 = vmul.f32 0.1, %v7412_v31 }
 0x631   : > { %v7477_v23 = vmul.f32 0.1, %v7413_v26  ;;  %vm7444_vm15 = vcmp.gt.f32.partialorder %v7412_v31, 0.0  ;;  %vm7445_vm2 = vcmp.gt.f32.partialorder %v7413_v26, 0.0  ;;  %v15068_v40 = vpack.c.bf16 %v14467_v28, %v14465_v20 }
 0x632   : > { %v14487_v46 = vsel %vm7443_vm14, %v7411_v47, %v7475_v63  ;;  %v14491_v2 = vsel %vm7444_vm15, %v7412_v31, %v7476_v51  ;;  %v15069_v36 = vpack.c.bf16 %v14477_v3, %v14475_v44 }
 0x633   : > { %v14493_v30 = vsel %vm7445_vm2, %v7413_v26, %v7477_v23 }
 0x634   : > { %v15071_v53 = vpack.c.bf16 %v14493_v30, %v14491_v2 }
 0x6ac   : > { %v9736_v16 = vpop.f32.mrb[140].mxu1 }
 0x6ad   : > { %v7006_v25 = vmul.f32 %v9736_v16, %v14495_v61  ;;  %v6870_v11 = vpop.f32.mrb[141].mxu1 }
 0x6ae   : > { %v7004_v38 = vmul.f32 %v14495_v61, %v6870_v11  ;;  %v9737_v6 = vpop.f32.mrb[142].mxu1 }
 0x6af   : > { %v7045_v14 = vadd.f32 %v14499_v8, %v7006_v25  ;;  %v7007_v22 = vmul.f32 %v9737_v6, %v14495_v61  ;;  %v6873_v54 = vpop.f32.mrb[143].mxu1 }
 0x6b0   : > { %v7043_v47 = vadd.f32 %v14499_v8, %v7004_v38  ;;  %v7005_v29 = vmul.f32 %v14495_v61, %v6873_v54 }
 0x6b1   : > { %v7109_v45 = vmul.f32 0.1, %v7045_v14  ;;  %v7046_v37 = vadd.f32 %v14499_v8, %v7007_v22  ;;  %vm7077_vm0 = vcmp.gt.f32.partialorder %v7045_v14, 0.0 }
 0x6b2   : > { %v7107_v63 = vmul.f32 0.1, %v7043_v47  ;;  %v7044_v31 = vadd.f32 %v14499_v8, %v7005_v29  ;;  %vm7075_vm1 = vcmp.gt.f32.partialorder %v7043_v47, 0.0 }
 0x6b3   : > { %vm7078_vm3 = vcmp.gt.f32.partialorder %v7046_v37, 0.0  ;;  %v7110_v26 = vmul.f32 0.1, %v7046_v37  ;;  %v7141_v23 = vsel %vm7077_vm0, %v7045_v14, %v7109_v45 }
 0x6b4   : > { %vm7076_vm4 = vcmp.gt.f32.partialorder %v7044_v31, 0.0  ;;  %v7108_v51 = vmul.f32 0.1, %v7044_v31  ;;  %v7139_v25 = vsel %vm7075_vm1, %v7043_v47, %v7107_v63 }
 0x6b5   : > { %v7142_v16 = vsel %vm7078_vm3, %v7046_v37, %v7110_v26 }
 0x6b6   : > { %v7140_v11 = vsel %vm7076_vm4, %v7044_v31, %v7108_v51  ;;  %v9740_v6 = vpop.f32.mrb[144].mxu1  ;;  %v7511_v38 = vpack.c.bf16 %v7142_v16, %v7141_v23 }
 0x6b7   : > { %v7510_v13 = vpack.c.bf16 %v7140_v11, %v7139_v25  ;;  %v7010_v54 = vmul.f32 %v9740_v6, %v14495_v61  ;;  %v6886_v17 = vpop.f32.mrb[145].mxu1 }
 0x6b8   : > { %v7008_v22 = vmul.f32 %v14495_v61, %v6886_v17  ;;  %v9741_v15 = vpop.f32.mrb[146].mxu1 }
 0x6b9   : > { %v7049_v29 = vadd.f32 %v14499_v8, %v7010_v54  ;;  %v7011_v9 = vmul.f32 %v9741_v15, %v14495_v61  ;;  %v6889_v35 = vpop.f32.mrb[147].mxu1  ;;  %7703 = vmatmul.mubr.bf16.vlgmr.msra.gmra.mrb[172].mxu1 %v7510_v13 }
 0x6ba   : > { %v7047_v14 = vadd.f32 %v14499_v8, %v7008_v22  ;;  %v7009_v47 = vmul.f32 %v14495_v61, %v6889_v35  ;;  %7710 = vmatprep.mubr.bf16.mxu1 %v7527_v12 }
 0x6bb   : > { %v7113_v45 = vmul.f32 0.1, %v7049_v29  ;;  %v7050_v37 = vadd.f32 %v14499_v8, %v7011_v9  ;;  %vm7081_vm5 = vcmp.gt.f32.partialorder %v7049_v29, 0.0 }
 0x6bc   : > { %v7111_v17 = vmul.f32 0.1, %v7047_v14  ;;  %v7048_v63 = vadd.f32 %v14499_v8, %v7009_v47  ;;  %vm7079_vm6 = vcmp.gt.f32.partialorder %v7047_v14, 0.0 }
 0x6bd   : > { %vm7082_vm7 = vcmp.gt.f32.partialorder %v7050_v37, 0.0  ;;  %v7114_v15 = vmul.f32 0.1, %v7050_v37  ;;  %v7145_v31 = vsel %vm7081_vm5, %v7049_v29, %v7113_v45 }
 0x6be   : > { %vm7080_vm8 = vcmp.gt.f32.partialorder %v7048_v63, 0.0  ;;  %v7112_v13 = vmul.f32 0.1, %v7048_v63  ;;  %v7143_v51 = vsel %vm7079_vm6, %v7047_v14, %v7111_v17 }
 0x6bf   : > { %v7146_v26 = vsel %vm7082_vm7, %v7050_v37, %v7114_v15 }
 0x6c0   : > { %v7144_v35 = vsel %vm7080_vm8, %v7048_v63, %v7112_v13  ;;  %v7513_v23 = vpack.c.bf16 %v7146_v26, %v7145_v31 }
 0x6c1   : > { %v9744_v16 = vpop.f32.mrb[148].mxu1  ;;  %7711 = vmatmul.mubr.bf16.gmra.mrb[176].mxu1 %v7511_v38  ;;  %v7512_v48 = vpack.c.bf16 %v7144_v35, %v7143_v51 }
 0x6c2   : > { %v7014_v39 = vmul.f32 %v9744_v16, %v14495_v61  ;;  %v6902_v12 = vpop.f32.mrb[149].mxu1  ;;  %7718 = vmatprep.mubr.bf16.mxu1 %v7528_v60 }
 0x6c3   : > { %v7012_v9 = vmul.f32 %v14495_v61, %v6902_v12  ;;  %v9745_v25 = vpop.f32.mrb[150].mxu1 }
 0x6c4   : > { %v7053_v11 = vadd.f32 %v14499_v8, %v7014_v39  ;;  %v7015_v6 = vmul.f32 %v9745_v25, %v14495_v61  ;;  %v6905_v54 = vpop.f32.mrb[151].mxu1 }
 0x6c5   : > { %v7051_v22 = vadd.f32 %v14499_v8, %v7012_v9  ;;  %v7013_v38 = vmul.f32 %v14495_v61, %v6905_v54 }
 0x6c6   : > { %v7117_v29 = vmul.f32 0.1, %v7053_v11  ;;  %v7054_v14 = vadd.f32 %v14499_v8, %v7015_v6  ;;  %vm7085_vm9 = vcmp.gt.f32.partialorder %v7053_v11, 0.0 }
 0x6c7   : > { %v7115_v47 = vmul.f32 0.1, %v7051_v22  ;;  %v7052_v24 = vadd.f32 %v14499_v8, %v7013_v38  ;;  %vm7083_vm10 = vcmp.gt.f32.partialorder %v7051_v22, 0.0 }
 0x6c8   : > { %vm7086_vm11 = vcmp.gt.f32.partialorder %v7054_v14, 0.0  ;;  %v7118_v49 = vmul.f32 0.1, %v7054_v14  ;;  %v14535_v63 = vsel %vm7085_vm9, %v7053_v11, %v7117_v29 }
 0x6c9   : > { %vm7084_vm12 = vcmp.gt.f32.partialorder %v7052_v24, 0.0  ;;  %v7116_v60 = vmul.f32 0.1, %v7052_v24  ;;  %v9748_v45 = vpop.f32.mrb[152].mxu1  ;;  %7719 = vmatmul.mubr.bf16.gmra.mrb[180].mxu1 %v7512_v48  ;;  %v7147_v26 = vsel %vm7083_vm10, %v7051_v22, %v7115_v47 }
 0x6ca   : > { %v7018_v37 = vmul.f32 %v9748_v45, %v14495_v61  ;;  %v6918_v17 = vpop.f32.mrb[153].mxu1  ;;  %7726 = vmatprep.mubr.bf16.mxu1 %v7529_v7  ;;  %v14537_v15 = vsel %vm7086_vm11, %v7054_v14, %v7118_v49 }
 0x6cb   : > { %v7016_v13 = vmul.f32 %v14495_v61, %v6918_v17  ;;  %v9749_v31 = vpop.f32.mrb[154].mxu1  ;;  %v7148_v51 = vsel %vm7084_vm12, %v7052_v24, %v7116_v60  ;;  %v7515_v35 = vpack.c.bf16 %v14537_v15, %v14535_v63 }
 0x6cc   : > { %v7057_v16 = vadd.f32 %v14499_v8, %v7018_v37  ;;  %v7019_v48 = vmul.f32 %v9749_v31, %v14495_v61  ;;  %v6921_v39 = vpop.f32.mrb[155].mxu1  ;;  %v7514_v12 = vpack.c.bf16 %v7148_v51, %v7147_v26 }
 0x6cd   : > { %v7055_v57 = vadd.f32 %v14499_v8, %v7016_v13  ;;  %v7017_v55 = vmul.f32 %v14495_v61, %v6921_v39 }
 0x6ce   : > { %v7121_v7 = vmul.f32 0.1, %v7057_v16  ;;  %v7058_v9 = vadd.f32 %v14499_v8, %v7019_v48  ;;  %vm7089_vm13 = vcmp.gt.f32.partialorder %v7057_v16, 0.0 }
 0x6cf   : > { %v7119_v25 = vmul.f32 0.1, %v7055_v57  ;;  %v7056_v11 = vadd.f32 %v14499_v8, %v7017_v55  ;;  %vm7087_vm14 = vcmp.gt.f32.partialorder %v7055_v57, 0.0 }
 0x6d0   : > { %vm7090_vm15 = vcmp.gt.f32.partialorder %v7058_v9, 0.0  ;;  %v7122_v6 = vmul.f32 0.1, %v7058_v9  ;;  %v14552_v14 = vsel %vm7089_vm13, %v7057_v16, %v7121_v7 }
 0x6d1   : > { %vm7088_vm2 = vcmp.gt.f32.partialorder %v7056_v11, 0.0  ;;  %v7120_v54 = vmul.f32 0.1, %v7056_v11  ;;  %v9752_v22 = vpop.f32.mrb[156].mxu1  ;;  %7727 = vmatmul.mubr.bf16.gmra.mrb[184].mxu1 %v7513_v23  ;;  %v14557_v60 = vsel %vm7087_vm14, %v7055_v57, %v7119_v25 }
 0x6d2   : > { %v7022_v38 = vmul.f32 %v9752_v22, %v14495_v61  ;;  %v6934_v29 = vpop.f32.mrb[157].mxu1  ;;  %7734 = vmatprep.mubr.bf16.mxu1 %v7530_v62  ;;  %v14554_v47 = vsel %vm7090_vm15, %v7058_v9, %v7122_v6 }
 0x6d3   : > { %v7020_v24 = vmul.f32 %v14495_v61, %v6934_v29  ;;  %v9753_v49 = vpop.f32.mrb[158].mxu1  ;;  %v14559_v45 = vsel %vm7088_vm2, %v7056_v11, %v7120_v54  ;;  %v7517_v23 = vpack.c.bf16 %v14554_v47, %v14552_v14 }
 0x6d4   : > { %v7061_v37 = vadd.f32 %v14499_v8, %v7022_v38  ;;  %v7023_v17 = vmul.f32 %v9753_v49, %v14495_v61  ;;  %v6937_v10 = vpop.f32.mrb[159].mxu1  ;;  %v7516_v59 = vpack.c.bf16 %v14559_v45, %v14557_v60 }
 0x6d5   : > { %v7059_v62 = vadd.f32 %v14499_v8, %v7020_v24  ;;  %v7021_v13 = vmul.f32 %v14495_v61, %v6937_v10 }
 0x6d6   : > { %v7125_v31 = vmul.f32 0.1, %v7061_v37  ;;  %v7062_v26 = vadd.f32 %v14499_v8, %v7023_v17  ;;  %vm7093_vm0 = vcmp.gt.f32.partialorder %v7061_v37, 0.0 }
 0x6d7   : > { %v7123_v51 = vmul.f32 0.1, %v7059_v62  ;;  %v7060_v16 = vadd.f32 %v14499_v8, %v7021_v13  ;;  %vm7091_vm1 = vcmp.gt.f32.partialorder %v7059_v62, 0.0 }
 0x6d8   : > { %vm7094_vm3 = vcmp.gt.f32.partialorder %v7062_v26, 0.0  ;;  %v7126_v48 = vmul.f32 0.1, %v7062_v26  ;;  %v14575_v9 = vsel %vm7093_vm0, %v7061_v37, %v7125_v31 }
 0x6d9   : > { %vm7092_vm4 = vcmp.gt.f32.partialorder %v7060_v16, 0.0  ;;  %v7124_v39 = vmul.f32 0.1, %v7060_v16  ;;  %v9756_v57 = vpop.f32.mrb[160].mxu1  ;;  %7735 = vmatmul.mubr.bf16.gmra.mrb[188].mxu1 %v7514_v12  ;;  %v14580_v54 = vsel %vm7091_vm1, %v7059_v62, %v7123_v51 }
 0x6da   : > { %v7026_v55 = vmul.f32 %v9756_v57, %v14495_v61  ;;  %v6950_v7 = vpop.f32.mrb[161].mxu1  ;;  %7742 = vmatprep.mubr.bf16.mxu1 %v7531_v50  ;;  %v14577_v25 = vsel %vm7094_vm3, %v7062_v26, %v7126_v48 }
 0x6db   : > { %v7024_v11 = vmul.f32 %v14495_v61, %v6950_v7  ;;  %v9757_v6 = vpop.f32.mrb[162].mxu1  ;;  %v14582_v22 = vsel %vm7092_vm4, %v7060_v16, %v7124_v39  ;;  %v7519_v12 = vpack.c.bf16 %v14577_v25, %v14575_v9 }
 0x6dc   : > { %v7065_v38 = vadd.f32 %v14499_v8, %v7026_v55  ;;  %v7027_v29 = vmul.f32 %v9757_v6, %v14495_v61  ;;  %v6953_v34 = vpop.f32.mrb[163].mxu1  ;;  %v7518_v58 = vpack.c.bf16 %v14582_v22, %v14580_v54 }
 0x6dd   : > { %v7063_v50 = vadd.f32 %v14499_v8, %v7024_v11  ;;  %v7025_v24 = vmul.f32 %v14495_v61, %v6953_v34 }
 0x6de   : > { %v7129_v49 = vmul.f32 0.1, %v7065_v38  ;;  %v7066_v37 = vadd.f32 %v14499_v8, %v7027_v29  ;;  %vm7097_vm5 = vcmp.gt.f32.partialorder %v7065_v38, 0.0 }
 0x6df   : > { %v7127_v17 = vmul.f32 0.1, %v7063_v50  ;;  %v7064_v10 = vadd.f32 %v14499_v8, %v7025_v24  ;;  %vm7095_vm6 = vcmp.gt.f32.partialorder %v7063_v50, 0.0 }
 0x6e0   : > { %vm7098_vm7 = vcmp.gt.f32.partialorder %v7066_v37, 0.0  ;;  %v7130_v62 = vmul.f32 0.1, %v7066_v37  ;;  %v14601_v16 = vsel %vm7097_vm5, %v7065_v38, %v7129_v49 }
 0x6e1   : > { %vm7096_vm8 = vcmp.gt.f32.partialorder %v7064_v10, 0.0  ;;  %v7128_v13 = vmul.f32 0.1, %v7064_v10  ;;  %v9760_v31 = vpop.f32.mrb[164].mxu1  ;;  %7743 = vmatmul.mubr.bf16.gmra.mrb[192].mxu1 %v7515_v35  ;;  %v7159_v55 = vsel %vm7095_vm6, %v7063_v50, %v7127_v17 }
 0x6e2   : > { %v7030_v26 = vmul.f32 %v9760_v31, %v14495_v61  ;;  %v6966_v51 = vpop.f32.mrb[165].mxu1  ;;  %7750 = vmatprep.mubr.bf16.mxu1 %v7532_v33  ;;  %v14603_v48 = vsel %vm7098_vm7, %v7066_v37, %v7130_v62 }
 0x6e3   : > { %v7028_v39 = vmul.f32 %v14495_v61, %v6966_v51  ;;  %v9761_v57 = vpop.f32.mrb[166].mxu1  ;;  %v7160_v7 = vsel %vm7096_vm8, %v7064_v10, %v7128_v13  ;;  %v7521_v63 = vpack.c.bf16 %v14603_v48, %v14601_v16 }
 0x6e4   : > { %v7069_v15 = vadd.f32 %v14499_v8, %v7030_v26  ;;  %v7031_v35 = vmul.f32 %v9761_v57, %v14495_v61  ;;  %v6969_v11 = vpop.f32.mrb[167].mxu1  ;;  %v7520_v6 = vpack.c.bf16 %v7160_v7, %v7159_v55 }
 0x6e5   : > { %v7067_v56 = vadd.f32 %v14499_v8, %v7028_v39  ;;  %v7029_v19 = vmul.f32 %v14495_v61, %v6969_v11 }
 0x6e6   : > { %v7133_v33 = vmul.f32 0.1, %v7069_v15  ;;  %v7070_v38 = vadd.f32 %v14499_v8, %v7031_v35  ;;  %vm7101_vm9 = vcmp.gt.f32.partialorder %v7069_v15, 0.0 }
 0x6e7   : > { %v7131_v29 = vmul.f32 0.1, %v7067_v56  ;;  %v7068_v34 = vadd.f32 %v14499_v8, %v7029_v19  ;;  %vm7099_vm10 = vcmp.gt.f32.partialorder %v7067_v56, 0.0 }
 0x6e8   : > { %vm7102_vm11 = vcmp.gt.f32.partialorder %v7070_v38, 0.0  ;;  %v7134_v50 = vmul.f32 0.1, %v7070_v38  ;;  %v7165_v10 = vsel %vm7101_vm9, %v7069_v15, %v7133_v33 }
 0x6e9   : > { %vm7100_vm12 = vcmp.gt.f32.partialorder %v7068_v34, 0.0  ;;  %v7132_v24 = vmul.f32 0.1, %v7068_v34  ;;  %v9764_v49 = vpop.f32.mrb[168].mxu1  ;;  %7751 = vmatmul.mubr.bf16.gmra.mrb[196].mxu1 %v7516_v59  ;;  %v7163_v26 = vsel %vm7099_vm10, %v7067_v56, %v7131_v29 }
 0x6ea   : > { %v7034_v37 = vmul.f32 %v9764_v49, %v14495_v61  ;;  %v6982_v17 = vpop.f32.mrb[169].mxu1  ;;  %7758 = vmatprep.mubr.bf16.mxu1 %v7533_v43  ;;  %v7166_v62 = vsel %vm7102_vm11, %v7070_v38, %v7134_v50 }
 0x6eb   : > { %v7032_v13 = vmul.f32 %v14495_v61, %v6982_v17  ;;  %v9765_v31 = vpop.f32.mrb[170].mxu1  ;;  %v7164_v51 = vsel %vm7100_vm12, %v7068_v34, %v7132_v24  ;;  %v7523_v16 = vpack.c.bf16 %v7166_v62, %v7165_v10 }
 0x6ec   : > { %v7073_v48 = vadd.f32 %v14499_v8, %v7034_v37  ;;  %v7035_v60 = vmul.f32 %v9765_v31, %v14495_v61  ;;  %v6985_v45 = vpop.f32.mrb[171].mxu1  ;;  %v7522_v59 = vpack.c.bf16 %v7164_v51, %v7163_v26 }
 0x6ed   : > { %v7071_v39 = vadd.f32 %v14499_v8, %v7032_v13  ;;  %v7033_v57 = vmul.f32 %v14495_v61, %v6985_v45 }
 0x6ee   : > { %v7137_v5 = vmul.f32 0.1, %v7073_v48  ;;  %v7074_v52 = vadd.f32 %v14499_v8, %v7035_v60  ;;  %vm7105_vm13 = vcmp.gt.f32.partialorder %v7073_v48, 0.0 }
 0x6ef   : > { %v7135_v43 = vmul.f32 0.1, %v7071_v39  ;;  %v7072_v55 = vadd.f32 %v14499_v8, %v7033_v57  ;;  %vm7103_vm14 = vcmp.gt.f32.partialorder %v7071_v39, 0.0 }
 0x6f0   : > { %vm7106_vm15 = vcmp.gt.f32.partialorder %v7074_v52, 0.0  ;;  %v7138_v7 = vmul.f32 0.1, %v7074_v52  ;;  %v7169_v61 = vsel %vm7105_vm13, %v7073_v48, %v7137_v5 }
 0x6f1   : > { %vm7104_vm2 = vcmp.gt.f32.partialorder %v7072_v55, 0.0  ;;  %v7136_v15 = vmul.f32 0.1, %v7072_v55  ;;  %7759 = vmatmul.mubr.bf16.gmra.mrb[200].mxu1 %v7517_v23  ;;  %v7167_v11 = vsel %vm7103_vm14, %v7071_v39, %v7135_v43 }
 0x6f2   : > { %7766 = vmatprep.mubr.bf16.mxu1 %v7534_v41  ;;  %v7170_v35 = vsel %vm7106_vm15, %v7074_v52, %v7138_v7  ;;  %v15070_v41 = vpack.c.bf16 %v14487_v46, %v14485_v27 }
 0x6f3   : > { %v7168_v56 = vsel %vm7104_vm2, %v7072_v55, %v7136_v15  ;;  %v7525_v19 = vpack.c.bf16 %v7170_v35, %v7169_v61 }
 0x6f4   : > { %v7524_v33 = vpack.c.bf16 %v7168_v56, %v7167_v11 }
 0x6f9   : > { %7767 = vmatmul.mubr.bf16.gmra.mrb[204].mxu1 %v7518_v58 }
 0x6fa   : > { %7774 = vmatprep.mubr.bf16.mxu1 %v7535_v18 }
 0x701   : > { %7775 = vmatmul.mubr.bf16.gmra.mrb[208].mxu1 %v7519_v12 }
 0x702   : > { %7782 = vmatprep.mubr.bf16.mxu1 %v7536_v32 }
 0x709   : > { %7783 = vmatmul.mubr.bf16.gmra.mrb[212].mxu1 %v7520_v6 }
 0x70a   : > { %7790 = vmatprep.mubr.bf16.mxu1 %v15067_v42 }
 0x711   : > { %7791 = vmatmul.mubr.bf16.gmra.mrb[216].mxu1 %v7521_v63 }
 0x712   : > { %7798 = vmatprep.mubr.bf16.mxu1 %v15068_v40 }
 0x719   : > { %7799 = vmatmul.mubr.bf16.gmra.mrb[220].mxu1 %v7522_v59 }
 0x71a   : > { %7806 = vmatprep.mubr.bf16.mxu1 %v15069_v36 }
 0x721   : > { %7807 = vmatmul.mubr.bf16.gmra.mrb[224].mxu1 %v7523_v16 }
 0x722   : > { %7814 = vmatprep.mubr.bf16.mxu1 %v15070_v41 }
 0x729   : > { %7815 = vmatmul.mubr.bf16.gmra.mrb[228].mxu1 %v7524_v33 }
 0x72a   : > { %7822 = vmatprep.mubr.bf16.mxu1 %v15071_v53 }
 0x731   : > { %7823 = vmatmul.mubr.bf16.gmra.mrb[232].mxu1 %v7525_v19 }
 0x78c   : > { %v9492_v18 = vpop.f32.mrb[172].mxu1 }
 0x78d   : > { %v9493_v0 = vpop.f32.mrb[173].mxu1 }
 0x78e   : > { %v9494_v32 = vadd.f32 %v9493_v0, %v9492_v18  ;;  %v9495_v1 = vpop.f32.mrb[174].mxu1 }
 0x78f   : > { %v9496_v20 = vpop.f32.mrb[175].mxu1 }
 0x790   : > { %v7838_v28 = vmul.f32 %v9494_v32, %v14661_v21  ;;  %v9497_v44 = vadd.f32 %v9496_v20, %v9495_v1 }
 0x792   : > { %v14667_v3 = vadd.f32 %v14663_v4, %v7838_v28  ;;  %v7839_v27 = vmul.f32 %v9497_v44, %v14661_v21 }
 0x794   : > { %v8854_v46 = vmul.f32 -1.442695, %v14667_v3  ;;  %v14672_v2 = vadd.f32 %v14663_v4, %v7839_v27  ;;  %v9498_v30 = vpop.f32.mrb[176].mxu1 }
 0x795   : > { %v9499_v8 = vpop.f32.mrb[177].mxu1 }
 0x796   : > { %10502 = vpow2.f32 %v8854_v46  ;;  %v8855_v14 = vmul.f32 -1.442695, %v14672_v2  ;;  %v9500_v47 = vadd.f32 %v9499_v8, %v9498_v30  ;;  %v9501_v23 = vpop.f32.mrb[178].mxu1 }
 0x797   : > { %v9502_v9 = vpop.f32.mrb[179].mxu1 }
 0x798   : > { %10504 = vpow2.f32 %v8855_v14  ;;  %v7840_v25 = vmul.f32 %v9500_v47, %v14661_v21  ;;  %v9503_v54 = vadd.f32 %v9502_v9, %v9501_v23 }
 0x79a   : > { %v14677_v22 = vadd.f32 %v14663_v4, %v7840_v25  ;;  %v7841_v12 = vmul.f32 %v9503_v54, %v14661_v21 }
 0x79c   : > { %v8856_v58 = vmul.f32 -1.442695, %v14677_v22  ;;  %v14682_v63 = vadd.f32 %v14663_v4, %v7841_v12  ;;  %v9504_v6 = vpop.f32.mrb[180].mxu1 }
 0x79d   : > { %v9505_v38 = vpop.f32.mrb[181].mxu1 }
 0x79e   : > { %10506 = vpow2.f32 %v8856_v58  ;;  %v8857_v29 = vmul.f32 -1.442695, %v14682_v63  ;;  %v9506_v34 = vadd.f32 %v9505_v38, %v9504_v6  ;;  %v9507_v50 = vpop.f32.mrb[182].mxu1 }
 0x79f   : > { %v9508_v24 = vpop.f32.mrb[183].mxu1 }
 0x7a0   : > { %v10503_v49 = vpop.eup %10502  ;;  %10508 = vpow2.f32 %v8857_v29  ;;  %v7842_v37 = vmul.f32 %v9506_v34, %v14661_v21  ;;  %v9509_v17 = vadd.f32 %v9508_v24, %v9507_v50 }
 0x7a1   : > { %v8005_v10 = vadd.f32 1.0, %v10503_v49 }
 0x7a2   : > { %v10505_v62 = vpop.eup %10504  ;;  %v14687_v13 = vadd.f32 %v14663_v4, %v7842_v37  ;;  %v7843_v31 = vmul.f32 %v9509_v17, %v14661_v21 }
 0x7a3   : > { %10510 = vrcp.f32 %v8005_v10  ;;  %v8006_v26 = vadd.f32 1.0, %v10505_v62 }
 0x7a4   : > { %v8858_v51 = vmul.f32 -1.442695, %v14687_v13  ;;  %v14692_v16 = vadd.f32 %v14663_v4, %v7843_v31  ;;  %v9510_v48 = vpop.f32.mrb[184].mxu1 }
 0x7a5   : > { %10512 = vrcp.f32 %v8006_v26  ;;  %v9511_v60 = vpop.f32.mrb[185].mxu1 }
 0x7a6   : > { %10514 = vpow2.f32 %v8858_v51  ;;  %v8859_v45 = vmul.f32 -1.442695, %v14692_v16  ;;  %v9512_v59 = vadd.f32 %v9511_v60, %v9510_v48  ;;  %v9513_v39 = vpop.f32.mrb[186].mxu1 }
 0x7a7   : > { %v9514_v57 = vpop.f32.mrb[187].mxu1 }
 0x7a8   : > { %v10507_v5 = vpop.eup %10506  ;;  %10516 = vpow2.f32 %v8859_v45  ;;  %v7844_v52 = vmul.f32 %v9512_v59, %v14661_v21  ;;  %v9515_v43 = vadd.f32 %v9514_v57, %v9513_v39 }
 0x7a9   : > { %v8007_v55 = vadd.f32 1.0, %v10507_v5 }
 0x7aa   : > { %v10509_v7 = vpop.eup %10508  ;;  %v14698_v15 = vadd.f32 %v14663_v4, %v7844_v52  ;;  %v7845_v61 = vmul.f32 %v9515_v43, %v14661_v21 }
 0x7ab   : > { %10518 = vrcp.f32 %v8007_v55  ;;  %v8008_v35 = vadd.f32 1.0, %v10509_v7 }
 0x7ac   : > { %v8860_v11 = vmul.f32 -1.442695, %v14698_v15  ;;  %v14703_v56 = vadd.f32 %v14663_v4, %v7845_v61  ;;  %v9516_v19 = vpop.f32.mrb[188].mxu1 }
 0x7ad   : > { %v10511_v33 = vpop.eup %10510  ;;  %10520 = vrcp.f32 %v8008_v35  ;;  %v9517_v42 = vpop.f32.mrb[189].mxu1 }
 0x7ae   : > { %v8101_v40 = vmul.f32 %v10511_v33, %v14667_v3  ;;  %10522 = vpow2.f32 %v8860_v11  ;;  %v8861_v36 = vmul.f32 -1.442695, %v14703_v56  ;;  %v9518_v41 = vadd.f32 %v9517_v42, %v9516_v19  ;;  %v9519_v53 = vpop.f32.mrb[190].mxu1 }
 0x7af   : > { %v10513_v18 = vpop.eup %10512  ;;  %v9520_v0 = vpop.f32.mrb[191].mxu1 }
 0x7b0   : > { %v10515_v32 = vpop.eup %10514  ;;  %8133 = vst [vmem:[%s14708_s30] sm:$0xff] %v8101_v40  ;;  %v8102_v1 = vmul.f32 %v10513_v18, %v14672_v2  ;;  %10524 = vpow2.f32 %v8861_v36  ;;  %v7846_v20 = vmul.f32 %v9518_v41, %v14661_v21  ;;  %v9521_v28 = vadd.f32 %v9520_v0, %v9519_v53 }
 0x7b1   : > { %v8009_v44 = vadd.f32 1.0, %v10515_v32 }
 0x7b2   : > { %v10517_v27 = vpop.eup %10516  ;;  %8134 = vst [vmem:[%s14708_s30 + $0x8] sm:$0xff] %v8102_v1  ;;  %v14717_v3 = vadd.f32 %v14663_v4, %v7846_v20  ;;  %v7847_v46 = vmul.f32 %v9521_v28, %v14661_v21 }
 0x7b3   : > { %10526 = vrcp.f32 %v8009_v44  ;;  %v8010_v30 = vadd.f32 1.0, %v10517_v27 }
 0x7b4   : > { %v8862_v8 = vmul.f32 -1.442695, %v14717_v3  ;;  %v14722_v14 = vadd.f32 %v14663_v4, %v7847_v46  ;;  %v9522_v2 = vpop.f32.mrb[192].mxu1 }
 0x7b5   : > { %v10519_v47 = vpop.eup %10518  ;;  %10528 = vrcp.f32 %v8010_v30  ;;  %v9523_v23 = vpop.f32.mrb[193].mxu1 }
 0x7b6   : > { %v8103_v9 = vmul.f32 %v10519_v47, %v14677_v22  ;;  %10530 = vpow2.f32 %v8862_v8  ;;  %v8863_v25 = vmul.f32 -1.442695, %v14722_v14  ;;  %v9524_v54 = vadd.f32 %v9523_v23, %v9522_v2  ;;  %v9525_v12 = vpop.f32.mrb[194].mxu1 }
 0x7b7   : > { %v10521_v58 = vpop.eup %10520  ;;  %v9526_v6 = vpop.f32.mrb[195].mxu1 }
 0x7b8   : > { %v10523_v38 = vpop.eup %10522  ;;  %8135 = vst [vmem:[%s14708_s30 + $0x10] sm:$0xff] %v8103_v9  ;;  %v8104_v29 = vmul.f32 %v10521_v58, %v14682_v63  ;;  %10532 = vpow2.f32 %v8863_v25  ;;  %v7848_v34 = vmul.f32 %v9524_v54, %v14661_v21  ;;  %v9527_v50 = vadd.f32 %v9526_v6, %v9525_v12 }
 0x7b9   : > { %v8011_v24 = vadd.f32 1.0, %v10523_v38 }
 0x7ba   : > { %v10525_v49 = vpop.eup %10524  ;;  %8136 = vst [vmem:[%s14708_s30 + $0x18] sm:$0xff] %v8104_v29  ;;  %v14731_v22 = vadd.f32 %v14663_v4, %v7848_v34  ;;  %v7849_v37 = vmul.f32 %v9527_v50, %v14661_v21 }
 0x7bb   : > { %10534 = vrcp.f32 %v8011_v24  ;;  %v8012_v17 = vadd.f32 1.0, %v10525_v49 }
 0x7bc   : > { %v8864_v10 = vmul.f32 -1.442695, %v14731_v22  ;;  %v14736_v62 = vadd.f32 %v14663_v4, %v7849_v37  ;;  %v9528_v63 = vpop.f32.mrb[196].mxu1 }
 0x7bd   : > { %v10527_v31 = vpop.eup %10526  ;;  %10536 = vrcp.f32 %v8012_v17  ;;  %v9529_v26 = vpop.f32.mrb[197].mxu1 }
 0x7be   : > { %v8105_v51 = vmul.f32 %v10527_v31, %v14687_v13  ;;  %10538 = vpow2.f32 %v8864_v10  ;;  %v8865_v48 = vmul.f32 -1.442695, %v14736_v62  ;;  %v9530_v60 = vadd.f32 %v9529_v26, %v9528_v63  ;;  %v9531_v45 = vpop.f32.mrb[198].mxu1 }
 0x7bf   : > { %v10529_v59 = vpop.eup %10528  ;;  %v9532_v39 = vpop.f32.mrb[199].mxu1 }
 0x7c0   : > { %v10531_v57 = vpop.eup %10530  ;;  %8137 = vst [vmem:[%s14708_s30 + $0x20] sm:$0xff] %v8105_v51  ;;  %v8106_v5 = vmul.f32 %v10529_v59, %v14692_v16  ;;  %10540 = vpow2.f32 %v8865_v48  ;;  %v7850_v52 = vmul.f32 %v9530_v60, %v14661_v21  ;;  %v9533_v43 = vadd.f32 %v9532_v39, %v9531_v45 }
 0x7c1   : > { %v8013_v55 = vadd.f32 1.0, %v10531_v57 }
 0x7c2   : > { %v10533_v7 = vpop.eup %10532  ;;  %8138 = vst [vmem:[%s14708_s30 + $0x28] sm:$0xff] %v8106_v5  ;;  %v14745_v13 = vadd.f32 %v14663_v4, %v7850_v52  ;;  %v7851_v61 = vmul.f32 %v9533_v43, %v14661_v21 }
 0x7c3   : > { %10542 = vrcp.f32 %v8013_v55  ;;  %v8014_v35 = vadd.f32 1.0, %v10533_v7 }
 0x7c4   : > { %v8866_v11 = vmul.f32 -1.442695, %v14745_v13  ;;  %v14750_v19 = vadd.f32 %v14663_v4, %v7851_v61  ;;  %v9534_v16 = vpop.f32.mrb[200].mxu1 }
 0x7c5   : > { %v10535_v33 = vpop.eup %10534  ;;  %10544 = vrcp.f32 %v8014_v35  ;;  %v9535_v42 = vpop.f32.mrb[201].mxu1 }
 0x7c6   : > { %v8107_v40 = vmul.f32 %v10535_v33, %v14698_v15  ;;  %10546 = vpow2.f32 %v8866_v11  ;;  %v8867_v36 = vmul.f32 -1.442695, %v14750_v19  ;;  %v9536_v41 = vadd.f32 %v9535_v42, %v9534_v16  ;;  %v9537_v53 = vpop.f32.mrb[202].mxu1 }
 0x7c7   : > { %v10537_v18 = vpop.eup %10536  ;;  %v9538_v0 = vpop.f32.mrb[203].mxu1 }
 0x7c8   : > { %v10539_v32 = vpop.eup %10538  ;;  %8139 = vst [vmem:[%s14708_s30 + $0x30] sm:$0xff] %v8107_v40  ;;  %v8108_v1 = vmul.f32 %v10537_v18, %v14703_v56  ;;  %10548 = vpow2.f32 %v8867_v36  ;;  %v7852_v20 = vmul.f32 %v9536_v41, %v14661_v21  ;;  %v9539_v28 = vadd.f32 %v9538_v0, %v9537_v53 }
 0x7c9   : > { %v8015_v44 = vadd.f32 1.0, %v10539_v32 }
 0x7ca   : > { %v10541_v27 = vpop.eup %10540  ;;  %8140 = vst [vmem:[%s14708_s30 + $0x38] sm:$0xff] %v8108_v1  ;;  %v14759_v15 = vadd.f32 %v14663_v4, %v7852_v20  ;;  %v7853_v46 = vmul.f32 %v9539_v28, %v14661_v21 }
 0x7cb   : > { %10550 = vrcp.f32 %v8015_v44  ;;  %v8016_v30 = vadd.f32 1.0, %v10541_v27 }
 0x7cc   : > { %v8868_v8 = vmul.f32 -1.442695, %v14759_v15  ;;  %v14764_v2 = vadd.f32 %v14663_v4, %v7853_v46  ;;  %v9540_v56 = vpop.f32.mrb[204].mxu1 }
 0x7cd   : > { %v10543_v47 = vpop.eup %10542  ;;  %10552 = vrcp.f32 %v8016_v30  ;;  %v9541_v23 = vpop.f32.mrb[205].mxu1 }
 0x7ce   : > { %v8109_v9 = vmul.f32 %v10543_v47, %v14717_v3  ;;  %10554 = vpow2.f32 %v8868_v8  ;;  %v8869_v25 = vmul.f32 -1.442695, %v14764_v2  ;;  %v9542_v54 = vadd.f32 %v9541_v23, %v9540_v56  ;;  %v9543_v12 = vpop.f32.mrb[206].mxu1 }
 0x7cf   : > { %v10545_v58 = vpop.eup %10544  ;;  %v9544_v6 = vpop.f32.mrb[207].mxu1 }
 0x7d0   : > { %v10547_v38 = vpop.eup %10546  ;;  %8141 = vst [vmem:[%s14708_s30 + $0x40] sm:$0xff] %v8109_v9  ;;  %v8110_v29 = vmul.f32 %v10545_v58, %v14722_v14  ;;  %10556 = vpow2.f32 %v8869_v25  ;;  %v7854_v34 = vmul.f32 %v9542_v54, %v14661_v21  ;;  %v9545_v50 = vadd.f32 %v9544_v6, %v9543_v12 }
 0x7d1   : > { %v8017_v24 = vadd.f32 1.0, %v10547_v38 }
 0x7d2   : > { %v10549_v49 = vpop.eup %10548  ;;  %8142 = vst [vmem:[%s14708_s30 + $0x48] sm:$0xff] %v8110_v29  ;;  %v14773_v3 = vadd.f32 %v14663_v4, %v7854_v34  ;;  %v7855_v37 = vmul.f32 %v9545_v50, %v14661_v21 }
 0x7d3   : > { %10558 = vrcp.f32 %v8017_v24  ;;  %v8018_v17 = vadd.f32 1.0, %v10549_v49 }
 0x7d4   : > { %v8870_v10 = vmul.f32 -1.442695, %v14773_v3  ;;  %v14778_v63 = vadd.f32 %v14663_v4, %v7855_v37  ;;  %v9546_v14 = vpop.f32.mrb[208].mxu1 }
 0x7d5   : > { %v10551_v31 = vpop.eup %10550  ;;  %10560 = vrcp.f32 %v8018_v17  ;;  %v9547_v26 = vpop.f32.mrb[209].mxu1 }
 0x7d6   : > { %v8111_v51 = vmul.f32 %v10551_v31, %v14731_v22  ;;  %10562 = vpow2.f32 %v8870_v10  ;;  %v8871_v48 = vmul.f32 -1.442695, %v14778_v63  ;;  %v9548_v60 = vadd.f32 %v9547_v26, %v9546_v14  ;;  %v9549_v45 = vpop.f32.mrb[210].mxu1 }
 0x7d7   : > { %v10553_v59 = vpop.eup %10552  ;;  %v9550_v39 = vpop.f32.mrb[211].mxu1 }
 0x7d8   : > { %v10555_v57 = vpop.eup %10554  ;;  %8143 = vst [vmem:[%s14708_s30 + $0x50] sm:$0xff] %v8111_v51  ;;  %v8112_v5 = vmul.f32 %v10553_v59, %v14736_v62  ;;  %10564 = vpow2.f32 %v8871_v48  ;;  %v7856_v52 = vmul.f32 %v9548_v60, %v14661_v21  ;;  %v9551_v43 = vadd.f32 %v9550_v39, %v9549_v45 }
 0x7d9   : > { %v8019_v55 = vadd.f32 1.0, %v10555_v57 }
 0x7da   : > { %v10557_v7 = vpop.eup %10556  ;;  %8144 = vst [vmem:[%s14708_s30 + $0x58] sm:$0xff] %v8112_v5  ;;  %v14787_v22 = vadd.f32 %v14663_v4, %v7856_v52  ;;  %v7857_v61 = vmul.f32 %v9551_v43, %v14661_v21 }
 0x7db   : > { %10566 = vrcp.f32 %v8019_v55  ;;  %v8020_v35 = vadd.f32 1.0, %v10557_v7 }
 0x7dc   : > { %v8872_v11 = vmul.f32 -1.442695, %v14787_v22  ;;  %v14792_v16 = vadd.f32 %v14663_v4, %v7857_v61  ;;  %v9552_v62 = vpop.f32.mrb[212].mxu1 }
 0x7dd   : > { %v10559_v33 = vpop.eup %10558  ;;  %10568 = vrcp.f32 %v8020_v35  ;;  %v9553_v42 = vpop.f32.mrb[213].mxu1 }
 0x7de   : > { %v8113_v40 = vmul.f32 %v10559_v33, %v14745_v13  ;;  %10570 = vpow2.f32 %v8872_v11  ;;  %v8873_v36 = vmul.f32 -1.442695, %v14792_v16  ;;  %v9554_v41 = vadd.f32 %v9553_v42, %v9552_v62  ;;  %v9555_v53 = vpop.f32.mrb[214].mxu1 }
 0x7df   : > { %v10561_v18 = vpop.eup %10560  ;;  %v9556_v0 = vpop.f32.mrb[215].mxu1 }
 0x7e0   : > { %v10563_v32 = vpop.eup %10562  ;;  %8145 = vst [vmem:[%s14708_s30 + $0x60] sm:$0xff] %v8113_v40  ;;  %v8114_v1 = vmul.f32 %v10561_v18, %v14750_v19  ;;  %10572 = vpow2.f32 %v8873_v36  ;;  %v7858_v20 = vmul.f32 %v9554_v41, %v14661_v21  ;;  %v9557_v28 = vadd.f32 %v9556_v0, %v9555_v53 }
 0x7e1   : > { %v8021_v44 = vadd.f32 1.0, %v10563_v32 }
 0x7e2   : > { %v10565_v27 = vpop.eup %10564  ;;  %8146 = vst [vmem:[%s14708_s30 + $0x68] sm:$0xff] %v8114_v1  ;;  %v14801_v13 = vadd.f32 %v14663_v4, %v7858_v20  ;;  %v7859_v46 = vmul.f32 %v9557_v28, %v14661_v21 }
 0x7e3   : > { %10574 = vrcp.f32 %v8021_v44  ;;  %v8022_v30 = vadd.f32 1.0, %v10565_v27 }
 0x7e4   : > { %v8874_v8 = vmul.f32 -1.442695, %v14801_v13  ;;  %v14806_v56 = vadd.f32 %v14663_v4, %v7859_v46  ;;  %v9558_v19 = vpop.f32.mrb[216].mxu1 }
 0x7e5   : > { %v10567_v47 = vpop.eup %10566  ;;  %10576 = vrcp.f32 %v8022_v30  ;;  %v9559_v23 = vpop.f32.mrb[217].mxu1 }
 0x7e6   : > { %v8115_v9 = vmul.f32 %v10567_v47, %v14759_v15  ;;  %10578 = vpow2.f32 %v8874_v8  ;;  %v8875_v25 = vmul.f32 -1.442695, %v14806_v56  ;;  %v9560_v54 = vadd.f32 %v9559_v23, %v9558_v19  ;;  %v9561_v12 = vpop.f32.mrb[218].mxu1 }
 0x7e7   : > { %v10569_v58 = vpop.eup %10568  ;;  %v9562_v6 = vpop.f32.mrb[219].mxu1 }
 0x7e8   : > { %v10571_v38 = vpop.eup %10570  ;;  %8147 = vst [vmem:[%s14708_s30 + $0x70] sm:$0xff] %v8115_v9  ;;  %v8116_v29 = vmul.f32 %v10569_v58, %v14764_v2  ;;  %10580 = vpow2.f32 %v8875_v25  ;;  %v7860_v34 = vmul.f32 %v9560_v54, %v14661_v21  ;;  %v9563_v50 = vadd.f32 %v9562_v6, %v9561_v12 }
 0x7e9   : > { %v8023_v24 = vadd.f32 1.0, %v10571_v38 }
 0x7ea   : > { %v10573_v49 = vpop.eup %10572  ;;  %8148 = vst [vmem:[%s14708_s30 + $0x78] sm:$0xff] %v8116_v29  ;;  %v14815_v15 = vadd.f32 %v14663_v4, %v7860_v34  ;;  %v7861_v37 = vmul.f32 %v9563_v50, %v14661_v21 }
 0x7eb   : > { %10582 = vrcp.f32 %v8023_v24  ;;  %v8024_v17 = vadd.f32 1.0, %v10573_v49 }
 0x7ec   : > { %v8876_v10 = vmul.f32 -1.442695, %v14815_v15  ;;  %v14820_v14 = vadd.f32 %v14663_v4, %v7861_v37  ;;  %v9564_v2 = vpop.f32.mrb[220].mxu1 }
 0x7ed   : > { %v10575_v31 = vpop.eup %10574  ;;  %10584 = vrcp.f32 %v8024_v17  ;;  %v9565_v26 = vpop.f32.mrb[221].mxu1 }
 0x7ee   : > { %v8117_v51 = vmul.f32 %v10575_v31, %v14773_v3  ;;  %10586 = vpow2.f32 %v8876_v10  ;;  %v8877_v48 = vmul.f32 -1.442695, %v14820_v14  ;;  %v9566_v60 = vadd.f32 %v9565_v26, %v9564_v2  ;;  %v9567_v45 = vpop.f32.mrb[222].mxu1 }
 0x7ef   : > { %v10577_v59 = vpop.eup %10576  ;;  %v9568_v39 = vpop.f32.mrb[223].mxu1 }
 0x7f0   : > { %v10579_v57 = vpop.eup %10578  ;;  %8149 = vst [vmem:[%s14708_s30 + $0x80] sm:$0xff] %v8117_v51  ;;  %v8118_v5 = vmul.f32 %v10577_v59, %v14778_v63  ;;  %10588 = vpow2.f32 %v8877_v48  ;;  %v7862_v52 = vmul.f32 %v9566_v60, %v14661_v21  ;;  %v9569_v43 = vadd.f32 %v9568_v39, %v9567_v45 }
 0x7f1   : > { %v8025_v55 = vadd.f32 1.0, %v10579_v57 }
 0x7f2   : > { %v10581_v7 = vpop.eup %10580  ;;  %8150 = vst [vmem:[%s14708_s30 + $0x88] sm:$0xff] %v8118_v5  ;;  %v14829_v3 = vadd.f32 %v14663_v4, %v7862_v52  ;;  %v7863_v61 = vmul.f32 %v9569_v43, %v14661_v21 }
 0x7f3   : > { %10590 = vrcp.f32 %v8025_v55  ;;  %v8026_v35 = vadd.f32 1.0, %v10581_v7 }
 0x7f4   : > { %v8878_v11 = vmul.f32 -1.442695, %v14829_v3  ;;  %v14834_v62 = vadd.f32 %v14663_v4, %v7863_v61  ;;  %v9570_v63 = vpop.f32.mrb[224].mxu1 }
 0x7f5   : > { %v10583_v33 = vpop.eup %10582  ;;  %10592 = vrcp.f32 %v8026_v35  ;;  %v9571_v42 = vpop.f32.mrb[225].mxu1 }
 0x7f6   : > { %v8119_v40 = vmul.f32 %v10583_v33, %v14787_v22  ;;  %10594 = vpow2.f32 %v8878_v11  ;;  %v8879_v36 = vmul.f32 -1.442695, %v14834_v62  ;;  %v9572_v41 = vadd.f32 %v9571_v42, %v9570_v63  ;;  %v9573_v53 = vpop.f32.mrb[226].mxu1 }
 0x7f7   : > { %v10585_v18 = vpop.eup %10584  ;;  %v9574_v0 = vpop.f32.mrb[227].mxu1 }
 0x7f8   : > { %v10587_v32 = vpop.eup %10586  ;;  %8151 = vst [vmem:[%s14708_s30 + $0x90] sm:$0xff] %v8119_v40  ;;  %v8120_v1 = vmul.f32 %v10585_v18, %v14792_v16  ;;  %10596 = vpow2.f32 %v8879_v36  ;;  %v7864_v20 = vmul.f32 %v9572_v41, %v14661_v21  ;;  %v9575_v28 = vadd.f32 %v9574_v0, %v9573_v53 }
 0x7f9   : > { %v8027_v44 = vadd.f32 1.0, %v10587_v32 }
 0x7fa   : > { %v10589_v27 = vpop.eup %10588  ;;  %8152 = vst [vmem:[%s14708_s30 + $0x98] sm:$0xff] %v8120_v1  ;;  %v14843_v22 = vadd.f32 %v14663_v4, %v7864_v20  ;;  %v7865_v46 = vmul.f32 %v9575_v28, %v14661_v21 }
 0x7fb   : > { %10598 = vrcp.f32 %v8027_v44  ;;  %v8028_v30 = vadd.f32 1.0, %v10589_v27 }
 0x7fc   : > { %v8880_v8 = vmul.f32 -1.442695, %v14843_v22  ;;  %v14848_v19 = vadd.f32 %v14663_v4, %v7865_v46  ;;  %v9576_v16 = vpop.f32.mrb[228].mxu1 }
 0x7fd   : > { %v10591_v47 = vpop.eup %10590  ;;  %10600 = vrcp.f32 %v8028_v30  ;;  %v9577_v23 = vpop.f32.mrb[229].mxu1 }
 0x7fe   : > { %v8121_v9 = vmul.f32 %v10591_v47, %v14801_v13  ;;  %10602 = vpow2.f32 %v8880_v8  ;;  %v8881_v25 = vmul.f32 -1.442695, %v14848_v19  ;;  %v9578_v54 = vadd.f32 %v9577_v23, %v9576_v16  ;;  %v9579_v12 = vpop.f32.mrb[230].mxu1 }
 0x7ff   : > { %v10593_v58 = vpop.eup %10592  ;;  %v9580_v6 = vpop.f32.mrb[231].mxu1 }
 0x800   : > { %v10595_v38 = vpop.eup %10594  ;;  %8153 = vst [vmem:[%s14708_s30 + $0xa0] sm:$0xff] %v8121_v9  ;;  %v8122_v29 = vmul.f32 %v10593_v58, %v14806_v56  ;;  %10604 = vpow2.f32 %v8881_v25  ;;  %v7866_v34 = vmul.f32 %v9578_v54, %v14661_v21  ;;  %v9581_v50 = vadd.f32 %v9580_v6, %v9579_v12 }
 0x801   : > { %v8029_v24 = vadd.f32 1.0, %v10595_v38 }
 0x802   : > { %v10597_v49 = vpop.eup %10596  ;;  %8154 = vst [vmem:[%s14708_s30 + $0xa8] sm:$0xff] %v8122_v29  ;;  %v7905_v13 = vadd.f32 %v14663_v4, %v7866_v34  ;;  %v7867_v37 = vmul.f32 %v9581_v50, %v14661_v21 }
 0x803   : > { %10606 = vrcp.f32 %v8029_v24  ;;  %v8030_v17 = vadd.f32 1.0, %v10597_v49 }
 0x804   : > { %v8882_v10 = vmul.f32 -1.442695, %v7905_v13  ;;  %v7906_v2 = vadd.f32 %v14663_v4, %v7867_v37  ;;  %v9582_v31 = vpop.f32.mrb[232].mxu1 }
 0x805   : > { %v10599_v26 = vpop.eup %10598  ;;  %10608 = vrcp.f32 %v8030_v17  ;;  %v9583_v56 = vpop.f32.mrb[233].mxu1 }
 0x806   : > { %v8123_v51 = vmul.f32 %v10599_v26, %v14815_v15  ;;  %10610 = vpow2.f32 %v8882_v10  ;;  %v8883_v48 = vmul.f32 -1.442695, %v7906_v2  ;;  %v9584_v60 = vadd.f32 %v9583_v56, %v9582_v31  ;;  %v9585_v45 = vpop.f32.mrb[234].mxu1 }
 0x807   : > { %v10601_v59 = vpop.eup %10600  ;;  %v9586_v39 = vpop.f32.mrb[235].mxu1 }
 0x808   : > { %v10603_v57 = vpop.eup %10602  ;;  %8155 = vst [vmem:[%s14708_s30 + $0xb0] sm:$0xff] %v8123_v51  ;;  %v8124_v5 = vmul.f32 %v10601_v59, %v14820_v14  ;;  %10612 = vpow2.f32 %v8883_v48  ;;  %v7868_v52 = vmul.f32 %v9584_v60, %v14661_v21  ;;  %v9587_v43 = vadd.f32 %v9586_v39, %v9585_v45 }
 0x809   : > { %v8031_v55 = vadd.f32 1.0, %v10603_v57 }
 0x80a   : > { %v10605_v7 = vpop.eup %10604  ;;  %8156 = vst [vmem:[%s14708_s30 + $0xb8] sm:$0xff] %v8124_v5  ;;  %v7907_v15 = vadd.f32 %v14663_v4, %v7868_v52  ;;  %v7869_v61 = vmul.f32 %v9587_v43, %v14661_v21 }
 0x80b   : > { %10614 = vrcp.f32 %v8031_v55  ;;  %v8032_v35 = vadd.f32 1.0, %v10605_v7 }
 0x80c   : > { %v8884_v11 = vmul.f32 -1.442695, %v7907_v15  ;;  %v7908_v63 = vadd.f32 %v14663_v4, %v7869_v61 }
 0x80d   : > { %v10607_v33 = vpop.eup %10606  ;;  %10616 = vrcp.f32 %v8032_v35 }
 0x80e   : > { %v8125_v14 = vmul.f32 %v10607_v33, %v14829_v3  ;;  %10618 = vpow2.f32 %v8884_v11  ;;  %v8885_v42 = vmul.f32 -1.442695, %v7908_v63 }
 0x80f   : > { %v10609_v40 = vpop.eup %10608 }
 0x810   : > { %v10611_v36 = vpop.eup %10610  ;;  %8157 = vst [vmem:[%s14708_s30 + $0xc0] sm:$0xff] %v8125_v14  ;;  %v8126_v41 = vmul.f32 %v10609_v40, %v14834_v62  ;;  %10620 = vpow2.f32 %v8885_v42 }
 0x811   : > { %v8033_v21 = vadd.f32 1.0, %v10611_v36 }
 0x812   : > { %v10613_v53 = vpop.eup %10612  ;;  %8158 = vst [vmem:[%s14708_s30 + $0xc8] sm:$0xff] %v8126_v41 }
 0x813   : > { %10622 = vrcp.f32 %v8033_v21  ;;  %v8034_v18 = vadd.f32 1.0, %v10613_v53 }
 0x815   : > { %v10615_v4 = vpop.eup %10614  ;;  %10624 = vrcp.f32 %v8034_v18 }
 0x816   : > { %v8127_v3 = vmul.f32 %v10615_v4, %v14843_v22 }
 0x817   : > { %v10617_v0 = vpop.eup %10616 }
 0x818   : > { %v10619_v32 = vpop.eup %10618  ;;  %8159 = vst [vmem:[%s14708_s30 + $0xd0] sm:$0xff] %v8127_v3  ;;  %v8128_v1 = vmul.f32 %v10617_v0, %v14848_v19 }
 0x819   : > { %v8035_v62 = vadd.f32 1.0, %v10619_v32 }
 0x81a   : > { %v10621_v20 = vpop.eup %10620  ;;  %8160 = vst [vmem:[%s14708_s30 + $0xd8] sm:$0xff] %v8128_v1 }
 0x81b   : > { %10626 = vrcp.f32 %v8035_v62  ;;  %v8036_v28 = vadd.f32 1.0, %v10621_v20 }
 0x81d   : > { %v10623_v44 = vpop.eup %10622  ;;  %10628 = vrcp.f32 %v8036_v28 }
 0x81e   : > { %v8129_v27 = vmul.f32 %v10623_v44, %v7905_v13 }
 0x81f   : > { %v10625_v46 = vpop.eup %10624 }
 0x820   : > { %8161 = vst [vmem:[%s14708_s30 + $0xe0] sm:$0xff] %v8129_v27  ;;  %v8130_v30 = vmul.f32 %v10625_v46, %v7906_v2 }
 0x822   : > { %8162 = vst [vmem:[%s14708_s30 + $0xe8] sm:$0xff] %v8130_v30 }
 0x825   : > { %v10627_v22 = vpop.eup %10626 }
 0x826   : > { %v8131_v8 = vmul.f32 %v10627_v22, %v7907_v15 }
 0x827   : > { %v10629_v16 = vpop.eup %10628 }
 0x828   : > { %8163 = vst [vmem:[%s14708_s30 + $0xf0] sm:$0xff] %v8131_v8  ;;  %v8132_v47 = vmul.f32 %v10629_v16, %v7908_v63 }
 0x82a   : > { %8164 = vst [vmem:[%s14708_s30 + $0xf8] sm:$0xff] %v8132_v47 }
 0x82b PF: > { %s15073_s21 = sld [smem:[#allocation29_spill]] }
 0x831   : > { %s36_s0 = sadd.s32 1, %s15073_s21  }
 0x832   : > { %p33_p7 = scmp.ge.s32.totalorder %s36_s0, 4  }
 0x834   :  { %35 = sbr.rel (!%p33_p7) target bundleno = 16 (0x10), region = 178 }
 0x83b   :  { %8186 = vsyncpa [#allocation4], 1 }
 0x83c   :  { %8188 = vsyncpa [#allocation4 + $0x1], 1 }
 0x83d   :  { %8189 = vsyncpa [#allocation6], 1 }
 0x83e   :  { %8190 = vsyncpa [#allocation9], 1 }
 0x83f   :  { %8191 = vsyncpa [#allocation12], 1 }
 0x840   :  { %8192 = vsyncpa [#allocation15], 1 }
 0x841   :  { %8193 = vsyncpa [#allocation18], 1 }
 0x842   :  { %8194 = vsyncpa [#allocation21], 1 }

</bundles_post_ra>
